<compile_context>
chip_gen: v7x
topology: tpu7x:2x2x1
jax: 0.10.0
libtpu: 0.0.40
codegen_flags: <defaults>
</compile_context>

<pallas_src>
import functools

import jax
import jax.numpy as jnp
from jax.experimental import pallas as pl
from jax.experimental.pallas import tpu as pltpu


# ---------------------------------------------------------------------------
# Kernel A: plain matmul + bias + activation (conv1x1 with folded BN)
# ---------------------------------------------------------------------------
def _mm_bias_act_kernel(x_ref, w_ref, b_ref, o_ref, *, act):
    y = jnp.dot(x_ref[...].astype(jnp.bfloat16), w_ref[...],
                preferred_element_type=jnp.float32)
    y = y + b_ref[...]
    if act == "relu":
        y = jnp.maximum(y, 0.0)
    o_ref[...] = y


def matmul_bias_act(x, w_bf16, bias, act="none", tm=256):
    M, K = x.shape
    N = w_bf16.shape[1]
    tm = M if M % tm else tm                     # tile M when it divides evenly
    return pl.pallas_call(
        functools.partial(_mm_bias_act_kernel, act=act),
        out_shape=jax.ShapeDtypeStruct((M, N), jnp.float32),
        grid=(M // tm,),
        in_specs=[
            pl.BlockSpec((tm, K), lambda i: (i, 0)),
            pl.BlockSpec((K, N), lambda i: (0, 0)),
            pl.BlockSpec((1, N), lambda i: (0, 0)),
        ],
        out_specs=pl.BlockSpec((tm, N), lambda i: (i, 0)),
        compiler_params=pltpu.CompilerParams(dimension_semantics=("parallel",)),
    )(x, w_bf16, bias)


# ---------------------------------------------------------------------------
# Kernel B: conv2(3x3)+bn2+relu, conv3(1x1)+bn3, CBAM channel attention
# (global avg/max pool + shared MLP + sigmoid gate + multiply) -- one kernel.
# ---------------------------------------------------------------------------
def _stem_ca_kernel(xpad_ref, w2_ref, b2_ref, w3_ref, b3_ref,
                    fc1w_ref, fc1b_ref, fc2w_ref, fc2b_ref, o_ref,
                    *, B, H, W):
    M = B * H * W
    P = w2_ref.shape[2]

    # conv2 (3x3, BN folded) via in-kernel im2col: 9 shifted-window matmuls.
    acc = jnp.zeros((M, P), jnp.float32)
    for k in range(9):
        di, dj = k // 3, k % 3
        win = xpad_ref[:, di:di + H, dj:dj + W, :]            # (B, H, W, P)
        a = win.reshape(M, P).astype(jnp.bfloat16)
        acc = acc + jnp.dot(a, w2_ref[k], preferred_element_type=jnp.float32)
    t2 = jnp.maximum(acc + b2_ref[...], 0.0)

    # conv3 (1x1, BN folded), no activation (ReLU comes after the residual).
    t3 = jnp.dot(t2.astype(jnp.bfloat16), w3_ref[...],
                 preferred_element_type=jnp.float32) + b3_ref[...]

    # CBAM channel attention: global pools + shared MLP + sigmoid gate.
    C1 = t3.shape[1]
    t3b = t3.reshape(B, H * W, C1)
    avg = jnp.mean(t3b, axis=1)                               # (B, C1)
    mx = jnp.max(t3b, axis=1)                                 # (B, C1)

    def mlp(z):
        h = jnp.maximum(
            jnp.dot(z, fc1w_ref[...], preferred_element_type=jnp.float32)
            + fc1b_ref[...], 0.0)
        return jnp.dot(h, fc2w_ref[...],
                       preferred_element_type=jnp.float32) + fc2b_ref[...]

    gate = jax.nn.sigmoid(mlp(avg) + mlp(mx))                 # (B, C1)
    o_ref[...] = (t3b * gate[:, None, :]).reshape(M, C1)


def stem_channel_attention(t1p, w2, b2, w3, b3, fc1w, fc1b, fc2w, fc2b,
                           *, B, H, W):
    M = B * H * W
    P = w2.shape[2]
    C1 = w3.shape[1]
    mid = fc1w.shape[1]
    return pl.pallas_call(
        functools.partial(_stem_ca_kernel, B=B, H=H, W=W),
        out_shape=jax.ShapeDtypeStruct((M, C1), jnp.float32),
        grid=(1,),
        in_specs=[
            pl.BlockSpec((B, H + 2, W + 2, P), lambda i: (0, 0, 0, 0)),
            pl.BlockSpec((9, P, P), lambda i: (0, 0, 0)),
            pl.BlockSpec((1, P), lambda i: (0, 0)),
            pl.BlockSpec((P, C1), lambda i: (0, 0)),
            pl.BlockSpec((1, C1), lambda i: (0, 0)),
            pl.BlockSpec((C1, mid), lambda i: (0, 0)),
            pl.BlockSpec((1, mid), lambda i: (0, 0)),
            pl.BlockSpec((mid, C1), lambda i: (0, 0)),
            pl.BlockSpec((1, C1), lambda i: (0, 0)),
        ],
        out_specs=pl.BlockSpec((M, C1), lambda i: (0, 0)),
        compiler_params=pltpu.CompilerParams(dimension_semantics=("arbitrary",)),
    )(t1p, w2, b2, w3, b3, fc1w, fc1b, fc2w, fc2b)


# ---------------------------------------------------------------------------
# Kernel C: fused AugmentedConv 3x3 (conv_out ++ qkv) with in-kernel im2col.
# Output N is padded to a multiple of 128 and tiled over a "parallel" grid.
# ---------------------------------------------------------------------------
def _fused_conv3x3_kernel(xpad_ref, w_ref, b_ref, o_ref, *, B, H, W):
    M = B * H * W
    C = xpad_ref.shape[3]
    o_ref[...] = jnp.broadcast_to(b_ref[...], o_ref.shape)
    for k in range(9):
        di, dj = k // 3, k % 3
        win = xpad_ref[:, di:di + H, dj:dj + W, :]            # (B, H, W, C)
        a = win.reshape(M, C).astype(jnp.bfloat16)
        o_ref[...] += jnp.dot(a, w_ref[k], preferred_element_type=jnp.float32)


def fused_conv3x3(xpad, w, b, *, B, H, W, tn=128):
    M = B * H * W
    C = xpad.shape[3]
    NP = w.shape[2]
    assert NP % tn == 0
    return pl.pallas_call(
        functools.partial(_fused_conv3x3_kernel, B=B, H=H, W=W),
        out_shape=jax.ShapeDtypeStruct((M, NP), jnp.float32),
        grid=(NP // tn,),
        in_specs=[
            pl.BlockSpec((B, H + 2, W + 2, C), lambda n: (0, 0, 0, 0)),
            pl.BlockSpec((9, C, tn), lambda n: (0, 0, n)),
            pl.BlockSpec((1, tn), lambda n: (0, n)),
        ],
        out_specs=pl.BlockSpec((M, tn), lambda n: (0, n)),
        compiler_params=pltpu.CompilerParams(dimension_semantics=("parallel",)),
    )(xpad, w, b)


# ---------------------------------------------------------------------------
# Kernel D: multi-head self attention over the H*W positions.
# All B*Nh heads in a single grid step via batched einsums.
# ---------------------------------------------------------------------------
def _mhsa_kernel(q_ref, k_ref, v_ref, o_ref, *, scale):
    q = (q_ref[...] * scale).astype(jnp.bfloat16)             # (BN, L, dkh)
    k = k_ref[...].astype(jnp.bfloat16)                       # (BN, L, dkh)
    v = v_ref[...].astype(jnp.bfloat16)                       # (BN, L, dvh)
    logits = jnp.einsum("bqd,bkd->bqk", q, k,
                        preferred_element_type=jnp.float32)   # (BN, L, L)
    m = jnp.max(logits, axis=-1, keepdims=True)
    p = jnp.exp(logits - m)
    denom = jnp.sum(p, axis=-1, keepdims=True)
    wts = (p * pl.reciprocal(denom, approx=True)).astype(jnp.bfloat16)
    o_ref[...] = jnp.einsum("bqk,bkd->bqd", wts, v,
                            preferred_element_type=jnp.float32)


def mhsa(fq, fk, fv, dkh):
    BN, L, _ = fq.shape
    dvh = fv.shape[2]
    return pl.pallas_call(
        functools.partial(_mhsa_kernel, scale=float(dkh) ** -0.5),
        out_shape=jax.ShapeDtypeStruct((BN, L, dvh), jnp.float32),
        grid=(1,),
        in_specs=[
            pl.BlockSpec(fq.shape, lambda i: (0, 0, 0)),
            pl.BlockSpec(fk.shape, lambda i: (0, 0, 0)),
            pl.BlockSpec(fv.shape, lambda i: (0, 0, 0)),
        ],
        out_specs=pl.BlockSpec((BN, L, dvh), lambda i: (0, 0, 0)),
        compiler_params=pltpu.CompilerParams(dimension_semantics=("arbitrary",)),
    )(fq, fk, fv)


# ---------------------------------------------------------------------------
# Kernel E: attn_out 1x1 conv + channel concat + residual add + ReLU.
# ---------------------------------------------------------------------------
def _merge_kernel(conv_ref, attn_ref, wa_ref, ba_ref, res_ref, o_ref):
    proj = jnp.dot(attn_ref[...].astype(jnp.bfloat16), wa_ref[...],
                   preferred_element_type=jnp.float32) + ba_ref[...]
    merged = jnp.concatenate([conv_ref[...], proj], axis=-1)
    o_ref[...] = jnp.maximum(merged + res_ref[...], 0.0)


def merge_residual(conv_out, attn_m, wa, ba, res):
    M, c_conv = conv_out.shape
    dv = attn_m.shape[1]
    C1 = c_conv + dv
    return pl.pallas_call(
        _merge_kernel,
        out_shape=jax.ShapeDtypeStruct((M, C1), jnp.float32),
        grid=(1,),
        in_specs=[
            pl.BlockSpec((M, c_conv), lambda i: (0, 0)),
            pl.BlockSpec((M, dv), lambda i: (0, 0)),
            pl.BlockSpec((dv, dv), lambda i: (0, 0)),
            pl.BlockSpec((1, dv), lambda i: (0, 0)),
            pl.BlockSpec((M, C1), lambda i: (0, 0)),
        ],
        out_specs=pl.BlockSpec((M, C1), lambda i: (0, 0)),
        compiler_params=pltpu.CompilerParams(dimension_semantics=("arbitrary",)),
    )(conv_out, attn_m, wa, ba, res)


# ---------------------------------------------------------------------------
# Host-side parameter folding (BN fold, layout, bf16 cast) -- done once.
# ---------------------------------------------------------------------------
def bn_scale_bias(gamma, beta, mean, var, eps=1e-5):
    # TODO(synk): BatchNorm implemented in eval mode (running stats); training-mode
    # batch statistics are not reproduced.
    s = gamma / jnp.sqrt(var + eps)
    return s, beta - mean * s


def fold_params(p):
    f = {}
    P, Cin = p["conv1_w"].shape[0], p["conv1_w"].shape[1]
    C1 = p["conv3_w"].shape[0]

    s1, b1 = bn_scale_bias(p["bn1_g"], p["bn1_b"], p["bn1_m"], p["bn1_v"])
    f["w1"] = (p["conv1_w"].reshape(P, Cin).T * s1[None, :]).astype(jnp.bfloat16)
    f["b1"] = b1.reshape(1, P).astype(jnp.float32)

    s2, b2 = bn_scale_bias(p["bn2_g"], p["bn2_b"], p["bn2_m"], p["bn2_v"])
    w2 = jnp.transpose(p["conv2_w"], (2, 3, 1, 0)).reshape(9, P, P) * s2[None, None, :]
    f["w2"] = w2.astype(jnp.bfloat16)
    f["b2"] = b2.reshape(1, P).astype(jnp.float32)

    s3, b3 = bn_scale_bias(p["bn3_g"], p["bn3_b"], p["bn3_m"], p["bn3_v"])
    f["w3"] = (p["conv3_w"].reshape(C1, P).T * s3[None, :]).astype(jnp.bfloat16)
    f["b3"] = b3.reshape(1, C1).astype(jnp.float32)

    # Channel-attention shared MLP (tiny -> kept f32 so epilogue stays f32).
    f["fc1w"] = p["ca_fc1_w"].T.astype(jnp.float32)
    f["fc1b"] = p["ca_fc1_b"].reshape(1, -1).astype(jnp.float32)
    f["fc2w"] = p["ca_fc2_w"].T.astype(jnp.float32)
    f["fc2b"] = p["ca_fc2_b"].reshape(1, -1).astype(jnp.float32)

    # Fused AugmentedConv 3x3 (conv_out ++ qkv), lane-dense padded N.
    wcat = jnp.concatenate([p["aa_conv_out_w"], p["aa_qkv_w"]], axis=0)
    ntot = wcat.shape[0]
    npad = ((ntot + 127) // 128) * 128
    wf = jnp.transpose(wcat, (2, 3, 1, 0)).reshape(9, C1, ntot)
    f["wf"] = jnp.pad(wf, ((0, 0), (0, 0), (0, npad - ntot))).astype(jnp.bfloat16)
    bf = jnp.concatenate([p["aa_conv_out_b"], p["aa_qkv_b"]])
    f["bf"] = jnp.pad(bf, (0, npad - ntot)).reshape(1, npad).astype(jnp.float32)

    dv = p["aa_attn_out_w"].shape[0]
    f["wattn"] = p["aa_attn_out_w"].reshape(dv, dv).T.astype(jnp.bfloat16)
    f["battn"] = p["aa_attn_out_b"].reshape(1, dv).astype(jnp.float32)
    return f


# ---------------------------------------------------------------------------
# Module forward (thin glue orchestrating the 5 Pallas kernels)
# ---------------------------------------------------------------------------
def bottleneck_forward(x, f, dk, dv, Nh):
    # TODO(synk): deformable-conv (dcn) branch, `downsample`, and relative
    # position logits (relative=False) are not exercised and not implemented.
    B, Cin, H, W = x.shape
    M = B * H * W
    L = H * W
    P = f["b1"].shape[1]
    C1 = f["b3"].shape[1]
    dkh, dvh = dk // Nh, dv // Nh

    xm = jnp.transpose(x, (0, 2, 3, 1)).reshape(M, Cin)        # NHWC flat, once

    # conv1 + bn1 + relu
    t1 = matmul_bias_act(xm, f["w1"], f["b1"], act="relu")     # (M, P)

    # conv2+bn2+relu, conv3+bn3, CBAM channel attention -- one fused kernel
    t1p = jnp.pad(t1.reshape(B, H, W, P), ((0, 0), (1, 1), (1, 1), (0, 0)))
    gated = stem_channel_attention(
        t1p, f["w2"], f["b2"], f["w3"], f["b3"],
        f["fc1w"], f["fc1b"], f["fc2w"], f["fc2b"], B=B, H=H, W=W)   # (M, C1)

    # AugmentedConv: fused conv_out + qkv 3x3 (in-kernel im2col, N-tiled)
    gpad = jnp.pad(gated.reshape(B, H, W, C1), ((0, 0), (1, 1), (1, 1), (0, 0)))
    y = fused_conv3x3(gpad, f["wf"], f["bf"], B=B, H=H, W=W)   # (M, npad)
    co_ch = C1 - dv
    conv_out = y[:, :co_ch]
    qkv = y[:, co_ch:co_ch + 2 * dk + dv]

    # Split heads (tiny host reshapes) and run all heads in one attention call.
    qkv3 = qkv.reshape(B, L, 2 * dk + dv)

    def split_heads(t, hd):
        return t.reshape(B, L, Nh, hd).transpose(0, 2, 1, 3).reshape(B * Nh, L, hd)

    fq = split_heads(qkv3[:, :, :dk], dkh)
    fk = split_heads(qkv3[:, :, dk:2 * dk], dkh)
    fv = split_heads(qkv3[:, :, 2 * dk:], dvh)
    attn = mhsa(fq, fk, fv, dkh)                               # (B*Nh, L, dvh)

    # NB: reproduces the reference exactly -- torch.reshape (no transpose) of
    # (B, Nh, H*W, dvh) into (B, Nh*dvh, H, W) before the 1x1 attn_out conv.
    attn_m = jnp.transpose(attn.reshape(B, dv, H, W), (0, 2, 3, 1)).reshape(M, dv)

    # attn_out 1x1 conv + concat + residual add + ReLU -- fused epilogue kernel
    out_m = merge_residual(conv_out, attn_m, f["wattn"], f["battn"], xm)   # (M, C1)
    return jnp.transpose(out_m.reshape(B, H, W, C1), (0, 3, 1, 2))


# ---------------------------------------------------------------------------
# Deterministic parameter construction
# ---------------------------------------------------------------------------
def init_params(key, inplanes, planes):
    c1 = planes * 4
    mid = c1 // 16
    dk, dv, Nh = 2 * c1, int(c1 // 20 * 4), 4
    keys = list(jax.random.split(key, 32))
    it = iter(keys)

    def nrm(shape, s=0.05):
        return jax.random.normal(next(it), shape, jnp.float32) * s

    def bn(c, tag, d):
        d[f"{tag}_g"] = 1.0 + 0.1 * jax.random.normal(next(it), (c,), jnp.float32)
        d[f"{tag}_b"] = 0.1 * jax.random.normal(next(it), (c,), jnp.float32)
        d[f"{tag}_m"] = 0.1 * jax.random.normal(next(it), (c,), jnp.float32)
        d[f"{tag}_v"] = jnp.abs(1.0 + 0.1 * jax.random.normal(next(it), (c,), jnp.float32))

    p = {}
    p["conv1_w"] = nrm((planes, inplanes, 1, 1)); bn(planes, "bn1", p)
    p["conv2_w"] = nrm((planes, planes, 3, 3));   bn(planes, "bn2", p)
    p["conv3_w"] = nrm((c1, planes, 1, 1));       bn(c1, "bn3", p)
    p["ca_fc1_w"] = nrm((mid, c1)); p["ca_fc1_b"] = nrm((mid,))
    p["ca_fc2_w"] = nrm((c1, mid)); p["ca_fc2_b"] = nrm((c1,))
    p["aa_conv_out_w"] = nrm((c1 - dv, c1, 3, 3)); p["aa_conv_out_b"] = nrm((c1 - dv,))
    p["aa_qkv_w"] = nrm((2 * dk + dv, c1, 3, 3));  p["aa_qkv_b"] = nrm((2 * dk + dv,))
    p["aa_attn_out_w"] = nrm((dv, dv, 1, 1));      p["aa_attn_out_b"] = nrm((dv,))
    return p, (dk, dv, Nh)


# ---------------------------------------------------------------------------
if __name__ == "__main__":
    # Bottleneck(inplanes=80, planes=20, stride=1, downsample=None, dcn=None)
    # inplanes == planes*4 so the residual add is valid without a downsample.
    inplanes, planes = 80, 20
    B, H, W = 2, 8, 8

    key = jax.random.PRNGKey(0)
    kx, kp = jax.random.split(key)
    x = jax.random.normal(kx, (B, inplanes, H, W), jnp.float32)   # NCHW like PyTorch
    params, (dk, dv, Nh) = init_params(kp, inplanes, planes)
    folded = fold_params(params)

    fwd = jax.jit(functools.partial(bottleneck_forward, dk=dk, dv=dv, Nh=Nh))
    out = fwd(x, folded)
    jax.block_until_ready(out)
    assert out.shape == (B, planes * 4, H, W) and out.dtype == jnp.float32
    assert bool(jnp.all(jnp.isfinite(out)))
    print("KERNEL_OK")
</pallas_src>

<mosaic_0001>
module attributes {stable_mosaic.version = 11 : i64} {
  func.func @_mm_bias_act_kernel(%arg0: i32, %arg1: memref<128x80xf32, #tpu.memory_space<vmem>>, %arg2: memref<80x20xbf16, #tpu.memory_space<vmem>>, %arg3: memref<1x20xf32, #tpu.memory_space<vmem>>, %arg4: memref<128x20xf32, #tpu.memory_space<vmem>>) attributes {dimension_semantics = [#tpu.dimension_semantics<parallel>], iteration_bounds = array<i64: 1>, scalar_prefetch = 0 : i64, scratch_operands = 0 : i64, tpu.core_type = #tpu.core_type<tc>, window_params = [{transform_indices = @transform_0, window_bounds = array<i64: 128, 80>}, {pipeline_mode = #tpu.pipeline_mode<synchronous>, transform_indices = @transform_1, window_bounds = array<i64: 80, 20>}, {pipeline_mode = #tpu.pipeline_mode<synchronous>, transform_indices = @transform_2, window_bounds = array<i64: 1, 20>}, {transform_indices = @transform_3, window_bounds = array<i64: 128, 20>}]} {
    %c0 = arith.constant 0 : index
    %c0_0 = arith.constant 0 : index
    %0 = vector.load %arg1[%c0, %c0_0] : memref<128x80xf32, #tpu.memory_space<vmem>>, vector<128x80xf32>
    %1 = arith.truncf %0 : vector<128x80xf32> to vector<128x80xbf16>
    %c0_1 = arith.constant 0 : index
    %c0_2 = arith.constant 0 : index
    %2 = vector.load %arg2[%c0_1, %c0_2] : memref<80x20xbf16, #tpu.memory_space<vmem>>, vector<80x20xbf16>
    %cst = arith.constant dense<0.000000e+00> : vector<128x20xf32>
    %3 = tpu.matmul %1, %2, %cst {dimension_numbers = #tpu.dot_dimension_numbers<[1], [0], [0], [1], [0, 0, 1, 1], [], []>} : vector<128x80xbf16>, vector<80x20xbf16>, vector<128x20xf32> -> vector<128x20xf32>
    %c0_3 = arith.constant 0 : index
    %c0_4 = arith.constant 0 : index
    %4 = vector.load %arg3[%c0_3, %c0_4] : memref<1x20xf32, #tpu.memory_space<vmem>>, vector<1x20xf32>
    %5 = vector.broadcast %4 : vector<1x20xf32> to vector<128x20xf32>
    %6 = arith.addf %3, %5 : vector<128x20xf32>
    %cst_5 = arith.constant 0.000000e+00 : f32
    %7 = vector.broadcast %cst_5 : f32 to vector<128x20xf32>
    %8 = arith.maximumf %6, %7 : vector<128x20xf32>
    %c0_6 = arith.constant 0 : index
    %c0_7 = arith.constant 0 : index
    %9 = vector.load %arg4[%c0_6, %c0_7] : memref<128x20xf32, #tpu.memory_space<vmem>>, vector<128x20xf32>
    tpu.vector_store %arg4[%c0_6, %c0_7], %8 {strides = array<i32>} : memref<128x20xf32, #tpu.memory_space<vmem>>, vector<128x20xf32>,
    return
  }
  func.func @transform_0(%arg0: i32) -> (i32, i32) {
    %c0_i32 = arith.constant 0 : i32
    %c0_i32_0 = arith.constant 0 : i32
    return %arg0, %c0_i32 : i32, i32
  }
  func.func @transform_1(%arg0: i32) -> (i32, i32) {
    %c0_i32 = arith.constant 0 : i32
    %c0_i32_0 = arith.constant 0 : i32
    %c0_i32_1 = arith.constant 0 : i32
    return %c0_i32, %c0_i32_0 : i32, i32
  }
  func.func @transform_2(%arg0: i32) -> (i32, i32) {
    %c0_i32 = arith.constant 0 : i32
    %c0_i32_0 = arith.constant 0 : i32
    %c0_i32_1 = arith.constant 0 : i32
    return %c0_i32, %c0_i32_0 : i32, i32
  }
  func.func @transform_3(%arg0: i32) -> (i32, i32) {
    %c0_i32 = arith.constant 0 : i32
    %c0_i32_0 = arith.constant 0 : i32
    return %arg0, %c0_i32 : i32, i32
  }
}

module attributes {stable_mosaic.version = 11 : i64} {
  func.func @_fused_conv3x3_kernel(%arg0: i32, %arg1: memref<2x10x10x80xf32, #tpu.memory_space<vmem>>, %arg2: memref<9x80x128xbf16, #tpu.memory_space<vmem>>, %arg3: memref<1x128xf32, #tpu.memory_space<vmem>>, %arg4: memref<128x128xf32, #tpu.memory_space<vmem>>) attributes {dimension_semantics = [#tpu.dimension_semantics<parallel>], iteration_bounds = array<i64: 4>, scalar_prefetch = 0 : i64, scratch_operands = 0 : i64, tpu.core_type = #tpu.core_type<tc>, window_params = [{pipeline_mode = #tpu.pipeline_mode<synchronous>, transform_indices = @transform_0, window_bounds = array<i64: 2, 10, 10, 80>}, {transform_indices = @transform_1, window_bounds = array<i64: 9, 80, 128>}, {transform_indices = @transform_2, window_bounds = array<i64: 1, 128>}, {transform_indices = @transform_3, window_bounds = array<i64: 128, 128>}]} {
    %c0 = arith.constant 0 : index
    %c0_0 = arith.constant 0 : index
    %0 = vector.load %arg3[%c0, %c0_0] : memref<1x128xf32, #tpu.memory_space<vmem>>, vector<1x128xf32>
    %1 = vector.shape_cast %0 : vector<1x128xf32> to vector<1x128xf32>
    %2 = vector.broadcast %1 : vector<1x128xf32> to vector<128x128xf32>
    %c0_1 = arith.constant 0 : index
    %c0_2 = arith.constant 0 : index
    %3 = vector.load %arg4[%c0_1, %c0_2] : memref<128x128xf32, #tpu.memory_space<vmem>>, vector<128x128xf32>
    tpu.vector_store %arg4[%c0_1, %c0_2], %2 {strides = array<i32>} : memref<128x128xf32, #tpu.memory_space<vmem>>, vector<128x128xf32>,
    %c0_3 = arith.constant 0 : index
    %c0_4 = arith.constant 0 : index
    %c0_5 = arith.constant 0 : index
    %c0_6 = arith.constant 0 : index
    %4 = vector.load %arg1[%c0_3, %c0_4, %c0_5, %c0_6] : memref<2x10x10x80xf32, #tpu.memory_space<vmem>>, vector<2x8x8x80xf32>
    %5 = vector.shape_cast %4 : vector<2x8x8x80xf32> to vector<128x80xf32>
    %6 = arith.truncf %5 : vector<128x80xf32> to vector<128x80xbf16>
    %c0_7 = arith.constant 0 : index
    %c0_8 = arith.constant 0 : index
    %7 = vector.load %arg4[%c0_7, %c0_8] : memref<128x128xf32, #tpu.memory_space<vmem>>, vector<128x128xf32>
    %c0_9 = arith.constant 0 : index
    %c0_10 = arith.constant 0 : index
    %c0_11 = arith.constant 0 : index
    %8 = vector.load %arg2[%c0_9, %c0_10, %c0_11] : memref<9x80x128xbf16, #tpu.memory_space<vmem>>, vector<1x80x128xbf16>
    %9 = vector.shape_cast %8 : vector<1x80x128xbf16> to vector<80x128xbf16>
    %cst = arith.constant dense<0.000000e+00> : vector<128x128xf32>
    %10 = tpu.matmul %6, %9, %cst {dimension_numbers = #tpu.dot_dimension_numbers<[1], [0], [0], [1], [0, 0, 1, 1], [], []>} : vector<128x80xbf16>, vector<80x128xbf16>, vector<128x128xf32> -> vector<128x128xf32>
    %11 = arith.addf %7, %10 : vector<128x128xf32>
    %c0_12 = arith.constant 0 : index
    %c0_13 = arith.constant 0 : index
    %12 = vector.load %arg4[%c0_12, %c0_13] : memref<128x128xf32, #tpu.memory_space<vmem>>, vector<128x128xf32>
    tpu.vector_store %arg4[%c0_12, %c0_13], %11 {strides = array<i32>} : memref<128x128xf32, #tpu.memory_space<vmem>>, vector<128x128xf32>,
    %c0_14 = arith.constant 0 : index
    %c0_15 = arith.constant 0 : index
    %c1 = arith.constant 1 : index
    %c0_16 = arith.constant 0 : index
    %13 = vector.load %arg1[%c0_14, %c0_15, %c1, %c0_16] : memref<2x10x10x80xf32, #tpu.memory_space<vmem>>, vector<2x8x8x80xf32>
    %14 = vector.shape_cast %13 : vector<2x8x8x80xf32> to vector<128x80xf32>
    %15 = arith.truncf %14 : vector<128x80xf32> to vector<128x80xbf16>
    %c0_17 = arith.constant 0 : index
    %c0_18 = arith.constant 0 : index
    %16 = vector.load %arg4[%c0_17, %c0_18] : memref<128x128xf32, #tpu.memory_space<vmem>>, vector<128x128xf32>
    %c1_19 = arith.constant 1 : index
    %c0_20 = arith.constant 0 : index
    %c0_21 = arith.constant 0 : index
    %17 = vector.load %arg2[%c1_19, %c0_20, %c0_21] : memref<9x80x128xbf16, #tpu.memory_space<vmem>>, vector<1x80x128xbf16>
    %18 = vector.shape_cast %17 : vector<1x80x128xbf16> to vector<80x128xbf16>
    %cst_22 = arith.constant dense<0.000000e+00> : vector<128x128xf32>
    %19 = tpu.matmul %15, %18, %cst_22 {dimension_numbers = #tpu.dot_dimension_numbers<[1], [0], [0], [1], [0, 0, 1, 1], [], []>} : vector<128x80xbf16>, vector<80x128xbf16>, vector<128x128xf32> -> vector<128x128xf32>
    %20 = arith.addf %16, %19 : vector<128x128xf32>
    %c0_23 = arith.constant 0 : index
    %c0_24 = arith.constant 0 : index
    %21 = vector.load %arg4[%c0_23, %c0_24] : memref<128x128xf32, #tpu.memory_space<vmem>>, vector<128x128xf32>
    tpu.vector_store %arg4[%c0_23, %c0_24], %20 {strides = array<i32>} : memref<128x128xf32, #tpu.memory_space<vmem>>, vector<128x128xf32>,
    %c0_25 = arith.constant 0 : index
    %c0_26 = arith.constant 0 : index
    %c2 = arith.constant 2 : index
    %c0_27 = arith.constant 0 : index
    %22 = vector.load %arg1[%c0_25, %c0_26, %c2, %c0_27] : memref<2x10x10x80xf32, #tpu.memory_space<vmem>>, vector<2x8x8x80xf32>
    %23 = vector.shape_cast %22 : vector<2x8x8x80xf32> to vector<128x80xf32>
    %24 = arith.truncf %23 : vector<128x80xf32> to vector<128x80xbf16>
    %c0_28 = arith.constant 0 : index
    %c0_29 = arith.constant 0 : index
    %25 = vector.load %arg4[%c0_28, %c0_29] : memref<128x128xf32, #tpu.memory_space<vmem>>, vector<128x128xf32>
    %c2_30 = arith.constant 2 : index
    %c0_31 = arith.constant 0 : index
    %c0_32 = arith.constant 0 : index
    %26 = vector.load %arg2[%c2_30, %c0_31, %c0_32] : memref<9x80x128xbf16, #tpu.memory_space<vmem>>, vector<1x80x128xbf16>
    %27 = vector.shape_cast %26 : vector<1x80x128xbf16> to vector<80x128xbf16>
    %cst_33 = arith.constant dense<0.000000e+00> : vector<128x128xf32>
    %28 = tpu.matmul %24, %27, %cst_33 {dimension_numbers = #tpu.dot_dimension_numbers<[1], [0], [0], [1], [0, 0, 1, 1], [], []>} : vector<128x80xbf16>, vector<80x128xbf16>, vector<128x128xf32> -> vector<128x128xf32>
    %29 = arith.addf %25, %28 : vector<128x128xf32>
    %c0_34 = arith.constant 0 : index
    %c0_35 = arith.constant 0 : index
    %30 = vector.load %arg4[%c0_34, %c0_35] : memref<128x128xf32, #tpu.memory_space<vmem>>, vector<128x128xf32>
    tpu.vector_store %arg4[%c0_34, %c0_35], %29 {strides = array<i32>} : memref<128x128xf32, #tpu.memory_space<vmem>>, vector<128x128xf32>,
    %c0_36 = arith.constant 0 : index
    %c1_37 = arith.constant 1 : index
    %c0_38 = arith.constant 0 : index
    %c0_39 = arith.constant 0 : index
    %31 = vector.load %arg1[%c0_36, %c1_37, %c0_38, %c0_39] : memref<2x10x10x80xf32, #tpu.memory_space<vmem>>, vector<2x8x8x80xf32>
    %32 = vector.shape_cast %31 : vector<2x8x8x80xf32> to vector<128x80xf32>
    %33 = arith.truncf %32 : vector<128x80xf32> to vector<128x80xbf16>
    %c0_40 = arith.constant 0 : index
    %c0_41 = arith.constant 0 : index
    %34 = vector.load %arg4[%c0_40, %c0_41] : memref<128x128xf32, #tpu.memory_space<vmem>>, vector<128x128xf32>
    %c3 = arith.constant 3 : index
    %c0_42 = arith.constant 0 : index
    %c0_43 = arith.constant 0 : index
    %35 = vector.load %arg2[%c3, %c0_42, %c0_43] : memref<9x80x128xbf16, #tpu.memory_space<vmem>>, vector<1x80x128xbf16>
    %36 = vector.shape_cast %35 : vector<1x80x128xbf16> to vector<80x128xbf16>
    %cst_44 = arith.constant dense<0.000000e+00> : vector<128x128xf32>
    %37 = tpu.matmul %33, %36, %cst_44 {dimension_numbers = #tpu.dot_dimension_numbers<[1], [0], [0], [1], [0, 0, 1, 1], [], []>} : vector<128x80xbf16>, vector<80x128xbf16>, vector<128x128xf32> -> vector<128x128xf32>
    %38 = arith.addf %34, %37 : vector<128x128xf32>
    %c0_45 = arith.constant 0 : index
    %c0_46 = arith.constant 0 : index
    %39 = vector.load %arg4[%c0_45, %c0_46] : memref<128x128xf32, #tpu.memory_space<vmem>>, vector<128x128xf32>
    tpu.vector_store %arg4[%c0_45, %c0_46], %38 {strides = array<i32>} : memref<128x128xf32, #tpu.memory_space<vmem>>, vector<128x128xf32>,
    %c0_47 = arith.constant 0 : index
    %c1_48 = arith.constant 1 : index
    %c1_49 = arith.constant 1 : index
    %c0_50 = arith.constant 0 : index
    %40 = vector.load %arg1[%c0_47, %c1_48, %c1_49, %c0_50] : memref<2x10x10x80xf32, #tpu.memory_space<vmem>>, vector<2x8x8x80xf32>
    %41 = vector.shape_cast %40 : vector<2x8x8x80xf32> to vector<128x80xf32>
    %42 = arith.truncf %41 : vector<128x80xf32> to vector<128x80xbf16>
    %c0_51 = arith.constant 0 : index
    %c0_52 = arith.constant 0 : index
    %43 = vector.load %arg4[%c0_51, %c0_52] : memref<128x128xf32, #tpu.memory_space<vmem>>, vector<128x128xf32>
    %c4 = arith.constant 4 : index
    %c0_53 = arith.constant 0 : index
    %c0_54 = arith.constant 0 : index
    %44 = vector.load %arg2[%c4, %c0_53, %c0_54] : memref<9x80x128xbf16, #tpu.memory_space<vmem>>, vector<1x80x128xbf16>
    %45 = vector.shape_cast %44 : vector<1x80x128xbf16> to vector<80x128xbf16>
    %cst_55 = arith.constant dense<0.000000e+00> : vector<128x128xf32>
    %46 = tpu.matmul %42, %45, %cst_55 {dimension_numbers = #tpu.dot_dimension_numbers<[1], [0], [0], [1], [0, 0, 1, 1], [], []>} : vector<128x80xbf16>, vector<80x128xbf16>, vector<128x128xf32> -> vector<128x128xf32>
    %47 = arith.addf %43, %46 : vector<128x128xf32>
    %c0_56 = arith.constant 0 : index
    %c0_57 = arith.constant 0 : index
    %48 = vector.load %arg4[%c0_56, %c0_57] : memref<128x128xf32, #tpu.memory_space<vmem>>, vector<128x128xf32>
    tpu.vector_store %arg4[%c0_56, %c0_57], %47 {strides = array<i32>} : memref<128x128xf32, #tpu.memory_space<vmem>>, vector<128x128xf32>,
    %c0_58 = arith.constant 0 : index
    %c1_59 = arith.constant 1 : index
    %c2_60 = arith.constant 2 : index
    %c0_61 = arith.constant 0 : index
    %49 = vector.load %arg1[%c0_58, %c1_59, %c2_60, %c0_61] : memref<2x10x10x80xf32, #tpu.memory_space<vmem>>, vector<2x8x8x80xf32>
    %50 = vector.shape_cast %49 : vector<2x8x8x80xf32> to vector<128x80xf32>
    %51 = arith.truncf %50 : vector<128x80xf32> to vector<128x80xbf16>
    %c0_62 = arith.constant 0 : index
    %c0_63 = arith.constant 0 : index
    %52 = vector.load %arg4[%c0_62, %c0_63] : memref<128x128xf32, #tpu.memory_space<vmem>>, vector<128x128xf32>
    %c5 = arith.constant 5 : index
    %c0_64 = arith.constant 0 : index
    %c0_65 = arith.constant 0 : index
    %53 = vector.load %arg2[%c5, %c0_64, %c0_65] : memref<9x80x128xbf16, #tpu.memory_space<vmem>>, vector<1x80x128xbf16>
    %54 = vector.shape_cast %53 : vector<1x80x128xbf16> to vector<80x128xbf16>
    %cst_66 = arith.constant dense<0.000000e+00> : vector<128x128xf32>
    %55 = tpu.matmul %51, %54, %cst_66 {dimension_numbers = #tpu.dot_dimension_numbers<[1], [0], [0], [1], [0, 0, 1, 1], [], []>} : vector<128x80xbf16>, vector<80x128xbf16>, vector<128x128xf32> -> vector<128x128xf32>
    %56 = arith.addf %52, %55 : vector<128x128xf32>
    %c0_67 = arith.constant 0 : index
    %c0_68 = arith.constant 0 : index
    %57 = vector.load %arg4[%c0_67, %c0_68] : memref<128x128xf32, #tpu.memory_space<vmem>>, vector<128x128xf32>
    tpu.vector_store %arg4[%c0_67, %c0_68], %56 {strides = array<i32>} : memref<128x128xf32, #tpu.memory_space<vmem>>, vector<128x128xf32>,
    %c0_69 = arith.constant 0 : index
    %c2_70 = arith.constant 2 : index
    %c0_71 = arith.constant 0 : index
    %c0_72 = arith.constant 0 : index
    %58 = vector.load %arg1[%c0_69, %c2_70, %c0_71, %c0_72] : memref<2x10x10x80xf32, #tpu.memory_space<vmem>>, vector<2x8x8x80xf32>
    %59 = vector.shape_cast %58 : vector<2x8x8x80xf32> to vector<128x80xf32>
    %60 = arith.truncf %59 : vector<128x80xf32> to vector<128x80xbf16>
    %c0_73 = arith.constant 0 : index
    %c0_74 = arith.constant 0 : index
    %61 = vector.load %arg4[%c0_73, %c0_74] : memref<128x128xf32, #tpu.memory_space<vmem>>, vector<128x128xf32>
    %c6 = arith.constant 6 : index
    %c0_75 = arith.constant 0 : index
    %c0_76 = arith.constant 0 : index
    %62 = vector.load %arg2[%c6, %c0_75, %c0_76] : memref<9x80x128xbf16, #tpu.memory_space<vmem>>, vector<1x80x128xbf16>
    %63 = vector.shape_cast %62 : vector<1x80x128xbf16> to vector<80x128xbf16>
    %cst_77 = arith.constant dense<0.000000e+00> : vector<128x128xf32>
    %64 = tpu.matmul %60, %63, %cst_77 {dimension_numbers = #tpu.dot_dimension_numbers<[1], [0], [0], [1], [0, 0, 1, 1], [], []>} : vector<128x80xbf16>, vector<80x128xbf16>, vector<128x128xf32> -> vector<128x128xf32>
    %65 = arith.addf %61, %64 : vector<128x128xf32>
    %c0_78 = arith.constant 0 : index
    %c0_79 = arith.constant 0 : index
    %66 = vector.load %arg4[%c0_78, %c0_79] : memref<128x128xf32, #tpu.memory_space<vmem>>, vector<128x128xf32>
    tpu.vector_store %arg4[%c0_78, %c0_79], %65 {strides = array<i32>} : memref<128x128xf32, #tpu.memory_space<vmem>>, vector<128x128xf32>,
    %c0_80 = arith.constant 0 : index
    %c2_81 = arith.constant 2 : index
    %c1_82 = arith.constant 1 : index
    %c0_83 = arith.constant 0 : index
    %67 = vector.load %arg1[%c0_80, %c2_81, %c1_82, %c0_83] : memref<2x10x10x80xf32, #tpu.memory_space<vmem>>, vector<2x8x8x80xf32>
    %68 = vector.shape_cast %67 : vector<2x8x8x80xf32> to vector<128x80xf32>
    %69 = arith.truncf %68 : vector<128x80xf32> to vector<128x80xbf16>
    %c0_84 = arith.constant 0 : index
    %c0_85 = arith.constant 0 : index
    %70 = vector.load %arg4[%c0_84, %c0_85] : memref<128x128xf32, #tpu.memory_space<vmem>>, vector<128x128xf32>
    %c7 = arith.constant 7 : index
    %c0_86 = arith.constant 0 : index
    %c0_87 = arith.constant 0 : index
    %71 = vector.load %arg2[%c7, %c0_86, %c0_87] : memref<9x80x128xbf16, #tpu.memory_space<vmem>>, vector<1x80x128xbf16>
    %72 = vector.shape_cast %71 : vector<1x80x128xbf16> to vector<80x128xbf16>
    %cst_88 = arith.constant dense<0.000000e+00> : vector<128x128xf32>
    %73 = tpu.matmul %69, %72, %cst_88 {dimension_numbers = #tpu.dot_dimension_numbers<[1], [0], [0], [1], [0, 0, 1, 1], [], []>} : vector<128x80xbf16>, vector<80x128xbf16>, vector<128x128xf32> -> vector<128x128xf32>
    %74 = arith.addf %70, %73 : vector<128x128xf32>
    %c0_89 = arith.constant 0 : index
    %c0_90 = arith.constant 0 : index
    %75 = vector.load %arg4[%c0_89, %c0_90] : memref<128x128xf32, #tpu.memory_space<vmem>>, vector<128x128xf32>
    tpu.vector_store %arg4[%c0_89, %c0_90], %74 {strides = array<i32>} : memref<128x128xf32, #tpu.memory_space<vmem>>, vector<128x128xf32>,
    %c0_91 = arith.constant 0 : index
    %c2_92 = arith.constant 2 : index
    %c2_93 = arith.constant 2 : index
    %c0_94 = arith.constant 0 : index
    %76 = vector.load %arg1[%c0_91, %c2_92, %c2_93, %c0_94] : memref<2x10x10x80xf32, #tpu.memory_space<vmem>>, vector<2x8x8x80xf32>
    %77 = vector.shape_cast %76 : vector<2x8x8x80xf32> to vector<128x80xf32>
    %78 = arith.truncf %77 : vector<128x80xf32> to vector<128x80xbf16>
    %c0_95 = arith.constant 0 : index
    %c0_96 = arith.constant 0 : index
    %79 = vector.load %arg4[%c0_95, %c0_96] : memref<128x128xf32, #tpu.memory_space<vmem>>, vector<128x128xf32>
    %c8 = arith.constant 8 : index
    %c0_97 = arith.constant 0 : index
    %c0_98 = arith.constant 0 : index
    %80 = vector.load %arg2[%c8, %c0_97, %c0_98] : memref<9x80x128xbf16, #tpu.memory_space<vmem>>, vector<1x80x128xbf16>
    %81 = vector.shape_cast %80 : vector<1x80x128xbf16> to vector<80x128xbf16>
    %cst_99 = arith.constant dense<0.000000e+00> : vector<128x128xf32>
    %82 = tpu.matmul %78, %81, %cst_99 {dimension_numbers = #tpu.dot_dimension_numbers<[1], [0], [0], [1], [0, 0, 1, 1], [], []>} : vector<128x80xbf16>, vector<80x128xbf16>, vector<128x128xf32> -> vector<128x128xf32>
    %83 = arith.addf %79, %82 : vector<128x128xf32>
    %c0_100 = arith.constant 0 : index
    %c0_101 = arith.constant 0 : index
    %84 = vector.load %arg4[%c0_100, %c0_101] : memref<128x128xf32, #tpu.memory_space<vmem>>, vector<128x128xf32>
    tpu.vector_store %arg4[%c0_100, %c0_101], %83 {strides = array<i32>} : memref<128x128xf32, #tpu.memory_space<vmem>>, vector<128x128xf32>,
    return
  }
  func.func @transform_0(%arg0: i32) -> (i32, i32, i32, i32) {
    %c0_i32 = arith.constant 0 : i32
    %c0_i32_0 = arith.constant 0 : i32
    %c0_i32_1 = arith.constant 0 : i32
    %c0_i32_2 = arith.constant 0 : i32
    %c0_i32_3 = arith.constant 0 : i32
    return %c0_i32, %c0_i32_0, %c0_i32_1, %c0_i32_2 : i32, i32, i32, i32
  }
  func.func @transform_1(%arg0: i32) -> (i32, i32, i32) {
    %c0_i32 = arith.constant 0 : i32
    %c0_i32_0 = arith.constant 0 : i32
    %c0_i32_1 = arith.constant 0 : i32
    return %c0_i32, %c0_i32_0, %arg0 : i32, i32, i32
  }
  func.func @transform_2(%arg0: i32) -> (i32, i32) {
    %c0_i32 = arith.constant 0 : i32
    %c0_i32_0 = arith.constant 0 : i32
    return %c0_i32, %arg0 : i32, i32
  }
  func.func @transform_3(%arg0: i32) -> (i32, i32) {
    %c0_i32 = arith.constant 0 : i32
    %c0_i32_0 = arith.constant 0 : i32
    return %c0_i32, %arg0 : i32, i32
  }
}

module attributes {stable_mosaic.version = 11 : i64} {
  func.func @_stem_ca_kernel(%arg0: i32, %arg1: memref<2x10x10x20xf32, #tpu.memory_space<vmem>>, %arg2: memref<9x20x20xbf16, #tpu.memory_space<vmem>>, %arg3: memref<1x20xf32, #tpu.memory_space<vmem>>, %arg4: memref<20x80xbf16, #tpu.memory_space<vmem>>, %arg5: memref<1x80xf32, #tpu.memory_space<vmem>>, %arg6: memref<80x5xf32, #tpu.memory_space<vmem>>, %arg7: memref<1x5xf32, #tpu.memory_space<vmem>>, %arg8: memref<5x80xf32, #tpu.memory_space<vmem>>, %arg9: memref<1x80xf32, #tpu.memory_space<vmem>>, %arg10: memref<128x80xf32, #tpu.memory_space<vmem>>) attributes {dimension_semantics = [#tpu.dimension_semantics<arbitrary>], iteration_bounds = array<i64: 1>, scalar_prefetch = 0 : i64, scratch_operands = 0 : i64, tpu.core_type = #tpu.core_type<tc>, window_params = [{pipeline_mode = #tpu.pipeline_mode<synchronous>, transform_indices = @transform_0, window_bounds = array<i64: 2, 10, 10, 20>}, {pipeline_mode = #tpu.pipeline_mode<synchronous>, transform_indices = @transform_1, window_bounds = array<i64: 9, 20, 20>}, {pipeline_mode = #tpu.pipeline_mode<synchronous>, transform_indices = @transform_2, window_bounds = array<i64: 1, 20>}, {pipeline_mode = #tpu.pipeline_mode<synchronous>, transform_indices = @transform_3, window_bounds = array<i64: 20, 80>}, {pipeline_mode = #tpu.pipeline_mode<synchronous>, transform_indices = @transform_4, window_bounds = array<i64: 1, 80>}, {pipeline_mode = #tpu.pipeline_mode<synchronous>, transform_indices = @transform_5, window_bounds = array<i64: 80, 5>}, {pipeline_mode = #tpu.pipeline_mode<synchronous>, transform_indices = @transform_6, window_bounds = array<i64: 1, 5>}, {pipeline_mode = #tpu.pipeline_mode<synchronous>, transform_indices = @transform_7, window_bounds = array<i64: 5, 80>}, {pipeline_mode = #tpu.pipeline_mode<synchronous>, transform_indices = @transform_8, window_bounds = array<i64: 1, 80>}, {pipeline_mode = #tpu.pipeline_mode<synchronous>, transform_indices = @transform_9, window_bounds = array<i64: 128, 80>}]} {
    %cst = arith.constant 0.000000e+00 : f32
    %0 = vector.broadcast %cst : f32 to vector<128x20xf32>
    %c0 = arith.constant 0 : index
    %c0_0 = arith.constant 0 : index
    %c0_1 = arith.constant 0 : index
    %c0_2 = arith.constant 0 : index
    %1 = vector.load %arg1[%c0, %c0_0, %c0_1, %c0_2] : memref<2x10x10x20xf32, #tpu.memory_space<vmem>>, vector<2x8x8x20xf32>
    %2 = vector.shape_cast %1 : vector<2x8x8x20xf32> to vector<128x20xf32>
    %3 = arith.truncf %2 : vector<128x20xf32> to vector<128x20xbf16>
    %c0_3 = arith.constant 0 : index
    %c0_4 = arith.constant 0 : index
    %c0_5 = arith.constant 0 : index
    %4 = vector.load %arg2[%c0_3, %c0_4, %c0_5] : memref<9x20x20xbf16, #tpu.memory_space<vmem>>, vector<1x20x20xbf16>
    %5 = vector.shape_cast %4 : vector<1x20x20xbf16> to vector<20x20xbf16>
    %cst_6 = arith.constant dense<0.000000e+00> : vector<128x20xf32>
    %6 = tpu.matmul %3, %5, %cst_6 {dimension_numbers = #tpu.dot_dimension_numbers<[1], [0], [0], [1], [0, 0, 1, 1], [], []>} : vector<128x20xbf16>, vector<20x20xbf16>, vector<128x20xf32> -> vector<128x20xf32>
    %7 = arith.addf %0, %6 : vector<128x20xf32>
    %c0_7 = arith.constant 0 : index
    %c0_8 = arith.constant 0 : index
    %c1 = arith.constant 1 : index
    %c0_9 = arith.constant 0 : index
    %8 = vector.load %arg1[%c0_7, %c0_8, %c1, %c0_9] : memref<2x10x10x20xf32, #tpu.memory_space<vmem>>, vector<2x8x8x20xf32>
    %9 = vector.shape_cast %8 : vector<2x8x8x20xf32> to vector<128x20xf32>
    %10 = arith.truncf %9 : vector<128x20xf32> to vector<128x20xbf16>
    %c1_10 = arith.constant 1 : index
    %c0_11 = arith.constant 0 : index
    %c0_12 = arith.constant 0 : index
    %11 = vector.load %arg2[%c1_10, %c0_11, %c0_12] : memref<9x20x20xbf16, #tpu.memory_space<vmem>>, vector<1x20x20xbf16>
    %12 = vector.shape_cast %11 : vector<1x20x20xbf16> to vector<20x20xbf16>
    %cst_13 = arith.constant dense<0.000000e+00> : vector<128x20xf32>
    %13 = tpu.matmul %10, %12, %cst_13 {dimension_numbers = #tpu.dot_dimension_numbers<[1], [0], [0], [1], [0, 0, 1, 1], [], []>} : vector<128x20xbf16>, vector<20x20xbf16>, vector<128x20xf32> -> vector<128x20xf32>
    %14 = arith.addf %7, %13 : vector<128x20xf32>
    %c0_14 = arith.constant 0 : index
    %c0_15 = arith.constant 0 : index
    %c2 = arith.constant 2 : index
    %c0_16 = arith.constant 0 : index
    %15 = vector.load %arg1[%c0_14, %c0_15, %c2, %c0_16] : memref<2x10x10x20xf32, #tpu.memory_space<vmem>>, vector<2x8x8x20xf32>
    %16 = vector.shape_cast %15 : vector<2x8x8x20xf32> to vector<128x20xf32>
    %17 = arith.truncf %16 : vector<128x20xf32> to vector<128x20xbf16>
    %c2_17 = arith.constant 2 : index
    %c0_18 = arith.constant 0 : index
    %c0_19 = arith.constant 0 : index
    %18 = vector.load %arg2[%c2_17, %c0_18, %c0_19] : memref<9x20x20xbf16, #tpu.memory_space<vmem>>, vector<1x20x20xbf16>
    %19 = vector.shape_cast %18 : vector<1x20x20xbf16> to vector<20x20xbf16>
    %cst_20 = arith.constant dense<0.000000e+00> : vector<128x20xf32>
    %20 = tpu.matmul %17, %19, %cst_20 {dimension_numbers = #tpu.dot_dimension_numbers<[1], [0], [0], [1], [0, 0, 1, 1], [], []>} : vector<128x20xbf16>, vector<20x20xbf16>, vector<128x20xf32> -> vector<128x20xf32>
    %21 = arith.addf %14, %20 : vector<128x20xf32>
    %c0_21 = arith.constant 0 : index
    %c1_22 = arith.constant 1 : index
    %c0_23 = arith.constant 0 : index
    %c0_24 = arith.constant 0 : index
    %22 = vector.load %arg1[%c0_21, %c1_22, %c0_23, %c0_24] : memref<2x10x10x20xf32, #tpu.memory_space<vmem>>, vector<2x8x8x20xf32>
    %23 = vector.shape_cast %22 : vector<2x8x8x20xf32> to vector<128x20xf32>
    %24 = arith.truncf %23 : vector<128x20xf32> to vector<128x20xbf16>
    %c3 = arith.constant 3 : index
    %c0_25 = arith.constant 0 : index
    %c0_26 = arith.constant 0 : index
    %25 = vector.load %arg2[%c3, %c0_25, %c0_26] : memref<9x20x20xbf16, #tpu.memory_space<vmem>>, vector<1x20x20xbf16>
    %26 = vector.shape_cast %25 : vector<1x20x20xbf16> to vector<20x20xbf16>
    %cst_27 = arith.constant dense<0.000000e+00> : vector<128x20xf32>
    %27 = tpu.matmul %24, %26, %cst_27 {dimension_numbers = #tpu.dot_dimension_numbers<[1], [0], [0], [1], [0, 0, 1, 1], [], []>} : vector<128x20xbf16>, vector<20x20xbf16>, vector<128x20xf32> -> vector<128x20xf32>
    %28 = arith.addf %21, %27 : vector<128x20xf32>
    %c0_28 = arith.constant 0 : index
    %c1_29 = arith.constant 1 : index
    %c1_30 = arith.constant 1 : index
    %c0_31 = arith.constant 0 : index
    %29 = vector.load %arg1[%c0_28, %c1_29, %c1_30, %c0_31] : memref<2x10x10x20xf32, #tpu.memory_space<vmem>>, vector<2x8x8x20xf32>
    %30 = vector.shape_cast %29 : vector<2x8x8x20xf32> to vector<128x20xf32>
    %31 = arith.truncf %30 : vector<128x20xf32> to vector<128x20xbf16>
    %c4 = arith.constant 4 : index
    %c0_32 = arith.constant 0 : index
    %c0_33 = arith.constant 0 : index
    %32 = vector.load %arg2[%c4, %c0_32, %c0_33] : memref<9x20x20xbf16, #tpu.memory_space<vmem>>, vector<1x20x20xbf16>
    %33 = vector.shape_cast %32 : vector<1x20x20xbf16> to vector<20x20xbf16>
    %cst_34 = arith.constant dense<0.000000e+00> : vector<128x20xf32>
    %34 = tpu.matmul %31, %33, %cst_34 {dimension_numbers = #tpu.dot_dimension_numbers<[1], [0], [0], [1], [0, 0, 1, 1], [], []>} : vector<128x20xbf16>, vector<20x20xbf16>, vector<128x20xf32> -> vector<128x20xf32>
    %35 = arith.addf %28, %34 : vector<128x20xf32>
    %c0_35 = arith.constant 0 : index
    %c1_36 = arith.constant 1 : index
    %c2_37 = arith.constant 2 : index
    %c0_38 = arith.constant 0 : index
    %36 = vector.load %arg1[%c0_35, %c1_36, %c2_37, %c0_38] : memref<2x10x10x20xf32, #tpu.memory_space<vmem>>, vector<2x8x8x20xf32>
    %37 = vector.shape_cast %36 : vector<2x8x8x20xf32> to vector<128x20xf32>
    %38 = arith.truncf %37 : vector<128x20xf32> to vector<128x20xbf16>
    %c5 = arith.constant 5 : index
    %c0_39 = arith.constant 0 : index
    %c0_40 = arith.constant 0 : index
    %39 = vector.load %arg2[%c5, %c0_39, %c0_40] : memref<9x20x20xbf16, #tpu.memory_space<vmem>>, vector<1x20x20xbf16>
    %40 = vector.shape_cast %39 : vector<1x20x20xbf16> to vector<20x20xbf16>
    %cst_41 = arith.constant dense<0.000000e+00> : vector<128x20xf32>
    %41 = tpu.matmul %38, %40, %cst_41 {dimension_numbers = #tpu.dot_dimension_numbers<[1], [0], [0], [1], [0, 0, 1, 1], [], []>} : vector<128x20xbf16>, vector<20x20xbf16>, vector<128x20xf32> -> vector<128x20xf32>
    %42 = arith.addf %35, %41 : vector<128x20xf32>
    %c0_42 = arith.constant 0 : index
    %c2_43 = arith.constant 2 : index
    %c0_44 = arith.constant 0 : index
    %c0_45 = arith.constant 0 : index
    %43 = vector.load %arg1[%c0_42, %c2_43, %c0_44, %c0_45] : memref<2x10x10x20xf32, #tpu.memory_space<vmem>>, vector<2x8x8x20xf32>
    %44 = vector.shape_cast %43 : vector<2x8x8x20xf32> to vector<128x20xf32>
    %45 = arith.truncf %44 : vector<128x20xf32> to vector<128x20xbf16>
    %c6 = arith.constant 6 : index
    %c0_46 = arith.constant 0 : index
    %c0_47 = arith.constant 0 : index
    %46 = vector.load %arg2[%c6, %c0_46, %c0_47] : memref<9x20x20xbf16, #tpu.memory_space<vmem>>, vector<1x20x20xbf16>
    %47 = vector.shape_cast %46 : vector<1x20x20xbf16> to vector<20x20xbf16>
    %cst_48 = arith.constant dense<0.000000e+00> : vector<128x20xf32>
    %48 = tpu.matmul %45, %47, %cst_48 {dimension_numbers = #tpu.dot_dimension_numbers<[1], [0], [0], [1], [0, 0, 1, 1], [], []>} : vector<128x20xbf16>, vector<20x20xbf16>, vector<128x20xf32> -> vector<128x20xf32>
    %49 = arith.addf %42, %48 : vector<128x20xf32>
    %c0_49 = arith.constant 0 : index
    %c2_50 = arith.constant 2 : index
    %c1_51 = arith.constant 1 : index
    %c0_52 = arith.constant 0 : index
    %50 = vector.load %arg1[%c0_49, %c2_50, %c1_51, %c0_52] : memref<2x10x10x20xf32, #tpu.memory_space<vmem>>, vector<2x8x8x20xf32>
    %51 = vector.shape_cast %50 : vector<2x8x8x20xf32> to vector<128x20xf32>
    %52 = arith.truncf %51 : vector<128x20xf32> to vector<128x20xbf16>
    %c7 = arith.constant 7 : index
    %c0_53 = arith.constant 0 : index
    %c0_54 = arith.constant 0 : index
    %53 = vector.load %arg2[%c7, %c0_53, %c0_54] : memref<9x20x20xbf16, #tpu.memory_space<vmem>>, vector<1x20x20xbf16>
    %54 = vector.shape_cast %53 : vector<1x20x20xbf16> to vector<20x20xbf16>
    %cst_55 = arith.constant dense<0.000000e+00> : vector<128x20xf32>
    %55 = tpu.matmul %52, %54, %cst_55 {dimension_numbers = #tpu.dot_dimension_numbers<[1], [0], [0], [1], [0, 0, 1, 1], [], []>} : vector<128x20xbf16>, vector<20x20xbf16>, vector<128x20xf32> -> vector<128x20xf32>
    %56 = arith.addf %49, %55 : vector<128x20xf32>
    %c0_56 = arith.constant 0 : index
    %c2_57 = arith.constant 2 : index
    %c2_58 = arith.constant 2 : index
    %c0_59 = arith.constant 0 : index
    %57 = vector.load %arg1[%c0_56, %c2_57, %c2_58, %c0_59] : memref<2x10x10x20xf32, #tpu.memory_space<vmem>>, vector<2x8x8x20xf32>
    %58 = vector.shape_cast %57 : vector<2x8x8x20xf32> to vector<128x20xf32>
    %59 = arith.truncf %58 : vector<128x20xf32> to vector<128x20xbf16>
    %c8 = arith.constant 8 : index
    %c0_60 = arith.constant 0 : index
    %c0_61 = arith.constant 0 : index
    %60 = vector.load %arg2[%c8, %c0_60, %c0_61] : memref<9x20x20xbf16, #tpu.memory_space<vmem>>, vector<1x20x20xbf16>
    %61 = vector.shape_cast %60 : vector<1x20x20xbf16> to vector<20x20xbf16>
    %cst_62 = arith.constant dense<0.000000e+00> : vector<128x20xf32>
    %62 = tpu.matmul %59, %61, %cst_62 {dimension_numbers = #tpu.dot_dimension_numbers<[1], [0], [0], [1], [0, 0, 1, 1], [], []>} : vector<128x20xbf16>, vector<20x20xbf16>, vector<128x20xf32> -> vector<128x20xf32>
    %63 = arith.addf %56, %62 : vector<128x20xf32>
    %c0_63 = arith.constant 0 : index
    %c0_64 = arith.constant 0 : index
    %64 = vector.load %arg3[%c0_63, %c0_64] : memref<1x20xf32, #tpu.memory_space<vmem>>, vector<1x20xf32>
    %65 = vector.broadcast %64 : vector<1x20xf32> to vector<128x20xf32>
    %66 = arith.addf %63, %65 : vector<128x20xf32>
    %cst_65 = arith.constant 0.000000e+00 : f32
    %67 = vector.broadcast %cst_65 : f32 to vector<128x20xf32>
    %68 = arith.maximumf %66, %67 : vector<128x20xf32>
    %69 = arith.truncf %68 : vector<128x20xf32> to vector<128x20xbf16>
    %c0_66 = arith.constant 0 : index
    %c0_67 = arith.constant 0 : index
    %70 = vector.load %arg4[%c0_66, %c0_67] : memref<20x80xbf16, #tpu.memory_space<vmem>>, vector<20x80xbf16>
    %cst_68 = arith.constant dense<0.000000e+00> : vector<128x80xf32>
    %71 = tpu.matmul %69, %70, %cst_68 {dimension_numbers = #tpu.dot_dimension_numbers<[1], [0], [0], [1], [0, 0, 1, 1], [], []>} : vector<128x20xbf16>, vector<20x80xbf16>, vector<128x80xf32> -> vector<128x80xf32>
    %c0_69 = arith.constant 0 : index
    %c0_70 = arith.constant 0 : index
    %72 = vector.load %arg5[%c0_69, %c0_70] : memref<1x80xf32, #tpu.memory_space<vmem>>, vector<1x80xf32>
    %73 = vector.broadcast %72 : vector<1x80xf32> to vector<128x80xf32>
    %74 = arith.addf %71, %73 : vector<128x80xf32>
    %75 = vector.shape_cast %74 : vector<128x80xf32> to vector<2x64x80xf32>
    %cst_71 = arith.constant dense<0.000000e+00> : vector<2x80xf32>
    %76 = vector.multi_reduction <add>, %75, %cst_71 [1] : vector<2x64x80xf32> to vector<2x80xf32>
    %cst_72 = arith.constant 6.400000e+01 : f32
    %77 = vector.broadcast %cst_72 : f32 to vector<2x80xf32>
    %78 = arith.divf %76, %77 : vector<2x80xf32>
    %cst_73 = arith.constant dense<0xFF800000> : vector<2x80xf32>
    %79 = vector.multi_reduction <maximumf>, %75, %cst_73 [1] : vector<2x64x80xf32> to vector<2x80xf32>
    %c0_74 = arith.constant 0 : index
    %c0_75 = arith.constant 0 : index
    %80 = vector.load %arg6[%c0_74, %c0_75] : memref<80x5xf32, #tpu.memory_space<vmem>>, vector<80x5xf32>
    %cst_76 = arith.constant dense<0.000000e+00> : vector<2x5xf32>
    %81 = tpu.matmul %78, %80, %cst_76 {dimension_numbers = #tpu.dot_dimension_numbers<[1], [0], [0], [1], [0, 0, 1, 1], [], []>} : vector<2x80xf32>, vector<80x5xf32>, vector<2x5xf32> -> vector<2x5xf32>
    %c0_77 = arith.constant 0 : index
    %c0_78 = arith.constant 0 : index
    %82 = vector.load %arg7[%c0_77, %c0_78] : memref<1x5xf32, #tpu.memory_space<vmem>>, vector<1x5xf32>
    %83 = vector.broadcast %82 : vector<1x5xf32> to vector<2x5xf32>
    %84 = arith.addf %81, %83 : vector<2x5xf32>
    %cst_79 = arith.constant 0.000000e+00 : f32
    %85 = vector.broadcast %cst_79 : f32 to vector<2x5xf32>
    %86 = arith.maximumf %84, %85 : vector<2x5xf32>
    %c0_80 = arith.constant 0 : index
    %c0_81 = arith.constant 0 : index
    %87 = vector.load %arg8[%c0_80, %c0_81] : memref<5x80xf32, #tpu.memory_space<vmem>>, vector<5x80xf32>
    %cst_82 = arith.constant dense<0.000000e+00> : vector<2x80xf32>
    %88 = tpu.matmul %86, %87, %cst_82 {dimension_numbers = #tpu.dot_dimension_numbers<[1], [0], [0], [1], [0, 0, 1, 1], [], []>} : vector<2x5xf32>, vector<5x80xf32>, vector<2x80xf32> -> vector<2x80xf32>
    %c0_83 = arith.constant 0 : index
    %c0_84 = arith.constant 0 : index
    %89 = vector.load %arg9[%c0_83, %c0_84] : memref<1x80xf32, #tpu.memory_space<vmem>>, vector<1x80xf32>
    %90 = vector.broadcast %89 : vector<1x80xf32> to vector<2x80xf32>
    %91 = arith.addf %88, %90 : vector<2x80xf32>
    %c0_85 = arith.constant 0 : index
    %c0_86 = arith.constant 0 : index
    %92 = vector.load %arg6[%c0_85, %c0_86] : memref<80x5xf32, #tpu.memory_space<vmem>>, vector<80x5xf32>
    %cst_87 = arith.constant dense<0.000000e+00> : vector<2x5xf32>
    %93 = tpu.matmul %79, %92, %cst_87 {dimension_numbers = #tpu.dot_dimension_numbers<[1], [0], [0], [1], [0, 0, 1, 1], [], []>} : vector<2x80xf32>, vector<80x5xf32>, vector<2x5xf32> -> vector<2x5xf32>
    %c0_88 = arith.constant 0 : index
    %c0_89 = arith.constant 0 : index
    %94 = vector.load %arg7[%c0_88, %c0_89] : memref<1x5xf32, #tpu.memory_space<vmem>>, vector<1x5xf32>
    %95 = vector.broadcast %94 : vector<1x5xf32> to vector<2x5xf32>
    %96 = arith.addf %93, %95 : vector<2x5xf32>
    %cst_90 = arith.constant 0.000000e+00 : f32
    %97 = vector.broadcast %cst_90 : f32 to vector<2x5xf32>
    %98 = arith.maximumf %96, %97 : vector<2x5xf32>
    %c0_91 = arith.constant 0 : index
    %c0_92 = arith.constant 0 : index
    %99 = vector.load %arg8[%c0_91, %c0_92] : memref<5x80xf32, #tpu.memory_space<vmem>>, vector<5x80xf32>
    %cst_93 = arith.constant dense<0.000000e+00> : vector<2x80xf32>
    %100 = tpu.matmul %98, %99, %cst_93 {dimension_numbers = #tpu.dot_dimension_numbers<[1], [0], [0], [1], [0, 0, 1, 1], [], []>} : vector<2x5xf32>, vector<5x80xf32>, vector<2x80xf32> -> vector<2x80xf32>
    %c0_94 = arith.constant 0 : index
    %c0_95 = arith.constant 0 : index
    %101 = vector.load %arg9[%c0_94, %c0_95] : memref<1x80xf32, #tpu.memory_space<vmem>>, vector<1x80xf32>
    %102 = vector.broadcast %101 : vector<1x80xf32> to vector<2x80xf32>
    %103 = arith.addf %100, %102 : vector<2x80xf32>
    %104 = arith.addf %91, %103 : vector<2x80xf32>
    %105 = arith.negf %104 : vector<2x80xf32>
    %106 = math.exp %105 : vector<2x80xf32>
    %cst_96 = arith.constant 1.000000e+00 : f32
    %107 = vector.broadcast %cst_96 : f32 to vector<2x80xf32>
    %108 = arith.addf %107, %106 : vector<2x80xf32>
    %109 = arith.divf %107, %108 : vector<2x80xf32>
    %110 = vector.shape_cast %109 : vector<2x80xf32> to vector<2x1x80xf32>
    %111 = vector.broadcast %110 : vector<2x1x80xf32> to vector<2x64x80xf32>
    %112 = arith.mulf %75, %111 : vector<2x64x80xf32>
    %113 = vector.shape_cast %112 : vector<2x64x80xf32> to vector<128x80xf32>
    %c0_97 = arith.constant 0 : index
    %c0_98 = arith.constant 0 : index
    %114 = vector.load %arg10[%c0_97, %c0_98] : memref<128x80xf32, #tpu.memory_space<vmem>>, vector<128x80xf32>
    tpu.vector_store %arg10[%c0_97, %c0_98], %113 {strides = array<i32>} : memref<128x80xf32, #tpu.memory_space<vmem>>, vector<128x80xf32>,
    return
  }
  func.func @transform_0(%arg0: i32) -> (i32, i32, i32, i32) {
    %c0_i32 = arith.constant 0 : i32
    %c0_i32_0 = arith.constant 0 : i32
    %c0_i32_1 = arith.constant 0 : i32
    %c0_i32_2 = arith.constant 0 : i32
    %c0_i32_3 = arith.constant 0 : i32
    return %c0_i32, %c0_i32_0, %c0_i32_1, %c0_i32_2 : i32, i32, i32, i32
  }
  func.func @transform_1(%arg0: i32) -> (i32, i32, i32) {
    %c0_i32 = arith.constant 0 : i32
    %c0_i32_0 = arith.constant 0 : i32
    %c0_i32_1 = arith.constant 0 : i32
    %c0_i32_2 = arith.constant 0 : i32
    return %c0_i32, %c0_i32_0, %c0_i32_1 : i32, i32, i32
  }
  func.func @transform_2(%arg0: i32) -> (i32, i32) {
    %c0_i32 = arith.constant 0 : i32
    %c0_i32_0 = arith.constant 0 : i32
    %c0_i32_1 = arith.constant 0 : i32
    return %c0_i32, %c0_i32_0 : i32, i32
  }
  func.func @transform_3(%arg0: i32) -> (i32, i32) {
    %c0_i32 = arith.constant 0 : i32
    %c0_i32_0 = arith.constant 0 : i32
    %c0_i32_1 = arith.constant 0 : i32
    return %c0_i32, %c0_i32_0 : i32, i32
  }
  func.func @transform_4(%arg0: i32) -> (i32, i32) {
    %c0_i32 = arith.constant 0 : i32
    %c0_i32_0 = arith.constant 0 : i32
    %c0_i32_1 = arith.constant 0 : i32
    return %c0_i32, %c0_i32_0 : i32, i32
  }
  func.func @transform_5(%arg0: i32) -> (i32, i32) {
    %c0_i32 = arith.constant 0 : i32
    %c0_i32_0 = arith.constant 0 : i32
    %c0_i32_1 = arith.constant 0 : i32
    return %c0_i32, %c0_i32_0 : i32, i32
  }
  func.func @transform_6(%arg0: i32) -> (i32, i32) {
    %c0_i32 = arith.constant 0 : i32
    %c0_i32_0 = arith.constant 0 : i32
    %c0_i32_1 = arith.constant 0 : i32
    return %c0_i32, %c0_i32_0 : i32, i32
  }
  func.func @transform_7(%arg0: i32) -> (i32, i32) {
    %c0_i32 = arith.constant 0 : i32
    %c0_i32_0 = arith.constant 0 : i32
    %c0_i32_1 = arith.constant 0 : i32
    return %c0_i32, %c0_i32_0 : i32, i32
  }
  func.func @transform_8(%arg0: i32) -> (i32, i32) {
    %c0_i32 = arith.constant 0 : i32
    %c0_i32_0 = arith.constant 0 : i32
    %c0_i32_1 = arith.constant 0 : i32
    return %c0_i32, %c0_i32_0 : i32, i32
  }
  func.func @transform_9(%arg0: i32) -> (i32, i32) {
    %c0_i32 = arith.constant 0 : i32
    %c0_i32_0 = arith.constant 0 : i32
    %c0_i32_1 = arith.constant 0 : i32
    return %c0_i32, %c0_i32_0 : i32, i32
  }
}

module attributes {stable_mosaic.version = 11 : i64} {
  func.func @_mhsa_kernel(%arg0: i32, %arg1: memref<8x64x40xf32, #tpu.memory_space<vmem>>, %arg2: memref<8x64x40xf32, #tpu.memory_space<vmem>>, %arg3: memref<8x64x4xf32, #tpu.memory_space<vmem>>, %arg4: memref<8x64x4xf32, #tpu.memory_space<vmem>>) attributes {dimension_semantics = [#tpu.dimension_semantics<arbitrary>], iteration_bounds = array<i64: 1>, scalar_prefetch = 0 : i64, scratch_operands = 0 : i64, tpu.core_type = #tpu.core_type<tc>, window_params = [{pipeline_mode = #tpu.pipeline_mode<synchronous>, transform_indices = @transform_0, window_bounds = array<i64: 8, 64, 40>}, {pipeline_mode = #tpu.pipeline_mode<synchronous>, transform_indices = @transform_1, window_bounds = array<i64: 8, 64, 40>}, {pipeline_mode = #tpu.pipeline_mode<synchronous>, transform_indices = @transform_2, window_bounds = array<i64: 8, 64, 4>}, {pipeline_mode = #tpu.pipeline_mode<synchronous>, transform_indices = @transform_3, window_bounds = array<i64: 8, 64, 4>}]} {
    %c0 = arith.constant 0 : index
    %c0_0 = arith.constant 0 : index
    %c0_1 = arith.constant 0 : index
    %0 = vector.load %arg1[%c0, %c0_0, %c0_1] : memref<8x64x40xf32, #tpu.memory_space<vmem>>, vector<8x64x40xf32>
    %cst = arith.constant 0.158113882 : f32
    %1 = vector.broadcast %cst : f32 to vector<8x64x40xf32>
    %2 = arith.mulf %0, %1 : vector<8x64x40xf32>
    %3 = arith.truncf %2 : vector<8x64x40xf32> to vector<8x64x40xbf16>
    %c0_2 = arith.constant 0 : index
    %c0_3 = arith.constant 0 : index
    %c0_4 = arith.constant 0 : index
    %4 = vector.load %arg2[%c0_2, %c0_3, %c0_4] : memref<8x64x40xf32, #tpu.memory_space<vmem>>, vector<8x64x40xf32>
    %5 = arith.truncf %4 : vector<8x64x40xf32> to vector<8x64x40xbf16>
    %c0_5 = arith.constant 0 : index
    %c0_6 = arith.constant 0 : index
    %c0_7 = arith.constant 0 : index
    %6 = vector.load %arg3[%c0_5, %c0_6, %c0_7] : memref<8x64x4xf32, #tpu.memory_space<vmem>>, vector<8x64x4xf32>
    %7 = arith.truncf %6 : vector<8x64x4xf32> to vector<8x64x4xbf16>
    "tpu.trace_start"() <{level = 10 : i32, message = "bqd,bkd->bqk"}> : () -> ()
    %cst_8 = arith.constant dense<0.000000e+00> : vector<8x64x64xf32>
    %8 = tpu.matmul %3, %5, %cst_8 {dimension_numbers = #tpu.dot_dimension_numbers<[2], [2], [1], [1], [0, 0, 0, 1, 1, 1], [0], [0]>} : vector<8x64x40xbf16>, vector<8x64x40xbf16>, vector<8x64x64xf32> -> vector<8x64x64xf32>
    "tpu.trace_stop"() : () -> ()
    %cst_9 = arith.constant dense<0xFF800000> : vector<8x64xf32>
    %9 = vector.multi_reduction <maximumf>, %8, %cst_9 [2] : vector<8x64x64xf32> to vector<8x64xf32>
    %10 = vector.shape_cast %9 : vector<8x64xf32> to vector<8x64x1xf32>
    %11 = vector.broadcast %10 : vector<8x64x1xf32> to vector<8x64x64xf32>
    %12 = arith.subf %8, %11 : vector<8x64x64xf32>
    %13 = math.exp %12 : vector<8x64x64xf32>
    %cst_10 = arith.constant dense<0.000000e+00> : vector<8x64xf32>
    %14 = vector.multi_reduction <add>, %13, %cst_10 [2] : vector<8x64x64xf32> to vector<8x64xf32>
    %15 = vector.shape_cast %14 : vector<8x64xf32> to vector<8x64x1xf32>
    %16 = tpu.reciprocal %15 {approx = true} : vector<8x64x1xf32> -> vector<8x64x1xf32>
    %17 = vector.broadcast %16 : vector<8x64x1xf32> to vector<8x64x64xf32>
    %18 = arith.mulf %13, %17 : vector<8x64x64xf32>
    %19 = arith.truncf %18 : vector<8x64x64xf32> to vector<8x64x64xbf16>
    "tpu.trace_start"() <{level = 10 : i32, message = "bqk,bkd->bqd"}> : () -> ()
    %cst_11 = arith.constant dense<0.000000e+00> : vector<8x64x4xf32>
    %20 = tpu.matmul %19, %7, %cst_11 {dimension_numbers = #tpu.dot_dimension_numbers<[2], [1], [1], [2], [0, 0, 0, 1, 1, 2], [0], [0]>} : vector<8x64x64xbf16>, vector<8x64x4xbf16>, vector<8x64x4xf32> -> vector<8x64x4xf32>
    "tpu.trace_stop"() : () -> ()
    %c0_12 = arith.constant 0 : index
    %c0_13 = arith.constant 0 : index
    %c0_14 = arith.constant 0 : index
    %21 = vector.load %arg4[%c0_12, %c0_13, %c0_14] : memref<8x64x4xf32, #tpu.memory_space<vmem>>, vector<8x64x4xf32>
    tpu.vector_store %arg4[%c0_12, %c0_13, %c0_14], %20 {strides = array<i32>} : memref<8x64x4xf32, #tpu.memory_space<vmem>>, vector<8x64x4xf32>,
    return
  }
  func.func @transform_0(%arg0: i32) -> (i32, i32, i32) {
    %c0_i32 = arith.constant 0 : i32
    %c0_i32_0 = arith.constant 0 : i32
    %c0_i32_1 = arith.constant 0 : i32
    %c0_i32_2 = arith.constant 0 : i32
    return %c0_i32, %c0_i32_0, %c0_i32_1 : i32, i32, i32
  }
  func.func @transform_1(%arg0: i32) -> (i32, i32, i32) {
    %c0_i32 = arith.constant 0 : i32
    %c0_i32_0 = arith.constant 0 : i32
    %c0_i32_1 = arith.constant 0 : i32
    %c0_i32_2 = arith.constant 0 : i32
    return %c0_i32, %c0_i32_0, %c0_i32_1 : i32, i32, i32
  }
  func.func @transform_2(%arg0: i32) -> (i32, i32, i32) {
    %c0_i32 = arith.constant 0 : i32
    %c0_i32_0 = arith.constant 0 : i32
    %c0_i32_1 = arith.constant 0 : i32
    %c0_i32_2 = arith.constant 0 : i32
    return %c0_i32, %c0_i32_0, %c0_i32_1 : i32, i32, i32
  }
  func.func @transform_3(%arg0: i32) -> (i32, i32, i32) {
    %c0_i32 = arith.constant 0 : i32
    %c0_i32_0 = arith.constant 0 : i32
    %c0_i32_1 = arith.constant 0 : i32
    %c0_i32_2 = arith.constant 0 : i32
    return %c0_i32, %c0_i32_0, %c0_i32_1 : i32, i32, i32
  }
}

module attributes {stable_mosaic.version = 11 : i64} {
  func.func @_merge_kernel(%arg0: i32, %arg1: memref<128x64xf32, #tpu.memory_space<vmem>>, %arg2: memref<128x16xf32, #tpu.memory_space<vmem>>, %arg3: memref<16x16xbf16, #tpu.memory_space<vmem>>, %arg4: memref<1x16xf32, #tpu.memory_space<vmem>>, %arg5: memref<128x80xf32, #tpu.memory_space<vmem>>, %arg6: memref<128x80xf32, #tpu.memory_space<vmem>>) attributes {dimension_semantics = [#tpu.dimension_semantics<arbitrary>], iteration_bounds = array<i64: 1>, scalar_prefetch = 0 : i64, scratch_operands = 0 : i64, tpu.core_type = #tpu.core_type<tc>, window_params = [{pipeline_mode = #tpu.pipeline_mode<synchronous>, transform_indices = @transform_0, window_bounds = array<i64: 128, 64>}, {pipeline_mode = #tpu.pipeline_mode<synchronous>, transform_indices = @transform_1, window_bounds = array<i64: 128, 16>}, {pipeline_mode = #tpu.pipeline_mode<synchronous>, transform_indices = @transform_2, window_bounds = array<i64: 16, 16>}, {pipeline_mode = #tpu.pipeline_mode<synchronous>, transform_indices = @transform_3, window_bounds = array<i64: 1, 16>}, {pipeline_mode = #tpu.pipeline_mode<synchronous>, transform_indices = @transform_4, window_bounds = array<i64: 128, 80>}, {pipeline_mode = #tpu.pipeline_mode<synchronous>, transform_indices = @transform_5, window_bounds = array<i64: 128, 80>}]} {
    %c0 = arith.constant 0 : index
    %c0_0 = arith.constant 0 : index
    %0 = vector.load %arg2[%c0, %c0_0] : memref<128x16xf32, #tpu.memory_space<vmem>>, vector<128x16xf32>
    %1 = arith.truncf %0 : vector<128x16xf32> to vector<128x16xbf16>
    %c0_1 = arith.constant 0 : index
    %c0_2 = arith.constant 0 : index
    %2 = vector.load %arg3[%c0_1, %c0_2] : memref<16x16xbf16, #tpu.memory_space<vmem>>, vector<16x16xbf16>
    %cst = arith.constant dense<0.000000e+00> : vector<128x16xf32>
    %3 = tpu.matmul %1, %2, %cst {dimension_numbers = #tpu.dot_dimension_numbers<[1], [0], [0], [1], [0, 0, 1, 1], [], []>} : vector<128x16xbf16>, vector<16x16xbf16>, vector<128x16xf32> -> vector<128x16xf32>
    %c0_3 = arith.constant 0 : index
    %c0_4 = arith.constant 0 : index
    %4 = vector.load %arg4[%c0_3, %c0_4] : memref<1x16xf32, #tpu.memory_space<vmem>>, vector<1x16xf32>
    %5 = vector.broadcast %4 : vector<1x16xf32> to vector<128x16xf32>
    %6 = arith.addf %3, %5 : vector<128x16xf32>
    %c0_5 = arith.constant 0 : index
    %c0_6 = arith.constant 0 : index
    %7 = vector.load %arg1[%c0_5, %c0_6] : memref<128x64xf32, #tpu.memory_space<vmem>>, vector<128x64xf32>
    %8 = tpu.concatenate %7, %6 in 1 : vector<128x64xf32>, vector<128x16xf32> -> vector<128x80xf32>
    %c0_7 = arith.constant 0 : index
    %c0_8 = arith.constant 0 : index
    %9 = vector.load %arg5[%c0_7, %c0_8] : memref<128x80xf32, #tpu.memory_space<vmem>>, vector<128x80xf32>
    %10 = arith.addf %8, %9 : vector<128x80xf32>
    %cst_9 = arith.constant 0.000000e+00 : f32
    %11 = vector.broadcast %cst_9 : f32 to vector<128x80xf32>
    %12 = arith.maximumf %10, %11 : vector<128x80xf32>
    %c0_10 = arith.constant 0 : index
    %c0_11 = arith.constant 0 : index
    %13 = vector.load %arg6[%c0_10, %c0_11] : memref<128x80xf32, #tpu.memory_space<vmem>>, vector<128x80xf32>
    tpu.vector_store %arg6[%c0_10, %c0_11], %12 {strides = array<i32>} : memref<128x80xf32, #tpu.memory_space<vmem>>, vector<128x80xf32>,
    return
  }
  func.func @transform_0(%arg0: i32) -> (i32, i32) {
    %c0_i32 = arith.constant 0 : i32
    %c0_i32_0 = arith.constant 0 : i32
    %c0_i32_1 = arith.constant 0 : i32
    return %c0_i32, %c0_i32_0 : i32, i32
  }
  func.func @transform_1(%arg0: i32) -> (i32, i32) {
    %c0_i32 = arith.constant 0 : i32
    %c0_i32_0 = arith.constant 0 : i32
    %c0_i32_1 = arith.constant 0 : i32
    return %c0_i32, %c0_i32_0 : i32, i32
  }
  func.func @transform_2(%arg0: i32) -> (i32, i32) {
    %c0_i32 = arith.constant 0 : i32
    %c0_i32_0 = arith.constant 0 : i32
    %c0_i32_1 = arith.constant 0 : i32
    return %c0_i32, %c0_i32_0 : i32, i32
  }
  func.func @transform_3(%arg0: i32) -> (i32, i32) {
    %c0_i32 = arith.constant 0 : i32
    %c0_i32_0 = arith.constant 0 : i32
    %c0_i32_1 = arith.constant 0 : i32
    return %c0_i32, %c0_i32_0 : i32, i32
  }
  func.func @transform_4(%arg0: i32) -> (i32, i32) {
    %c0_i32 = arith.constant 0 : i32
    %c0_i32_0 = arith.constant 0 : i32
    %c0_i32_1 = arith.constant 0 : i32
    return %c0_i32, %c0_i32_0 : i32, i32
  }
  func.func @transform_5(%arg0: i32) -> (i32, i32) {
    %c0_i32 = arith.constant 0 : i32
    %c0_i32_0 = arith.constant 0 : i32
    %c0_i32_1 = arith.constant 0 : i32
    return %c0_i32, %c0_i32_0 : i32, i32
  }
}

</mosaic_0001>

<bundles_post_ra>
// kernel: bottleneck_forward.5
= control target key start
LH: loop header
LB: loop body
LE: loop exit
PB: predicated region body
PF: predicated region fallthrough
CT: control target
= control target key end

     0   :  { %8 = vsyncpa [#allocation3], 0  ;;  %s528_s0 = inlined_call_operand.hbm [shape: f32[128,80], index: 0, kind: input, shape index: {}]   ;;  %s529_s1 = inlined_call_operand.vmem [shape: bf16[80,20], index: 1, kind: input, shape index: {}]   ;;  %s530_s2 = inlined_call_operand.hbm [shape: f32[1,20], index: 2, kind: input, shape index: {}]   ;;  %s531_s3 = inlined_call_operand.vmem [shape: f32[128,20], index: 3, kind: output, shape index: {}]  }
   0x1   :  { %9 = vsyncpa [#allocation5], 0  ;;  %s393_s12 = smov [#allocation2]   ;;  %s345_s16 = scalar_lea.hbm %s528_s0, 2048 }
   0x2   :  { %s15_s13 = sshll.u32 %s393_s12, 4  ;;  %p346_p0 = scmp.ne.s32.totalorder %s528_s0, %s345_s16  ;;  %s16_s13 = int_to_ptr.vmem [resolvable:$true] %s15_s13 }
   0x3   :  { %p349_p1 = scmp.lt.u32.totalorder %s345_s16, %s528_s0 }
   0x5   :  { %p351_p2 = pnand %p349_p1, %p346_p0 }
   0x7   :  { %354 = shalt.err (!%p351_p2)
}
   0x8   :  { %s355_s21 = scalar_lea.vmem %s16_s13, 2048  ;;  %p360_p4 = scmp.lt.s32.totalorder %s16_s13, %s16_s13 }
   0x9   :  { %p356_p3 = scmp.ne.s32.totalorder %s16_s13, %s355_s21  ;;  %p361_p5 = scmp.lt.s32.totalorder %s355_s21, %s355_s21 }
   0xb   :  { %p362_p6 = por %p361_p5, %p360_p4 }
   0xd   :  { %p363_p7 = pnand %p362_p6, %p356_p3 }
   0xf   :  { %366 = shalt.err (!%p363_p7)
}
  0x10   :  { %s394_s22 = smov 128   ;;  %s395_s23 = smov 8  }
  0x11   :  { %21 = dma.hbm_to_vmem [thread:$0]  %s528_s0, 2048, %s16_s13, [#allocation3], %s394_s22, %s394_s22, %s395_s23  }
  0x12   :  { %s396_s26 = smov [#allocation4]   ;;  %s367_s30 = scalar_lea.hbm %s530_s2, 16 }
  0x13   :  { %s30_s27 = sshll.u32 %s396_s26, 4  ;;  %p368_p8 = scmp.ne.s32.totalorder %s530_s2, %s367_s30  ;;  %s31_s27 = int_to_ptr.vmem [resolvable:$true] %s30_s27 }
  0x14   :  { %p371_p9 = scmp.lt.u32.totalorder %s367_s30, %s530_s2 }
  0x16   :  { %p373_p10 = pnand %p371_p9, %p368_p8 }
  0x18   :  { %376 = shalt.err (!%p373_p10)
}
  0x19   :  { %s377_s8 = scalar_lea.vmem %s31_s27, 16  ;;  %s381_s0 = scalar_lea.vmem %s31_s27, 32 }
  0x1a   :  { %p378_p11 = scmp.ne.s32.totalorder %s31_s27, %s377_s8  ;;  %p382_p12 = scmp.lt.s32.totalorder %s31_s27, %s31_s27 }
  0x1b   :  { %p383_p13 = scmp.lt.s32.totalorder %s381_s0, %s377_s8 }
  0x1d   :  { %p384_p0 = por %p383_p13, %p382_p12 }
  0x1f   :  { %p385_p1 = pnand %p384_p0, %p378_p11 }
  0x21   :  { %388 = shalt.err (!%p385_p1)
}
  0x22   :  { %33 = dma.hbm_to_vmem [thread:$0]  %s530_s2, 16, %s31_s27, [#allocation5]  }
  0x23   :  { %389 = dma.done.wait [#allocation3], 2048  }
  0x24   :  { %390 = vsyncadd [#allocation3], 4294965248 }
  0x25   :  { %391 = dma.done.wait [#allocation5], 16  }
  0x26   :  { %392 = vsyncadd [#allocation5], 4294967280  ;;  %v340_v0 = vld [vmem:[%s529_s1] sm:$0xff]   ;;  %v341_v1 = vld [vmem:[%s529_s1 + $0x8] sm:$0xff]   ;;  %vm112_vm0 = vcmask 654336   ;;  %vm250_vm1 = vcmask 162816  }
  0x27   :  { %300 = vmatprep.subr.bf16.mxu0 %v340_v0  ;;  %326 = vmatprep.subr.bf16.mxu1 %v340_v0  ;;  %v342_v2 = vld [vmem:[%s529_s1 + $0x10] sm:$0xff]   ;;  %v41_v3 = vld [vmem:[#allocation2] sm:$0xff]  ;;  %v42_v4 = vld [vmem:[#allocation2 + $0x8] sm:$0xff] }
  0x28   :  { %301 = vmatpush3.bf16.msra.mxu0 %v340_v0  ;;  %331 = vmatpush3.bf16.msra.mxu1 %v340_v0  ;;  %v49_v5 = vld [vmem:[#allocation2 + $0x40] sm:$0xff]  ;;  %v57_v6 = vpack.c.bf16 %v42_v4, %v41_v3  ;;  %v50_v7 = vld [vmem:[#allocation2 + $0x48] sm:$0xff]  ;;  %v343_v9 = vld [vmem:[%s529_s1 + $0x18] sm:$0xff]  }
  0x29   :  { %302 = vmatprep.subr.bf16.mxu0 %v341_v1  ;;  %327 = vmatprep.subr.bf16.mxu1 %v341_v1  ;;  %v61_v8 = vpack.c.bf16 %v50_v7, %v49_v5  ;;  %v344_v10 = vld [vmem:[%s529_s1 + $0x20] sm:$0xff]   ;;  %v43_v11 = vld [vmem:[#allocation2 + $0x10] sm:$0xff]  ;;  %v44_v12 = vld [vmem:[#allocation2 + $0x18] sm:$0xff] }
  0x2a   :  { %310 = vmatprep.mubr.msk.bf16.mxu0 %vm112_vm0, %v57_v6  ;;  %v51_v13 = vld [vmem:[#allocation2 + $0x50] sm:$0xff]  ;;  %v52_v14 = vld [vmem:[#allocation2 + $0x58] sm:$0xff]  ;;  %v45_v15 = vld [vmem:[#allocation2 + $0x20] sm:$0xff]  ;;  %v58_v19 = vpack.c.bf16 %v44_v12, %v43_v11 }
  0x2b   :  { %318 = vmatprep.mubr.msk.bf16.mxu1 %vm112_vm0, %v61_v8  ;;  %v46_v16 = vld [vmem:[#allocation2 + $0x28] sm:$0xff]  ;;  %v53_v17 = vld [vmem:[#allocation2 + $0x60] sm:$0xff]  ;;  %v62_v20 = vpack.c.bf16 %v52_v14, %v51_v13  ;;  %v47_v23 = vld [vmem:[#allocation2 + $0x30] sm:$0xff] }
  0x2c   :  { %303 = vmatpush3.bf16.msra.mxu0 %v341_v1  ;;  %332 = vmatpush3.bf16.msra.mxu1 %v341_v1  ;;  %v54_v18 = vld [vmem:[#allocation2 + $0x68] sm:$0xff]  ;;  %v59_v21 = vpack.c.bf16 %v46_v16, %v45_v15  ;;  %v48_v24 = vld [vmem:[#allocation2 + $0x38] sm:$0xff]  ;;  %v55_v25 = vld [vmem:[#allocation2 + $0x70] sm:$0xff] }
  0x2d   :  { %304 = vmatprep.subr.bf16.mxu0 %v342_v2  ;;  %328 = vmatprep.subr.bf16.mxu1 %v342_v2  ;;  %v63_v22 = vpack.c.bf16 %v54_v18, %v53_v17  ;;  %v56_v26 = vld [vmem:[#allocation2 + $0x78] sm:$0xff]  ;;  %v60_v27 = vpack.c.bf16 %v48_v24, %v47_v23  ;;  %v273_v29 = vld [vmem:[#allocation4] ss:$0 sm:$0xff] }
  0x2e   :  { %v64_v28 = vpack.c.bf16 %v56_v26, %v55_v25 }
  0x30   :  { %305 = vmatpush3.bf16.msra.mxu0 %v342_v2  ;;  %333 = vmatpush3.bf16.msra.mxu1 %v342_v2 }
  0x31   :  { %306 = vmatprep.subr.bf16.mxu0 %v343_v9  ;;  %329 = vmatprep.subr.bf16.mxu1 %v343_v9 }
  0x34   :  { %307 = vmatpush3.bf16.msra.mxu0 %v343_v9  ;;  %334 = vmatpush3.bf16.msra.mxu1 %v343_v9 }
  0x35   :  { %308 = vmatprep.subr.bf16.mxu0 %v344_v10  ;;  %330 = vmatprep.subr.bf16.mxu1 %v344_v10 }
  0x38   :  { %309 = vmatpush3.bf16.msra.mxu0 %v344_v10  ;;  %335 = vmatpush3.bf16.msra.mxu1 %v344_v10 }
  0x3b   :  { %311 = vmatmul.mubr.msk.bf16.vlgmr.msra.gmra.mrb[0].mxu0 %vm112_vm0, %v58_v19  ;;  %319 = vmatmul.mubr.msk.bf16.vlgmr.msra.gmra.mrb[0].mxu1 %vm112_vm0, %v62_v20 }
  0x3c   :  { %314 = vmatprep.mubr.msk.bf16.mxu0 %vm112_vm0, %v59_v21  ;;  %322 = vmatprep.mubr.msk.bf16.mxu1 %vm112_vm0, %v63_v22 }
  0x43   :  { %315 = vmatmul.mubr.msk.bf16.gmra.mrb[4].mxu0 %vm112_vm0, %v60_v27  ;;  %323 = vmatmul.mubr.msk.bf16.gmra.mrb[4].mxu1 %vm112_vm0, %v64_v28 }
 0x10e   :  { %v312_v30 = vpop.f32.mrb[0].mxu0  ;;  %v320_v31 = vpop.f32.mrb[0].mxu1 }
 0x10f   :  { %v180_v32 = vadd.f32 %v312_v30, %v273_v29  ;;  %v212_v33 = vadd.f32 %v320_v31, %v273_v29  ;;  %v171_v34 = vpop.f32.mrb[1].mxu0  ;;  %v203_v35 = vpop.f32.mrb[1].mxu1 }
 0x110   :  { %v172_v36 = vadd.f32 %v273_v29, %v171_v34  ;;  %v204_v37 = vadd.f32 %v273_v29, %v203_v35  ;;  %v313_v38 = vpop.f32.mrb[2].mxu0  ;;  %v321_v39 = vpop.f32.mrb[2].mxu1 }
 0x111   :  { %v236_v40 = vmax.f32 %v180_v32, 0.0  ;;  %v244_v41 = vmax.f32 %v212_v33, 0.0  ;;  %v183_v42 = vadd.f32 %v313_v38, %v273_v29  ;;  %v215_v43 = vadd.f32 %v321_v39, %v273_v29  ;;  %v174_v44 = vpop.f32.mrb[3].mxu0  ;;  %v206_v45 = vpop.f32.mrb[3].mxu1 }
 0x112   :  { %v234_v46 = vmax.f32 %v172_v36, 0.0  ;;  %v242_v47 = vmax.f32 %v204_v37, 0.0  ;;  %v175_v48 = vadd.f32 %v273_v29, %v174_v44  ;;  %v207_v49 = vadd.f32 %v273_v29, %v206_v45 }
 0x113   :  { %253 = vst.msk [vmem:[%s531_s3 + $0x10] sm:$0xff] %vm250_vm1, %v236_v40  ;;  %261 = vst.msk [vmem:[%s531_s3 + $0x50] sm:$0xff] %vm250_vm1, %v244_v41  ;;  %v237_v50 = vmax.f32 %v183_v42, 0.0  ;;  %v245_v51 = vmax.f32 %v215_v43, 0.0 }
 0x114   :  { %251 = vst.msk [vmem:[%s531_s3] sm:$0xff] %vm250_vm1, %v234_v46  ;;  %259 = vst.msk [vmem:[%s531_s3 + $0x40] sm:$0xff] %vm250_vm1, %v242_v47  ;;  %v235_v52 = vmax.f32 %v175_v48, 0.0  ;;  %v243_v53 = vmax.f32 %v207_v49, 0.0 }
 0x115   :  { %254 = vst.msk [vmem:[%s531_s3 + $0x18] sm:$0xff] %vm250_vm1, %v237_v50  ;;  %262 = vst.msk [vmem:[%s531_s3 + $0x58] sm:$0xff] %vm250_vm1, %v245_v51 }
 0x116   :  { %252 = vst.msk [vmem:[%s531_s3 + $0x8] sm:$0xff] %vm250_vm1, %v235_v52  ;;  %260 = vst.msk [vmem:[%s531_s3 + $0x48] sm:$0xff] %vm250_vm1, %v243_v53  ;;  %v316_v54 = vpop.f32.mrb[4].mxu0  ;;  %v324_v55 = vpop.f32.mrb[4].mxu1 }
 0x117   :  { %v196_v56 = vadd.f32 %v316_v54, %v273_v29  ;;  %v228_v57 = vadd.f32 %v324_v55, %v273_v29  ;;  %v187_v58 = vpop.f32.mrb[5].mxu0  ;;  %v219_v59 = vpop.f32.mrb[5].mxu1 }
 0x118   :  { %v188_v60 = vadd.f32 %v273_v29, %v187_v58  ;;  %v220_v61 = vadd.f32 %v273_v29, %v219_v59  ;;  %v317_v62 = vpop.f32.mrb[6].mxu0  ;;  %v325_v63 = vpop.f32.mrb[6].mxu1 }
 0x119   :  { %v240_v0 = vmax.f32 %v196_v56, 0.0  ;;  %v248_v1 = vmax.f32 %v228_v57, 0.0  ;;  %v199_v2 = vadd.f32 %v317_v62, %v273_v29  ;;  %v231_v3 = vadd.f32 %v325_v63, %v273_v29  ;;  %v190_v4 = vpop.f32.mrb[7].mxu0  ;;  %v222_v5 = vpop.f32.mrb[7].mxu1 }
 0x11a   :  { %v238_v6 = vmax.f32 %v188_v60, 0.0  ;;  %v246_v7 = vmax.f32 %v220_v61, 0.0  ;;  %v191_v8 = vadd.f32 %v273_v29, %v190_v4  ;;  %v223_v9 = vadd.f32 %v273_v29, %v222_v5 }
 0x11b   :  { %257 = vst.msk [vmem:[%s531_s3 + $0x30] sm:$0xff] %vm250_vm1, %v240_v0  ;;  %265 = vst.msk [vmem:[%s531_s3 + $0x70] sm:$0xff] %vm250_vm1, %v248_v1  ;;  %v241_v10 = vmax.f32 %v199_v2, 0.0  ;;  %v249_v11 = vmax.f32 %v231_v3, 0.0 }
 0x11c   :  { %255 = vst.msk [vmem:[%s531_s3 + $0x20] sm:$0xff] %vm250_vm1, %v238_v6  ;;  %263 = vst.msk [vmem:[%s531_s3 + $0x60] sm:$0xff] %vm250_vm1, %v246_v7  ;;  %v239_v12 = vmax.f32 %v191_v8, 0.0  ;;  %v247_v13 = vmax.f32 %v223_v9, 0.0 }
 0x11d   :  { %258 = vst.msk [vmem:[%s531_s3 + $0x38] sm:$0xff] %vm250_vm1, %v241_v10  ;;  %266 = vst.msk [vmem:[%s531_s3 + $0x78] sm:$0xff] %vm250_vm1, %v249_v11 }
 0x11e   :  { %256 = vst.msk [vmem:[%s531_s3 + $0x28] sm:$0xff] %vm250_vm1, %v239_v12  ;;  %264 = vst.msk [vmem:[%s531_s3 + $0x68] sm:$0xff] %vm250_vm1, %v247_v13 }
 0x11f   :  { %271 = vsyncpa [#allocation3], 1 }
 0x120   :  { %272 = vsyncpa [#allocation5], 1 }

// kernel: bottleneck_forward.7
= control target key start
LH: loop header
LB: loop body
LE: loop exit
PB: predicated region body
PF: predicated region fallthrough
CT: control target
= control target key end

     0   :  { %s3879_s12 = smov 0   ;;  %s3881_s13 = smov 0   ;;  %s4769_s0 = inlined_call_operand.vmem [shape: f32[2,10,10,80], index: 0, kind: input, shape index: {}]   ;;  %s4770_s1 = inlined_call_operand.vmem [shape: bf16[9,80,512], index: 1, kind: input, shape index: {}]   ;;  %s4771_s2 = inlined_call_operand.vmem [shape: f32[1,512], index: 2, kind: input, shape index: {}]   ;;  %s4772_s3 = inlined_call_operand.vmem [shape: f32[128,512], index: 3, kind: output, shape index: {}]  }
   0x1   :  { %s3883_s14 = smov 0  }
   0x2 LB: > { %s3895_s15 = sadd.s32 4294967295, %s3857_s14   ;;  %s3898_s16 = sadd.s32 1, %s3857_s14   ;;  %s3857_s14 = sphi %s3883_s14, %s4776_s14   ;;  %s3853_s13 = sphi %s3881_s13, %s4775_s13   ;;  %s3849_s12 = sphi %s3879_s12, %s4774_s12  }
   0x3   : > { %s38_s17 = ssub.s32 %s3857_s14, %s3898_s16  ;;  %s41_s18 = sadd.s32 1, %s3853_s13 }
   0x4   : > { %p39_p0 = scmp.eq.s32.totalorder %s38_s17, 0  ;;  %p48_p1 = scmp.ne.s32.totalorder %s3853_s13, %s3849_s12 }
   0x5   : > { %p49_p2 = scmp.eq.s32.totalorder %s3857_s14, 0  ;;  %p104_p3 = scmp.eq.s32.totalorder %s3895_s15, 3 }
   0x6   : > { %s3908_s19 = scalar_select %p39_p0, %s3853_s13, %s41_s18  }
   0x7   : > { %p50_p4 = por %p49_p2, %p48_p1  ;;  %p3910_p5 = por %p104_p3, %p48_p1 }
   0x8   : > { %p2877_p6 = scmp.ge.s32.totalorder %s3857_s14, 4 }
   0xa   : > { %129 = sbr.rel (%p2877_p6) target bundleno = 81 (0x51), region = 20 }
  0x11   : > { %132 = sbr.rel (!%p50_p4) target bundleno = 81 (0x51), region = 24  ;;  %s134_s21 = sand.u32 (%p50_p4), 1, %s3853_s13  }
  0x12   : > { %s2878_s22 = sshll.u32 (%p50_p4), %s3857_s14, 2  ;;  %s3764_s23 = smul.u32 (%p50_p4), 360, %s134_s21 }
  0x13   : > { %s3920_s26 = scalar_lea.vmem (%p50_p4), %s4770_s1, %s2878_s22 }
  0x14   : > { %v154_v0 = vld [vmem:[%s3920_s26] sm:$0xf] (%p50_p4)  ;;  %v156_v1 = vld [vmem:[%s3920_s26 + $0x10] sm:$0xf] (%p50_p4)  ;;  %s3927_s27 = scalar_lea.vmem (%p50_p4), [#allocation2], %s3764_s23 }
  0x15   : > { %v158_v2 = vld [vmem:[%s3920_s26 + $0x20] sm:$0xf] (%p50_p4)  ;;  %v160_v3 = vld [vmem:[%s3920_s26 + $0x30] sm:$0xf] (%p50_p4)  ;;  %155 = vst [vmem:[%s3927_s27] sm:$0xf] (%p50_p4), %v154_v0 }
  0x16   : > { %v162_v4 = vld [vmem:[%s3920_s26 + $0x40] sm:$0xf] (%p50_p4)  ;;  %157 = vst [vmem:[%s3927_s27 + $0x4] sm:$0xf] (%p50_p4), %v156_v1  ;;  %159 = vst [vmem:[%s3927_s27 + $0x8] sm:$0xf] (%p50_p4), %v158_v2 }
  0x17   : > { %161 = vst [vmem:[%s3927_s27 + $0xc] sm:$0xf] (%p50_p4), %v160_v3  ;;  %163 = vst [vmem:[%s3927_s27 + $0x10] sm:$0xf] (%p50_p4), %v162_v4  ;;  %v164_v5 = vld [vmem:[%s3920_s26 + $0x50] sm:$0xf] (%p50_p4) }
  0x18   : > { %v166_v6 = vld [vmem:[%s3920_s26 + $0x60] sm:$0xf]  ;;  %v168_v7 = vld [vmem:[%s3920_s26 + $0x70] sm:$0xf]  ;;  %165 = vst [vmem:[%s3927_s27 + $0x14] sm:$0xf] %v164_v5 }
  0x19   : > { %167 = vst [vmem:[%s3927_s27 + $0x18] sm:$0xf] %v166_v6  ;;  %169 = vst [vmem:[%s3927_s27 + $0x1c] sm:$0xf] %v168_v7  ;;  %v170_v8 = vld [vmem:[%s3920_s26 + $0x80] sm:$0xf] }
  0x1a   : > { %v172_v9 = vld [vmem:[%s3920_s26 + $0x90] sm:$0xf]  ;;  %v174_v10 = vld [vmem:[%s3920_s26 + $0xa0] sm:$0xf]  ;;  %171 = vst [vmem:[%s3927_s27 + $0x20] sm:$0xf] %v170_v8 }
  0x1b   : > { %173 = vst [vmem:[%s3927_s27 + $0x24] sm:$0xf] %v172_v9  ;;  %175 = vst [vmem:[%s3927_s27 + $0x28] sm:$0xf] %v174_v10  ;;  %v176_v11 = vld [vmem:[%s3920_s26 + $0xb0] sm:$0xf] }
  0x1c   : > { %v178_v12 = vld [vmem:[%s3920_s26 + $0xc0] sm:$0xf]  ;;  %v180_v13 = vld [vmem:[%s3920_s26 + $0xd0] sm:$0xf]  ;;  %177 = vst [vmem:[%s3927_s27 + $0x2c] sm:$0xf] %v176_v11 }
  0x1d   : > { %179 = vst [vmem:[%s3927_s27 + $0x30] sm:$0xf] %v178_v12  ;;  %181 = vst [vmem:[%s3927_s27 + $0x34] sm:$0xf] %v180_v13  ;;  %v182_v14 = vld [vmem:[%s3920_s26 + $0xe0] sm:$0xf] }
  0x1e   : > { %v184_v15 = vld [vmem:[%s3920_s26 + $0xf0] sm:$0xf]  ;;  %v186_v16 = vld [vmem:[%s3920_s26 + $0x100] sm:$0xf]  ;;  %183 = vst [vmem:[%s3927_s27 + $0x38] sm:$0xf] %v182_v14 }
  0x1f   : > { %185 = vst [vmem:[%s3927_s27 + $0x3c] sm:$0xf] %v184_v15  ;;  %187 = vst [vmem:[%s3927_s27 + $0x40] sm:$0xf] %v186_v16  ;;  %v188_v17 = vld [vmem:[%s3920_s26 + $0x110] sm:$0xf] }
  0x20   : > { %v190_v18 = vld [vmem:[%s3920_s26 + $0x120] sm:$0xf]  ;;  %v192_v19 = vld [vmem:[%s3920_s26 + $0x130] sm:$0xf]  ;;  %189 = vst [vmem:[%s3927_s27 + $0x44] sm:$0xf] %v188_v17 }
  0x21   : > { %191 = vst [vmem:[%s3927_s27 + $0x48] sm:$0xf] %v190_v18  ;;  %193 = vst [vmem:[%s3927_s27 + $0x4c] sm:$0xf] %v192_v19  ;;  %v194_v20 = vld [vmem:[%s3920_s26 + $0x140] sm:$0xf] }
  0x22   : > { %v196_v21 = vld [vmem:[%s3920_s26 + $0x150] sm:$0xf]  ;;  %v198_v22 = vld [vmem:[%s3920_s26 + $0x160] sm:$0xf]  ;;  %195 = vst [vmem:[%s3927_s27 + $0x50] sm:$0xf] %v194_v20 }
  0x23   : > { %197 = vst [vmem:[%s3927_s27 + $0x54] sm:$0xf] %v196_v21  ;;  %199 = vst [vmem:[%s3927_s27 + $0x58] sm:$0xf] %v198_v22  ;;  %v200_v23 = vld [vmem:[%s3920_s26 + $0x170] sm:$0xf] }
  0x24   : > { %v202_v24 = vld [vmem:[%s3920_s26 + $0x180] sm:$0xf]  ;;  %v204_v25 = vld [vmem:[%s3920_s26 + $0x190] sm:$0xf]  ;;  %201 = vst [vmem:[%s3927_s27 + $0x5c] sm:$0xf] %v200_v23 }
  0x25   : > { %203 = vst [vmem:[%s3927_s27 + $0x60] sm:$0xf] %v202_v24  ;;  %205 = vst [vmem:[%s3927_s27 + $0x64] sm:$0xf] %v204_v25  ;;  %v206_v26 = vld [vmem:[%s3920_s26 + $0x1a0] sm:$0xf] }
  0x26   : > { %v208_v27 = vld [vmem:[%s3920_s26 + $0x1b0] sm:$0xf]  ;;  %v210_v28 = vld [vmem:[%s3920_s26 + $0x1c0] sm:$0xf]  ;;  %207 = vst [vmem:[%s3927_s27 + $0x68] sm:$0xf] %v206_v26 }
  0x27   : > { %209 = vst [vmem:[%s3927_s27 + $0x6c] sm:$0xf] %v208_v27  ;;  %211 = vst [vmem:[%s3927_s27 + $0x70] sm:$0xf] %v210_v28  ;;  %v212_v29 = vld [vmem:[%s3920_s26 + $0x1d0] sm:$0xf] }
  0x28   : > { %v214_v30 = vld [vmem:[%s3920_s26 + $0x1e0] sm:$0xf]  ;;  %v216_v31 = vld [vmem:[%s3920_s26 + $0x1f0] sm:$0xf]  ;;  %213 = vst [vmem:[%s3927_s27 + $0x74] sm:$0xf] %v212_v29 }
  0x29   : > { %215 = vst [vmem:[%s3927_s27 + $0x78] sm:$0xf] %v214_v30  ;;  %217 = vst [vmem:[%s3927_s27 + $0x7c] sm:$0xf] %v216_v31  ;;  %v218_v32 = vld [vmem:[%s3920_s26 + $0x200] sm:$0xf] }
  0x2a   : > { %v220_v33 = vld [vmem:[%s3920_s26 + $0x210] sm:$0xf]  ;;  %v222_v34 = vld [vmem:[%s3920_s26 + $0x220] sm:$0xf]  ;;  %219 = vst [vmem:[%s3927_s27 + $0x80] sm:$0xf] %v218_v32 }
  0x2b   : > { %221 = vst [vmem:[%s3927_s27 + $0x84] sm:$0xf] %v220_v33  ;;  %223 = vst [vmem:[%s3927_s27 + $0x88] sm:$0xf] %v222_v34  ;;  %v224_v35 = vld [vmem:[%s3920_s26 + $0x230] sm:$0xf] }
  0x2c   : > { %v226_v36 = vld [vmem:[%s3920_s26 + $0x240] sm:$0xf]  ;;  %v228_v37 = vld [vmem:[%s3920_s26 + $0x250] sm:$0xf]  ;;  %225 = vst [vmem:[%s3927_s27 + $0x8c] sm:$0xf] %v224_v35 }
  0x2d   : > { %227 = vst [vmem:[%s3927_s27 + $0x90] sm:$0xf] %v226_v36  ;;  %229 = vst [vmem:[%s3927_s27 + $0x94] sm:$0xf] %v228_v37  ;;  %v230_v38 = vld [vmem:[%s3920_s26 + $0x260] sm:$0xf] }
  0x2e   : > { %v232_v39 = vld [vmem:[%s3920_s26 + $0x270] sm:$0xf]  ;;  %v234_v40 = vld [vmem:[%s3920_s26 + $0x280] sm:$0xf]  ;;  %231 = vst [vmem:[%s3927_s27 + $0x98] sm:$0xf] %v230_v38 }
  0x2f   : > { %233 = vst [vmem:[%s3927_s27 + $0x9c] sm:$0xf] %v232_v39  ;;  %235 = vst [vmem:[%s3927_s27 + $0xa0] sm:$0xf] %v234_v40  ;;  %v236_v41 = vld [vmem:[%s3920_s26 + $0x290] sm:$0xf] }
  0x30   : > { %v238_v42 = vld [vmem:[%s3920_s26 + $0x2a0] sm:$0xf]  ;;  %v240_v43 = vld [vmem:[%s3920_s26 + $0x2b0] sm:$0xf]  ;;  %237 = vst [vmem:[%s3927_s27 + $0xa4] sm:$0xf] %v236_v41 }
  0x31   : > { %239 = vst [vmem:[%s3927_s27 + $0xa8] sm:$0xf] %v238_v42  ;;  %241 = vst [vmem:[%s3927_s27 + $0xac] sm:$0xf] %v240_v43  ;;  %v242_v44 = vld [vmem:[%s3920_s26 + $0x2c0] sm:$0xf] }
  0x32   : > { %v244_v45 = vld [vmem:[%s3920_s26 + $0x2d0] sm:$0xf]  ;;  %v246_v46 = vld [vmem:[%s3920_s26 + $0x2e0] sm:$0xf]  ;;  %243 = vst [vmem:[%s3927_s27 + $0xb0] sm:$0xf] %v242_v44 }
  0x33   : > { %245 = vst [vmem:[%s3927_s27 + $0xb4] sm:$0xf] %v244_v45  ;;  %247 = vst [vmem:[%s3927_s27 + $0xb8] sm:$0xf] %v246_v46  ;;  %v248_v47 = vld [vmem:[%s3920_s26 + $0x2f0] sm:$0xf] }
  0x34   : > { %v250_v48 = vld [vmem:[%s3920_s26 + $0x300] sm:$0xf]  ;;  %v252_v49 = vld [vmem:[%s3920_s26 + $0x310] sm:$0xf]  ;;  %249 = vst [vmem:[%s3927_s27 + $0xbc] sm:$0xf] %v248_v47 }
  0x35   : > { %251 = vst [vmem:[%s3927_s27 + $0xc0] sm:$0xf] %v250_v48  ;;  %253 = vst [vmem:[%s3927_s27 + $0xc4] sm:$0xf] %v252_v49  ;;  %v254_v50 = vld [vmem:[%s3920_s26 + $0x320] sm:$0xf] }
  0x36   : > { %v256_v51 = vld [vmem:[%s3920_s26 + $0x330] sm:$0xf]  ;;  %v258_v52 = vld [vmem:[%s3920_s26 + $0x340] sm:$0xf]  ;;  %255 = vst [vmem:[%s3927_s27 + $0xc8] sm:$0xf] %v254_v50 }
  0x37   : > { %257 = vst [vmem:[%s3927_s27 + $0xcc] sm:$0xf] %v256_v51  ;;  %259 = vst [vmem:[%s3927_s27 + $0xd0] sm:$0xf] %v258_v52  ;;  %v260_v53 = vld [vmem:[%s3920_s26 + $0x350] sm:$0xf] }
  0x38   : > { %v262_v54 = vld [vmem:[%s3920_s26 + $0x360] sm:$0xf]  ;;  %v264_v55 = vld [vmem:[%s3920_s26 + $0x370] sm:$0xf]  ;;  %261 = vst [vmem:[%s3927_s27 + $0xd4] sm:$0xf] %v260_v53 }
  0x39   : > { %263 = vst [vmem:[%s3927_s27 + $0xd8] sm:$0xf] %v262_v54  ;;  %265 = vst [vmem:[%s3927_s27 + $0xdc] sm:$0xf] %v264_v55  ;;  %v266_v56 = vld [vmem:[%s3920_s26 + $0x380] sm:$0xf] }
  0x3a   : > { %v268_v57 = vld [vmem:[%s3920_s26 + $0x390] sm:$0xf]  ;;  %v270_v58 = vld [vmem:[%s3920_s26 + $0x3a0] sm:$0xf]  ;;  %267 = vst [vmem:[%s3927_s27 + $0xe0] sm:$0xf] %v266_v56 }
  0x3b   : > { %269 = vst [vmem:[%s3927_s27 + $0xe4] sm:$0xf] %v268_v57  ;;  %271 = vst [vmem:[%s3927_s27 + $0xe8] sm:$0xf] %v270_v58  ;;  %v272_v59 = vld [vmem:[%s3920_s26 + $0x3b0] sm:$0xf] }
  0x3c   : > { %v274_v60 = vld [vmem:[%s3920_s26 + $0x3c0] sm:$0xf]  ;;  %v276_v61 = vld [vmem:[%s3920_s26 + $0x3d0] sm:$0xf]  ;;  %273 = vst [vmem:[%s3927_s27 + $0xec] sm:$0xf] %v272_v59 }
  0x3d   : > { %275 = vst [vmem:[%s3927_s27 + $0xf0] sm:$0xf] %v274_v60  ;;  %277 = vst [vmem:[%s3927_s27 + $0xf4] sm:$0xf] %v276_v61  ;;  %v278_v62 = vld [vmem:[%s3920_s26 + $0x3e0] sm:$0xf] }
  0x3e   : > { %v280_v63 = vld [vmem:[%s3920_s26 + $0x3f0] sm:$0xf]  ;;  %v282_v0 = vld [vmem:[%s3920_s26 + $0x400] sm:$0xf]  ;;  %279 = vst [vmem:[%s3927_s27 + $0xf8] sm:$0xf] %v278_v62 }
  0x3f   : > { %281 = vst [vmem:[%s3927_s27 + $0xfc] sm:$0xf] %v280_v63  ;;  %283 = vst [vmem:[%s3927_s27 + $0x100] sm:$0xf] %v282_v0  ;;  %v284_v1 = vld [vmem:[%s3920_s26 + $0x410] sm:$0xf] }
  0x40   : > { %v286_v2 = vld [vmem:[%s3920_s26 + $0x420] sm:$0xf]  ;;  %v288_v3 = vld [vmem:[%s3920_s26 + $0x430] sm:$0xf]  ;;  %285 = vst [vmem:[%s3927_s27 + $0x104] sm:$0xf] %v284_v1 }
  0x41   : > { %287 = vst [vmem:[%s3927_s27 + $0x108] sm:$0xf] %v286_v2  ;;  %289 = vst [vmem:[%s3927_s27 + $0x10c] sm:$0xf] %v288_v3  ;;  %v290_v4 = vld [vmem:[%s3920_s26 + $0x440] sm:$0xf] }
  0x42   : > { %v292_v5 = vld [vmem:[%s3920_s26 + $0x450] sm:$0xf]  ;;  %v294_v6 = vld [vmem:[%s3920_s26 + $0x460] sm:$0xf]  ;;  %291 = vst [vmem:[%s3927_s27 + $0x110] sm:$0xf] %v290_v4 }
  0x43   : > { %293 = vst [vmem:[%s3927_s27 + $0x114] sm:$0xf] %v292_v5  ;;  %295 = vst [vmem:[%s3927_s27 + $0x118] sm:$0xf] %v294_v6  ;;  %v296_v7 = vld [vmem:[%s3920_s26 + $0x470] sm:$0xf] }
  0x44   : > { %v298_v8 = vld [vmem:[%s3920_s26 + $0x480] sm:$0xf]  ;;  %v300_v9 = vld [vmem:[%s3920_s26 + $0x490] sm:$0xf]  ;;  %297 = vst [vmem:[%s3927_s27 + $0x11c] sm:$0xf] %v296_v7 }
  0x45   : > { %299 = vst [vmem:[%s3927_s27 + $0x120] sm:$0xf] %v298_v8  ;;  %301 = vst [vmem:[%s3927_s27 + $0x124] sm:$0xf] %v300_v9  ;;  %v302_v10 = vld [vmem:[%s3920_s26 + $0x4a0] sm:$0xf] }
  0x46   : > { %v304_v11 = vld [vmem:[%s3920_s26 + $0x4b0] sm:$0xf]  ;;  %v306_v12 = vld [vmem:[%s3920_s26 + $0x4c0] sm:$0xf]  ;;  %303 = vst [vmem:[%s3927_s27 + $0x128] sm:$0xf] %v302_v10 }
  0x47   : > { %305 = vst [vmem:[%s3927_s27 + $0x12c] sm:$0xf] %v304_v11  ;;  %307 = vst [vmem:[%s3927_s27 + $0x130] sm:$0xf] %v306_v12  ;;  %v308_v13 = vld [vmem:[%s3920_s26 + $0x4d0] sm:$0xf] }
  0x48   : > { %v310_v14 = vld [vmem:[%s3920_s26 + $0x4e0] sm:$0xf]  ;;  %v312_v15 = vld [vmem:[%s3920_s26 + $0x4f0] sm:$0xf]  ;;  %309 = vst [vmem:[%s3927_s27 + $0x134] sm:$0xf] %v308_v13 }
  0x49   : > { %311 = vst [vmem:[%s3927_s27 + $0x138] sm:$0xf] %v310_v14  ;;  %313 = vst [vmem:[%s3927_s27 + $0x13c] sm:$0xf] %v312_v15  ;;  %v314_v16 = vld [vmem:[%s3920_s26 + $0x500] sm:$0xf] }
  0x4a   : > { %v316_v17 = vld [vmem:[%s3920_s26 + $0x510] sm:$0xf]  ;;  %v318_v18 = vld [vmem:[%s3920_s26 + $0x520] sm:$0xf]  ;;  %315 = vst [vmem:[%s3927_s27 + $0x140] sm:$0xf] %v314_v16 }
  0x4b   : > { %317 = vst [vmem:[%s3927_s27 + $0x144] sm:$0xf] %v316_v17  ;;  %319 = vst [vmem:[%s3927_s27 + $0x148] sm:$0xf] %v318_v18  ;;  %v320_v19 = vld [vmem:[%s3920_s26 + $0x530] sm:$0xf] }
  0x4c   : > { %v322_v20 = vld [vmem:[%s3920_s26 + $0x540] sm:$0xf]  ;;  %v324_v21 = vld [vmem:[%s3920_s26 + $0x550] sm:$0xf]  ;;  %321 = vst [vmem:[%s3927_s27 + $0x14c] sm:$0xf] %v320_v19 }
  0x4d   : > { %323 = vst [vmem:[%s3927_s27 + $0x150] sm:$0xf] %v322_v20  ;;  %325 = vst [vmem:[%s3927_s27 + $0x154] sm:$0xf] %v324_v21  ;;  %v326_v22 = vld [vmem:[%s3920_s26 + $0x560] sm:$0xf] }
  0x4e   : > { %v328_v23 = vld [vmem:[%s3920_s26 + $0x570] sm:$0xf]  ;;  %v330_v24 = vld [vmem:[%s3920_s26 + $0x580] sm:$0xf]  ;;  %327 = vst [vmem:[%s3927_s27 + $0x158] sm:$0xf] %v326_v22 }
  0x4f   : > { %329 = vst [vmem:[%s3927_s27 + $0x15c] sm:$0xf] %v328_v23  ;;  %331 = vst [vmem:[%s3927_s27 + $0x160] sm:$0xf] %v330_v24  ;;  %v332_v25 = vld [vmem:[%s3920_s26 + $0x590] sm:$0xf] }
  0x50   : > { %333 = vst [vmem:[%s3927_s27 + $0x164] sm:$0xf] %v332_v25 }
  0x51 PF: > { %p2879_p7 = scmp.ge.s32.totalorder %s3857_s14, 1  ;;  %p541_p8 = scmp.lt.s32.totalorder %s3857_s14, 5 }
  0x53   : > { %p542_p9 = pnand %p2879_p7, %p541_p8 }
  0x54   : > { %s548_s28 = sand.u32 (!%p542_p9), 1, %s3849_s12   ;;  %v600_v26 = vld [vmem:[%s4769_s0] sm:$0xff] (!%p542_p9)  ;;  %v4113_v27 = vld [vmem:[%s4769_s0 + $0x10] sm:$0xff] (!%p542_p9)  ;;  %vm680_vm0 = vcmask (!%p542_p9), 654336   ;;  %p573_p10 = scmp.lt.s32.totalorder (!%p542_p9), %s3895_s15, 3 }
  0x55   : > { %545 = sbr.rel (%p542_p9) target bundleno = 473 (0x1d9), region = 69  ;;  %v4118_v28 = vld [vmem:[%s4769_s0 + $0x11] sm:$0xff] (!%p542_p9)  ;;  %v616_v29 = vpack.c.bf16 (!%p542_p9), %v4113_v27, %v600_v26  ;;  %v4126_v30 = vld [vmem:[%s4769_s0 + $0x21] sm:$0xff] (!%p542_p9)  ;;  %s2880_s14 = sshll.u32 (!%p542_p9), %s548_s28, 7 }
  0x56   : > { %s3765_s8 = smul.u32 (!%p542_p9), 360, %s548_s28  ;;  %v4131_v31 = vld [vmem:[%s4769_s0 + $0x20] sm:$0xff] (!%p542_p9)  ;;  %v1553_v32 = vpack.c.bf16 (!%p542_p9), %v4126_v30, %v4118_v28  ;;  %v4138_v33 = vld [vmem:[%s4769_s0 + $0x30] sm:$0xff] (!%p542_p9)  ;;  %s4711_s12 = scalar_lea.vmem (!%p542_p9), [#allocation3], %s2880_s14 }
  0x57   : > { %v4143_v34 = vld [vmem:[%s4769_s0 + $0x40] sm:$0xff] (!%p542_p9)  ;;  %v1319_v35 = vpack.c.bf16 (!%p542_p9), %v4131_v31, %v4113_v27  ;;  %3306 = vmatprep.mubr.msk.bf16.mxu1 (!%p542_p9), %vm680_vm0, %v616_v29  ;;  %v4166_v47 = vld [vmem:[%s4769_s0 + $0x50] sm:$0xff] (!%p542_p9)  ;;  %v4199_v56 = vpack.c.bf16 (!%p542_p9), %v4138_v33, %v4131_v31 }
  0x58   : > { %v1320_v36 = vpack.c.bf16 (!%p542_p9), %v4143_v34, %v4138_v33  ;;  %s4150_s23 = scalar_lea.vmem (!%p542_p9), [#allocation2], %s3765_s8  ;;  %3410 = vmatprep.mubr.msk.bf16.mxu0 (!%p542_p9), %vm680_vm0, %v1553_v32  ;;  %v4171_v48 = vld [vmem:[%s4769_s0 + $0x60] sm:$0xff] (!%p542_p9)  ;;  %v4179_v51 = vld [vmem:[%s4769_s0 + $0x31] sm:$0xff] (!%p542_p9)  ;;  %v4217_v61 = vpack.c.bf16 (!%p542_p9), %v4166_v47, %v4143_v34 }
  0x59   : > { %v3790_v37 = vld [vmem:[%s4150_s23] sm:$0xff] (!%p542_p9)   ;;  %v3792_v39 = vld [vmem:[%s4150_s23 + $0x8] sm:$0xff] (!%p542_p9)   ;;  %v3794_v41 = vld [vmem:[%s4150_s23 + $0x10] sm:$0xff] (!%p542_p9)   ;;  %v1321_v49 = vpack.c.bf16 (!%p542_p9), %v4171_v48, %v4166_v47 }
  0x5a   : > { %v3791_v38 = vld [vmem:[%s4150_s23 + $0xa0] sm:$0xff] (!%p542_p9)   ;;  %3296 = vmatprep.subr.bf16.mxu1 (!%p542_p9), %v3790_v37  ;;  %v3793_v40 = vld [vmem:[%s4150_s23 + $0xa8] sm:$0xff] (!%p542_p9)   ;;  %v3795_v42 = vld [vmem:[%s4150_s23 + $0xb0] sm:$0xff] (!%p542_p9)  }
  0x5b   : > { %3400 = vmatprep.subr.bf16.mxu0 (!%p542_p9), %v3791_v38  ;;  %3297 = vmatpush3.bf16.msra.mxu1 (!%p542_p9), %v3790_v37  ;;  %v3796_v43 = vld [vmem:[%s4150_s23 + $0x18] sm:$0xff] (!%p542_p9)   ;;  %v3798_v45 = vld [vmem:[%s4150_s23 + $0x20] sm:$0xff] (!%p542_p9)   ;;  %v3800_v50 = vld [vmem:[%s4150_s23 + $0x28] sm:$0xff] (!%p542_p9)  }
  0x5c   : > { %3401 = vmatpush3.bf16.msra.mxu0 %v3791_v38  ;;  %3298 = vmatprep.subr.bf16.mxu1 %v3792_v39  ;;  %v3797_v44 = vld [vmem:[%s4150_s23 + $0xb8] sm:$0xff]   ;;  %v3799_v46 = vld [vmem:[%s4150_s23 + $0xc0] sm:$0xff]   ;;  %v3801_v53 = vld [vmem:[%s4150_s23 + $0xc8] sm:$0xff]   ;;  %s574_s8 = scalar_select %p573_p10, %s3895_s15, 3 }
  0x5d   : > { %3402 = vmatprep.subr.bf16.mxu0 %v3793_v40  ;;  %v4184_v52 = vld [vmem:[%s4769_s0 + $0x41] sm:$0xff]  ;;  %v4190_v54 = vld [vmem:[%s4769_s0 + $0xb0] sm:$0xff]  ;;  %s3176_s28 = sshll.u32 (%p3910_p5), %s3895_s15, 3 }
  0x5e   : > { %v4195_v55 = vld [vmem:[%s4769_s0 + $0xc0] sm:$0xff]  ;;  %v4204_v57 = vld [vmem:[%s4769_s0 + $0x51] sm:$0xff]  ;;  %v1554_v60 = vpack.c.bf16 %v4184_v52, %v4179_v51  ;;  %s575_s11 = scalar_lea.vmem %s4771_s2, %s574_s8  ;;  %s2716_s21 = scalar_lea.vmem (%p3910_p5), %s4772_s3, %s3176_s28 }
  0x5f   : > { %3299 = vmatpush3.bf16.msra.mxu1 %v3792_v39  ;;  %v4209_v58 = vld [vmem:[%s4769_s0 + $0x61] sm:$0xff]  ;;  %v1323_v59 = vpack.c.bf16 %v4195_v55, %v4190_v54  ;;  %v3802_v62 = vld [vmem:[%s4150_s23 + $0x30] sm:$0xff]  }
  0x60   : > { %3403 = vmatpush3.bf16.msra.mxu0 %v3793_v40  ;;  %3300 = vmatprep.subr.bf16.mxu1 %v3794_v41  ;;  %v1555_v63 = vpack.c.bf16 %v4209_v58, %v4204_v57  ;;  %v4225_v0 = vld [vmem:[%s4769_s0 + $0x70] sm:$0xff]  ;;  %v4236_v3 = vld [vmem:[%s4769_s0 + $0xe0] sm:$0xff] }
  0x61   : > { %3404 = vmatprep.subr.bf16.mxu0 %v3795_v42  ;;  %v3803_v1 = vld [vmem:[%s4150_s23 + $0xd0] sm:$0xff]   ;;  %v4248_v5 = vld [vmem:[%s4769_s0 + $0x81] sm:$0xff]  ;;  %v4285_v15 = vpack.c.bf16 %v4225_v0, %v4171_v48 }
  0x62   : > { %v4231_v2 = vld [vmem:[%s4769_s0 + $0xd0] sm:$0xff]  ;;  %v3804_v6 = vld [vmem:[%s4150_s23 + $0x38] sm:$0xff]   ;;  %v3806_v19 = vld [vmem:[%s4150_s23 + $0x40] sm:$0xff]  }
  0x63   : > { %3301 = vmatpush3.bf16.msra.mxu1 %v3794_v41  ;;  %v4243_v4 = vld [vmem:[%s4769_s0 + $0x71] sm:$0xff]  ;;  %v4259_v8 = vld [vmem:[%s4769_s0 + $0x100] sm:$0xff]  ;;  %v1324_v9 = vpack.c.bf16 %v4236_v3, %v4231_v2  ;;  %v4322_v26 = vpack.c.bf16 %v4231_v2, %v4195_v55 }
  0x64   : > { %3405 = vmatpush3.bf16.msra.mxu0 %v3795_v42  ;;  %3302 = vmatprep.subr.bf16.mxu1 %v3796_v43  ;;  %v4254_v7 = vld [vmem:[%s4769_s0 + $0xf0] sm:$0xff]  ;;  %v608_v10 = vld [vmem:[%s4769_s0 + $0xa0] sm:$0xff]  ;;  %v1556_v16 = vpack.c.bf16 %v4248_v5, %v4243_v4 }
  0x65   : > { %3406 = vmatprep.subr.bf16.mxu0 %v3797_v44  ;;  %v4270_v11 = vld [vmem:[%s4769_s0 + $0xb1] sm:$0xff]  ;;  %v1325_v12 = vpack.c.bf16 %v4259_v8, %v4254_v7  ;;  %v4279_v13 = vld [vmem:[%s4769_s0 + $0xc1] sm:$0xff]  ;;  %v620_v17 = vpack.c.bf16 %v4190_v54, %v608_v10  ;;  %v4329_v37 = vpack.c.bf16 %v4254_v7, %v4236_v3 }
  0x66   : > { %v3805_v14 = vld [vmem:[%s4150_s23 + $0xd8] sm:$0xff]   ;;  %v1557_v18 = vpack.c.bf16 %v4279_v13, %v4270_v11  ;;  %v3807_v20 = vld [vmem:[%s4150_s23 + $0xe0] sm:$0xff]   ;;  %v3808_v24 = vld [vmem:[%s4150_s23 + $0x48] sm:$0xff]  }
  0x67   : > { %3303 = vmatpush3.bf16.msra.mxu1 %v3796_v43  ;;  %v4300_v21 = vld [vmem:[%s4769_s0 + $0xd1] sm:$0xff]  ;;  %v4305_v22 = vld [vmem:[%s4769_s0 + $0xe1] sm:$0xff] }
  0x68   : > { %3407 = vmatpush3.bf16.msra.mxu0 %v3797_v44  ;;  %3304 = vmatprep.subr.bf16.mxu1 %v3798_v45  ;;  %v4312_v23 = vld [vmem:[%s4769_s0 + $0xf1] sm:$0xff]  ;;  %v4318_v25 = vld [vmem:[%s4769_s0 + $0x101] sm:$0xff]  ;;  %v1558_v32 = vpack.c.bf16 %v4305_v22, %v4300_v21 }
  0x69   : > { %3408 = vmatprep.subr.bf16.mxu0 %v3799_v46  ;;  %v3809_v29 = vld [vmem:[%s4150_s23 + $0xe8] sm:$0xff]   ;;  %v1559_v38 = vpack.c.bf16 %v4318_v25, %v4312_v23  ;;  %v3810_v39 = vld [vmem:[%s4150_s23 + $0x50] sm:$0xff]  }
  0x6a   : > { %v4339_v40 = vld [vmem:[%s4769_s0 + $0x110] sm:$0xff]  ;;  %v4353_v43 = vld [vmem:[%s4769_s0 + $0x121] sm:$0xff] }
  0x6b   : > { %3305 = vmatpush3.bf16.msra.mxu1 %v3798_v45  ;;  %v4344_v41 = vld [vmem:[%s4769_s0 + $0x111] sm:$0xff]  ;;  %v834_v44 = vld [vmem:[%s4769_s0 + $0x1] sm:$0xff] }
  0x6c   : > { %3409 = vmatpush3.bf16.msra.mxu0 %v3799_v46  ;;  %3322 = vmatprep.subr.bf16.mxu1 %v3800_v50  ;;  %v3811_v42 = vld [vmem:[%s4150_s23 + $0xf0] sm:$0xff]   ;;  %v4367_v46 = vld [vmem:[%s4769_s0 + $0x22] sm:$0xff] }
  0x6d   : > { %3426 = vmatprep.subr.bf16.mxu0 %v3801_v53  ;;  %v4362_v45 = vld [vmem:[%s4769_s0 + $0x12] sm:$0xff]  ;;  %v4405_v10 = vld [vmem:[%s4769_s0 + $0x62] sm:$0xff] }
  0x6e   : > { %3307 = vmatmul.mubr.msk.bf16.vlgmr.msra.gmra.mrb[0].mxu1 %vm680_vm0, %v4199_v56  ;;  %v3104_v27 = vld [vmem:[%s4769_s0 + $0x91] sm:$0xff] }
  0x6f   : > { %3411 = vmatmul.mubr.msk.bf16.vlgmr.msra.gmra.mrb[0].mxu0 %vm680_vm0, %v1554_v60  ;;  %3323 = vmatpush3.bf16.msra.mxu1 %v3800_v50  ;;  %v4371_v50 = vpack.c.bf16 %v4339_v40, %v4259_v8  ;;  %v850_v60 = vpack.c.bf16 %v4118_v28, %v834_v44  ;;  %v4391_v28 = vld [vmem:[%s4769_s0 + $0x42] sm:$0xff]  ;;  %v3832_v31 = vld [vmem:[%s4150_s23 + $0x150] sm:$0xff]   ;;  %v2259_v34 = vpack.c.bf16 %v3104_v27, %v4248_v5 }
  0x70   : > { %3427 = vmatpush3.bf16.msra.mxu0 %v3801_v53  ;;  %3310 = vmatprep.mubr.msk.bf16.mxu1 %vm680_vm0, %v4217_v61  ;;  %v1560_v53 = vpack.c.bf16 %v4353_v43, %v4344_v41  ;;  %v3816_v44 = vld [vmem:[%s4150_s23 + $0x68] sm:$0xff]  }
  0x71   : > { %3324 = vmatprep.subr.bf16.mxu1 %v3802_v62  ;;  %3414 = vmatprep.mubr.msk.bf16.mxu0 %vm680_vm0, %v1555_v63  ;;  %v4386_v63 = vld [vmem:[%s4769_s0 + $0x32] sm:$0xff] }
  0x72   : > { %3428 = vmatprep.subr.bf16.mxu0 %v3803_v1  ;;  %v3112_v47 = vld [vmem:[%s4769_s0 + $0x131] sm:$0xff] }
  0x73   : > { %3325 = vmatpush3.bf16.msra.mxu1 %v3802_v62  ;;  %v1787_v62 = vpack.c.bf16 %v4367_v46, %v4362_v45  ;;  %v3151_v54 = vld [vmem:[%s4769_s0 + $0x132] sm:$0xff] }
  0x74   : > { %3429 = vmatpush3.bf16.msra.mxu0 %v3803_v1  ;;  %3326 = vmatprep.subr.bf16.mxu1 %v3804_v6  ;;  %v4396_v1 = vld [vmem:[%s4769_s0 + $0x52] sm:$0xff] }
  0x75   : > { %3430 = vmatprep.subr.bf16.mxu0 %v3805_v14  ;;  %v3143_v55 = vld [vmem:[%s4769_s0 + $0x92] sm:$0xff] }
  0x76   : > { %3311 = vmatmul.mubr.msk.bf16.gmra.mrb[4].mxu1 %vm680_vm0, %v4285_v15 }
  0x77   : > { %3415 = vmatmul.mubr.msk.bf16.gmra.mrb[4].mxu0 %vm680_vm0, %v1556_v16  ;;  %3327 = vmatpush3.bf16.msra.mxu1 %v3804_v6  ;;  %v4400_v6 = vpack.c.bf16 %v4179_v51, %v4126_v30  ;;  %v4411_v16 = vpack.c.bf16 %v4204_v57, %v4184_v52  ;;  %v4422_v30 = vld [vmem:[%s4769_s0 + $0x72] sm:$0xff]  ;;  %v4427_v51 = vld [vmem:[%s4769_s0 + $0x82] sm:$0xff] }
  0x78   : > { %3314 = vmatprep.mubr.msk.bf16.mxu1 %vm680_vm0, %v620_v17  ;;  %3418 = vmatprep.mubr.msk.bf16.mxu0 %vm680_vm0, %v1557_v18  ;;  %v3812_v17 = vld [vmem:[%s4150_s23 + $0x58] sm:$0xff]   ;;  %v1789_v18 = vpack.c.bf16 %v4405_v10, %v4396_v1  ;;  %v3814_v52 = vld [vmem:[%s4150_s23 + $0x60] sm:$0xff]  }
  0x79   : > { %3431 = vmatpush3.bf16.msra.mxu0 %v3805_v14  ;;  %3328 = vmatprep.subr.bf16.mxu1 %v3806_v19  ;;  %v1788_v14 = vpack.c.bf16 %v4391_v28, %v4386_v63  ;;  %v842_v57 = vld [vmem:[%s4769_s0 + $0xa1] sm:$0xff] }
  0x7a   : > { %3432 = vmatprep.subr.bf16.mxu0 %v3807_v20 }
  0x7b   : > { %3329 = vmatpush3.bf16.msra.mxu1 %v3806_v19  ;;  %v3813_v19 = vld [vmem:[%s4150_s23 + $0xf8] sm:$0xff]  }
  0x7c   : > { %3330 = vmatprep.subr.bf16.mxu1 %v3808_v24 }
  0x7d   : > { %3433 = vmatpush3.bf16.msra.mxu0 %v3807_v20  ;;  %v4437_v20 = vld [vmem:[%s4769_s0 + $0xb2] sm:$0xff] }
  0x7e   : > { %3315 = vmatmul.mubr.msk.bf16.gmra.mrb[8].mxu1 %vm680_vm0, %v4322_v26  ;;  %3434 = vmatprep.subr.bf16.mxu0 %v3809_v29 }
  0x7f   : > { %3419 = vmatmul.mubr.msk.bf16.gmra.mrb[8].mxu0 %vm680_vm0, %v1558_v32  ;;  %3318 = vmatprep.mubr.msk.bf16.mxu1 %vm680_vm0, %v4329_v37  ;;  %v4450_v32 = vpack.c.bf16 %v4243_v4, %v4209_v58  ;;  %v3817_v58 = vld [vmem:[%s4150_s23 + $0x108] sm:$0xff]  }
  0x80   : > { %3422 = vmatprep.mubr.msk.bf16.mxu0 %vm680_vm0, %v1559_v38  ;;  %3331 = vmatpush3.bf16.msra.mxu1 %v3808_v24  ;;  %v4444_v24 = vld [vmem:[%s4769_s0 + $0xc2] sm:$0xff]  ;;  %v1790_v38 = vpack.c.bf16 %v4427_v51, %v4422_v30  ;;  %v4467_v4 = vld [vmem:[%s4769_s0 + $0xd2] sm:$0xff] }
  0x81   : > { %3435 = vmatpush3.bf16.msra.mxu0 %v3809_v29  ;;  %3348 = vmatprep.subr.bf16.mxu1 %v3810_v39  ;;  %v3815_v29 = vld [vmem:[%s4150_s23 + $0x100] sm:$0xff]  }
  0x82   : > { %3452 = vmatprep.subr.bf16.mxu0 %v3811_v42 }
  0x86   : > { %3319 = vmatmul.mubr.msk.bf16.gmra.mrb[12].mxu1 %vm680_vm0, %v4371_v50 }
  0x87   : > { %3423 = vmatmul.mubr.msk.bf16.gmra.mrb[12].mxu0 %vm680_vm0, %v1560_v53  ;;  %3332 = vmatprep.mubr.msk.bf16.mxu1 %vm680_vm0, %v850_v60  ;;  %v3818_v53 = vld [vmem:[%s4150_s23 + $0x70] sm:$0xff]  }
  0x88   : > { %3436 = vmatprep.mubr.msk.bf16.mxu0 %vm680_vm0, %v1787_v62  ;;  %v4478_v60 = vld [vmem:[%s4769_s0 + $0xf2] sm:$0xff]  ;;  %v4483_v62 = vld [vmem:[%s4769_s0 + $0x102] sm:$0xff] }
  0x8e   : > { %3333 = vmatmul.mubr.msk.bf16.vlgmr.msra.gmra.mrb[0].mxu1 %vm680_vm0, %v4400_v6 }
  0x8f   : > { %3437 = vmatmul.mubr.msk.bf16.vlgmr.msra.gmra.mrb[0].mxu0 %vm680_vm0, %v1788_v14  ;;  %3349 = vmatpush3.bf16.msra.mxu1 %v3810_v39  ;;  %v854_v39 = vpack.c.bf16 %v4270_v11, %v842_v57  ;;  %v4472_v11 = vld [vmem:[%s4769_s0 + $0xe2] sm:$0xff]  ;;  %v4487_v14 = vpack.c.bf16 %v4300_v21, %v4279_v13  ;;  %v4509_v21 = vld [vmem:[%s4769_s0 + $0x112] sm:$0xff] }
  0x90   : > { %3453 = vmatpush3.bf16.msra.mxu0 %v3811_v42  ;;  %3336 = vmatprep.mubr.msk.bf16.mxu1 %vm680_vm0, %v4411_v16  ;;  %v1791_v42 = vpack.c.bf16 %v4444_v24, %v4437_v20  ;;  %v3820_v57 = vld [vmem:[%s4150_s23 + $0x78] sm:$0xff]  }
  0x91   : > { %3350 = vmatprep.subr.bf16.mxu1 %v3812_v17  ;;  %3440 = vmatprep.mubr.msk.bf16.mxu0 %vm680_vm0, %v1789_v18  ;;  %v1792_v18 = vpack.c.bf16 %v4472_v11, %v4467_v4  ;;  %v3821_v13 = vld [vmem:[%s4150_s23 + $0x118] sm:$0xff]  }
  0x92   : > { %3454 = vmatprep.subr.bf16.mxu0 %v3813_v19 }
  0x93   : > { %3351 = vmatpush3.bf16.msra.mxu1 %v3812_v17  ;;  %v3819_v17 = vld [vmem:[%s4150_s23 + $0x110] sm:$0xff]  }
  0x94   : > { %3455 = vmatpush3.bf16.msra.mxu0 %v3813_v19  ;;  %3352 = vmatprep.subr.bf16.mxu1 %v3814_v52  ;;  %v4494_v19 = vpack.c.bf16 %v4312_v23, %v4305_v22  ;;  %v4514_v22 = vld [vmem:[%s4769_s0 + $0x122] sm:$0xff] }
  0x95   : > { %3456 = vmatprep.subr.bf16.mxu0 %v3815_v29  ;;  %v1068_v23 = vld [vmem:[%s4769_s0 + $0x2] sm:$0xff] }
  0x96   : > { %3337 = vmatmul.mubr.msk.bf16.gmra.mrb[4].mxu1 %vm680_vm0, %v4450_v32 }
  0x97   : > { %3441 = vmatmul.mubr.msk.bf16.gmra.mrb[4].mxu0 %vm680_vm0, %v1790_v38  ;;  %3353 = vmatpush3.bf16.msra.mxu1 %v3814_v52  ;;  %v1793_v52 = vpack.c.bf16 %v4483_v62, %v4478_v60  ;;  %v1794_v38 = vpack.c.bf16 %v4514_v22, %v4509_v21 }
  0x98   : > { %3340 = vmatprep.mubr.msk.bf16.mxu1 %vm680_vm0, %v854_v39  ;;  %3444 = vmatprep.mubr.msk.bf16.mxu0 %vm680_vm0, %v1791_v42  ;;  %v1084_v39 = vpack.c.bf16 %v4362_v45, %v1068_v23  ;;  %v3822_v45 = vld [vmem:[%s4150_s23 + $0x80] sm:$0xff]  }
  0x99   : > { %3457 = vmatpush3.bf16.msra.mxu0 %v3815_v29  ;;  %3354 = vmatprep.subr.bf16.mxu1 %v3816_v44  ;;  %v4521_v29 = vpack.c.bf16 %v4344_v41, %v4318_v25  ;;  %v4534_v25 = vpack.c.bf16 %v4386_v63, %v4367_v46  ;;  %v4538_v41 = vpack.c.bf16 %v4396_v1, %v4391_v28  ;;  %v3823_v42 = vld [vmem:[%s4150_s23 + $0x120] sm:$0xff]   ;;  %v3065_v46 = vld [vmem:[%s4769_s0 + $0x90] sm:$0xff] }
  0x9a   : > { %3458 = vmatprep.subr.bf16.mxu0 %v3817_v58  ;;  %v3824_v63 = vld [vmem:[%s4150_s23 + $0x88] sm:$0xff]   ;;  %v4565_v1 = vpack.c.bf16 %v4422_v30, %v4405_v10  ;;  %v3828_v10 = vld [vmem:[%s4150_s23 + $0x98] sm:$0xff]   ;;  %v4580_v30 = vpack.c.bf16 %v4467_v4, %v4444_v24 }
  0x9b   : > { %3355 = vmatpush3.bf16.msra.mxu1 %v3816_v44  ;;  %v3825_v28 = vld [vmem:[%s4150_s23 + $0x128] sm:$0xff]  }
  0x9c   : > { %3356 = vmatprep.subr.bf16.mxu1 %v3818_v53  ;;  %v3073_v24 = vld [vmem:[%s4769_s0 + $0x130] sm:$0xff] }
  0x9d   : > { %3459 = vmatpush3.bf16.msra.mxu0 %v3817_v58 }
  0x9e   : > { %3341 = vmatmul.mubr.msk.bf16.gmra.mrb[8].mxu1 %vm680_vm0, %v4487_v14  ;;  %3460 = vmatprep.subr.bf16.mxu0 %v3819_v17 }
  0x9f   : > { %3445 = vmatmul.mubr.msk.bf16.gmra.mrb[8].mxu0 %vm680_vm0, %v1792_v18  ;;  %3344 = vmatprep.mubr.msk.bf16.mxu1 %vm680_vm0, %v4494_v19  ;;  %v3830_v18 = vld [vmem:[%s4150_s23 + $0x140] sm:$0xff]  }
  0xa0   : > { %3448 = vmatprep.mubr.msk.bf16.mxu0 %vm680_vm0, %v1793_v52  ;;  %3357 = vmatpush3.bf16.msra.mxu1 %v3818_v53  ;;  %v3827_v53 = vld [vmem:[%s4150_s23 + $0x130] sm:$0xff]  }
  0xa1   : > { %3461 = vmatpush3.bf16.msra.mxu0 %v3819_v17  ;;  %3374 = vmatprep.subr.bf16.mxu1 %v3820_v57  ;;  %v4585_v17 = vpack.c.bf16 %v4478_v60, %v4472_v11 }
  0xa2   : > { %3478 = vmatprep.subr.bf16.mxu0 %v3821_v13 }
  0xa6   : > { %3345 = vmatmul.mubr.msk.bf16.gmra.mrb[12].mxu1 %vm680_vm0, %v4521_v29 }
  0xa7   : > { %3449 = vmatmul.mubr.msk.bf16.gmra.mrb[12].mxu0 %vm680_vm0, %v1794_v38  ;;  %3358 = vmatprep.mubr.msk.bf16.mxu1 %vm680_vm0, %v1084_v39 }
  0xa8   : > { %3462 = vmatprep.mubr.msk.bf16.mxu0 %vm680_vm0, %v4199_v56  ;;  %v4551_v56 = vld [vmem:[%s4769_s0 + $0x80] sm:$0xff] }
  0xa9   : > { %v2025_v44 = vpack.c.bf16 %v3065_v46, %v4551_v56  ;;  %v1322_v33 = vpack.c.bf16 %v4551_v56, %v4225_v0  ;;  %v2493_v0 = vpack.c.bf16 %v3143_v55, %v4427_v51 }
  0xae   : > { %3359 = vmatmul.mubr.msk.bf16.vlgmr.msra.gmra.mrb[0].mxu1 %vm680_vm0, %v4534_v25 }
  0xaf   : > { %3463 = vmatmul.mubr.msk.bf16.vlgmr.msra.gmra.mrb[0].mxu0 %vm680_vm0, %v4217_v61  ;;  %3375 = vmatpush3.bf16.msra.mxu1 %v3820_v57  ;;  %v1076_v61 = vld [vmem:[%s4769_s0 + $0xa2] sm:$0xff] }
  0xb0   : > { %3479 = vmatpush3.bf16.msra.mxu0 %v3821_v13  ;;  %3362 = vmatprep.mubr.msk.bf16.mxu1 %vm680_vm0, %v4538_v41  ;;  %v1088_v58 = vpack.c.bf16 %v4437_v20, %v1076_v61  ;;  %v3829_v20 = vld [vmem:[%s4150_s23 + $0x138] sm:$0xff]  }
  0xb1   : > { %3376 = vmatprep.subr.bf16.mxu1 %v3822_v45  ;;  %3466 = vmatprep.mubr.msk.bf16.mxu0 %vm680_vm0, %v4285_v15  ;;  %v3826_v15 = vld [vmem:[%s4150_s23 + $0x90] sm:$0xff]  }
  0xb2   : > { %3480 = vmatprep.subr.bf16.mxu0 %v3823_v42 }
  0xb3   : > { %3377 = vmatpush3.bf16.msra.mxu1 %v3822_v45 }
  0xb4   : > { %3481 = vmatpush3.bf16.msra.mxu0 %v3823_v42  ;;  %3378 = vmatprep.subr.bf16.mxu1 %v3824_v63 }
  0xb5   : > { %3482 = vmatprep.subr.bf16.mxu0 %v3825_v28 }
  0xb6   : > { %3363 = vmatmul.mubr.msk.bf16.gmra.mrb[4].mxu1 %vm680_vm0, %v4565_v1 }
  0xb7   : > { %3467 = vmatmul.mubr.msk.bf16.gmra.mrb[4].mxu0 %vm680_vm0, %v2025_v44  ;;  %3379 = vmatpush3.bf16.msra.mxu1 %v3824_v63 }
  0xb8   : > { %3366 = vmatprep.mubr.msk.bf16.mxu1 %vm680_vm0, %v1088_v58  ;;  %3470 = vmatprep.mubr.msk.bf16.mxu0 %vm680_vm0, %v4322_v26  ;;  %v3072_v26 = vld [vmem:[%s4769_s0 + $0x120] sm:$0xff] }
  0xb9   : > { %3483 = vmatpush3.bf16.msra.mxu0 %v3825_v28  ;;  %3380 = vmatprep.subr.bf16.mxu1 %v3826_v15  ;;  %v2029_v4 = vpack.c.bf16 %v3073_v24, %v3072_v26  ;;  %v1326_v48 = vpack.c.bf16 %v3072_v26, %v4339_v40 }
  0xba   : > { %3484 = vmatprep.subr.bf16.mxu0 %v3827_v53 }
  0xbb   : > { %3381 = vmatpush3.bf16.msra.mxu1 %v3826_v15 }
  0xbc   : > { %3382 = vmatprep.subr.bf16.mxu1 %v3828_v10 }
  0xbd   : > { %3485 = vmatpush3.bf16.msra.mxu0 %v3827_v53 }
  0xbe   : > { %3367 = vmatmul.mubr.msk.bf16.gmra.mrb[8].mxu1 %vm680_vm0, %v4580_v30  ;;  %3486 = vmatprep.subr.bf16.mxu0 %v3829_v20 }
  0xbf   : > { %3471 = vmatmul.mubr.msk.bf16.gmra.mrb[8].mxu0 %vm680_vm0, %v4329_v37  ;;  %3370 = vmatprep.mubr.msk.bf16.mxu1 %vm680_vm0, %v4585_v17  ;;  %v1091_v37 = vpack.c.bf16 %v4509_v21, %v4483_v62 }
  0xc0   : > { %3474 = vmatprep.mubr.msk.bf16.mxu0 %vm680_vm0, %v4371_v50  ;;  %3383 = vmatpush3.bf16.msra.mxu1 %v3828_v10  ;;  %v3831_v50 = vld [vmem:[%s4150_s23 + $0x148] sm:$0xff]  }
  0xc1   : > { %3487 = vmatpush3.bf16.msra.mxu0 %v3829_v20  ;;  %3530 = vmatprep.subr.bf16.mxu1 %v3830_v18 }
  0xc2   : > { %3504 = vmatprep.subr.bf16.mxu0 %v3830_v18 }
  0xc6   : > { %3371 = vmatmul.mubr.msk.bf16.gmra.mrb[12].mxu1 %vm680_vm0, %v1091_v37 }
  0xc7   : > { %3475 = vmatmul.mubr.msk.bf16.gmra.mrb[12].mxu0 %vm680_vm0, %v2029_v4  ;;  %3384 = vmatprep.mubr.msk.bf16.mxu1 %vm680_vm0, %v1319_v35  ;;  %v3833_v35 = vld [vmem:[%s4150_s23 + $0x158] sm:$0xff]  }
  0xc8   : > { %3488 = vmatprep.mubr.msk.bf16.mxu0 %vm680_vm0, %v4400_v6 }
  0xce   : > { %3385 = vmatmul.mubr.msk.bf16.vlgmr.msra.gmra.mrb[0].mxu1 %vm680_vm0, %v1320_v36  ;;  %v3834_v36 = vld [vmem:[%s4150_s23 + $0x160] sm:$0xff]  }
  0xcf   : > { %3489 = vmatmul.mubr.msk.bf16.vlgmr.msra.gmra.mrb[0].mxu0 %vm680_vm0, %v4411_v16  ;;  %3535 = vmatpush3.bf16.msra.mxu1 %v3830_v18 }
  0xd0   : > { %3505 = vmatpush3.bf16.msra.mxu0 %v3830_v18  ;;  %3388 = vmatprep.mubr.msk.bf16.mxu1 %vm680_vm0, %v1321_v49  ;;  %v2263_v49 = vpack.c.bf16 %v3112_v47, %v4353_v43  ;;  %v4695_v43 = vld [vmem:[%s575_s11] ss:$0 sm:$0xff] }
  0xd1   : > { %3492 = vmatprep.mubr.msk.bf16.mxu0 %vm680_vm0, %v4450_v32  ;;  %3506 = vmatprep.subr.bf16.mxu0 %v3831_v50 }
  0xd2   : > { %3531 = vmatprep.subr.bf16.mxu1 %v3831_v50 }
  0xd3   : > { %3536 = vmatpush3.bf16.msra.mxu1 %v3831_v50 }
  0xd4   : > { %3507 = vmatpush3.bf16.msra.mxu0 %v3831_v50  ;;  %3532 = vmatprep.subr.bf16.mxu1 %v3832_v31 }
  0xd5   : > { %3508 = vmatprep.subr.bf16.mxu0 %v3832_v31 }
  0xd6   : > { %3389 = vmatmul.mubr.msk.bf16.gmra.mrb[4].mxu1 %vm680_vm0, %v1322_v33 }
  0xd7   : > { %3493 = vmatmul.mubr.msk.bf16.gmra.mrb[4].mxu0 %vm680_vm0, %v2259_v34  ;;  %3392 = vmatprep.mubr.msk.bf16.mxu1 %vm680_vm0, %v1323_v59  ;;  %v2497_v59 = vpack.c.bf16 %v3151_v54, %v4514_v22 }
  0xd8   : > { %3496 = vmatprep.mubr.msk.bf16.mxu0 %vm680_vm0, %v4487_v14  ;;  %3509 = vmatpush3.bf16.msra.mxu0 %v3832_v31 }
  0xd9   : > { %3537 = vmatpush3.bf16.msra.mxu1 %v3832_v31  ;;  %3510 = vmatprep.subr.bf16.mxu0 %v3833_v35 }
  0xda   : > { %3533 = vmatprep.subr.bf16.mxu1 %v3833_v35 }
  0xdc   : > { %3511 = vmatpush3.bf16.msra.mxu0 %v3833_v35 }
  0xdd   : > { %3538 = vmatpush3.bf16.msra.mxu1 %v3833_v35  ;;  %3512 = vmatprep.subr.bf16.mxu0 %v3834_v36 }
  0xde   : > { %3393 = vmatmul.mubr.msk.bf16.gmra.mrb[8].mxu1 %vm680_vm0, %v1324_v9  ;;  %3534 = vmatprep.subr.bf16.mxu1 %v3834_v36 }
  0xdf   : > { %3497 = vmatmul.mubr.msk.bf16.gmra.mrb[8].mxu0 %vm680_vm0, %v4494_v19  ;;  %3396 = vmatprep.mubr.msk.bf16.mxu1 %vm680_vm0, %v1325_v12 }
  0xe0   : > { %3500 = vmatprep.mubr.msk.bf16.mxu0 %vm680_vm0, %v4521_v29  ;;  %3513 = vmatpush3.bf16.msra.mxu0 %v3834_v36 }
  0xe1   : > { %3539 = vmatpush3.bf16.msra.mxu1 %v3834_v36 }
  0xe6   : > { %3397 = vmatmul.mubr.msk.bf16.gmra.mrb[12].mxu1 %vm680_vm0, %v1326_v48 }
  0xe7   : > { %3501 = vmatmul.mubr.msk.bf16.gmra.mrb[12].mxu0 %vm680_vm0, %v2263_v49  ;;  %3522 = vmatprep.mubr.msk.bf16.mxu1 %vm680_vm0, %v4580_v30 }
  0xe8   : > { %3514 = vmatprep.mubr.msk.bf16.mxu0 %vm680_vm0, %v4534_v25 }
  0xee   : > { %3523 = vmatmul.mubr.msk.bf16.vlgmr.msra.gmra.mrb[16].mxu1 %vm680_vm0, %v4585_v17 }
  0xef   : > { %3515 = vmatmul.mubr.msk.bf16.vlgmr.msra.gmra.mrb[0].mxu0 %vm680_vm0, %v4538_v41  ;;  %3526 = vmatprep.mubr.msk.bf16.mxu1 %vm680_vm0, %v1091_v37 }
  0xf0   : > { %3518 = vmatprep.mubr.msk.bf16.mxu0 %vm680_vm0, %v4565_v1 }
  0xf6   : > { %3527 = vmatmul.mubr.msk.bf16.gmra.mrb[20].mxu1 %vm680_vm0, %v2497_v59 }
  0xf7   : > { %3519 = vmatmul.mubr.msk.bf16.gmra.mrb[4].mxu0 %vm680_vm0, %v2493_v0 }
 0x1a1   : > { %v3386_v2 = vpop.f32.mrb[0].mxu1 }
 0x1a2   : > { %v1442_v3 = vpop.f32.mrb[1].mxu1  ;;  %v3542_v10 = vadd.f32 %v3386_v2, %v4695_v43 }
 0x1a3   : > { %v3387_v5 = vpop.f32.mrb[2].mxu1  ;;  %v3548_v20 = vadd.f32 %v4695_v43, %v1442_v3 }
 0x1a4   : > { %v1445_v7 = vpop.f32.mrb[3].mxu1  ;;  %v3554_v24 = vadd.f32 %v3387_v5, %v4695_v43 }
 0x1a5   : > { %v3560_v31 = vadd.f32 %v4695_v43, %v1445_v7 }
 0x1a9   : > { %v4683_v8 = vpop.f32.mrb[4].mxu1 }
 0x1aa   : > { %v4686_v9 = vpop.f32.mrb[5].mxu1  ;;  %v3566_v55 = vadd.f32 %v4683_v8, %v4695_v43 }
 0x1ab   : > { %v4688_v12 = vpop.f32.mrb[6].mxu1  ;;  %v3572_v0 = vadd.f32 %v4695_v43, %v4686_v9 }
 0x1ac   : > { %v4690_v40 = vpop.f32.mrb[7].mxu1  ;;  %v3578_v7 = vadd.f32 %v4688_v12, %v4695_v43 }
 0x1ad   : > { %v3584_v8 = vadd.f32 %v4695_v43, %v4690_v40 }
 0x1b1   : > { %v3394_v6 = vpop.f32.mrb[8].mxu1 }
 0x1b2   : > { %v3590_v16 = vadd.f32 %v3394_v6, %v4695_v43  ;;  %v3498_v51 = vpop.f32.mrb[8].mxu0  ;;  %v1474_v32 = vpop.f32.mrb[9].mxu1 }
 0x1b3   : > { %v3599_v11 = vadd.f32 %v4695_v43, %v1474_v32  ;;  %v2411_v60 = vpop.f32.mrb[9].mxu0  ;;  %v3395_v62 = vpop.f32.mrb[10].mxu1 }
 0x1b4   : > { %v3593_v14 = vadd.f32 %v3590_v16, %v3498_v51  ;;  %v3608_v19 = vadd.f32 %v3395_v62, %v4695_v43  ;;  %v3499_v52 = vpop.f32.mrb[10].mxu0  ;;  %v1477_v57 = vpop.f32.mrb[11].mxu1 }
 0x1b5   : > { %v3602_v13 = vadd.f32 %v3599_v11, %v2411_v60  ;;  %v3617_v21 = vadd.f32 %v4695_v43, %v1477_v57  ;;  %v2414_v22 = vpop.f32.mrb[11].mxu0 }
 0x1b6   : > { %v3611_v23 = vadd.f32 %v3608_v19, %v3499_v52 }
 0x1b7   : > { %v3620_v29 = vadd.f32 %v3617_v21, %v2414_v22 }
 0x1b9   : > { %v3398_v38 = vpop.f32.mrb[12].mxu1 }
 0x1ba   : > { %v3626_v39 = vadd.f32 %v3398_v38, %v4695_v43  ;;  %v3502_v25 = vpop.f32.mrb[12].mxu0  ;;  %v1490_v41 = vpop.f32.mrb[13].mxu1 }
 0x1bb   : > { %v3635_v45 = vadd.f32 %v4695_v43, %v1490_v41  ;;  %v2427_v42 = vpop.f32.mrb[13].mxu0  ;;  %v3399_v56 = vpop.f32.mrb[14].mxu1 }
 0x1bc   : > { %v3629_v46 = vadd.f32 %v3626_v39, %v3502_v25  ;;  %v3644_v63 = vadd.f32 %v3399_v56, %v4695_v43  ;;  %v3503_v61 = vpop.f32.mrb[14].mxu0  ;;  %v1493_v28 = vpop.f32.mrb[15].mxu1 }
 0x1bd   : > { %v3638_v1 = vadd.f32 %v3635_v45, %v2427_v42  ;;  %v3653_v44 = vadd.f32 %v4695_v43, %v1493_v28  ;;  %v2430_v58 = vpop.f32.mrb[15].mxu0 }
 0x1be   : > { %v3647_v15 = vadd.f32 %v3644_v63, %v3503_v61 }
 0x1bf   : > { %v3656_v53 = vadd.f32 %v3653_v44, %v2430_v58 }
 0x1c1   : > { %v3524_v30 = vpop.f32.mrb[16].mxu1 }
 0x1c2   : > { %v3516_v17 = vpop.f32.mrb[0].mxu0  ;;  %v3596_v18 = vadd.f32 %v3593_v14, %v3524_v30  ;;  %v2645_v26 = vpop.f32.mrb[17].mxu1 }
 0x1c3   : > { %v3545_v37 = vadd.f32 %v3542_v10, %v3516_v17  ;;  %v2613_v4 = vpop.f32.mrb[1].mxu0  ;;  %v3605_v50 = vadd.f32 %v3602_v13, %v2645_v26  ;;  %v3525_v27 = vpop.f32.mrb[18].mxu1 }
 0x1c4   : > { %v3551_v33 = vadd.f32 %v3548_v20, %v2613_v4  ;;  %v3517_v34 = vpop.f32.mrb[2].mxu0  ;;  %2702 = vst [vmem:[%s4711_s12 + $0x50] sm:$0xff] %v3596_v18  ;;  %v3614_v35 = vadd.f32 %v3611_v23, %v3525_v27  ;;  %v2648_v36 = vpop.f32.mrb[19].mxu1 }
 0x1c5   : > { %2694 = vst [vmem:[%s4711_s12 + $0x10] sm:$0xff] %v3545_v37  ;;  %v3557_v47 = vadd.f32 %v3554_v24, %v3517_v34  ;;  %v2616_v48 = vpop.f32.mrb[3].mxu0  ;;  %2700 = vst [vmem:[%s4711_s12 + $0x40] sm:$0xff] %v3605_v50  ;;  %v3623_v49 = vadd.f32 %v3620_v29, %v2648_v36 }
 0x1c6   : > { %2692 = vst [vmem:[%s4711_s12] sm:$0xff] %v3551_v33  ;;  %v3563_v54 = vadd.f32 %v3560_v31, %v2616_v48  ;;  %2703 = vst [vmem:[%s4711_s12 + $0x58] sm:$0xff] %v3614_v35 }
 0x1c7   : > { %2695 = vst [vmem:[%s4711_s12 + $0x18] sm:$0xff] %v3557_v47  ;;  %2701 = vst [vmem:[%s4711_s12 + $0x48] sm:$0xff] %v3623_v49 }
 0x1c8   : > { %2693 = vst [vmem:[%s4711_s12 + $0x8] sm:$0xff] %v3563_v54 }
 0x1c9   : > { %v3528_v59 = vpop.f32.mrb[20].mxu1 }
 0x1ca   : > { %v3520_v2 = vpop.f32.mrb[4].mxu0  ;;  %v3632_v3 = vadd.f32 %v3629_v46, %v3528_v59  ;;  %v2661_v5 = vpop.f32.mrb[21].mxu1  ;;  %2714 = sbr.rel (!%p3910_p5) target bundleno = 473 (0x1d9), region = 77 }
 0x1cb   : > { %v3569_v6 = vadd.f32 %v3566_v55, %v3520_v2  ;;  %v2629_v16 = vpop.f32.mrb[5].mxu0  ;;  %v3641_v51 = vadd.f32 %v3638_v1, %v2661_v5  ;;  %v3529_v32 = vpop.f32.mrb[22].mxu1  ;;  %v2794_v25 = vld [vmem:[%s4711_s12 + $0x50] sm:$0xff] (%p3910_p5) }
 0x1cc   : > { %v3575_v9 = vadd.f32 %v3572_v0, %v2629_v16  ;;  %v3521_v11 = vpop.f32.mrb[6].mxu0  ;;  %2706 = vst [vmem:[%s4711_s12 + $0x70] sm:$0xff] %v3632_v3  ;;  %v3650_v60 = vadd.f32 %v3647_v15, %v3529_v32  ;;  %v2664_v62 = vpop.f32.mrb[23].mxu1  ;;  %v2778_v57 = vld [vmem:[%s4711_s12 + $0x10] sm:$0xff] (%p3910_p5)  ;;  %v2790_v38 = vld [vmem:[%s4711_s12 + $0x40] sm:$0xff] (%p3910_p5)  ;;  %2795 = vst [vmem:[%s2716_s21 + $0x140] sm:$0xff] (%p3910_p5), %v2794_v25 }
 0x1cd   : > { %2698 = vst [vmem:[%s4711_s12 + $0x30] sm:$0xff] %v3569_v6  ;;  %v3581_v14 = vadd.f32 %v3578_v7, %v3521_v11  ;;  %v2632_v12 = vpop.f32.mrb[7].mxu0  ;;  %2704 = vst [vmem:[%s4711_s12 + $0x60] sm:$0xff] %v3641_v51  ;;  %v3659_v19 = vadd.f32 %v3656_v53, %v2664_v62  ;;  %v2774_v40 = vld [vmem:[%s4711_s12] sm:$0xff] (%p3910_p5)  ;;  %v2796_v41 = vld [vmem:[%s4711_s12 + $0x58] sm:$0xff] (%p3910_p5) }
 0x1ce   : > { %2696 = vst [vmem:[%s4711_s12 + $0x20] sm:$0xff] %v3575_v9  ;;  %v3587_v52 = vadd.f32 %v3584_v8, %v2632_v12  ;;  %2707 = vst [vmem:[%s4711_s12 + $0x78] sm:$0xff] %v3650_v60  ;;  %v2780_v13 = vld [vmem:[%s4711_s12 + $0x18] sm:$0xff] (%p3910_p5)  ;;  %v2792_v39 = vld [vmem:[%s4711_s12 + $0x48] sm:$0xff] (%p3910_p5) }
 0x1cf   : > { %2699 = vst [vmem:[%s4711_s12 + $0x38] sm:$0xff] %v3581_v14  ;;  %2705 = vst [vmem:[%s4711_s12 + $0x68] sm:$0xff] %v3659_v19  ;;  %v2776_v43 = vld [vmem:[%s4711_s12 + $0x8] sm:$0xff] (%p3910_p5) }
 0x1d0   : > { %2697 = vst [vmem:[%s4711_s12 + $0x28] sm:$0xff] %v3587_v52  ;;  %2775 = vst [vmem:[%s2716_s21] sm:$0xff] (%p3910_p5), %v2774_v40 }
 0x1d1   : > { %2777 = vst [vmem:[%s2716_s21 + $0x20] sm:$0xff] %v2776_v43  ;;  %2779 = vst [vmem:[%s2716_s21 + $0x40] sm:$0xff] %v2778_v57 }
 0x1d2   : > { %2781 = vst [vmem:[%s2716_s21 + $0x60] sm:$0xff] %v2780_v13  ;;  %2791 = vst [vmem:[%s2716_s21 + $0x100] sm:$0xff] %v2790_v38 }
 0x1d3   : > { %2793 = vst [vmem:[%s2716_s21 + $0x120] sm:$0xff] %v2792_v39  ;;  %2797 = vst [vmem:[%s2716_s21 + $0x160] sm:$0xff] %v2796_v41  ;;  %v2802_v56 = vld [vmem:[%s4711_s12 + $0x70] sm:$0xff] }
 0x1d4   : > { %v2786_v23 = vld [vmem:[%s4711_s12 + $0x30] sm:$0xff]  ;;  %v2798_v45 = vld [vmem:[%s4711_s12 + $0x60] sm:$0xff]  ;;  %2803 = vst [vmem:[%s2716_s21 + $0x1c0] sm:$0xff] %v2802_v56 }
 0x1d5   : > { %v2782_v21 = vld [vmem:[%s4711_s12 + $0x20] sm:$0xff]  ;;  %2787 = vst [vmem:[%s2716_s21 + $0xc0] sm:$0xff] %v2786_v23  ;;  %2799 = vst [vmem:[%s2716_s21 + $0x180] sm:$0xff] %v2798_v45  ;;  %v2804_v46 = vld [vmem:[%s4711_s12 + $0x78] sm:$0xff] }
 0x1d6   : > { %2783 = vst [vmem:[%s2716_s21 + $0x80] sm:$0xff] %v2782_v21  ;;  %v2788_v29 = vld [vmem:[%s4711_s12 + $0x38] sm:$0xff]  ;;  %v2800_v42 = vld [vmem:[%s4711_s12 + $0x68] sm:$0xff]  ;;  %2805 = vst [vmem:[%s2716_s21 + $0x1e0] sm:$0xff] %v2804_v46 }
 0x1d7   : > { %v2784_v22 = vld [vmem:[%s4711_s12 + $0x28] sm:$0xff]  ;;  %2789 = vst [vmem:[%s2716_s21 + $0xe0] sm:$0xff] %v2788_v29  ;;  %2801 = vst [vmem:[%s2716_s21 + $0x1a0] sm:$0xff] %v2800_v42 }
 0x1d8   : > { %2785 = vst [vmem:[%s2716_s21 + $0xa0] sm:$0xff] %v2784_v22 }
 0x1d9 PF: > { %p10_p11 = scmp.ge.s32.totalorder %s3898_s16, 6   ;;  %s4774_s12 = smov %s3853_s13 }
 0x1da   : > { %s4775_s13 = smov %s3908_s19  ;;  %s4776_s14 = smov %s3898_s16 }
 0x1db   :  { %12 = sbr.rel (!%p10_p11) target bundleno = 2 (0x2), region = 159 }

// kernel: bottleneck_forward.6
= control target key start
LH: loop header
LB: loop body
LE: loop exit
PB: predicated region body
PF: predicated region fallthrough
CT: control target
= control target key end

     0   :  { %14 = vsyncpa [#allocation3], 0  ;;  %s4200_s0 = inlined_call_operand.vmem [shape: f32[2,10,10,20], index: 0, kind: input, shape index: {}]   ;;  %s4201_s1 = inlined_call_operand.hbm [shape: bf16[9,20,20], index: 1, kind: input, shape index: {}]   ;;  %s4202_s2 = inlined_call_operand.hbm [shape: f32[1,20], index: 2, kind: input, shape index: {}]   ;;  %s4203_s3 = inlined_call_operand.hbm [shape: bf16[20,80], index: 3, kind: input, shape index: {}]   ;;  %s4204_s4 = inlined_call_operand.hbm [shape: f32[1,80], index: 4, kind: input, shape index: {}]   ;;  %s4205_s5 = inlined_call_operand.vmem [shape: f32[80,5], index: 5, kind: input, shape index: {}]   ;;  %s4206_s6 = inlined_call_operand.hbm [shape: f32[1,5], index: 6, kind: input, shape index: {}]   ;;  %s4207_s7 = inlined_call_operand.hbm [shape: f32[5,80], index: 7, kind: input, shape index: {}]   ;;  %s4208_s8 = inlined_call_operand.hbm [shape: f32[1,80], index: 8, kind: input, shape index: {}]   ;;  %s4209_s9 = inlined_call_operand.vmem [shape: f32[128,80], index: 9, kind: output, shape index: {}]  }
   0x1   :  { %15 = vsyncpa [#allocation5], 0 }
   0x2   :  { %16 = vsyncpa [#allocation8], 0 }
   0x3   :  { %17 = vsyncpa [#allocation11], 0  ;;  %s3334_s30 = smov [#allocation4]   ;;  %s3335_s11 = smov [#allocation7]  }
   0x4   :  { %s38_s10 = sshll.u32 %s3334_s30, 4  ;;  %s60_s12 = sshll.u32 %s3335_s11, 4  ;;  %s39_s10 = int_to_ptr.vmem [resolvable:$true] %s38_s10  ;;  %s61_s12 = int_to_ptr.vmem [resolvable:$true] %s60_s12 }
   0x5   :  { %s3172_s15 = scalar_lea.hbm %s4202_s2, 16 }
   0x6   :  { %p3173_p0 = scmp.ne.s32.totalorder %s4202_s2, %s3172_s15  ;;  %p3176_p1 = scmp.lt.u32.totalorder %s3172_s15, %s4202_s2 }
   0x8   :  { %p3178_p2 = pnand %p3176_p1, %p3173_p0 }
   0xa   :  { %3181 = shalt.err (!%p3178_p2)
}
   0xb   :  { %s3182_s20 = scalar_lea.vmem %s39_s10, 16  ;;  %s3186_s21 = scalar_lea.vmem %s39_s10, 32 }
   0xc   :  { %p3183_p3 = scmp.ne.s32.totalorder %s39_s10, %s3182_s20  ;;  %p3187_p4 = scmp.lt.s32.totalorder %s39_s10, %s39_s10 }
   0xd   :  { %p3188_p5 = scmp.lt.s32.totalorder %s3186_s21, %s3182_s20 }
   0xf   :  { %p3189_p6 = por %p3188_p5, %p3187_p4 }
  0x11   :  { %p3190_p7 = pnand %p3189_p6, %p3183_p3 }
  0x13   :  { %3193 = shalt.err (!%p3190_p7)
}
  0x14   :  { %41 = dma.hbm_to_vmem [thread:$0]  %s4202_s2, 16, %s39_s10, [#allocation5]  }
  0x15   :  { %s3194_s26 = scalar_lea.hbm %s4204_s4, 16 }
  0x16   :  { %p3195_p8 = scmp.ne.s32.totalorder %s4204_s4, %s3194_s26  ;;  %p3198_p9 = scmp.lt.u32.totalorder %s3194_s26, %s4204_s4 }
  0x18   :  { %p3200_p10 = pnand %p3198_p9, %p3195_p8 }
  0x1a   :  { %3203 = shalt.err (!%p3200_p10)
}
  0x1b   :  { %s3204_s11 = scalar_lea.vmem %s61_s12, 16  ;;  %s3208_s13 = scalar_lea.vmem %s61_s12, 32 }
  0x1c   :  { %p3205_p11 = scmp.ne.s32.totalorder %s61_s12, %s3204_s11  ;;  %p3209_p12 = scmp.lt.s32.totalorder %s61_s12, %s61_s12 }
  0x1d   :  { %p3210_p13 = scmp.lt.s32.totalorder %s3208_s13, %s3204_s11 }
  0x1f   :  { %p3211_p0 = por %p3210_p13, %p3209_p12 }
  0x21   :  { %p3212_p1 = pnand %p3211_p0, %p3205_p11 }
  0x23   :  { %3215 = shalt.err (!%p3212_p1)
}
  0x24   :  { %63 = dma.hbm_to_vmem [thread:$0]  %s4204_s4, 16, %s61_s12, [#allocation8]  }
  0x25   :  { %s3336_s14 = smov [#allocation10]   ;;  %s3337_s16 = smov [#allocation2]  }
  0x26   :  { %s82_s15 = sshll.u32 %s3336_s14, 4  ;;  %s25_s17 = sshll.u32 %s3337_s16, 4  ;;  %s83_s15 = int_to_ptr.vmem [resolvable:$true] %s82_s15  ;;  %s3421_s17 = int_to_ptr.vmem [resolvable:$true] %s25_s17 }
  0x27   :  { %s3216_s20 = scalar_lea.hbm %s4207_s7, 128 }
  0x28   :  { %p3217_p2 = scmp.ne.s32.totalorder %s4207_s7, %s3216_s20  ;;  %p3220_p3 = scmp.lt.u32.totalorder %s3216_s20, %s4207_s7 }
  0x2a   :  { %p3222_p4 = pnand %p3220_p3, %p3217_p2 }
  0x2c   :  { %3225 = shalt.err (!%p3222_p4)
}
  0x2d   :  { %s3226_s4 = scalar_lea.vmem %s83_s15, 128  ;;  %p3231_p6 = scmp.lt.s32.totalorder %s83_s15, %s83_s15 }
  0x2e   :  { %p3227_p5 = scmp.ne.s32.totalorder %s83_s15, %s3226_s4  ;;  %p3232_p7 = scmp.lt.s32.totalorder %s3226_s4, %s3226_s4 }
  0x30   :  { %p3233_p8 = por %p3232_p7, %p3231_p6 }
  0x32   :  { %p3234_p9 = pnand %p3233_p8, %p3227_p5 }
  0x34   :  { %3237 = shalt.err (!%p3234_p9)
}
  0x35   :  { %85 = dma.hbm_to_vmem [thread:$0]  %s4207_s7, 128, %s83_s15, [#allocation11]  }
  0x36   :  { %s3238_s28 = scalar_lea.hbm %s4201_s1, 1728 }
  0x37   :  { %p3239_p10 = scmp.ne.s32.totalorder %s4201_s1, %s3238_s28  ;;  %p3242_p11 = scmp.lt.u32.totalorder %s3238_s28, %s4201_s1 }
  0x39   :  { %p3244_p12 = pnand %p3242_p11, %p3239_p10 }
  0x3b   :  { %3247 = shalt.err (!%p3244_p12)
}
  0x3c   :  { %s3248_s2 = scalar_lea.vmem %s3421_s17, 1728  ;;  %p3253_p0 = scmp.lt.s32.totalorder %s3421_s17, %s3421_s17 }
  0x3d   :  { %p3249_p13 = scmp.ne.s32.totalorder %s3421_s17, %s3248_s2  ;;  %p3254_p1 = scmp.lt.s32.totalorder %s3248_s2, %s3248_s2 }
  0x3f   :  { %p3255_p2 = por %p3254_p1, %p3253_p0 }
  0x41   :  { %p3256_p3 = pnand %p3255_p2, %p3249_p13 }
  0x43   :  { %3259 = shalt.err (!%p3256_p3)
}
  0x44   :  { %s3338_s7 = smov 64   ;;  %s3339_s10 = smov 4  }
  0x45   :  { %31 = dma.hbm_to_vmem [thread:$0]  %s4201_s1, 1728, %s3421_s17, [#allocation3], %s3338_s7, %s3338_s7, %s3339_s10  }
  0x46   :  { %s3340_s16 = smov [#allocation6]   ;;  %s3341_s19 = smov [#allocation9]  }
  0x47   :  { %s47_s18 = sshll.u32 %s3340_s16, 4  ;;  %s72_s20 = sshll.u32 %s3341_s19, 4  ;;  %s48_s18 = int_to_ptr.vmem [resolvable:$true] %s47_s18  ;;  %s73_s20 = int_to_ptr.vmem [resolvable:$true] %s72_s20 }
  0x48   :  { %s3260_s23 = scalar_lea.hbm %s4203_s3, 192 }
  0x49   :  { %p3261_p4 = scmp.ne.s32.totalorder %s4203_s3, %s3260_s23  ;;  %p3264_p5 = scmp.lt.u32.totalorder %s3260_s23, %s4203_s3 }
  0x4b   :  { %p3266_p6 = pnand %p3264_p5, %p3261_p4 }
  0x4d   :  { %3269 = shalt.err (!%p3266_p6)
}
  0x4e   :  { %s3270_s1 = scalar_lea.vmem %s48_s18, 192  ;;  %p3275_p8 = scmp.lt.s32.totalorder %s48_s18, %s48_s18 }
  0x4f   :  { %p3271_p7 = scmp.ne.s32.totalorder %s48_s18, %s3270_s1  ;;  %p3276_p9 = scmp.lt.s32.totalorder %s3270_s1, %s3270_s1 }
  0x51   :  { %p3277_p10 = por %p3276_p9, %p3275_p8 }
  0x53   :  { %p3278_p11 = pnand %p3277_p10, %p3271_p7 }
  0x55   :  { %3281 = shalt.err (!%p3278_p11)
}
  0x56   :  { %53 = dma.hbm_to_vmem [thread:$0]  %s4203_s3, 192, %s48_s18, [#allocation5], %s3338_s7, %s3338_s7, %s3339_s10  }
  0x57   :  { %s3282_s29 = scalar_lea.hbm %s4206_s6, 16 }
  0x58   :  { %p3283_p12 = scmp.ne.s32.totalorder %s4206_s6, %s3282_s29  ;;  %p3286_p13 = scmp.lt.u32.totalorder %s3282_s29, %s4206_s6 }
  0x5a   :  { %p3288_p0 = pnand %p3286_p13, %p3283_p12 }
  0x5c   :  { %3291 = shalt.err (!%p3288_p0)
}
  0x5d   :  { %s3292_s14 = scalar_lea.vmem %s73_s20, 16  ;;  %s3296_s15 = scalar_lea.vmem %s73_s20, 32 }
  0x5e   :  { %p3293_p1 = scmp.ne.s32.totalorder %s73_s20, %s3292_s14  ;;  %p3297_p2 = scmp.lt.s32.totalorder %s73_s20, %s73_s20 }
  0x5f   :  { %p3298_p3 = scmp.lt.s32.totalorder %s3296_s15, %s3292_s14 }
  0x61   :  { %p3299_p4 = por %p3298_p3, %p3297_p2 }
  0x63   :  { %p3300_p5 = pnand %p3299_p4, %p3293_p1 }
  0x65   :  { %3303 = shalt.err (!%p3300_p5)
}
  0x66   :  { %75 = dma.hbm_to_vmem [thread:$0]  %s4206_s6, 16, %s73_s20, [#allocation8]  }
  0x67   :  { %s3342_s10 = smov [#allocation12]   ;;  %s3304_s21 = scalar_lea.hbm %s4208_s8, 16 }
  0x68   :  { %s92_s16 = sshll.u32 %s3342_s10, 4  ;;  %p3305_p6 = scmp.ne.s32.totalorder %s4208_s8, %s3304_s21  ;;  %s93_s16 = int_to_ptr.vmem [resolvable:$true] %s92_s16 }
  0x69   :  { %p3308_p7 = scmp.lt.u32.totalorder %s3304_s21, %s4208_s8 }
  0x6b   :  { %p3310_p8 = pnand %p3308_p7, %p3305_p6 }
  0x6d   :  { %3313 = shalt.err (!%p3310_p8)
}
  0x6e   :  { %s3314_s12 = scalar_lea.vmem %s93_s16, 16  ;;  %s3318_s6 = scalar_lea.vmem %s93_s16, 32 }
  0x6f   :  { %p3315_p9 = scmp.ne.s32.totalorder %s93_s16, %s3314_s12  ;;  %p3319_p10 = scmp.lt.s32.totalorder %s93_s16, %s93_s16 }
  0x70   :  { %p3320_p11 = scmp.lt.s32.totalorder %s3318_s6, %s3314_s12 }
  0x72   :  { %p3321_p12 = por %p3320_p11, %p3319_p10 }
  0x74   :  { %p3322_p13 = pnand %p3321_p12, %p3315_p9 }
  0x76   :  { %3325 = shalt.err (!%p3322_p13)
}
  0x77   :  { %95 = dma.hbm_to_vmem [thread:$0]  %s4208_s8, 16, %s93_s16, [#allocation11]  }
  0x78   :  { %3326 = dma.done.wait [#allocation3], 1728  }
  0x79   :  { %3327 = vsyncadd [#allocation3], 4294965568 }
  0x7a   :  { %3328 = dma.done.wait [#allocation5], 208  }
  0x7b   :  { %3329 = vsyncadd [#allocation5], 4294967088 }
  0x7c   :  { %3330 = dma.done.wait [#allocation8], 32  }
  0x7d   :  { %3331 = vsyncadd [#allocation8], 4294967264 }
  0x7e   :  { %3332 = dma.done.wait [#allocation11], 144  }
  0x7f   :  { %3333 = vsyncadd [#allocation11], 4294967152  ;;  %v3148_v0 = vld [vmem:[#allocation2 + $0xc] sm:$0xff]   ;;  %vm207_vm0 = vcmask 1041408   ;;  %v3488_v1 = vld [vmem:[#allocation2 + $0x24] sm:$0xff]   ;;  %vm182_vm1 = vcmask 162816  }
  0x80   :  { %2702 = vmatprep.subr.bf16.mxu1 %v3148_v0  ;;  %v3150_v2 = vld [vmem:[#allocation2 + $0x14] ss:$0 sps:$4 sm:$0x33]   ;;  %v145_v3 = vld [vmem:[%s4200_s0 + $0x1] sm:$0xff]  ;;  %2762 = vmatprep.subr.bf16.mxu0 %v3488_v1  ;;  %v3159_v48 = vld [vmem:[#allocation2 + $0x18] sm:$0xff]   ;;  %vm3344_vm2 = vmmov 0  }
  0x81   :  { %2703 = vmatpush3.bf16.msra.mxu1 %v3148_v0  ;;  %v3494_v4 = vld [vmem:[#allocation2 + $0x2c] ss:$0 sps:$4 sm:$0x33]   ;;  %v146_v5 = vld [vmem:[%s4200_s0 + $0x11] sm:$0xff]  ;;  %2763 = vmatpush3.bf16.msra.mxu0 %v3488_v1  ;;  %v209_v6 = vsel %vm207_vm0, %v3150_v2, 0  ;;  %v3510_v9 = vld [vmem:[%s4200_s0 + $0x20] sm:$0xff] }
  0x82   :  { %3124 = vmatprep.subr.msk.bf16.mxu1 %vm207_vm0, %v3150_v2  ;;  %v161_v7 = vpack.c.bf16 %v146_v5, %v145_v3  ;;  %v3505_v8 = vld [vmem:[%s4200_s0 + $0x10] sm:$0xff]  ;;  %v147_v10 = vld [vmem:[%s4200_s0 + $0x21] sm:$0xff]  ;;  %3127 = vmatprep.subr.msk.bf16.mxu0 %vm207_vm0, %v3494_v4  ;;  %v3519_v11 = vsel %vm207_vm0, %v3494_v4, 0  ;;  %v3153_v27 = vld [vmem:[#allocation2 + $0x38] ss:$0 sps:$4 sm:$0x33]  }
  0x83   :  { %v635_v12 = vpack.c.bf16 %v3510_v9, %v3505_v8  ;;  %v148_v13 = vld [vmem:[%s4200_s0 + $0x31] sm:$0xff]  ;;  %v3534_v15 = vld [vmem:[%s4200_s0 + $0x40] sm:$0xff]  ;;  %v858_v32 = vsel %vm207_vm0, %v3153_v27, 0  ;;  %v3156_v38 = vld [vmem:[#allocation2 + $0x8] ss:$0 sps:$4 sm:$0x33]   ;;  %v812_v39 = vpack.c.bf16 %v147_v10, %v146_v5 }
  0x84   :  { %v3529_v14 = vld [vmem:[%s4200_s0 + $0x30] sm:$0xff]  ;;  %2706 = vmatprep.mubr.msk.bf16.mxu1 %vm182_vm1, %v161_v7  ;;  %v3537_v16 = vpack.c.bf16 %v148_v13, %v147_v10  ;;  %v149_v19 = vld [vmem:[%s4200_s0 + $0x41] sm:$0xff]  ;;  %v342_v40 = vsel %vm207_vm0, %v3156_v38, 0  ;;  %v3160_v2 = vld [vmem:[#allocation2 + $0x20] ss:$0 sps:$4 sm:$0x33]  }
  0x85   :  { %v3152_v17 = vld [vmem:[#allocation2 + $0x30] sm:$0xff]   ;;  %2705 = vmatpush3.bf16.msra.mxu1 %v209_v6  ;;  %2766 = vmatprep.mubr.msk.bf16.mxu0 %vm182_vm1, %v635_v12  ;;  %v636_v18 = vpack.c.bf16 %v3534_v15, %v3529_v14  ;;  %v3559_v23 = vld [vmem:[%s4200_s0 + $0x60] sm:$0xff]  ;;  %v813_v46 = vpack.c.bf16 %v149_v19, %v148_v13  ;;  %v3158_v56 = vld [vmem:[#allocation2 + $0x48] sm:$0xff]   ;;  %v3653_v61 = vpack.c.bf16 %v3529_v14, %v3510_v9  ;;  %v503_v9 = vsel %vm207_vm0, %v3160_v2, 0 }
  0x86   :  { %v150_v20 = vld [vmem:[%s4200_s0 + $0x51] sm:$0xff]  ;;  %2765 = vmatpush3.bf16.msra.mxu0 %v3519_v11  ;;  %v151_v25 = vld [vmem:[%s4200_s0 + $0x61] sm:$0xff]  ;;  %vm1872_vm3 = vcmask 654336   ;;  %vm1979_vm4 = vcmask 1041409   ;;  %vm2066_vm5 = vcmask 1044480   ;;  %vm2062_vm6 = vcmask 39936  }
  0x87   :  { %v3551_v21 = vld [vmem:[%s4200_s0 + $0x50] sm:$0xff]  ;;  %v3554_v22 = vpack.c.bf16 %v150_v20, %v149_v19  ;;  %2782 = vmatprep.subr.bf16.mxu0 %v3152_v17  ;;  %v3582_v29 = vld [vmem:[%s4200_s0 + $0x80] sm:$0xff]  ;;  %v814_v49 = vpack.c.bf16 %v151_v25, %v150_v20 }
  0x88   :  { %v637_v24 = vpack.c.bf16 %v3559_v23, %v3551_v21  ;;  %2707 = vmatmul.mubr.msk.bf16.vlgmr.msra.gmra.mrb[0].mxu1 %vm182_vm1, %v3537_v16  ;;  %v152_v26 = vld [vmem:[%s4200_s0 + $0x71] sm:$0xff]  ;;  %v153_v30 = vld [vmem:[%s4200_s0 + $0xa1] sm:$0xff]  ;;  %v3657_v63 = vpack.c.bf16 %v3551_v21, %v3534_v15 }
  0x89   :  { %2767 = vmatmul.mubr.msk.bf16.vlgmr.msra.gmra.mrb[0].mxu0 %vm182_vm1, %v636_v18  ;;  %2710 = vmatprep.mubr.msk.bf16.mxu1 %vm182_vm1, %v3554_v22  ;;  %v3577_v28 = vld [vmem:[%s4200_s0 + $0x70] sm:$0xff]  ;;  %v3154_v33 = vld [vmem:[#allocation2 + $0x3c] sm:$0xff]   ;;  %v3593_v34 = vpack.c.bf16 %v152_v26, %v151_v25  ;;  %v3157_v50 = vld [vmem:[#allocation2 + $0x44] ss:$0 sps:$4 sm:$0x33]  }
  0x8a   :  { %2783 = vmatpush3.bf16.msra.mxu0 %v3152_v17  ;;  %2770 = vmatprep.mubr.msk.bf16.mxu0 %vm182_vm1, %v637_v24  ;;  %v154_v31 = vld [vmem:[%s4200_s0 + $0xb1] sm:$0xff]  ;;  %v3155_v35 = vld [vmem:[#allocation2] sm:$0xff]   ;;  %v638_v36 = vpack.c.bf16 %v3582_v29, %v3577_v28  ;;  %v1035_v55 = vsel %vm207_vm0, %v3157_v50, 0  ;;  %v3688_v10 = vpack.c.bf16 %v3577_v28, %v3559_v23 }
  0x8b   :  { %3129 = vmatprep.subr.msk.bf16.mxu0 %vm207_vm0, %v3153_v27  ;;  %v165_v37 = vpack.c.bf16 %v154_v31, %v153_v30  ;;  %2722 = vmatprep.subr.bf16.mxu1 %v3155_v35  ;;  %v155_v41 = vld [vmem:[%s4200_s0 + $0xc1] sm:$0xff]  ;;  %v156_v42 = vld [vmem:[%s4200_s0 + $0xd1] sm:$0xff]  ;;  %v3161_v30 = vld [vmem:[#allocation2 + $0x50] ss:$0 sps:$4 sm:$0x33]  }
  0x8c   :  { %2723 = vmatpush3.bf16.msra.mxu1 %v3155_v35  ;;  %v157_v43 = vld [vmem:[%s4200_s0 + $0xe1] sm:$0xff]  ;;  %v158_v44 = vld [vmem:[%s4200_s0 + $0xf1] sm:$0xff]  ;;  %v3616_v45 = vpack.c.bf16 %v156_v42, %v155_v41  ;;  %v816_v60 = vpack.c.bf16 %v155_v41, %v154_v31 }
  0x8d   :  { %3125 = vmatprep.subr.msk.bf16.mxu1 %vm207_vm0, %v3156_v38  ;;  %v3618_v47 = vpack.c.bf16 %v158_v44, %v157_v43  ;;  %v159_v51 = vld [vmem:[%s4200_s0 + $0x101] sm:$0xff]  ;;  %v160_v52 = vld [vmem:[%s4200_s0 + $0x111] sm:$0xff]  ;;  %v817_v62 = vpack.c.bf16 %v157_v43, %v156_v42 }
  0x8e   :  { %2785 = vmatpush3.bf16.msra.mxu0 %v858_v32  ;;  %v3635_v53 = vld [vmem:[%s4200_s0 + $0x81] sm:$0xff]  ;;  %v3642_v57 = vpack.c.bf16 %v160_v52, %v159_v51  ;;  %v818_v0 = vpack.c.bf16 %v159_v51, %v158_v44  ;;  %v3676_v6 = vld [vmem:[%s4200_s0 + $0xb0] sm:$0xff] }
  0x8f   :  { %2802 = vmatprep.subr.bf16.mxu0 %v3154_v33  ;;  %v118_v54 = vld [vmem:[%s4200_s0] sm:$0xff]  ;;  %v815_v58 = vpack.c.bf16 %v3635_v53, %v152_v26  ;;  %v2451_v7 = vld [vmem:[%s4200_s0 + $0x12] sm:$0xff] }
  0x90   :  { %2711 = vmatmul.mubr.msk.bf16.gmra.mrb[4].mxu1 %vm182_vm1, %v3593_v34  ;;  %v134_v59 = vpack.c.bf16 %v3505_v8, %v118_v54  ;;  %v3668_v3 = vld [vmem:[%s4200_s0 + $0x121] sm:$0xff]  ;;  %v3705_v17 = vld [vmem:[%s4200_s0 + $0xd0] sm:$0xff] }
  0x91   :  { %2771 = vmatmul.mubr.msk.bf16.gmra.mrb[4].mxu0 %vm182_vm1, %v638_v36  ;;  %2714 = vmatprep.mubr.msk.bf16.mxu1 %vm182_vm1, %v165_v37  ;;  %v126_v5 = vld [vmem:[%s4200_s0 + $0xa0] sm:$0xff]  ;;  %v819_v12 = vpack.c.bf16 %v3668_v3, %v160_v52  ;;  %v2453_v18 = vld [vmem:[%s4200_s0 + $0x32] sm:$0xff] }
  0x92   :  { %2786 = vmatprep.mubr.msk.bf16.mxu0 %vm182_vm1, %v812_v39  ;;  %2725 = vmatpush3.bf16.msra.mxu1 %v342_v40  ;;  %v2452_v8 = vld [vmem:[%s4200_s0 + $0x22] sm:$0xff]  ;;  %v138_v13 = vpack.c.bf16 %v3676_v6, %v126_v5  ;;  %v3722_v21 = vld [vmem:[%s4200_s0 + $0xf0] sm:$0xff]  ;;  %v1213_v39 = vsel %vm207_vm0, %v3161_v30, 0  ;;  %v3163_v5 = vld [vmem:[#allocation2 + $0x5c] ss:$0 sps:$4 sm:$0x33]  }
  0x93   :  { %2742 = vmatprep.subr.bf16.mxu1 %v3159_v48  ;;  %v989_v14 = vpack.c.bf16 %v2452_v8, %v2451_v7  ;;  %v3700_v15 = vld [vmem:[%s4200_s0 + $0xc0] sm:$0xff]  ;;  %v2455_v23 = vld [vmem:[%s4200_s0 + $0x52] sm:$0xff]  ;;  %v3792_v51 = vpack.c.bf16 %v2453_v18, %v2452_v8 }
  0x94   :  { %v2454_v19 = vld [vmem:[%s4200_s0 + $0x42] sm:$0xff]  ;;  %v3732_v25 = vpack.c.bf16 %v3705_v17, %v3700_v15  ;;  %v3751_v32 = vld [vmem:[%s4200_s0 + $0x110] sm:$0xff] }
  0x95   :  { %v3717_v20 = vld [vmem:[%s4200_s0 + $0xe0] sm:$0xff]  ;;  %v990_v26 = vpack.c.bf16 %v2454_v19, %v2453_v18  ;;  %v2459_v37 = vld [vmem:[%s4200_s0 + $0xb2] sm:$0xff]  ;;  %v3794_v54 = vpack.c.bf16 %v2455_v23, %v2454_v19 }
  0x96   :  { %v2456_v24 = vld [vmem:[%s4200_s0 + $0x62] sm:$0xff]  ;;  %v3736_v27 = vpack.c.bf16 %v3722_v21, %v3717_v20  ;;  %v3162_v40 = vld [vmem:[#allocation2 + $0x54] sm:$0xff]  }
  0x97   :  { %v991_v28 = vpack.c.bf16 %v2456_v24, %v2455_v23  ;;  %v3746_v31 = vld [vmem:[%s4200_s0 + $0x100] sm:$0xff] }
  0x98   :  { %2715 = vmatmul.mubr.msk.bf16.gmra.mrb[8].mxu1 %vm182_vm1, %v3616_v45  ;;  %v3760_v35 = vld [vmem:[%s4200_s0 + $0x82] sm:$0xff]  ;;  %v141_v41 = vpack.c.bf16 %v3751_v32, %v3746_v31 }
  0x99   :  { %2787 = vmatmul.mubr.msk.bf16.vlgmr.msra.gmra.mrb[0].mxu0 %vm182_vm1, %v813_v46  ;;  %2718 = vmatprep.mubr.msk.bf16.mxu1 %vm182_vm1, %v3618_v47  ;;  %v441_v36 = vld [vmem:[%s4200_s0 + $0x2] sm:$0xff]  ;;  %v2461_v46 = vld [vmem:[%s4200_s0 + $0xd2] sm:$0xff] }
  0x9a   :  { %2803 = vmatpush3.bf16.msra.mxu0 %v3154_v33  ;;  %2790 = vmatprep.mubr.msk.bf16.mxu0 %vm182_vm1, %v814_v49  ;;  %v2457_v33 = vld [vmem:[%s4200_s0 + $0x72] sm:$0xff]  ;;  %v2460_v38 = vld [vmem:[%s4200_s0 + $0xc2] sm:$0xff]  ;;  %v457_v43 = vpack.c.bf16 %v2451_v7, %v441_v36 }
  0x9b   :  { %3130 = vmatprep.subr.msk.bf16.mxu0 %vm207_vm0, %v3157_v50  ;;  %v992_v42 = vpack.c.bf16 %v3760_v35, %v2457_v33  ;;  %v993_v44 = vpack.c.bf16 %v2460_v38, %v2459_v37  ;;  %v2463_v49 = vld [vmem:[%s4200_s0 + $0xf2] sm:$0xff]  ;;  %v2464_v50 = vld [vmem:[%s4200_s0 + $0x102] sm:$0xff] }
  0x9e   :  { %2805 = vmatpush3.bf16.msra.mxu0 %v1035_v55  ;;  %v995_v55 = vpack.c.bf16 %v2464_v50, %v2463_v49 }
  0x9f   :  { %2822 = vmatprep.subr.bf16.mxu0 %v3158_v56 }
  0xa0   :  { %2719 = vmatmul.mubr.msk.bf16.gmra.mrb[12].mxu1 %vm182_vm1, %v3642_v57 }
  0xa1   :  { %2791 = vmatmul.mubr.msk.bf16.gmra.mrb[4].mxu0 %vm182_vm1, %v815_v58  ;;  %2726 = vmatprep.mubr.msk.bf16.mxu1 %vm182_vm1, %v134_v59  ;;  %v3808_v58 = vld [vmem:[%s4200_s0 + $0x122] sm:$0xff] }
  0xa2   :  { %2794 = vmatprep.mubr.msk.bf16.mxu0 %vm182_vm1, %v816_v60  ;;  %v449_v59 = vld [vmem:[%s4200_s0 + $0xa2] sm:$0xff]  ;;  %v460_v60 = vpack.c.bf16 %v2457_v33, %v2456_v24 }
  0xa8   :  { %2727 = vmatmul.mubr.msk.bf16.vlgmr.msra.gmra.mrb[0].mxu1 %vm182_vm1, %v3653_v61 }
  0xa9   :  { %2795 = vmatmul.mubr.msk.bf16.gmra.mrb[8].mxu0 %vm182_vm1, %v817_v62  ;;  %2730 = vmatprep.mubr.msk.bf16.mxu1 %vm182_vm1, %v3657_v63 }
  0xaa   :  { %2798 = vmatprep.mubr.msk.bf16.mxu0 %vm182_vm1, %v818_v0  ;;  %2743 = vmatpush3.bf16.msra.mxu1 %v3159_v48  ;;  %v2462_v48 = vld [vmem:[%s4200_s0 + $0xe2] sm:$0xff]  ;;  %v461_v0 = vpack.c.bf16 %v2459_v37, %v449_v59 }
  0xab   :  { %3126 = vmatprep.subr.msk.bf16.mxu1 %vm207_vm0, %v3160_v2  ;;  %v994_v52 = vpack.c.bf16 %v2462_v48, %v2461_v46  ;;  %v462_v2 = vpack.c.bf16 %v2461_v46, %v2460_v38 }
  0xae   :  { %2745 = vmatpush3.bf16.msra.mxu1 %v503_v9  ;;  %v640_v9 = vpack.c.bf16 %v3717_v20, %v3705_v17 }
  0xaf   :  { %2988 = vmatprep.subr.bf16.mxu1 %v3488_v1 }
  0xb0   :  { %2731 = vmatmul.mubr.msk.bf16.gmra.mrb[4].mxu1 %vm182_vm1, %v3688_v10 }
  0xb1   :  { %2799 = vmatmul.mubr.msk.bf16.gmra.mrb[12].mxu0 %vm182_vm1, %v819_v12  ;;  %2734 = vmatprep.mubr.msk.bf16.mxu1 %vm182_vm1, %v138_v13 }
  0xb2   :  { %2806 = vmatprep.mubr.msk.bf16.mxu0 %vm182_vm1, %v989_v14  ;;  %v3165_v14 = vld [vmem:[#allocation2 + $0x68] ss:$0 sps:$4 sm:$0x33]  }
  0xb3   :  { %v1567_v17 = vsel %vm207_vm0, %v3165_v14, 0 }
  0xb8   :  { %2735 = vmatmul.mubr.msk.bf16.gmra.mrb[8].mxu1 %vm182_vm1, %v3732_v25 }
  0xb9   :  { %2807 = vmatmul.mubr.msk.bf16.vlgmr.msra.gmra.mrb[0].mxu0 %vm182_vm1, %v990_v26  ;;  %2738 = vmatprep.mubr.msk.bf16.mxu1 %vm182_vm1, %v3736_v27 }
  0xba   :  { %2823 = vmatpush3.bf16.msra.mxu0 %v3158_v56  ;;  %2810 = vmatprep.mubr.msk.bf16.mxu0 %vm182_vm1, %v991_v28  ;;  %v2465_v56 = vld [vmem:[%s4200_s0 + $0x112] sm:$0xff] }
  0xbb   :  { %3131 = vmatprep.subr.msk.bf16.mxu0 %vm207_vm0, %v3161_v30  ;;  %v996_v62 = vpack.c.bf16 %v3808_v58, %v2465_v56  ;;  %v464_v7 = vpack.c.bf16 %v2465_v56, %v2464_v50 }
  0xbe   :  { %2825 = vmatpush3.bf16.msra.mxu0 %v1213_v39 }
  0xbf   :  { %2842 = vmatprep.subr.bf16.mxu0 %v3162_v40 }
  0xc0   :  { %2739 = vmatmul.mubr.msk.bf16.gmra.mrb[12].mxu1 %vm182_vm1, %v141_v41 }
  0xc1   :  { %2811 = vmatmul.mubr.msk.bf16.gmra.mrb[4].mxu0 %vm182_vm1, %v992_v42  ;;  %2746 = vmatprep.mubr.msk.bf16.mxu1 %vm182_vm1, %v457_v43 }
  0xc2   :  { %2814 = vmatprep.mubr.msk.bf16.mxu0 %vm182_vm1, %v993_v44 }
  0xc8   :  { %2747 = vmatmul.mubr.msk.bf16.vlgmr.msra.gmra.mrb[0].mxu1 %vm182_vm1, %v3792_v51 }
  0xc9   :  { %2815 = vmatmul.mubr.msk.bf16.gmra.mrb[8].mxu0 %vm182_vm1, %v994_v52  ;;  %2750 = vmatprep.mubr.msk.bf16.mxu1 %vm182_vm1, %v3794_v54 }
  0xca   :  { %2818 = vmatprep.mubr.msk.bf16.mxu0 %vm182_vm1, %v995_v55  ;;  %2990 = vmatpush3.bf16.msra.mxu1 %v3488_v1  ;;  %v463_v1 = vpack.c.bf16 %v2463_v49, %v2462_v48 }
  0xcb   :  { %3128 = vmatprep.subr.msk.bf16.mxu1 %vm207_vm0, %v3494_v4  ;;  %v2484_v4 = vld [vmem:[%s4200_s0 + $0x90] sm:$0xff] }
  0xcc   :  { %v1170_v8 = vpack.c.bf16 %v2484_v4, %v3582_v29  ;;  %v641_v29 = vpack.c.bf16 %v3746_v31, %v3722_v21 }
  0xce   :  { %2991 = vmatpush3.bf16.msra.mxu1 %v3519_v11  ;;  %v1390_v11 = vsel %vm207_vm0, %v3163_v5, 0 }
  0xd0   :  { %2751 = vmatmul.mubr.msk.bf16.gmra.mrb[4].mxu1 %vm182_vm1, %v460_v60 }
  0xd1   :  { %2819 = vmatmul.mubr.msk.bf16.gmra.mrb[12].mxu0 %vm182_vm1, %v996_v62  ;;  %2754 = vmatprep.mubr.msk.bf16.mxu1 %vm182_vm1, %v461_v0 }
  0xd2   :  { %2826 = vmatprep.mubr.msk.bf16.mxu0 %vm182_vm1, %v3653_v61  ;;  %v3164_v61 = vld [vmem:[#allocation2 + $0x60] sm:$0xff]  }
  0xd8   :  { %2755 = vmatmul.mubr.msk.bf16.gmra.mrb[8].mxu1 %vm182_vm1, %v462_v2 }
  0xd9   :  { %2827 = vmatmul.mubr.msk.bf16.vlgmr.msra.gmra.mrb[0].mxu0 %vm182_vm1, %v3657_v63  ;;  %2758 = vmatprep.mubr.msk.bf16.mxu1 %vm182_vm1, %v463_v1  ;;  %v639_v63 = vpack.c.bf16 %v3700_v15, %v3676_v6  ;;  %v2414_v6 = vld [vmem:[%s4200_s0 + $0x120] sm:$0xff]  ;;  %v2510_v15 = vld [vmem:[%s4200_s0 + $0x91] sm:$0xff] }
  0xda   :  { %2843 = vmatpush3.bf16.msra.mxu0 %v3162_v40  ;;  %2830 = vmatprep.mubr.msk.bf16.mxu0 %vm182_vm1, %v3688_v10  ;;  %v2492_v10 = vld [vmem:[%s4200_s0 + $0x130] sm:$0xff]  ;;  %v642_v12 = vpack.c.bf16 %v2414_v6, %v3751_v32  ;;  %v1347_v18 = vpack.c.bf16 %v2510_v15, %v3635_v53  ;;  %v3912_v40 = vld [vmem:[#allocation4] ss:$0 sm:$0xff] }
  0xdb   :  { %3132 = vmatprep.subr.msk.bf16.mxu0 %vm207_vm0, %v3163_v5  ;;  %v1174_v13 = vpack.c.bf16 %v2492_v10, %v2414_v6 }
  0xde   :  { %2845 = vmatpush3.bf16.msra.mxu0 %v1390_v11 }
  0xdf   :  { %2862 = vmatprep.subr.bf16.mxu0 %v3164_v61 }
  0xe0   :  { %2759 = vmatmul.mubr.msk.bf16.gmra.mrb[12].mxu1 %vm182_vm1, %v464_v7 }
  0xe1   :  { %2831 = vmatmul.mubr.msk.bf16.gmra.mrb[4].mxu0 %vm182_vm1, %v1170_v8  ;;  %2774 = vmatprep.mubr.msk.bf16.mxu1 %vm182_vm1, %v639_v63 }
  0xe2   :  { %2834 = vmatprep.mubr.msk.bf16.mxu0 %vm182_vm1, %v3732_v25 }
  0xe8   :  { %2775 = vmatmul.mubr.msk.bf16.vlgmr.msra.gmra.mrb[8].mxu1 %vm182_vm1, %v640_v9 }
  0xe9   :  { %2835 = vmatmul.mubr.msk.bf16.gmra.mrb[8].mxu0 %vm182_vm1, %v3736_v27  ;;  %2778 = vmatprep.mubr.msk.bf16.mxu1 %vm182_vm1, %v641_v29 }
  0xea   :  { %2838 = vmatprep.mubr.msk.bf16.mxu0 %vm182_vm1, %v141_v41 }
  0xf0   :  { %2779 = vmatmul.mubr.msk.bf16.gmra.mrb[12].mxu1 %vm182_vm1, %v642_v12 }
  0xf1   :  { %2839 = vmatmul.mubr.msk.bf16.gmra.mrb[12].mxu0 %vm182_vm1, %v1174_v13 }
  0xf2   :  { %2846 = vmatprep.mubr.msk.bf16.mxu0 %vm182_vm1, %v3537_v16  ;;  %v2518_v16 = vld [vmem:[%s4200_s0 + $0x131] sm:$0xff] }
  0xf9   :  { %2847 = vmatmul.mubr.msk.bf16.vlgmr.msra.gmra.mrb[0].mxu0 %vm182_vm1, %v3554_v22  ;;  %v1351_v22 = vpack.c.bf16 %v2518_v16, %v3668_v3  ;;  %v3167_v3 = vld [vmem:[#allocation6 + $0x8] ss:$0 sps:$4 sm:$0x33]  }
  0xfa   :  { %2863 = vmatpush3.bf16.msra.mxu0 %v3164_v61  ;;  %2850 = vmatprep.mubr.msk.bf16.mxu0 %vm182_vm1, %v3593_v34  ;;  %v2536_v34 = vld [vmem:[%s4200_s0 + $0x92] sm:$0xff]  ;;  %v1773_v19 = vsel %vm207_vm0, %v3167_v3, 0 }
  0xfb   :  { %3133 = vmatprep.subr.msk.bf16.mxu0 %vm207_vm0, %v3165_v14 }
  0xfe   :  { %2865 = vmatpush3.bf16.msra.mxu0 %v1567_v17 }
 0x101   :  { %2851 = vmatmul.mubr.msk.bf16.gmra.mrb[4].mxu0 %vm182_vm1, %v1347_v18 }
 0x102   :  { %2854 = vmatprep.mubr.msk.bf16.mxu0 %vm182_vm1, %v3616_v45  ;;  %v1524_v45 = vpack.c.bf16 %v2536_v34, %v3760_v35 }
 0x109   :  { %2855 = vmatmul.mubr.msk.bf16.gmra.mrb[8].mxu0 %vm182_vm1, %v3618_v47  ;;  %v2544_v47 = vld [vmem:[%s4200_s0 + $0x132] sm:$0xff] }
 0x10a   :  { %2858 = vmatprep.mubr.msk.bf16.mxu0 %vm182_vm1, %v3642_v57  ;;  %v1528_v53 = vpack.c.bf16 %v2544_v47, %v3808_v58  ;;  %v3166_v57 = vld [vmem:[#allocation6] sm:$0xff]  }
 0x10b   :  { %2882 = vmatprep.subr.bf16.mxu1 %v3166_v57 }
 0x10c   :  { %2883 = vmatpush3.bf16.msra.mxu1 %v3166_v57 }
 0x10d   :  { %3134 = vmatprep.subr.msk.bf16.mxu1 %vm207_vm0, %v3167_v3 }
 0x110   :  { %2885 = vmatpush3.bf16.msra.mxu1 %v1773_v19 }
 0x111   :  { %2859 = vmatmul.mubr.msk.bf16.gmra.mrb[12].mxu0 %vm182_vm1, %v1351_v22 }
 0x112   :  { %2866 = vmatprep.mubr.msk.bf16.mxu0 %vm182_vm1, %v3792_v51 }
 0x119   :  { %2867 = vmatmul.mubr.msk.bf16.vlgmr.msra.gmra.mrb[0].mxu0 %vm182_vm1, %v3794_v54 }
 0x11a   :  { %2870 = vmatprep.mubr.msk.bf16.mxu0 %vm182_vm1, %v460_v60 }
 0x121   :  { %2871 = vmatmul.mubr.msk.bf16.gmra.mrb[4].mxu0 %vm182_vm1, %v1524_v45 }
 0x122   :  { %2874 = vmatprep.mubr.msk.bf16.mxu0 %vm182_vm1, %v462_v2 }
 0x129   :  { %2875 = vmatmul.mubr.msk.bf16.gmra.mrb[8].mxu0 %vm182_vm1, %v463_v1 }
 0x12a   :  { %2878 = vmatprep.mubr.msk.bf16.mxu0 %vm182_vm1, %v464_v7 }
 0x131   :  { %2879 = vmatmul.mubr.msk.bf16.gmra.mrb[12].mxu0 %vm182_vm1, %v1528_v53 }
 0x19b   :  { %v2748_v20 = vpop.f32.mrb[0].mxu1 }
 0x19c   :  { %v539_v21 = vpop.f32.mrb[1].mxu1 }
 0x19d   :  { %v2749_v23 = vpop.f32.mrb[2].mxu1 }
 0x19e   :  { %v542_v24 = vpop.f32.mrb[3].mxu1 }
 0x1a3   :  { %v2752_v25 = vpop.f32.mrb[4].mxu1 }
 0x1a4   :  { %v555_v26 = vpop.f32.mrb[5].mxu1 }
 0x1a5   :  { %v2753_v27 = vpop.f32.mrb[6].mxu1 }
 0x1a6   :  { %v558_v28 = vpop.f32.mrb[7].mxu1 }
 0x1bb   :  { %v2776_v30 = vpop.f32.mrb[8].mxu1 }
 0x1bc   :  { %v749_v31 = vpop.f32.mrb[9].mxu1 }
 0x1bd   :  { %v2777_v32 = vpop.f32.mrb[10].mxu1 }
 0x1be   :  { %v752_v33 = vpop.f32.mrb[11].mxu1 }
 0x1c3   :  { %v3904_v35 = vpop.f32.mrb[12].mxu1 }
 0x1c4   :  { %v3906_v36 = vpop.f32.mrb[13].mxu1 }
 0x1c5   :  { %v3908_v37 = vpop.f32.mrb[14].mxu1 }
 0x1c6   :  { %v3910_v38 = vpop.f32.mrb[15].mxu1 }
 0x1ec   :  { %v2868_v39 = vpop.f32.mrb[0].mxu0 }
 0x1ed   :  { %v2992_v41 = vadd.f32 %v2868_v39, %v2748_v20  ;;  %v1603_v42 = vpop.f32.mrb[1].mxu0 }
 0x1ee   :  { %v2993_v43 = vadd.f32 %v1603_v42, %v539_v21  ;;  %v2869_v44 = vpop.f32.mrb[2].mxu0 }
 0x1ef   :  { %v1691_v46 = vadd.f32 %v2992_v41, %v3912_v40  ;;  %v2994_v48 = vadd.f32 %v2869_v44, %v2749_v23  ;;  %v1606_v49 = vpop.f32.mrb[3].mxu0 }
 0x1f0   :  { %v1689_v50 = vadd.f32 %v2993_v43, %v3912_v40  ;;  %v2995_v51 = vadd.f32 %v1606_v49, %v542_v24 }
 0x1f1   :  { %v1692_v52 = vadd.f32 %v2994_v48, %v3912_v40  ;;  %v1707_v55 = vmax.f32 %v1691_v46, 0.0 }
 0x1f2   :  { %v1690_v54 = vadd.f32 %v2995_v51, %v3912_v40  ;;  %v1705_v58 = vmax.f32 %v1689_v50, 0.0 }
 0x1f3   :  { %v1708_v56 = vmax.f32 %v1692_v52, 0.0 }
 0x1f4   :  { %v1706_v59 = vmax.f32 %v1690_v54, 0.0  ;;  %v2872_v60 = vpop.f32.mrb[4].mxu0  ;;  %v3343_v54 = vmov 0.0|0.0  }
 0x1f5   :  { %v1722_v62 = vpack.c.bf16 %v1708_v56, %v1707_v55  ;;  %v2996_v0 = vadd.f32 %v2872_v60, %v2752_v25  ;;  %v1619_v2 = vpop.f32.mrb[5].mxu0  ;;  %2958 = vmatprep.subr.bf16.mxu1 %v3343_v54  ;;  %v1962_v55 = vld [vmem:[%s4205_s5 + $0x10] sm:$0xff]  ;;  %v1963_v56 = vld [vmem:[%s4205_s5 + $0x18] sm:$0xff]  ;;  %v1965_v60 = vld [vmem:[%s4205_s5 + $0x28] sm:$0xff] }
 0x1f6   :  { %v1721_v1 = vpack.c.bf16 %v1706_v59, %v1705_v58  ;;  %v2997_v5 = vadd.f32 %v1619_v2, %v555_v26  ;;  %v2873_v4 = vpop.f32.mrb[6].mxu0  ;;  %v3959_v58 = vpack.c.bf16 %v1963_v56, %v1962_v55  ;;  %v1964_v59 = vld [vmem:[%s4205_s5 + $0x20] sm:$0xff]  ;;  %v1967_v2 = vld [vmem:[%s4205_s5 + $0x38] sm:$0xff] }
 0x1f7   :  { %v1695_v11 = vadd.f32 %v2996_v0, %v3912_v40  ;;  %v2998_v61 = vadd.f32 %v2873_v4, %v2753_v27  ;;  %v1622_v7 = vpop.f32.mrb[7].mxu0  ;;  %v1966_v0 = vld [vmem:[%s4205_s5 + $0x30] sm:$0xff]  ;;  %v1969_v4 = vld [vmem:[%s4205_s5 + $0x48] sm:$0xff] }
 0x1f8   :  { %v1693_v8 = vadd.f32 %v2997_v5, %v3912_v40  ;;  %v2999_v63 = vadd.f32 %v1622_v7, %v558_v28  ;;  %2886 = vmatprep.mubr.msk.bf16.mxu1 %vm182_vm1, %v1721_v1  ;;  %v1968_v1 = vld [vmem:[%s4205_s5 + $0x40] sm:$0xff]  ;;  %v3982_v5 = vpack.c.bf16 %v1967_v2, %v1966_v0  ;;  %v2556_v7 = vld [vmem:[#allocation7] ss:$0 sm:$0xff] }
 0x1f9   :  { %v1696_v9 = vadd.f32 %v2998_v61, %v3912_v40  ;;  %2887 = vmatmul.mubr.msk.bf16.vlgmr.msra.gmra.mrb[16].mxu1 %vm182_vm1, %v1722_v62  ;;  %v1711_v6 = vmax.f32 %v1695_v11, 0.0  ;;  %v3969_v62 = vpack.c.bf16 %v1965_v60, %v1964_v59  ;;  %v3345_v11 = vmov 0.0  }
 0x1fa   :  { %v1694_v29 = vadd.f32 %v2999_v63, %v3912_v40  ;;  %v1709_v12 = vmax.f32 %v1693_v8, 0.0  ;;  %v3990_v61 = vpack.c.bf16 %v1969_v4, %v1968_v1 }
 0x1fb   :  { %v1712_v10 = vmax.f32 %v1696_v9, 0.0 }
 0x1fc   :  { %v1710_v13 = vmax.f32 %v1694_v29, 0.0  ;;  %v2876_v14 = vpop.f32.mrb[8].mxu0 }
 0x1fd   :  { %v1724_v15 = vpack.c.bf16 %v1712_v10, %v1711_v6  ;;  %v3000_v17 = vadd.f32 %v2876_v14, %v2776_v30  ;;  %v1635_v18 = vpop.f32.mrb[9].mxu0 }
 0x1fe   :  { %v1723_v16 = vpack.c.bf16 %v1710_v13, %v1709_v12  ;;  %v3001_v22 = vadd.f32 %v1635_v18, %v749_v31  ;;  %v2877_v34 = vpop.f32.mrb[10].mxu0 }
 0x1ff   :  { %v1699_v45 = vadd.f32 %v3000_v17, %v3912_v40  ;;  %v3002_v47 = vadd.f32 %v2877_v34, %v2777_v32  ;;  %v1638_v53 = vpop.f32.mrb[11].mxu0 }
 0x200   :  { %v1697_v57 = vadd.f32 %v3001_v22, %v3912_v40  ;;  %v3003_v3 = vadd.f32 %v1638_v53, %v752_v33  ;;  %2890 = vmatprep.mubr.msk.bf16.mxu1 %vm182_vm1, %v1723_v16 }
 0x201   :  { %v1700_v19 = vadd.f32 %v3002_v47, %v3912_v40  ;;  %2891 = vmatmul.mubr.msk.bf16.gmra.mrb[20].mxu1 %vm182_vm1, %v1724_v15  ;;  %v1715_v21 = vmax.f32 %v1699_v45, 0.0 }
 0x202   :  { %v1698_v20 = vadd.f32 %v3003_v3, %v3912_v40  ;;  %v1713_v24 = vmax.f32 %v1697_v57, 0.0 }
 0x203   :  { %v1716_v23 = vmax.f32 %v1700_v19, 0.0 }
 0x204   :  { %v1714_v25 = vmax.f32 %v1698_v20, 0.0  ;;  %v2880_v26 = vpop.f32.mrb[12].mxu0 }
 0x205   :  { %v1726_v27 = vpack.c.bf16 %v1716_v23, %v1715_v21  ;;  %v3004_v28 = vadd.f32 %v2880_v26, %v3904_v35  ;;  %v1651_v30 = vpop.f32.mrb[13].mxu0 }
 0x206   :  { %v1725_v31 = vpack.c.bf16 %v1714_v25, %v1713_v24  ;;  %v3005_v32 = vadd.f32 %v1651_v30, %v3906_v36  ;;  %v2881_v33 = vpop.f32.mrb[14].mxu0 }
 0x207   :  { %v1703_v39 = vadd.f32 %v3004_v28, %v3912_v40  ;;  %v3006_v41 = vadd.f32 %v2881_v33, %v3908_v37  ;;  %v1654_v42 = vpop.f32.mrb[15].mxu0  ;;  %v1960_v37 = vld [vmem:[%s4205_s5] sm:$0xff] }
 0x208   :  { %v1701_v43 = vadd.f32 %v3005_v32, %v3912_v40  ;;  %v3007_v44 = vadd.f32 %v1654_v42, %v3910_v38  ;;  %2894 = vmatprep.mubr.msk.bf16.mxu1 %vm182_vm1, %v1725_v31  ;;  %v1961_v38 = vld [vmem:[%s4205_s5 + $0x8] sm:$0xff] }
 0x209   :  { %v1704_v46 = vadd.f32 %v3006_v41, %v3912_v40  ;;  %2895 = vmatmul.mubr.msk.bf16.gmra.mrb[24].mxu1 %vm182_vm1, %v1726_v27  ;;  %v1719_v48 = vmax.f32 %v1703_v39, 0.0 }
 0x20a   :  { %v1702_v35 = vadd.f32 %v3007_v44, %v3912_v40  ;;  %v1717_v49 = vmax.f32 %v1701_v43, 0.0  ;;  %v3949_v40 = vpack.c.bf16 %v1961_v38, %v1960_v37 }
 0x20b   :  { %v1720_v36 = vmax.f32 %v1704_v46, 0.0 }
 0x20c   :  { %v1718_v50 = vmax.f32 %v1702_v35, 0.0  ;;  %2960 = vmatpush3.bf16.msra.mxu1 %v3949_v40 }
 0x20d   :  { %v1728_v51 = vpack.c.bf16 %v1720_v36, %v1719_v48  ;;  %2961 = vmatprep.subr.bf16.mxu1 %v3343_v54 }
 0x20e   :  { %v1727_v52 = vpack.c.bf16 %v1718_v50, %v1717_v49 }
 0x210   :  { %2898 = vmatprep.mubr.msk.bf16.mxu1 %vm182_vm1, %v1727_v52  ;;  %2963 = vmatpush3.bf16.msra.mxu1 %v3959_v58 }
 0x211   :  { %2899 = vmatmul.mubr.msk.bf16.gmra.mrb[28].mxu1 %vm182_vm1, %v1728_v51  ;;  %2964 = vmatprep.subr.bf16.mxu1 %v3343_v54 }
 0x212   :  { %2922 = vmatprep.mubr.msk.f32.mxu1 %vm3344_vm2, %v3345_v11 }
 0x214   :  { %2966 = vmatpush3.bf16.msra.mxu1 %v3969_v62 }
 0x215   :  { %2967 = vmatprep.subr.bf16.mxu1 %v3343_v54 }
 0x218   :  { %2969 = vmatpush3.bf16.msra.mxu1 %v3982_v5 }
 0x219   :  { %2970 = vmatprep.subr.bf16.mxu1 %v3343_v54 }
 0x21c   :  { %2972 = vmatpush3.bf16.msra.mxu1 %v3990_v61 }
 0x21d   :  { %2925 = vmatprep.subr.mxu1 %v3345_v11 }
 0x2cc   :  { %v2888_v8 = vpop.f32.mrb[16].mxu1 }
 0x2cd   :  { %v1809_v63 = vpop.f32.mrb[17].mxu1  ;;  %v3997_v10 = vadd.f32 %v2888_v8, %v2556_v7 }
 0x2ce   :  { %v3995_v9 = vadd.f32 %v2556_v7, %v1809_v63  ;;  %v2889_v29 = vpop.f32.mrb[18].mxu1 }
 0x2cf   :  { %v1812_v6 = vpop.f32.mrb[19].mxu1  ;;  %v4003_v14 = vadd.f32 %v2889_v29, %v2556_v7  ;;  %v1876_v18 = vsel %vm1872_vm3, %v3997_v10, 0.0 }
 0x2d0   :  { %v3999_v12 = vadd.f32 %v2556_v7, %v1812_v6  ;;  %v1873_v13 = vsel %vm1872_vm3, %v3995_v9, 0.0 }
 0x2d1   :  { %v1878_v45 = vsel %vm1872_vm3, %v4003_v14, 0.0 }
 0x2d2   :  { %v1874_v15 = vsel %vm1872_vm3, %v3999_v12, 0.0 }
 0x2d3   :  { %v1875_v17 = vadd.f32 %v1874_v15, %v1873_v13 }
 0x2d4   :  { %v2892_v16 = vpop.f32.mrb[20].mxu1 }
 0x2d5   :  { %v1877_v22 = vadd.f32 %v1876_v18, %v1875_v17  ;;  %v1825_v34 = vpop.f32.mrb[21].mxu1  ;;  %v4013_v19 = vadd.f32 %v2892_v16, %v2556_v7 }
 0x2d6   :  { %v4011_v47 = vadd.f32 %v2556_v7, %v1825_v34  ;;  %v2893_v53 = vpop.f32.mrb[22].mxu1 }
 0x2d7   :  { %v1879_v57 = vadd.f32 %v1878_v45, %v1877_v22  ;;  %v1828_v3 = vpop.f32.mrb[23].mxu1  ;;  %v1884_v26 = vsel %vm1872_vm3, %v4013_v19, 0.0  ;;  %v4023_v27 = vadd.f32 %v2893_v53, %v2556_v7 }
 0x2d8   :  { %v1880_v20 = vsel %vm1872_vm3, %v4011_v47, 0.0  ;;  %v4017_v21 = vadd.f32 %v2556_v7, %v1828_v3 }
 0x2d9   :  { %v1881_v23 = vadd.f32 %v1880_v20, %v1879_v57  ;;  %v1886_v41 = vsel %vm1872_vm3, %v4023_v27, 0.0 }
 0x2da   :  { %v1882_v24 = vsel %vm1872_vm3, %v4017_v21, 0.0 }
 0x2db   :  { %v1883_v25 = vadd.f32 %v1882_v24, %v1881_v23 }
 0x2dc   :  { %v2896_v28 = vpop.f32.mrb[24].mxu1 }
 0x2dd   :  { %v1885_v30 = vadd.f32 %v1884_v26, %v1883_v25  ;;  %v1841_v31 = vpop.f32.mrb[25].mxu1  ;;  %v4029_v42 = vadd.f32 %v2896_v28, %v2556_v7  ;;  %v4063_v28 = vld [vmem:[#allocation10] sm:$0x1f] }
 0x2de   :  { %v4025_v32 = vadd.f32 %v2556_v7, %v1841_v31  ;;  %v2897_v33 = vpop.f32.mrb[26].mxu1 }
 0x2df   :  { %v1844_v39 = vpop.f32.mrb[27].mxu1  ;;  %v1887_v44 = vadd.f32 %v1886_v41, %v1885_v30  ;;  %v4035_v35 = vadd.f32 %v2897_v33, %v2556_v7  ;;  %v1897_v49 = vsel %vm1872_vm3, %v4029_v42, 0.0  ;;  %v1922_v33 = vsel %vm1872_vm3, %v4003_v14, -inf }
 0x2e0   :  { %v4031_v43 = vadd.f32 %v2556_v7, %v1844_v39  ;;  %v1894_v46 = vsel %vm1872_vm3, %v4025_v32, 0.0  ;;  %v1919_v39 = vsel %vm1872_vm3, %v3999_v12, -inf  ;;  %v1941_v41 = vsel %vm1872_vm3, %v4029_v42, -inf }
 0x2e1   :  { %v1888_v51 = vrot.slane %v1887_v44, 4  ;;  %v1899_v38 = vsel %vm1872_vm3, %v4035_v35, 0.0  ;;  %v1943_v30 = vsel %vm1872_vm3, %v4035_v35, -inf }
 0x2e2   :  { %v1895_v48 = vsel %vm1872_vm3, %v4031_v43, 0.0  ;;  %v1940_v31 = vsel %vm1872_vm3, %v4031_v43, -inf }
 0x2e3   :  { %v1896_v36 = vadd.f32 %v1895_v48, %v1894_v46  ;;  %v1889_v4 = vadd.f32 %v1888_v51, %v1887_v44  ;;  %v1939_v44 = vsel %vm1872_vm3, %v4025_v32, -inf  ;;  %v1944_v48 = vmax.f32 %v1940_v31, %v1943_v30 }
 0x2e4   :  { %v2900_v50 = vpop.f32.mrb[28].mxu1 }
 0x2e5   :  { %v1898_v52 = vadd.f32 %v1897_v49, %v1896_v36  ;;  %v1857_v37 = vpop.f32.mrb[29].mxu1  ;;  %v4045_v0 = vadd.f32 %v2900_v50, %v2556_v7  ;;  %v1890_v15 = vrot.slane %v1889_v4, 2  ;;  %v1920_v36 = vsel %vm1872_vm3, %v3997_v10, -inf }
 0x2e6   :  { %v4043_v55 = vadd.f32 %v2556_v7, %v1857_v37  ;;  %v2901_v56 = vpop.f32.mrb[30].mxu1  ;;  %v1918_v49 = vsel %vm1872_vm3, %v3995_v9, -inf  ;;  %v1926_v50 = vsel %vm1872_vm3, %v4017_v21, -inf  ;;  %v1942_v37 = vmax.f32 %v1939_v44, %v1941_v41 }
 0x2e7   :  { %v1900_v59 = vadd.f32 %v1899_v38, %v1898_v52  ;;  %v1860_v60 = vpop.f32.mrb[31].mxu1  ;;  %v4051_v63 = vadd.f32 %v2901_v56, %v2556_v7  ;;  %v1905_v13 = vsel %vm1872_vm3, %v4045_v0, 0.0  ;;  %v1891_v22 = vadd.f32 %v1890_v15, %v1889_v4 }
 0x2e8   :  { %v1901_v2 = vsel %vm1872_vm3, %v4043_v55, 0.0  ;;  %v4049_v1 = vadd.f32 %v2556_v7, %v1860_v60  ;;  %v1945_v51 = vsel %vm1872_vm3, %v4043_v55, -inf  ;;  %v1923_v52 = vmax.f32 %v1919_v39, %v1922_v33 }
 0x2e9   :  { %v1902_v8 = vadd.f32 %v1901_v2, %v1900_v59  ;;  %v1907_v18 = vsel %vm1872_vm3, %v4051_v63, 0.0  ;;  %v1892_v57 = vrot.slane %v1891_v22, 1  ;;  %v1924_v56 = vsel %vm1872_vm3, %v4011_v47, -inf }
 0x2ea   :  { %v1903_v29 = vsel %vm1872_vm3, %v4049_v1, 0.0  ;;  %v1947_v46 = vsel %vm1872_vm3, %v4049_v1, -inf  ;;  %v1921_v59 = vmax.f32 %v1918_v49, %v1920_v36  ;;  %v1927_v60 = vmax.f32 %v1923_v52, %v1926_v50 }
 0x2eb   :  { %v1904_v6 = vadd.f32 %v1903_v29, %v1902_v8  ;;  %v1893_v3 = vadd.f32 %v1892_v57, %v1891_v22  ;;  %v1948_v38 = vmax.f32 %v1944_v48, %v1947_v46  ;;  %v1946_v2 = vmax.f32 %v1942_v37, %v1945_v51 }
 0x2ec   :  { %v1951_v4 = vsel %vm1872_vm3, %v4051_v63, -inf  ;;  %v1925_v8 = vmax.f32 %v1921_v59, %v1924_v56  ;;  %v2300_v56 = vlaneseq }
 0x2ed   :  { %v1906_v17 = vadd.f32 %v1905_v13, %v1904_v6  ;;  %v1916_v24 = vmul.f32 0.015625, %v1893_v3  ;;  %v1952_v29 = vmax.f32 %v1948_v38, %v1951_v4  ;;  %v1930_v6 = vsel %vm1872_vm3, %v4023_v27, -inf }
 0x2ee   :  { %v1949_v13 = vsel %vm1872_vm3, %v4045_v0, -inf  ;;  %v1931_v15 = vmax.f32 %v1927_v60, %v1930_v6  ;;  %v3346_v38 = vmov 1966171168   ;;  %v2301_v59 = vshrl.u32 %v2300_v56, 7 }
 0x2ef   :  { %v1908_v16 = vadd.f32 %v1907_v18, %v1906_v17  ;;  %v1950_v17 = vmax.f32 %v1946_v2, %v1949_v13  ;;  %v1928_v18 = vsel %vm1872_vm3, %v4013_v19, -inf }
 0x2f1   :  { %v1909_v34 = vrot.slane %v1908_v16, 4  ;;  %v1953_v22 = vmax.f32 %v1950_v17, %v1952_v29 }
 0x2f3   :  { %v1910_v45 = vadd.f32 %v1909_v34, %v1908_v16  ;;  %v1929_v16 = vmax.f32 %v1925_v8, %v1928_v18  ;;  %v2321_v8 = vsub.s32 0, %v2301_v59 }
 0x2f5   :  { %v1911_v53 = vrot.slane %v1910_v45, 2  ;;  %v1932_v34 = vmax.f32 %v1929_v16, %v1931_v15 }
 0x2f7   :  { %v1912_v7 = vadd.f32 %v1911_v53, %v1910_v45  ;;  %v2567_v45 = vld [vmem:[#allocation9] ss:$0 sm:$0xff]  ;;  %v1954_v53 = vrot.slane %v1953_v22, 4 }
 0x2f9   :  { %v1913_v20 = vrot.slane %v1912_v7, 1 }
 0x2fb   :  { %v1914_v23 = vadd.f32 %v1913_v20, %v1912_v7  ;;  %v1933_v20 = vrot.slane %v1932_v34, 4 }
 0x2fd   :  { %v1917_v25 = vmul.f32 0.015625, %v1914_v23 }
 0x2ff   :  { %v1980_v26 = vsel %vm1979_vm4, %v1917_v25, %v1916_v24  ;;  %v1955_v24 = vmax.f32 %v1953_v22, %v1954_v53  ;;  %v1934_v25 = vmax.f32 %v1932_v34, %v1933_v20 }
 0x300   :  { %2923 = vmatmul.mubr.msk.f32.vlgmr.msra.gmra.mrb[32].mxu1 %vm1872_vm3, %v1980_v26 }
 0x301   :  { %2927 = vmatprep.mubr.msk.f32.mxu1 %vm3344_vm2, %v3345_v11  ;;  %2926 = vmatpush3.msk.msra.mxu1 %vm2066_vm5, %v4063_v28  ;;  %v1956_v26 = vrot.slane %v1955_v24, 2  ;;  %v1935_v30 = vrot.slane %v1934_v25, 2 }
 0x302   :  { %2973 = vmatprep.subr.bf16.mxu1 %v3343_v54 }
 0x303   :  { %v1957_v31 = vmax.f32 %v1955_v24, %v1956_v26  ;;  %v1936_v33 = vmax.f32 %v1934_v25, %v1935_v30 }
 0x305   :  { %v1958_v39 = vrot.slane %v1957_v31, 1 }
 0x307   :  { %v1959_v41 = vmax.f32 %v1957_v31, %v1958_v39 }
 0x3d3   :  { %v2049_v57 = vpop.f32.mrb[32].mxu1 }
 0x3d4   :  { %v2050_v7 = vadd.f32 %v2567_v45, %v2049_v57  ;;  %v2924_v3 = vpop.f32.mrb[33].mxu1 }
 0x3d6   :  { %v2053_v23 = vmax.f32 %v2050_v7, 0.0 }
 0x3d8   :  { %2928 = vmatmul.mubr.msk.f32.vlgmr.msra.gmra.mrb[34].mxu1 %vm2062_vm6, %v2053_v23 }
 0x3d9   :  { %2975 = vmatpush3.bf16.msra.mxu1 %v3949_v40  ;;  %2950 = vmatprep.mubr.msk.f32.mxu1 %vm3344_vm2, %v3345_v11  ;;  %v1937_v40 = vrot.slane %v1936_v33, 1 }
 0x3da   :  { %2976 = vmatprep.subr.bf16.mxu1 %v3343_v54 }
 0x3db   :  { %v1938_v44 = vmax.f32 %v1936_v33, %v1937_v40 }
 0x3dd   :  { %2978 = vmatpush3.bf16.msra.mxu1 %v3959_v58  ;;  %v2142_v58 = vsel %vm1979_vm4, %v1959_v41, %v1938_v44 }
 0x3de   :  { %2979 = vmatprep.subr.bf16.mxu1 %v3343_v54 }
 0x3e1   :  { %2981 = vmatpush3.bf16.msra.mxu1 %v3969_v62 }
 0x3e2   :  { %2982 = vmatprep.subr.bf16.mxu1 %v3343_v54 }
 0x3e5   :  { %2984 = vmatpush3.bf16.msra.mxu1 %v3982_v5 }
 0x3e6   :  { %2985 = vmatprep.subr.bf16.mxu1 %v3343_v54 }
 0x3e9   :  { %2987 = vmatpush3.bf16.msra.mxu1 %v3990_v61  ;;  %v2569_v61 = vld [vmem:[#allocation12] ss:$0 sm:$0xff] }
 0x3ea   :  { %2953 = vmatprep.subr.mxu1 %v3345_v11  ;;  %v3008_v48 = vadd.f32 %v2569_v61, %v2569_v61 }
 0x3ec   :  { %2951 = vmatmul.mubr.msk.f32.vlgmr.msra.gmra.mrb[36].mxu1 %vm1872_vm3, %v2142_v58 }
 0x3ed   :  { %2954 = vmatpush3.msk.msra.mxu1 %vm2066_vm5, %v4063_v28  ;;  %2955 = vmatprep.mubr.msk.f32.mxu1 %vm3344_vm2, %v3345_v11  ;;  %v2298_v28 = vunpack.c.l.s4 %v3346_v38 }
 0x3ef   :  { %v2299_v11 = vunpack.c.0.s8 %v2298_v28 }
 0x3f1   :  { %v2302_v60 = vsub.s32 %v2299_v11, %v2301_v59 }
 0x4bf   :  { %v2211_v62 = vpop.f32.mrb[36].mxu1 }
 0x4c0   :  { %v2212_v5 = vadd.f32 %v2567_v45, %v2211_v62  ;;  %v2952_v46 = vpop.f32.mrb[37].mxu1 }
 0x4c2   :  { %v2215_v54 = vmax.f32 %v2212_v5, 0.0 }
 0x4c4   :  { %2956 = vmatmul.mubr.msk.f32.vlgmr.msra.gmra.mrb[34].mxu1 %vm2062_vm6, %v2215_v54 }
 0x597   :  { %v2285_v36 = vpop.f32.mrb[34].mxu1 }
 0x598   :  { %v3009_v49 = vadd.f32 %v3008_v48, %v2285_v36  ;;  %v2957_v50 = vpop.f32.mrb[35].mxu1 }
 0x59a   :  { %v2575_v51 = vmul.f32 -1.442695, %v3009_v49 }
 0x59c   :  { %3168 = vpow2.f32 %v2575_v51 }
 0x5a6   :  { %v3169_v52 = vpop.eup %3168 }
 0x5a7   :  { %v2293_v37 = vadd.f32 1.0, %v3169_v52 }
 0x5a9   :  { %3170 = vrcp.f32 %v2293_v37 }
 0x5b3   :  { %v3171_v2 = vpop.eup %3170 }
 0x5b4   :  { %v2303_v4 = vrot.slane %v3171_v2, %v2302_v60 }
 0x5b6   :  { %v2304_v29 = vcombine.high %v2303_v4, %v2303_v4  ;;  %v2311_v6 = vrot.slane %v2303_v4, %v2302_v60 }
 0x5b8   :  { %v2318_v13 = vrot.slane %v2304_v29, %v2302_v60  ;;  %v2322_v15 = vrot.slane %v2311_v6, %v2321_v8 }
 0x5ba   :  { %v2326_v17 = vrot.slane %v2318_v13, %v2321_v8  ;;  %v2329_v18 = vmul.f32 %v2322_v15, %v3995_v9  ;;  %v2330_v16 = vmul.f32 %v2322_v15, %v3999_v12  ;;  %v2331_v22 = vmul.f32 %v2322_v15, %v3997_v10 }
 0x5bb   :  { %v2332_v34 = vmul.f32 %v2322_v15, %v4003_v14  ;;  %v2333_v45 = vmul.f32 %v2322_v15, %v4011_v47  ;;  %v2334_v53 = vmul.f32 %v2322_v15, %v4017_v21  ;;  %v2335_v57 = vmul.f32 %v2322_v15, %v4013_v19 }
 0x5bc   :  { %v2336_v7 = vmul.f32 %v2322_v15, %v4023_v27  ;;  %v2337_v3 = vmul.f32 %v2326_v17, %v4025_v32  ;;  %v2338_v20 = vmul.f32 %v2326_v17, %v4031_v43  ;;  %v2339_v9 = vmul.f32 %v2326_v17, %v4029_v42  ;;  %2345 = vst.msk [vmem:[%s4209_s9] sm:$0xff] %vm1872_vm3, %v2329_v18 }
 0x5bd   :  { %2346 = vst.msk [vmem:[%s4209_s9 + $0x8] sm:$0xff] %vm1872_vm3, %v2330_v16  ;;  %2347 = vst.msk [vmem:[%s4209_s9 + $0x10] sm:$0xff] %vm1872_vm3, %v2331_v22  ;;  %v2340_v10 = vmul.f32 %v2326_v17, %v4035_v35  ;;  %v2341_v12 = vmul.f32 %v2326_v17, %v4043_v55  ;;  %v2342_v14 = vmul.f32 %v2326_v17, %v4049_v1 }
 0x5be   :  { %v2343_v47 = vmul.f32 %v2326_v17, %v4045_v0  ;;  %2348 = vst.msk [vmem:[%s4209_s9 + $0x18] sm:$0xff] %vm1872_vm3, %v2332_v34  ;;  %2349 = vst.msk [vmem:[%s4209_s9 + $0x20] sm:$0xff] %vm1872_vm3, %v2333_v45  ;;  %v2344_v19 = vmul.f32 %v2326_v17, %v4051_v63 }
 0x5bf   :  { %2350 = vst.msk [vmem:[%s4209_s9 + $0x28] sm:$0xff] %vm1872_vm3, %v2334_v53  ;;  %2351 = vst.msk [vmem:[%s4209_s9 + $0x30] sm:$0xff] %vm1872_vm3, %v2335_v57 }
 0x5c0   :  { %2352 = vst.msk [vmem:[%s4209_s9 + $0x38] sm:$0xff] %vm1872_vm3, %v2336_v7  ;;  %2353 = vst.msk [vmem:[%s4209_s9 + $0x40] sm:$0xff] %vm1872_vm3, %v2337_v3 }
 0x5c1   :  { %2354 = vst.msk [vmem:[%s4209_s9 + $0x48] sm:$0xff] %vm1872_vm3, %v2338_v20  ;;  %2355 = vst.msk [vmem:[%s4209_s9 + $0x50] sm:$0xff] %vm1872_vm3, %v2339_v9 }
 0x5c2   :  { %2356 = vst.msk [vmem:[%s4209_s9 + $0x58] sm:$0xff] %vm1872_vm3, %v2340_v10  ;;  %2357 = vst.msk [vmem:[%s4209_s9 + $0x60] sm:$0xff] %vm1872_vm3, %v2341_v12 }
 0x5c3   :  { %2358 = vst.msk [vmem:[%s4209_s9 + $0x68] sm:$0xff] %vm1872_vm3, %v2342_v14  ;;  %2359 = vst.msk [vmem:[%s4209_s9 + $0x70] sm:$0xff] %vm1872_vm3, %v2343_v47 }
 0x5c4   :  { %2360 = vst.msk [vmem:[%s4209_s9 + $0x78] sm:$0xff] %vm1872_vm3, %v2344_v19 }
 0x5c5   :  { %2365 = vsyncpa [#allocation3], 1 }
 0x5c6   :  { %2366 = vsyncpa [#allocation5], 1 }
 0x5c7   :  { %2367 = vsyncpa [#allocation8], 1 }
 0x5c8   :  { %2368 = vsyncpa [#allocation11], 1 }

// kernel: bottleneck_forward.9
= control target key start
LH: loop header
LB: loop body
LE: loop exit
PB: predicated region body
PF: predicated region fallthrough
CT: control target
= control target key end

     0   :  { %vm61_vm0 = vcmask 130048   ;;  %s681_s0 = inlined_call_operand.vmem [shape: f32[128,64], index: 0, kind: input, shape index: {}]   ;;  %s682_s1 = inlined_call_operand.vmem [shape: f32[128,16], index: 1, kind: input, shape index: {}]   ;;  %s683_s2 = inlined_call_operand.vmem [shape: bf16[16,16], index: 2, kind: input, shape index: {}]   ;;  %s684_s3 = inlined_call_operand.vmem [shape: f32[1,16], index: 3, kind: input, shape index: {}]   ;;  %s685_s4 = inlined_call_operand.vmem [shape: f32[128,80], index: 4, kind: input, shape index: {}]   ;;  %s686_s5 = inlined_call_operand.hbm [shape: f32[128,80], index: 5, kind: output, shape index: {}]  }
   0x1   :  { %v404_v0 = vld [vmem:[%s683_s2] sm:$0xff]   ;;  %v23_v2 = vld [vmem:[%s682_s1 + $0x8] sm:$0xff]  ;;  %v24_v6 = vld [vmem:[%s682_s1 + $0x10] sm:$0xff] }
   0x2   :  { %v22_v1 = vld [vmem:[%s682_s1] sm:$0xff]  ;;  %380 = vmatprep.subr.bf16.mxu0 %v404_v0  ;;  %398 = vmatprep.subr.bf16.mxu1 %v404_v0  ;;  %v31_v5 = vld [vmem:[%s682_s1 + $0x48] sm:$0xff]  ;;  %v25_v7 = vld [vmem:[%s682_s1 + $0x18] sm:$0xff] }
   0x3   :  { %v30_v3 = vld [vmem:[%s682_s1 + $0x40] sm:$0xff]  ;;  %v38_v4 = vpack.c.bf16 %v23_v2, %v22_v1  ;;  %381 = vmatpush3.bf16.msra.mxu0 %v404_v0  ;;  %399 = vmatpush3.bf16.msra.mxu1 %v404_v0  ;;  %v39_v9 = vpack.c.bf16 %v25_v7, %v24_v6  ;;  %v32_v10 = vld [vmem:[%s682_s1 + $0x50] sm:$0xff]  ;;  %v33_v11 = vld [vmem:[%s682_s1 + $0x58] sm:$0xff] }
   0x4   :  { %v42_v8 = vpack.c.bf16 %v31_v5, %v30_v3  ;;  %v26_v12 = vld [vmem:[%s682_s1 + $0x20] sm:$0xff]  ;;  %v43_v13 = vpack.c.bf16 %v33_v11, %v32_v10  ;;  %v27_v14 = vld [vmem:[%s682_s1 + $0x28] sm:$0xff]  ;;  %v28_v18 = vld [vmem:[%s682_s1 + $0x30] sm:$0xff] }
   0x5   :  { %382 = vmatprep.mubr.msk.bf16.mxu0 %vm61_vm0, %v38_v4  ;;  %v40_v15 = vpack.c.bf16 %v27_v14, %v26_v12  ;;  %v34_v16 = vld [vmem:[%s682_s1 + $0x60] sm:$0xff]  ;;  %v35_v17 = vld [vmem:[%s682_s1 + $0x68] sm:$0xff] }
   0x6   :  { %390 = vmatprep.mubr.msk.bf16.mxu1 %vm61_vm0, %v42_v8  ;;  %383 = vmatmul.mubr.msk.bf16.vlgmr.msra.gmra.mrb[0].mxu0 %vm61_vm0, %v39_v9  ;;  %v44_v19 = vpack.c.bf16 %v35_v17, %v34_v16 }
   0x7   :  { %391 = vmatmul.mubr.msk.bf16.vlgmr.msra.gmra.mrb[0].mxu1 %vm61_vm0, %v43_v13 }
   0x8   :  { %10 = vsyncpa [#allocation3], 0  ;;  %386 = vmatprep.mubr.msk.bf16.mxu0 %vm61_vm0, %v40_v15  ;;  %v29_v20 = vld [vmem:[%s682_s1 + $0x38] sm:$0xff]  ;;  %v36_v21 = vld [vmem:[%s682_s1 + $0x70] sm:$0xff]  ;;  %394 = vmatprep.mubr.msk.bf16.mxu1 %vm61_vm0, %v44_v19  ;;  %vm263_vm1 = vcmask 523264   ;;  %vm328_vm2 = vcmask 654336  }
   0x9   :  { %v37_v22 = vld [vmem:[%s682_s1 + $0x78] sm:$0xff]  ;;  %v41_v23 = vpack.c.bf16 %v29_v20, %v28_v18  ;;  %v361_v25 = vld [vmem:[%s684_s3] ss:$0 sm:$0xff]  ;;  %s429_s1 = smov 64   ;;  %v193_v58 = vld [vmem:[%s681_s0 + $0x50] sm:$0xff]  ;;  %s430_s9 = smov [#allocation2]  }
   0xa   :  { %v45_v24 = vpack.c.bf16 %v37_v22, %v36_v21  ;;  %v185_v59 = vld [vmem:[%s681_s0 + $0x10] sm:$0xff]  ;;  %v186_v4 = vld [vmem:[%s681_s0 + $0x18] sm:$0xff]  ;;  %v183_v5 = vld [vmem:[%s681_s0] sm:$0xff]  ;;  %s350_s10 = sshll.u32 %s430_s9, 4  ;;  %s351_s10 = int_to_ptr.vmem [resolvable:$true] %s350_s10 }
   0xb   :  { %v290_v60 = vld [vmem:[%s685_s4 + $0x50] sm:$0xff]  ;;  %v283_v6 = vld [vmem:[%s685_s4 + $0x18] sm:$0xff]  ;;  %v280_v7 = vld [vmem:[%s685_s4] sm:$0xff]  ;;  %p410_p1 = scmp.lt.s32.totalorder %s351_s10, %s351_s10 }
   0xc   :  { %v282_v61 = vld [vmem:[%s685_s4 + $0x10] sm:$0xff]  ;;  %v194_v16 = vld [vmem:[%s681_s0 + $0x58] sm:$0xff]  ;;  %v191_v17 = vld [vmem:[%s681_s0 + $0x40] sm:$0xff] }
   0xd   :  { %v291_v18 = vld [vmem:[%s685_s4 + $0x58] sm:$0xff]  ;;  %v288_v19 = vld [vmem:[%s685_s4 + $0x40] sm:$0xff] }
   0xe   :  { %387 = vmatmul.mubr.msk.bf16.gmra.mrb[4].mxu0 %vm61_vm0, %v41_v23 }
   0xf   :  { %395 = vmatmul.mubr.msk.bf16.gmra.mrb[4].mxu1 %vm61_vm0, %v45_v24 }
  0xd9   :  { %v384_v26 = vpop.f32.mrb[0].mxu0 }
  0xda   :  { %v392_v27 = vpop.f32.mrb[0].mxu1  ;;  %v129_v28 = vadd.f32 %v384_v26, %v361_v25  ;;  %v120_v30 = vpop.f32.mrb[1].mxu0 }
  0xdb   :  { %v161_v29 = vadd.f32 %v392_v27, %v361_v25  ;;  %v152_v31 = vpop.f32.mrb[1].mxu1  ;;  %v385_v32 = vpop.f32.mrb[2].mxu0  ;;  %v121_v36 = vadd.f32 %v361_v25, %v120_v30  ;;  %v289_v30 = vld [vmem:[%s685_s4 + $0x48] sm:$0xff] }
  0xdc   :  { %v393_v33 = vpop.f32.mrb[2].mxu1  ;;  %219 = vrot.lane.b32.xlu1 %v129_v28, %s429_s1  ;;  %v123_v35 = vpop.f32.mrb[3].mxu0  ;;  %v132_v37 = vadd.f32 %v385_v32, %v361_v25  ;;  %v153_v40 = vadd.f32 %v361_v25, %v152_v31  ;;  %v192_v28 = vld [vmem:[%s681_s0 + $0x48] sm:$0xff] }
  0xdd   :  { %235 = vrot.lane.b32.xlu0 %v161_v29, %s429_s1  ;;  %v155_v34 = vpop.f32.mrb[3].mxu1  ;;  %v164_v41 = vadd.f32 %v393_v33, %v361_v25  ;;  %v124_v49 = vadd.f32 %v361_v25, %v123_v35  ;;  %v184_v29 = vld [vmem:[%s681_s0 + $0x8] sm:$0xff] }
  0xde   :  { %v156_v48 = vadd.f32 %v361_v25, %v155_v34  ;;  %v281_v31 = vld [vmem:[%s685_s4 + $0x8] sm:$0xff] }
  0xe0   :  { %221 = vrot.lane.b32.xlu1 %v132_v37, %s429_s1 }
  0xe1   :  { %215 = vrot.lane.b32.xlu0 %v121_v36, %s429_s1  ;;  %v388_v38 = vpop.f32.mrb[4].mxu0 }
  0xe2   :  { %v396_v39 = vpop.f32.mrb[4].mxu1  ;;  %v136_v42 = vpop.f32.mrb[5].mxu0  ;;  %v145_v50 = vadd.f32 %v388_v38, %v361_v25 }
  0xe3   :  { %v168_v43 = vpop.f32.mrb[5].mxu1  ;;  %v389_v44 = vpop.f32.mrb[6].mxu0  ;;  %v137_v52 = vadd.f32 %v361_v25, %v136_v42  ;;  %v177_v56 = vadd.f32 %v396_v39, %v361_v25  ;;  %v287_v42 = vld [vmem:[%s685_s4 + $0x38] sm:$0xff] }
  0xe4   :  { %v397_v45 = vpop.f32.mrb[6].mxu1  ;;  %237 = vrot.lane.b32.xlu1 %v164_v41, %s429_s1  ;;  %v139_v46 = vpop.f32.mrb[7].mxu0  ;;  %v148_v51 = vadd.f32 %v389_v44, %v361_v25  ;;  %v169_v54 = vadd.f32 %v361_v25, %v168_v43  ;;  %v189_v41 = vld [vmem:[%s681_s0 + $0x30] sm:$0xff] }
  0xe5   :  { %231 = vrot.lane.b32.xlu0 %v153_v40, %s429_s1  ;;  %v171_v47 = vpop.f32.mrb[7].mxu1  ;;  %v140_v53 = vadd.f32 %v361_v25, %v139_v46  ;;  %v180_v57 = vadd.f32 %v397_v45, %v361_v25  ;;  %v190_v40 = vld [vmem:[%s681_s0 + $0x38] sm:$0xff]  ;;  %v286_v43 = vld [vmem:[%s685_s4 + $0x30] sm:$0xff] }
  0xe6   :  { %v172_v55 = vadd.f32 %v361_v25, %v171_v47 }
  0xe8   :  { %233 = vrot.lane.b32.xlu1 %v156_v48, %s429_s1 }
  0xe9   :  { %217 = vrot.lane.b32.xlu0 %v124_v49, %s429_s1 }
  0xec   :  { %229 = vrot.lane.b32.xlu1 %v148_v51, %s429_s1 }
  0xed   :  { %227 = vrot.lane.b32.xlu0 %v145_v50, %s429_s1 }
  0xf0   :  { %225 = vrot.lane.b32.xlu1 %v140_v53, %s429_s1  ;;  %v187_v53 = vld [vmem:[%s681_s0 + $0x20] sm:$0xff] }
  0xf1   :  { %223 = vrot.lane.b32.xlu0 %v137_v52, %s429_s1  ;;  %v188_v52 = vld [vmem:[%s681_s0 + $0x28] sm:$0xff] }
  0xf4   :  { %241 = vrot.lane.b32.xlu1 %v172_v55, %s429_s1  ;;  %v284_v55 = vld [vmem:[%s685_s4 + $0x20] sm:$0xff] }
  0xf5   :  { %239 = vrot.lane.b32.xlu0 %v169_v54, %s429_s1  ;;  %v285_v54 = vld [vmem:[%s685_s4 + $0x28] sm:$0xff] }
  0xf8   :  { %245 = vrot.lane.b32.xlu1 %v180_v57, %s429_s1 }
  0xf9   :  { %243 = vrot.lane.b32.xlu0 %v177_v56, %s429_s1 }
 0x14e   :  { %v220_v63 = vpop.permute.xlu1 %219 }
 0x14f   :  { %v236_v62 = vpop.permute.xlu0 %235  ;;  %v266_v1 = vsel %vm263_vm1, %v185_v59, %v220_v63 }
 0x150   :  { %v274_v0 = vsel %vm263_vm1, %v193_v58, %v236_v62  ;;  %v298_v3 = vadd.f32 %v282_v61, %v266_v1  ;;  %v195_v1 = vld [vmem:[%s681_s0 + $0x60] sm:$0xff] }
 0x151   :  { %v306_v2 = vadd.f32 %v290_v60, %v274_v0  ;;  %v196_v0 = vld [vmem:[%s681_s0 + $0x68] sm:$0xff] }
 0x152   :  { %v314_v9 = vmax.f32 %v298_v3, 0.0  ;;  %v222_v10 = vpop.permute.xlu1 %221  ;;  %v292_v3 = vld [vmem:[%s685_s4 + $0x60] sm:$0xff] }
 0x153   :  { %v322_v8 = vmax.f32 %v306_v2, 0.0  ;;  %v216_v11 = vpop.permute.xlu0 %215  ;;  %v267_v12 = vsel %vm263_vm1, %v186_v4, %v222_v10  ;;  %v293_v2 = vld [vmem:[%s685_s4 + $0x68] sm:$0xff] }
 0x154   :  { %v264_v13 = vsel %vm263_vm1, %v183_v5, %v216_v11  ;;  %331 = vst.msk [vmem:[#allocation2 + $0x10] sm:$0xff] %vm328_vm2, %v314_v9  ;;  %v299_v14 = vadd.f32 %v283_v6, %v267_v12  ;;  %v198_v12 = vld [vmem:[%s681_s0 + $0x78] sm:$0xff] }
 0x155   :  { %339 = vst.msk [vmem:[#allocation2 + $0x50] sm:$0xff] %vm328_vm2, %v322_v8  ;;  %v296_v15 = vadd.f32 %v280_v7, %v264_v13  ;;  %v197_v13 = vld [vmem:[%s681_s0 + $0x70] sm:$0xff]  ;;  %s405_s0 = scalar_lea.vmem %s351_s10, 2048 }
 0x156   :  { %v315_v20 = vmax.f32 %v299_v14, 0.0  ;;  %v238_v22 = vpop.permute.xlu1 %237  ;;  %v295_v14 = vld [vmem:[%s685_s4 + $0x78] sm:$0xff]  ;;  %p406_p0 = scmp.ne.s32.totalorder %s351_s10, %s405_s0  ;;  %p411_p2 = scmp.lt.s32.totalorder %s405_s0, %s405_s0 }
 0x157   :  { %v312_v21 = vmax.f32 %v296_v15, 0.0  ;;  %v232_v23 = vpop.permute.xlu0 %231  ;;  %v275_v24 = vsel %vm263_vm1, %v194_v16, %v238_v22  ;;  %v294_v15 = vld [vmem:[%s685_s4 + $0x70] sm:$0xff] }
 0x158   :  { %v272_v25 = vsel %vm263_vm1, %v191_v17, %v232_v23  ;;  %332 = vst.msk [vmem:[#allocation2 + $0x18] sm:$0xff] %vm328_vm2, %v315_v20  ;;  %v307_v26 = vadd.f32 %v291_v18, %v275_v24  ;;  %p412_p3 = por %p411_p2, %p410_p1 }
 0x159   :  { %329 = vst.msk [vmem:[#allocation2] sm:$0xff] %vm328_vm2, %v312_v21  ;;  %v304_v27 = vadd.f32 %v288_v19, %v272_v25 }
 0x15a   :  { %v323_v32 = vmax.f32 %v307_v26, 0.0  ;;  %v234_v34 = vpop.permute.xlu1 %233  ;;  %p413_p4 = pnand %p412_p3, %p406_p0 }
 0x15b   :  { %v320_v33 = vmax.f32 %v304_v27, 0.0  ;;  %v218_v35 = vpop.permute.xlu0 %217  ;;  %v273_v36 = vsel %vm263_vm1, %v192_v28, %v234_v34 }
 0x15c   :  { %v265_v37 = vsel %vm263_vm1, %v184_v29, %v218_v35  ;;  %340 = vst.msk [vmem:[#allocation2 + $0x58] sm:$0xff] %vm328_vm2, %v323_v32  ;;  %v305_v38 = vadd.f32 %v289_v30, %v273_v36 }
 0x15d   :  { %337 = vst.msk [vmem:[#allocation2 + $0x40] sm:$0xff] %vm328_vm2, %v320_v33  ;;  %v297_v39 = vadd.f32 %v281_v31, %v265_v37 }
 0x15e   :  { %v321_v44 = vmax.f32 %v305_v38, 0.0  ;;  %v230_v46 = vpop.permute.xlu1 %229 }
 0x15f   :  { %v313_v45 = vmax.f32 %v297_v39, 0.0  ;;  %v228_v47 = vpop.permute.xlu0 %227  ;;  %v271_v48 = vsel %vm263_vm1, %v190_v40, %v230_v46 }
 0x160   :  { %v270_v49 = vsel %vm263_vm1, %v189_v41, %v228_v47  ;;  %338 = vst.msk [vmem:[#allocation2 + $0x48] sm:$0xff] %vm328_vm2, %v321_v44  ;;  %v303_v50 = vadd.f32 %v287_v42, %v271_v48 }
 0x161   :  { %330 = vst.msk [vmem:[#allocation2 + $0x8] sm:$0xff] %vm328_vm2, %v313_v45  ;;  %v302_v51 = vadd.f32 %v286_v43, %v270_v49 }
 0x162   :  { %v319_v56 = vmax.f32 %v303_v50, 0.0  ;;  %v226_v58 = vpop.permute.xlu1 %225 }
 0x163   :  { %v318_v57 = vmax.f32 %v302_v51, 0.0  ;;  %v224_v59 = vpop.permute.xlu0 %223  ;;  %v269_v60 = vsel %vm263_vm1, %v188_v52, %v226_v58 }
 0x164   :  { %v268_v61 = vsel %vm263_vm1, %v187_v53, %v224_v59  ;;  %336 = vst.msk [vmem:[#allocation2 + $0x38] sm:$0xff] %vm328_vm2, %v319_v56  ;;  %v301_v62 = vadd.f32 %v285_v54, %v269_v60 }
 0x165   :  { %335 = vst.msk [vmem:[#allocation2 + $0x30] sm:$0xff] %vm328_vm2, %v318_v57  ;;  %v300_v63 = vadd.f32 %v284_v55, %v268_v61 }
 0x166   :  { %v317_v4 = vmax.f32 %v301_v62, 0.0  ;;  %v242_v6 = vpop.permute.xlu1 %241 }
 0x167   :  { %v316_v5 = vmax.f32 %v300_v63, 0.0  ;;  %v240_v7 = vpop.permute.xlu0 %239  ;;  %v277_v8 = vsel %vm263_vm1, %v196_v0, %v242_v6 }
 0x168   :  { %v276_v9 = vsel %vm263_vm1, %v195_v1, %v240_v7  ;;  %334 = vst.msk [vmem:[#allocation2 + $0x28] sm:$0xff] %vm328_vm2, %v317_v4  ;;  %v309_v10 = vadd.f32 %v293_v2, %v277_v8 }
 0x169   :  { %333 = vst.msk [vmem:[#allocation2 + $0x20] sm:$0xff] %vm328_vm2, %v316_v5  ;;  %v308_v11 = vadd.f32 %v292_v3, %v276_v9 }
 0x16a   :  { %v325_v16 = vmax.f32 %v309_v10, 0.0  ;;  %v246_v18 = vpop.permute.xlu1 %245 }
 0x16b   :  { %v324_v17 = vmax.f32 %v308_v11, 0.0  ;;  %v244_v19 = vpop.permute.xlu0 %243  ;;  %v279_v20 = vsel %vm263_vm1, %v198_v12, %v246_v18 }
 0x16c   :  { %v278_v21 = vsel %vm263_vm1, %v197_v13, %v244_v19  ;;  %342 = vst.msk [vmem:[#allocation2 + $0x68] sm:$0xff] %vm328_vm2, %v325_v16  ;;  %v311_v22 = vadd.f32 %v295_v14, %v279_v20 }
 0x16d   :  { %341 = vst.msk [vmem:[#allocation2 + $0x60] sm:$0xff] %vm328_vm2, %v324_v17  ;;  %v310_v23 = vadd.f32 %v294_v15, %v278_v21 }
 0x16e   :  { %v327_v24 = vmax.f32 %v311_v22, 0.0 }
 0x16f   :  { %v326_v25 = vmax.f32 %v310_v23, 0.0 }
 0x170   :  { %344 = vst.msk [vmem:[#allocation2 + $0x78] sm:$0xff] %vm328_vm2, %v327_v24 }
 0x171   :  { %343 = vst.msk [vmem:[#allocation2 + $0x70] sm:$0xff] %vm328_vm2, %v326_v25 }
 0x172   :  { %416 = shalt.err (!%p413_p4)
}
 0x173   :  { %s417_s12 = scalar_lea.hbm %s686_s5, 2048 }
 0x174   :  { %p418_p5 = scmp.ne.s32.totalorder %s686_s5, %s417_s12  ;;  %p421_p6 = scmp.lt.u32.totalorder %s417_s12, %s686_s5 }
 0x176   :  { %p423_p7 = pnand %p421_p6, %p418_p5 }
 0x178   :  { %426 = shalt.err (!%p423_p7)
}
 0x179   :  { %s431_s17 = smov 128   ;;  %s432_s18 = smov 8  }
 0x17a   :  { %356 = dma.vmem_to_hbm [thread:$0]  %s351_s10, 2048, %s686_s5, [#allocation3], %s431_s17, %s431_s17, %s432_s18  }
 0x17b   :  { %427 = dma.done.wait [#allocation3], 2048  }
 0x17c   :  { %428 = vsyncadd [#allocation3], 4294965248 }
 0x17d   :  { %360 = vsyncpa [#allocation3], 1 }

// kernel: bottleneck_forward.8
= control target key start
LH: loop header
LB: loop body
LE: loop exit
PB: predicated region body
PF: predicated region fallthrough
CT: control target
= control target key end

     0   :  { %vm367_vm0 = vcmask 326656   ;;  %vm1080_vm1 = vcmask 523264   ;;  %vm2433_vm2 = vcmask 31744   ;;  %s4882_s1 = inlined_call_operand.vmem [shape: f32[8,64,40], index: 1, kind: input, shape index: {}]   ;;  %s4883_s0 = inlined_call_operand.vmem [shape: f32[8,64,40], index: 0, kind: input, shape index: {}]   ;;  %s4884_s2 = inlined_call_operand.vmem [shape: f32[8,64,4], index: 2, kind: input, shape index: {}]   ;;  %s4885_s3 = inlined_call_operand.vmem [shape: f32[8,64,4], index: 3, kind: output, shape index: {}]  }
   0x1   :  { %v175_v0 = vld [vmem:[%s4882_s1] sm:$0xff]  ;;  %v176_v1 = vld [vmem:[%s4882_s1 + $0x8] sm:$0xff]  ;;  %v177_v5 = vld [vmem:[%s4882_s1 + $0x10] sm:$0xff] }
   0x2   :  { %v183_v2 = vld [vmem:[%s4882_s1 + $0x40] sm:$0xff]  ;;  %v239_v3 = vpack.c.bf16 %v176_v1, %v175_v0  ;;  %v184_v4 = vld [vmem:[%s4882_s1 + $0x48] sm:$0xff]  ;;  %v178_v6 = vld [vmem:[%s4882_s1 + $0x18] sm:$0xff] }
   0x3   :  { %v243_v7 = vpack.c.bf16 %v184_v4, %v183_v2  ;;  %v240_v8 = vpack.c.bf16 %v178_v6, %v177_v5  ;;  %v185_v9 = vld [vmem:[%s4882_s1 + $0x50] sm:$0xff]  ;;  %v186_v10 = vld [vmem:[%s4882_s1 + $0x58] sm:$0xff]  ;;  %v179_v14 = vld [vmem:[%s4882_s1 + $0x20] sm:$0xff] }
   0x4   :  { %2950 = vmatprep.subr.msk.bf16.mxu0 %vm367_vm0, %v239_v3  ;;  %v381_v11 = vsel %vm367_vm0, %v239_v3, 0  ;;  %v244_v12 = vpack.c.bf16 %v186_v10, %v185_v9  ;;  %v15_v15 = vld [vmem:[%s4883_s0] sm:$0xff]  ;;  %v16_v16 = vld [vmem:[%s4883_s0 + $0x8] sm:$0xff]  ;;  %v181_v32 = vld [vmem:[%s4882_s1 + $0x30] sm:$0xff] }
   0x5   :  { %2954 = vmatprep.subr.msk.bf16.mxu1 %vm367_vm0, %v243_v7  ;;  %2695 = vmatpush3.bf16.xpose.msra.mxu0 %v381_v11  ;;  %v470_v13 = vsel %vm367_vm0, %v243_v7, 0  ;;  %v180_v17 = vld [vmem:[%s4882_s1 + $0x28] sm:$0xff]  ;;  %v79_v18 = vmul.f32 0.15811388, %v15_v15  ;;  %v23_v19 = vld [vmem:[%s4883_s0 + $0x40] sm:$0xff]  ;;  %v384_v26 = vsel %vm367_vm0, %v240_v8, 0 }
   0x6   :  { %2711 = vmatpush3.bf16.xpose.msra.mxu1 %v470_v13  ;;  %2951 = vmatprep.subr.msk.bf16.mxu0 %vm367_vm0, %v240_v8  ;;  %v24_v20 = vld [vmem:[%s4883_s0 + $0x48] sm:$0xff]  ;;  %v187_v21 = vld [vmem:[%s4882_s1 + $0x60] sm:$0xff]  ;;  %v80_v23 = vmul.f32 0.15811388, %v16_v16  ;;  %v87_v24 = vmul.f32 0.15811388, %v23_v19  ;;  %v241_v27 = vpack.c.bf16 %v180_v17, %v179_v14 }
   0x7   :  { %2955 = vmatprep.subr.msk.bf16.mxu1 %vm367_vm0, %v244_v12  ;;  %v188_v22 = vld [vmem:[%s4882_s1 + $0x68] sm:$0xff]  ;;  %v88_v25 = vmul.f32 0.15811388, %v24_v20  ;;  %v473_v29 = vsel %vm367_vm0, %v244_v12, 0  ;;  %v182_v33 = vld [vmem:[%s4882_s1 + $0x38] sm:$0xff]  ;;  %v189_v34 = vld [vmem:[%s4882_s1 + $0x70] sm:$0xff] }
   0x8   :  { %v143_v28 = vpack.c.bf16 %v80_v23, %v79_v18  ;;  %v245_v30 = vpack.c.bf16 %v188_v22, %v187_v21  ;;  %v190_v35 = vld [vmem:[%s4882_s1 + $0x78] sm:$0xff]  ;;  %v387_v36 = vsel %vm367_vm0, %v241_v27, 0  ;;  %v242_v37 = vpack.c.bf16 %v182_v33, %v181_v32  ;;  %v191_v40 = vld [vmem:[%s4882_s1 + $0x80] sm:$0xff]  ;;  %v192_v41 = vld [vmem:[%s4882_s1 + $0x88] sm:$0xff] }
   0x9   :  { %v147_v31 = vpack.c.bf16 %v88_v25, %v87_v24  ;;  %v246_v39 = vpack.c.bf16 %v190_v35, %v189_v34  ;;  %v199_v42 = vld [vmem:[%s4882_s1 + $0xc0] sm:$0xff]  ;;  %v200_v43 = vld [vmem:[%s4882_s1 + $0xc8] sm:$0xff]  ;;  %v17_v44 = vld [vmem:[%s4883_s0 + $0x10] sm:$0xff]  ;;  %v247_v49 = vpack.c.bf16 %v192_v41, %v191_v40 }
   0xa   :  { %2702 = vmatprep.mubr.msk.bf16.mxu0 %vm367_vm0, %v143_v28  ;;  %v476_v38 = vsel %vm367_vm0, %v245_v30, 0  ;;  %v18_v45 = vld [vmem:[%s4883_s0 + $0x18] sm:$0xff]  ;;  %v390_v46 = vsel %vm367_vm0, %v242_v37, 0  ;;  %v25_v47 = vld [vmem:[%s4883_s0 + $0x50] sm:$0xff]  ;;  %v251_v51 = vpack.c.bf16 %v200_v43, %v199_v42  ;;  %v81_v52 = vmul.f32 0.15811388, %v17_v44 }
   0xb   :  { %2718 = vmatprep.mubr.msk.bf16.mxu1 %vm367_vm0, %v147_v31  ;;  %v26_v48 = vld [vmem:[%s4883_s0 + $0x58] sm:$0xff]  ;;  %v479_v50 = vsel %vm367_vm0, %v246_v39, 0  ;;  %v82_v53 = vmul.f32 0.15811388, %v18_v45  ;;  %v19_v54 = vld [vmem:[%s4883_s0 + $0x20] sm:$0xff]  ;;  %v20_v55 = vld [vmem:[%s4883_s0 + $0x28] sm:$0xff] }
   0xc   :  { %v89_v56 = vmul.f32 0.15811388, %v25_v47  ;;  %v90_v57 = vmul.f32 0.15811388, %v26_v48  ;;  %v27_v58 = vld [vmem:[%s4883_s0 + $0x60] sm:$0xff]  ;;  %v28_v59 = vld [vmem:[%s4883_s0 + $0x68] sm:$0xff] }
   0xd   :  { %2697 = vmatpush3.bf16.xpose.msra.mxu0 %v384_v26  ;;  %v193_v60 = vld [vmem:[%s4882_s1 + $0x90] sm:$0xff]  ;;  %v194_v61 = vld [vmem:[%s4882_s1 + $0x98] sm:$0xff]  ;;  %v83_v62 = vmul.f32 0.15811388, %v19_v54  ;;  %v84_v63 = vmul.f32 0.15811388, %v20_v55  ;;  %v144_v0 = vpack.c.bf16 %v82_v53, %v81_v52 }
   0xe   :  { %2713 = vmatpush3.bf16.xpose.msra.mxu1 %v473_v29  ;;  %2952 = vmatprep.subr.msk.bf16.mxu0 %vm367_vm0, %v241_v27  ;;  %v201_v1 = vld [vmem:[%s4882_s1 + $0xd0] sm:$0xff]  ;;  %v202_v2 = vld [vmem:[%s4882_s1 + $0xd8] sm:$0xff]  ;;  %v91_v3 = vmul.f32 0.15811388, %v27_v58  ;;  %v92_v4 = vmul.f32 0.15811388, %v28_v59  ;;  %v148_v5 = vpack.c.bf16 %v90_v57, %v89_v56  ;;  %v248_v9 = vpack.c.bf16 %v194_v61, %v193_v60 }
   0xf   :  { %2956 = vmatprep.subr.msk.bf16.mxu1 %vm367_vm0, %v245_v30  ;;  %v21_v6 = vld [vmem:[%s4883_s0 + $0x30] sm:$0xff]  ;;  %v22_v7 = vld [vmem:[%s4883_s0 + $0x38] sm:$0xff]  ;;  %v559_v8 = vsel %vm367_vm0, %v247_v49, 0  ;;  %v648_v12 = vsel %vm367_vm0, %v251_v51, 0  ;;  %v252_v13 = vpack.c.bf16 %v202_v2, %v201_v1  ;;  %v145_v14 = vpack.c.bf16 %v84_v63, %v83_v62  ;;  %v31_v18 = vld [vmem:[%s4883_s0 + $0x80] sm:$0xff] }
  0x10   :  { %v29_v10 = vld [vmem:[%s4883_s0 + $0x70] sm:$0xff]  ;;  %v30_v11 = vld [vmem:[%s4883_s0 + $0x78] sm:$0xff]  ;;  %v85_v15 = vmul.f32 0.15811388, %v21_v6  ;;  %v86_v16 = vmul.f32 0.15811388, %v22_v7  ;;  %v149_v17 = vpack.c.bf16 %v92_v4, %v91_v3 }
  0x11   :  { %v32_v19 = vld [vmem:[%s4883_s0 + $0x88] sm:$0xff]  ;;  %v93_v20 = vmul.f32 0.15811388, %v29_v10  ;;  %v94_v21 = vmul.f32 0.15811388, %v30_v11  ;;  %v39_v22 = vld [vmem:[%s4883_s0 + $0xc0] sm:$0xff] }
  0x12   :  { %v40_v23 = vld [vmem:[%s4883_s0 + $0xc8] sm:$0xff]  ;;  %v195_v24 = vld [vmem:[%s4882_s1 + $0xa0] sm:$0xff]  ;;  %v95_v26 = vmul.f32 0.15811388, %v31_v18  ;;  %v96_v27 = vmul.f32 0.15811388, %v32_v19  ;;  %v146_v28 = vpack.c.bf16 %v86_v16, %v85_v15 }
  0x13   :  { %v196_v25 = vld [vmem:[%s4882_s1 + $0xa8] sm:$0xff]  ;;  %v203_v29 = vld [vmem:[%s4882_s1 + $0xe0] sm:$0xff]  ;;  %v103_v31 = vmul.f32 0.15811388, %v39_v22  ;;  %v104_v32 = vmul.f32 0.15811388, %v40_v23  ;;  %v150_v33 = vpack.c.bf16 %v94_v21, %v93_v20 }
  0x14   :  { %v204_v30 = vld [vmem:[%s4882_s1 + $0xe8] sm:$0xff]  ;;  %v562_v34 = vsel %vm367_vm0, %v248_v9, 0  ;;  %v249_v35 = vpack.c.bf16 %v196_v25, %v195_v24  ;;  %v197_v40 = vld [vmem:[%s4882_s1 + $0xb0] sm:$0xff]  ;;  %v198_v41 = vld [vmem:[%s4882_s1 + $0xb8] sm:$0xff] }
  0x15   :  { %2699 = vmatpush3.bf16.xpose.msra.mxu0 %v387_v36  ;;  %v651_v36 = vsel %vm367_vm0, %v252_v13, 0  ;;  %v205_v42 = vld [vmem:[%s4882_s1 + $0xf0] sm:$0xff]  ;;  %v206_v43 = vld [vmem:[%s4882_s1 + $0xf8] sm:$0xff]  ;;  %v250_v45 = vpack.c.bf16 %v198_v41, %v197_v40  ;;  %v207_v48 = vld [vmem:[%s4882_s1 + $0x100] sm:$0xff] }
  0x16   :  { %2715 = vmatpush3.bf16.xpose.msra.mxu1 %v476_v38  ;;  %2953 = vmatprep.subr.msk.bf16.mxu0 %vm367_vm0, %v242_v37  ;;  %v253_v37 = vpack.c.bf16 %v204_v30, %v203_v29  ;;  %v151_v38 = vpack.c.bf16 %v96_v27, %v95_v26  ;;  %v565_v44 = vsel %vm367_vm0, %v249_v35, 0  ;;  %v254_v47 = vpack.c.bf16 %v206_v43, %v205_v42  ;;  %v33_v52 = vld [vmem:[%s4883_s0 + $0x90] sm:$0xff]  ;;  %v34_v53 = vld [vmem:[%s4883_s0 + $0x98] sm:$0xff]  ;;  %v35_v62 = vld [vmem:[%s4883_s0 + $0xa0] sm:$0xff] }
  0x17   :  { %2957 = vmatprep.subr.msk.bf16.mxu1 %vm367_vm0, %v246_v39  ;;  %v155_v39 = vpack.c.bf16 %v104_v32, %v103_v31  ;;  %v568_v54 = vsel %vm367_vm0, %v250_v45, 0  ;;  %v41_v56 = vld [vmem:[%s4883_s0 + $0xd0] sm:$0xff]  ;;  %v42_v57 = vld [vmem:[%s4883_s0 + $0xd8] sm:$0xff]  ;;  %v97_v60 = vmul.f32 0.15811388, %v33_v52  ;;  %v36_v63 = vld [vmem:[%s4883_s0 + $0xa8] sm:$0xff] }
  0x18   :  { %v657_v58 = vsel %vm367_vm0, %v254_v47, 0  ;;  %v98_v61 = vmul.f32 0.15811388, %v34_v53  ;;  %v106_v1 = vmul.f32 0.15811388, %v42_v57  ;;  %v43_v2 = vld [vmem:[%s4883_s0 + $0xe0] sm:$0xff] }
  0x19   :  { %v44_v3 = vld [vmem:[%s4883_s0 + $0xe8] sm:$0xff]  ;;  %v209_v4 = vld [vmem:[%s4882_s1 + $0x110] sm:$0xff]  ;;  %v99_v6 = vmul.f32 0.15811388, %v35_v62  ;;  %v100_v7 = vmul.f32 0.15811388, %v36_v63 }
  0x1a   :  { %v218_v10 = vld [vmem:[%s4882_s1 + $0x158] sm:$0xff]  ;;  %v107_v11 = vmul.f32 0.15811388, %v43_v2  ;;  %v45_v18 = vld [vmem:[%s4883_s0 + $0xf0] sm:$0xff]  ;;  %v47_v26 = vld [vmem:[%s4883_s0 + $0x100] sm:$0xff] }
  0x1b   :  { %v38_v15 = vld [vmem:[%s4883_s0 + $0xb8] sm:$0xff]  ;;  %v153_v22 = vpack.c.bf16 %v100_v7, %v99_v6  ;;  %v48_v27 = vld [vmem:[%s4883_s0 + $0x108] sm:$0xff]  ;;  %v55_v30 = vld [vmem:[%s4883_s0 + $0x140] sm:$0xff] }
  0x1c   :  { %v46_v19 = vld [vmem:[%s4883_s0 + $0xf8] sm:$0xff]  ;;  %v102_v24 = vmul.f32 0.15811388, %v38_v15  ;;  %v56_v31 = vld [vmem:[%s4883_s0 + $0x148] sm:$0xff]  ;;  %v211_v32 = vld [vmem:[%s4882_s1 + $0x120] sm:$0xff] }
  0x1d   :  { %2701 = vmatpush3.bf16.xpose.msra.mxu0 %v390_v46  ;;  %v654_v46 = vsel %vm367_vm0, %v253_v37, 0  ;;  %v110_v29 = vmul.f32 0.15811388, %v46_v19  ;;  %v120_v40 = vmul.f32 0.15811388, %v56_v31  ;;  %v224_v57 = vld [vmem:[%s4882_s1 + $0x188] sm:$0xff] }
  0x1e   :  { %2717 = vmatpush3.bf16.xpose.msra.mxu1 %v479_v50  ;;  %2958 = vmatprep.subr.msk.bf16.mxu0 %vm367_vm0, %v247_v49  ;;  %v208_v49 = vld [vmem:[%s4882_s1 + $0x108] sm:$0xff]  ;;  %v215_v50 = vld [vmem:[%s4882_s1 + $0x140] sm:$0xff] }
  0x1f   :  { %2962 = vmatprep.subr.msk.bf16.mxu1 %vm367_vm0, %v251_v51  ;;  %v216_v51 = vld [vmem:[%s4882_s1 + $0x148] sm:$0xff]  ;;  %v255_v55 = vpack.c.bf16 %v208_v49, %v207_v48  ;;  %v213_v48 = vld [vmem:[%s4882_s1 + $0x130] sm:$0xff]  ;;  %v214_v49 = vld [vmem:[%s4882_s1 + $0x138] sm:$0xff] }
  0x20   :  { %v259_v59 = vpack.c.bf16 %v216_v51, %v215_v50  ;;  %v221_v50 = vld [vmem:[%s4882_s1 + $0x170] sm:$0xff]  ;;  %v222_v51 = vld [vmem:[%s4882_s1 + $0x178] sm:$0xff]  ;;  %v258_v53 = vpack.c.bf16 %v214_v49, %v213_v48  ;;  %v51_v6 = vld [vmem:[%s4883_s0 + $0x120] sm:$0xff] }
  0x21   :  { %v737_v16 = vsel %vm367_vm0, %v255_v55, 0  ;;  %v52_v7 = vld [vmem:[%s4883_s0 + $0x128] sm:$0xff] }
  0x22   :  { %v826_v20 = vsel %vm367_vm0, %v259_v59, 0  ;;  %v746_v62 = vsel %vm367_vm0, %v258_v53, 0  ;;  %v116_v15 = vmul.f32 0.15811388, %v52_v7 }
  0x24   :  { %2703 = vmatmul.mubr.msk.bf16.vlgmr.msra.gmra.mrb[0].mxu0 %vm367_vm0, %v144_v0  ;;  %v105_v0 = vmul.f32 0.15811388, %v41_v56  ;;  %v223_v56 = vld [vmem:[%s4882_s1 + $0x180] sm:$0xff] }
  0x25   :  { %2719 = vmatmul.mubr.msk.bf16.vlgmr.msra.gmra.mrb[0].mxu1 %vm367_vm0, %v148_v5  ;;  %2727 = vmatpush3.bf16.xpose.msra.mxu0 %v559_v8  ;;  %v210_v5 = vld [vmem:[%s4882_s1 + $0x118] sm:$0xff]  ;;  %v152_v8 = vpack.c.bf16 %v98_v61, %v97_v60  ;;  %v49_v60 = vld [vmem:[%s4883_s0 + $0x110] sm:$0xff]  ;;  %v263_v63 = vpack.c.bf16 %v224_v57, %v223_v56 }
  0x26   :  { %2743 = vmatpush3.bf16.xpose.msra.mxu1 %v648_v12  ;;  %2959 = vmatprep.subr.msk.bf16.mxu0 %vm367_vm0, %v248_v9  ;;  %v217_v9 = vld [vmem:[%s4882_s1 + $0x150] sm:$0xff]  ;;  %v108_v12 = vmul.f32 0.15811388, %v44_v3  ;;  %v50_v61 = vld [vmem:[%s4883_s0 + $0x118] sm:$0xff] }
  0x27   :  { %2963 = vmatprep.subr.msk.bf16.mxu1 %vm367_vm0, %v252_v13  ;;  %2706 = vmatprep.mubr.msk.bf16.mxu0 %vm367_vm0, %v145_v14  ;;  %v156_v13 = vpack.c.bf16 %v106_v1, %v105_v0  ;;  %v37_v14 = vld [vmem:[%s4883_s0 + $0xb0] sm:$0xff]  ;;  %v260_v21 = vpack.c.bf16 %v218_v10, %v217_v9  ;;  %v58_v1 = vld [vmem:[%s4883_s0 + $0x158] sm:$0xff]  ;;  %v59_v10 = vld [vmem:[%s4883_s0 + $0x160] sm:$0xff] }
  0x28   :  { %2722 = vmatprep.mubr.msk.bf16.mxu1 %vm367_vm0, %v149_v17  ;;  %v256_v17 = vpack.c.bf16 %v210_v5, %v209_v4  ;;  %v101_v23 = vmul.f32 0.15811388, %v37_v14  ;;  %v157_v25 = vpack.c.bf16 %v108_v12, %v107_v11  ;;  %v57_v0 = vld [vmem:[%s4883_s0 + $0x150] sm:$0xff]  ;;  %v113_v4 = vmul.f32 0.15811388, %v49_v60  ;;  %v60_v11 = vld [vmem:[%s4883_s0 + $0x168] sm:$0xff] }
  0x29   :  { %v114_v5 = vmul.f32 0.15811388, %v50_v61  ;;  %v122_v9 = vmul.f32 0.15811388, %v58_v1  ;;  %v225_v12 = vld [vmem:[%s4882_s1 + $0x190] sm:$0xff]  ;;  %v230_v57 = vld [vmem:[%s4882_s1 + $0x1b8] sm:$0xff] }
  0x2a   :  { %v740_v42 = vsel %vm367_vm0, %v256_v17, 0  ;;  %v115_v14 = vmul.f32 0.15811388, %v51_v6  ;;  %v123_v19 = vmul.f32 0.15811388, %v59_v10  ;;  %v229_v56 = vld [vmem:[%s4882_s1 + $0x1b0] sm:$0xff] }
  0x2b   :  { %v266_v61 = vpack.c.bf16 %v230_v57, %v229_v56  ;;  %v66_v1 = vld [vmem:[%s4883_s0 + $0x198] sm:$0xff]  ;;  %v68_v6 = vld [vmem:[%s4883_s0 + $0x1a8] sm:$0xff] }
  0x2c   :  { %2707 = vmatmul.mubr.msk.bf16.gmra.mrb[4].mxu0 %vm367_vm0, %v146_v28  ;;  %v109_v28 = vmul.f32 0.15811388, %v45_v18  ;;  %v234_v18 = vld [vmem:[%s4882_s1 + $0x1d8] sm:$0xff] }
  0x2d   :  { %2729 = vmatpush3.bf16.xpose.msra.mxu0 %v562_v34  ;;  %2723 = vmatmul.mubr.msk.bf16.gmra.mrb[4].mxu1 %vm367_vm0, %v150_v33  ;;  %v212_v33 = vld [vmem:[%s4882_s1 + $0x128] sm:$0xff]  ;;  %v111_v34 = vmul.f32 0.15811388, %v47_v26  ;;  %v61_v26 = vld [vmem:[%s4883_s0 + $0x170] sm:$0xff] }
  0x2e   :  { %2745 = vmatpush3.bf16.xpose.msra.mxu1 %v651_v36  ;;  %2960 = vmatprep.subr.msk.bf16.mxu0 %vm367_vm0, %v249_v35  ;;  %v112_v35 = vmul.f32 0.15811388, %v48_v27  ;;  %v154_v36 = vpack.c.bf16 %v102_v24, %v101_v23  ;;  %v158_v41 = vpack.c.bf16 %v110_v29, %v109_v28  ;;  %v257_v43 = vpack.c.bf16 %v212_v33, %v211_v32  ;;  %v54_v23 = vld [vmem:[%s4883_s0 + $0x138] sm:$0xff] }
  0x2f   :  { %2964 = vmatprep.subr.msk.bf16.mxu1 %vm367_vm0, %v253_v37  ;;  %2734 = vmatprep.mubr.msk.bf16.mxu0 %vm367_vm0, %v151_v38  ;;  %v219_v37 = vld [vmem:[%s4882_s1 + $0x160] sm:$0xff]  ;;  %v220_v38 = vld [vmem:[%s4882_s1 + $0x168] sm:$0xff]  ;;  %v915_v24 = vsel %vm367_vm0, %v263_v63, 0  ;;  %v62_v27 = vld [vmem:[%s4883_s0 + $0x178] sm:$0xff]  ;;  %v118_v32 = vmul.f32 0.15811388, %v54_v23 }
  0x30   :  { %2750 = vmatprep.mubr.msk.bf16.mxu1 %vm367_vm0, %v155_v39  ;;  %v119_v39 = vmul.f32 0.15811388, %v55_v30  ;;  %v743_v52 = vsel %vm367_vm0, %v257_v43, 0  ;;  %v161_v30 = vpack.c.bf16 %v116_v15, %v115_v14  ;;  %v132_v15 = vmul.f32 0.15811388, %v68_v6 }
  0x35   :  { %2731 = vmatpush3.bf16.xpose.msra.mxu0 %v565_v44  ;;  %v829_v44 = vsel %vm367_vm0, %v260_v21, 0 }
  0x36   :  { %2747 = vmatpush3.bf16.xpose.msra.mxu1 %v654_v46  ;;  %2961 = vmatprep.subr.msk.bf16.mxu0 %vm367_vm0, %v250_v45  ;;  %v261_v45 = vpack.c.bf16 %v220_v38, %v219_v37  ;;  %v159_v46 = vpack.c.bf16 %v112_v35, %v111_v34  ;;  %v63_v34 = vld [vmem:[%s4883_s0 + $0x180] sm:$0xff]  ;;  %v64_v35 = vld [vmem:[%s4883_s0 + $0x188] sm:$0xff]  ;;  %v126_v37 = vmul.f32 0.15811388, %v62_v27 }
  0x37   :  { %2965 = vmatprep.subr.msk.bf16.mxu1 %vm367_vm0, %v254_v47  ;;  %v163_v47 = vpack.c.bf16 %v120_v40, %v119_v39  ;;  %v71_v38 = vld [vmem:[%s4883_s0 + $0x1c0] sm:$0xff]  ;;  %v72_v39 = vld [vmem:[%s4883_s0 + $0x1c8] sm:$0xff] }
  0x38   :  { %v227_v40 = vld [vmem:[%s4882_s1 + $0x1a0] sm:$0xff]  ;;  %v136_v48 = vmul.f32 0.15811388, %v72_v39 }
  0x3d   :  { %2733 = vmatpush3.bf16.xpose.msra.mxu0 %v568_v54  ;;  %v832_v54 = vsel %vm367_vm0, %v261_v45, 0 }
  0x3e   :  { %2749 = vmatpush3.bf16.xpose.msra.mxu1 %v657_v58  ;;  %2966 = vmatprep.subr.msk.bf16.mxu0 %vm367_vm0, %v255_v55  ;;  %v262_v55 = vpack.c.bf16 %v222_v51, %v221_v50  ;;  %v231_v58 = vld [vmem:[%s4882_s1 + $0x1c0] sm:$0xff] }
  0x3f   :  { %2970 = vmatprep.subr.msk.bf16.mxu1 %vm367_vm0, %v259_v59  ;;  %v232_v59 = vld [vmem:[%s4882_s1 + $0x1c8] sm:$0xff] }
  0x40   :  { %v835_v2 = vsel %vm367_vm0, %v262_v55, 0  ;;  %v267_v3 = vpack.c.bf16 %v232_v59, %v231_v58  ;;  %v237_v58 = vld [vmem:[%s4882_s1 + $0x1f0] sm:$0xff]  ;;  %v238_v59 = vld [vmem:[%s4882_s1 + $0x1f8] sm:$0xff] }
  0x42   :  { %v1004_v28 = vsel %vm367_vm0, %v267_v3, 0 }
  0x44   :  { %2735 = vmatmul.mubr.msk.bf16.vlgmr.msra.gmra.mrb[8].mxu0 %vm367_vm0, %v152_v8  ;;  %v121_v8 = vmul.f32 0.15811388, %v57_v0  ;;  %v65_v0 = vld [vmem:[%s4883_s0 + $0x190] sm:$0xff] }
  0x45   :  { %2751 = vmatmul.mubr.msk.bf16.vlgmr.msra.gmra.mrb[8].mxu1 %vm367_vm0, %v156_v13  ;;  %2759 = vmatpush3.bf16.xpose.msra.mxu0 %v737_v16  ;;  %v226_v13 = vld [vmem:[%s4882_s1 + $0x198] sm:$0xff]  ;;  %v160_v16 = vpack.c.bf16 %v114_v5, %v113_v4  ;;  %v67_v5 = vld [vmem:[%s4883_s0 + $0x1a0] sm:$0xff]  ;;  %v129_v10 = vmul.f32 0.15811388, %v65_v0 }
  0x46   :  { %2775 = vmatpush3.bf16.xpose.msra.mxu1 %v826_v20  ;;  %2967 = vmatprep.subr.msk.bf16.mxu0 %vm367_vm0, %v256_v17  ;;  %v233_v17 = vld [vmem:[%s4882_s1 + $0x1d0] sm:$0xff]  ;;  %v124_v20 = vmul.f32 0.15811388, %v60_v11  ;;  %v74_v4 = vld [vmem:[%s4883_s0 + $0x1d8] sm:$0xff]  ;;  %v130_v11 = vmul.f32 0.15811388, %v66_v1 }
  0x47   :  { %2971 = vmatprep.subr.msk.bf16.mxu1 %vm367_vm0, %v260_v21  ;;  %2738 = vmatprep.mubr.msk.bf16.mxu0 %vm367_vm0, %v153_v22  ;;  %v164_v21 = vpack.c.bf16 %v122_v9, %v121_v8  ;;  %v53_v22 = vld [vmem:[%s4883_s0 + $0x130] sm:$0xff]  ;;  %v268_v29 = vpack.c.bf16 %v234_v18, %v233_v17  ;;  %v75_v8 = vld [vmem:[%s4883_s0 + $0x1e0] sm:$0xff]  ;;  %v76_v9 = vld [vmem:[%s4883_s0 + $0x1e8] sm:$0xff]  ;;  %v131_v14 = vmul.f32 0.15811388, %v67_v5 }
  0x48   :  { %2754 = vmatprep.mubr.msk.bf16.mxu1 %vm367_vm0, %v157_v25  ;;  %v264_v25 = vpack.c.bf16 %v226_v13, %v225_v12  ;;  %v117_v31 = vmul.f32 0.15811388, %v53_v22  ;;  %v165_v33 = vpack.c.bf16 %v124_v20, %v123_v19  ;;  %v138_v13 = vmul.f32 0.15811388, %v74_v4  ;;  %v70_v22 = vld [vmem:[%s4883_s0 + $0x1b8] sm:$0xff] }
  0x49   :  { %v140_v17 = vmul.f32 0.15811388, %v76_v9  ;;  %v168_v18 = vpack.c.bf16 %v130_v11, %v129_v10  ;;  %v169_v20 = vpack.c.bf16 %v132_v15, %v131_v14  ;;  %v134_v27 = vmul.f32 0.15811388, %v70_v22 }
  0x4a   :  { %v918_v50 = vsel %vm367_vm0, %v264_v25, 0 }
  0x4c   :  { %2739 = vmatmul.mubr.msk.bf16.gmra.mrb[12].mxu0 %vm367_vm0, %v154_v36  ;;  %v125_v36 = vmul.f32 0.15811388, %v61_v26 }
  0x4d   :  { %2761 = vmatpush3.bf16.xpose.msra.mxu0 %v740_v42  ;;  %2755 = vmatmul.mubr.msk.bf16.gmra.mrb[12].mxu1 %vm367_vm0, %v158_v41  ;;  %v228_v41 = vld [vmem:[%s4882_s1 + $0x1a8] sm:$0xff]  ;;  %v127_v42 = vmul.f32 0.15811388, %v63_v34 }
  0x4e   :  { %2777 = vmatpush3.bf16.xpose.msra.mxu1 %v829_v44  ;;  %2968 = vmatprep.subr.msk.bf16.mxu0 %vm367_vm0, %v257_v43  ;;  %v128_v43 = vmul.f32 0.15811388, %v64_v35  ;;  %v162_v44 = vpack.c.bf16 %v118_v32, %v117_v31  ;;  %v166_v49 = vpack.c.bf16 %v126_v37, %v125_v36  ;;  %v265_v51 = vpack.c.bf16 %v228_v41, %v227_v40 }
  0x4f   :  { %2972 = vmatprep.subr.msk.bf16.mxu1 %vm367_vm0, %v261_v45  ;;  %2766 = vmatprep.mubr.msk.bf16.mxu0 %vm367_vm0, %v159_v46  ;;  %v235_v45 = vld [vmem:[%s4882_s1 + $0x1e0] sm:$0xff]  ;;  %v236_v46 = vld [vmem:[%s4882_s1 + $0x1e8] sm:$0xff] }
  0x50   :  { %2782 = vmatprep.mubr.msk.bf16.mxu1 %vm367_vm0, %v163_v47  ;;  %v135_v47 = vmul.f32 0.15811388, %v71_v38  ;;  %v921_v60 = vsel %vm367_vm0, %v265_v51, 0 }
  0x55   :  { %2763 = vmatpush3.bf16.xpose.msra.mxu0 %v743_v52  ;;  %v1007_v52 = vsel %vm367_vm0, %v268_v29, 0 }
  0x56   :  { %2779 = vmatpush3.bf16.xpose.msra.mxu1 %v832_v54  ;;  %2969 = vmatprep.subr.msk.bf16.mxu0 %vm367_vm0, %v258_v53  ;;  %v269_v53 = vpack.c.bf16 %v236_v46, %v235_v45  ;;  %v167_v54 = vpack.c.bf16 %v128_v43, %v127_v42 }
  0x57   :  { %2973 = vmatprep.subr.msk.bf16.mxu1 %vm367_vm0, %v262_v55  ;;  %v171_v55 = vpack.c.bf16 %v136_v48, %v135_v47 }
  0x5d   :  { %2765 = vmatpush3.bf16.xpose.msra.mxu0 %v746_v62  ;;  %v1010_v62 = vsel %vm367_vm0, %v269_v53, 0 }
  0x5e   :  { %2781 = vmatpush3.bf16.xpose.msra.mxu1 %v835_v2  ;;  %2974 = vmatprep.subr.msk.bf16.mxu0 %vm367_vm0, %v263_v63  ;;  %v270_v63 = vpack.c.bf16 %v238_v59, %v237_v58  ;;  %v73_v2 = vld [vmem:[%s4883_s0 + $0x1d0] sm:$0xff] }
  0x5f   :  { %2978 = vmatprep.subr.msk.bf16.mxu1 %vm367_vm0, %v267_v3  ;;  %v924_v3 = vsel %vm367_vm0, %v266_v61, 0  ;;  %v137_v12 = vmul.f32 0.15811388, %v73_v2 }
  0x60   :  { %v1013_v7 = vsel %vm367_vm0, %v270_v63, 0 }
  0x61   :  { %v172_v19 = vpack.c.bf16 %v138_v13, %v137_v12 }
  0x64   :  { %2767 = vmatmul.mubr.msk.bf16.vlgmr.msra.gmra.mrb[16].mxu0 %vm367_vm0, %v160_v16  ;;  %v139_v16 = vmul.f32 0.15811388, %v75_v8 }
  0x65   :  { %2783 = vmatmul.mubr.msk.bf16.vlgmr.msra.gmra.mrb[16].mxu1 %vm367_vm0, %v164_v21  ;;  %2791 = vmatpush3.bf16.xpose.msra.mxu0 %v915_v24  ;;  %v69_v21 = vld [vmem:[%s4883_s0 + $0x1b0] sm:$0xff] }
  0x66   :  { %2807 = vmatpush3.bf16.xpose.msra.mxu1 %v1004_v28  ;;  %2975 = vmatprep.subr.msk.bf16.mxu0 %vm367_vm0, %v264_v25  ;;  %v173_v23 = vpack.c.bf16 %v140_v17, %v139_v16  ;;  %v77_v24 = vld [vmem:[%s4883_s0 + $0x1f0] sm:$0xff]  ;;  %v78_v25 = vld [vmem:[%s4883_s0 + $0x1f8] sm:$0xff]  ;;  %v133_v26 = vmul.f32 0.15811388, %v69_v21 }
  0x67   :  { %2979 = vmatprep.subr.msk.bf16.mxu1 %vm367_vm0, %v268_v29  ;;  %2770 = vmatprep.mubr.msk.bf16.mxu0 %vm367_vm0, %v161_v30  ;;  %v141_v28 = vmul.f32 0.15811388, %v77_v24  ;;  %v142_v29 = vmul.f32 0.15811388, %v78_v25 }
  0x68   :  { %2786 = vmatprep.mubr.msk.bf16.mxu1 %vm367_vm0, %v165_v33  ;;  %v170_v30 = vpack.c.bf16 %v134_v27, %v133_v26 }
  0x69   :  { %v174_v31 = vpack.c.bf16 %v142_v29, %v141_v28 }
  0x6c   :  { %2771 = vmatmul.mubr.msk.bf16.gmra.mrb[20].mxu0 %vm367_vm0, %v162_v44 }
  0x6d   :  { %2793 = vmatpush3.bf16.xpose.msra.mxu0 %v918_v50  ;;  %2787 = vmatmul.mubr.msk.bf16.gmra.mrb[20].mxu1 %vm367_vm0, %v166_v49 }
  0x6e   :  { %2809 = vmatpush3.bf16.xpose.msra.mxu1 %v1007_v52  ;;  %2976 = vmatprep.subr.msk.bf16.mxu0 %vm367_vm0, %v265_v51 }
  0x6f   :  { %2980 = vmatprep.subr.msk.bf16.mxu1 %vm367_vm0, %v269_v53  ;;  %2798 = vmatprep.mubr.msk.bf16.mxu0 %vm367_vm0, %v167_v54 }
  0x70   :  { %2814 = vmatprep.mubr.msk.bf16.mxu1 %vm367_vm0, %v171_v55 }
  0x75   :  { %2795 = vmatpush3.bf16.xpose.msra.mxu0 %v921_v60 }
  0x76   :  { %2811 = vmatpush3.bf16.xpose.msra.mxu1 %v1010_v62  ;;  %2977 = vmatprep.subr.msk.bf16.mxu0 %vm367_vm0, %v266_v61 }
  0x77   :  { %2981 = vmatprep.subr.msk.bf16.mxu1 %vm367_vm0, %v270_v63 }
  0x7d   :  { %2797 = vmatpush3.bf16.xpose.msra.mxu0 %v924_v3 }
  0x7e   :  { %2813 = vmatpush3.bf16.xpose.msra.mxu1 %v1013_v7 }
  0x84   :  { %2799 = vmatmul.mubr.msk.bf16.vlgmr.msra.gmra.mrb[24].mxu0 %vm367_vm0, %v168_v18 }
  0x85   :  { %2815 = vmatmul.mubr.msk.bf16.vlgmr.msra.gmra.mrb[24].mxu1 %vm367_vm0, %v172_v19  ;;  %2802 = vmatprep.mubr.msk.bf16.mxu0 %vm367_vm0, %v169_v20 }
  0x86   :  { %2818 = vmatprep.mubr.msk.bf16.mxu1 %vm367_vm0, %v173_v23 }
  0x8c   :  { %2803 = vmatmul.mubr.msk.bf16.gmra.mrb[28].mxu0 %vm367_vm0, %v170_v30 }
  0x8d   :  { %2819 = vmatmul.mubr.msk.bf16.gmra.mrb[28].mxu1 %vm367_vm0, %v174_v31 }
  0xf7   :  { %v3738_v32 = vpop.f32.mrb[0].mxu0 }
  0xf8   :  { %v3740_v33 = vpop.f32.mrb[0].mxu1  ;;  %v3742_v34 = vpop.f32.mrb[1].mxu0  ;;  %v1087_v35 = vsel %vm1080_vm1, %v3738_v32, -inf }
  0xf9   :  { %v3746_v36 = vpop.f32.mrb[1].mxu1  ;;  %1088 = vmax.xlane.f32.xlu0 %v1087_v35  ;;  %v3748_v37 = vpop.f32.mrb[2].mxu0  ;;  %v1111_v42 = vsel %vm1080_vm1, %v3740_v33, -inf  ;;  %v1081_v45 = vsel %vm1080_vm1, %v3742_v34, -inf }
  0xfa   :  { %v3750_v38 = vpop.f32.mrb[2].mxu1  ;;  %v1105_v39 = vsel %vm1080_vm1, %v3746_v36, -inf  ;;  %v3754_v40 = vpop.f32.mrb[3].mxu0  ;;  %v1090_v43 = vsel %vm1080_vm1, %v3748_v37, -inf }
  0xfb   :  { %1106 = vmax.xlane.f32.xlu1 %v1105_v39  ;;  %v3756_v41 = vpop.f32.mrb[3].mxu1  ;;  %v1114_v50 = vsel %vm1080_vm1, %v3750_v38, -inf  ;;  %v1084_v54 = vsel %vm1080_vm1, %v3754_v40, -inf }
  0xfc   :  { %v1108_v55 = vsel %vm1080_vm1, %v3756_v41, -inf }
  0xfd   :  { %1112 = vmax.xlane.f32.xlu0 %v1111_v42 }
  0xff   :  { %1091 = vmax.xlane.f32.xlu1 %v1090_v43  ;;  %v3762_v44 = vpop.f32.mrb[4].mxu0 }
 0x100   :  { %v3766_v46 = vpop.f32.mrb[5].mxu0  ;;  %v3768_v47 = vpop.f32.mrb[4].mxu1  ;;  %v1099_v56 = vsel %vm1080_vm1, %v3762_v44, -inf }
 0x101   :  { %1082 = vmax.xlane.f32.xlu0 %v1081_v45  ;;  %v3770_v48 = vpop.f32.mrb[6].mxu0  ;;  %v3772_v49 = vpop.f32.mrb[5].mxu1  ;;  %v1123_v58 = vsel %vm1080_vm1, %v3768_v47, -inf  ;;  %v1093_v60 = vsel %vm1080_vm1, %v3766_v46, -inf }
 0x102   :  { %v3776_v51 = vpop.f32.mrb[7].mxu0  ;;  %v3778_v52 = vpop.f32.mrb[6].mxu1  ;;  %v1102_v57 = vsel %vm1080_vm1, %v3770_v48, -inf  ;;  %v1117_v62 = vsel %vm1080_vm1, %v3772_v49, -inf }
 0x103   :  { %1115 = vmax.xlane.f32.xlu1 %v1114_v50  ;;  %v3780_v53 = vpop.f32.mrb[7].mxu1  ;;  %v1126_v59 = vsel %vm1080_vm1, %v3778_v52, -inf  ;;  %v1096_v61 = vsel %vm1080_vm1, %v3776_v51, -inf }
 0x104   :  { %v1120_v63 = vsel %vm1080_vm1, %v3780_v53, -inf }
 0x105   :  { %1085 = vmax.xlane.f32.xlu0 %v1084_v54 }
 0x107   :  { %1109 = vmax.xlane.f32.xlu1 %v1108_v55 }
 0x109   :  { %1100 = vmax.xlane.f32.xlu0 %v1099_v56 }
 0x10b   :  { %1103 = vmax.xlane.f32.xlu1 %v1102_v57 }
 0x10d   :  { %1124 = vmax.xlane.f32.xlu0 %v1123_v58 }
 0x10f   :  { %1127 = vmax.xlane.f32.xlu1 %v1126_v59 }
 0x111   :  { %1094 = vmax.xlane.f32.xlu0 %v1093_v60 }
 0x113   :  { %1097 = vmax.xlane.f32.xlu1 %v1096_v61 }
 0x115   :  { %1118 = vmax.xlane.f32.xlu0 %v1117_v62 }
 0x117   :  { %1121 = vmax.xlane.f32.xlu1 %v1120_v63  ;;  %v3802_v0 = vpop.f32.mrb[8].mxu0 }
 0x118   :  { %v3804_v1 = vpop.f32.mrb[9].mxu0  ;;  %v3806_v2 = vpop.f32.mrb[8].mxu1  ;;  %v1135_v3 = vsel %vm1080_vm1, %v3802_v0, -inf }
 0x119   :  { %v3810_v4 = vpop.f32.mrb[9].mxu1  ;;  %1136 = vmax.xlane.f32.xlu0 %v1135_v3  ;;  %v3812_v5 = vpop.f32.mrb[10].mxu0  ;;  %v1159_v9 = vsel %vm1080_vm1, %v3806_v2, -inf  ;;  %v1129_v13 = vsel %vm1080_vm1, %v3804_v1, -inf }
 0x11a   :  { %v3814_v6 = vpop.f32.mrb[11].mxu0  ;;  %v3816_v7 = vpop.f32.mrb[10].mxu1  ;;  %v1138_v8 = vsel %vm1080_vm1, %v3812_v5, -inf  ;;  %v1153_v22 = vsel %vm1080_vm1, %v3810_v4, -inf }
 0x11b   :  { %v3822_v10 = vpop.f32.mrb[11].mxu1  ;;  %1139 = vmax.xlane.f32.xlu1 %v1138_v8  ;;  %v1162_v11 = vsel %vm1080_vm1, %v3816_v7, -inf  ;;  %v1132_v18 = vsel %vm1080_vm1, %v3814_v6, -inf }
 0x11c   :  { %v1156_v23 = vsel %vm1080_vm1, %v3822_v10, -inf }
 0x11d   :  { %1160 = vmax.xlane.f32.xlu0 %v1159_v9 }
 0x11f   :  { %1163 = vmax.xlane.f32.xlu1 %v1162_v11  ;;  %v3826_v12 = vpop.f32.mrb[12].mxu0 }
 0x120   :  { %v3830_v14 = vpop.f32.mrb[13].mxu0  ;;  %v3832_v15 = vpop.f32.mrb[12].mxu1  ;;  %v1147_v24 = vsel %vm1080_vm1, %v3826_v12, -inf }
 0x121   :  { %1130 = vmax.xlane.f32.xlu0 %v1129_v13  ;;  %v3834_v16 = vpop.f32.mrb[14].mxu0  ;;  %v3836_v17 = vpop.f32.mrb[13].mxu1  ;;  %v1171_v26 = vsel %vm1080_vm1, %v3832_v15, -inf  ;;  %v1141_v28 = vsel %vm1080_vm1, %v3830_v14, -inf }
 0x122   :  { %v3840_v19 = vpop.f32.mrb[15].mxu0  ;;  %v3842_v20 = vpop.f32.mrb[14].mxu1  ;;  %v1150_v25 = vsel %vm1080_vm1, %v3834_v16, -inf  ;;  %v1165_v30 = vsel %vm1080_vm1, %v3836_v17, -inf }
 0x123   :  { %1133 = vmax.xlane.f32.xlu1 %v1132_v18  ;;  %v3844_v21 = vpop.f32.mrb[15].mxu1  ;;  %v1174_v27 = vsel %vm1080_vm1, %v3842_v20, -inf  ;;  %v1144_v29 = vsel %vm1080_vm1, %v3840_v19, -inf }
 0x124   :  { %v1168_v31 = vsel %vm1080_vm1, %v3844_v21, -inf }
 0x125   :  { %1154 = vmax.xlane.f32.xlu0 %v1153_v22 }
 0x127   :  { %1157 = vmax.xlane.f32.xlu1 %v1156_v23 }
 0x129   :  { %1148 = vmax.xlane.f32.xlu0 %v1147_v24 }
 0x12b   :  { %1151 = vmax.xlane.f32.xlu1 %v1150_v25 }
 0x12d   :  { %1172 = vmax.xlane.f32.xlu0 %v1171_v26 }
 0x12f   :  { %1175 = vmax.xlane.f32.xlu1 %v1174_v27 }
 0x131   :  { %1142 = vmax.xlane.f32.xlu0 %v1141_v28 }
 0x133   :  { %1145 = vmax.xlane.f32.xlu1 %v1144_v29 }
 0x135   :  { %1166 = vmax.xlane.f32.xlu0 %v1165_v30 }
 0x137   :  { %1169 = vmax.xlane.f32.xlu1 %v1168_v31  ;;  %v3866_v35 = vpop.f32.mrb[16].mxu0 }
 0x138   :  { %v3868_v39 = vpop.f32.mrb[17].mxu0  ;;  %v3870_v42 = vpop.f32.mrb[16].mxu1  ;;  %v1183_v43 = vsel %vm1080_vm1, %v3866_v35, -inf }
 0x139   :  { %v3874_v45 = vpop.f32.mrb[17].mxu1  ;;  %1184 = vmax.xlane.f32.xlu0 %v1183_v43  ;;  %v3876_v50 = vpop.f32.mrb[18].mxu0  ;;  %v1207_v57 = vsel %vm1080_vm1, %v3870_v42, -inf  ;;  %v1177_v61 = vsel %vm1080_vm1, %v3868_v39, -inf }
 0x13a   :  { %v3878_v54 = vpop.f32.mrb[19].mxu0  ;;  %v3880_v55 = vpop.f32.mrb[18].mxu1  ;;  %v1186_v56 = vsel %vm1080_vm1, %v3876_v50, -inf  ;;  %v1201_v22 = vsel %vm1080_vm1, %v3874_v45, -inf }
 0x13b   :  { %v3886_v58 = vpop.f32.mrb[19].mxu1  ;;  %1187 = vmax.xlane.f32.xlu1 %v1186_v56  ;;  %v1210_v59 = vsel %vm1080_vm1, %v3880_v55, -inf  ;;  %v1180_v9 = vsel %vm1080_vm1, %v3878_v54, -inf }
 0x13c   :  { %v1204_v23 = vsel %vm1080_vm1, %v3886_v58, -inf }
 0x13d   :  { %1208 = vmax.xlane.f32.xlu0 %v1207_v57 }
 0x13f   :  { %1211 = vmax.xlane.f32.xlu1 %v1210_v59  ;;  %v3890_v60 = vpop.f32.mrb[20].mxu0 }
 0x140   :  { %v3894_v62 = vpop.f32.mrb[21].mxu0  ;;  %v3896_v63 = vpop.f32.mrb[20].mxu1  ;;  %v1195_v24 = vsel %vm1080_vm1, %v3890_v60, -inf }
 0x141   :  { %1178 = vmax.xlane.f32.xlu0 %v1177_v61  ;;  %v3898_v3 = vpop.f32.mrb[22].mxu0  ;;  %v3900_v8 = vpop.f32.mrb[21].mxu1  ;;  %v1219_v26 = vsel %vm1080_vm1, %v3896_v63, -inf  ;;  %v1189_v28 = vsel %vm1080_vm1, %v3894_v62, -inf }
 0x142   :  { %v3904_v11 = vpop.f32.mrb[23].mxu0  ;;  %v3906_v13 = vpop.f32.mrb[22].mxu1  ;;  %v1198_v25 = vsel %vm1080_vm1, %v3898_v3, -inf  ;;  %v1213_v30 = vsel %vm1080_vm1, %v3900_v8, -inf }
 0x143   :  { %1181 = vmax.xlane.f32.xlu1 %v1180_v9  ;;  %v3908_v18 = vpop.f32.mrb[23].mxu1  ;;  %v1222_v27 = vsel %vm1080_vm1, %v3906_v13, -inf  ;;  %v1192_v29 = vsel %vm1080_vm1, %v3904_v11, -inf }
 0x144   :  { %v1216_v31 = vsel %vm1080_vm1, %v3908_v18, -inf }
 0x145   :  { %1202 = vmax.xlane.f32.xlu0 %v1201_v22 }
 0x147   :  { %1205 = vmax.xlane.f32.xlu1 %v1204_v23 }
 0x149   :  { %1196 = vmax.xlane.f32.xlu0 %v1195_v24 }
 0x14b   :  { %1199 = vmax.xlane.f32.xlu1 %v1198_v25 }
 0x14d   :  { %1220 = vmax.xlane.f32.xlu0 %v1219_v26 }
 0x14f   :  { %1223 = vmax.xlane.f32.xlu1 %v1222_v27 }
 0x151   :  { %1190 = vmax.xlane.f32.xlu0 %v1189_v28 }
 0x153   :  { %1193 = vmax.xlane.f32.xlu1 %v1192_v29 }
 0x155   :  { %1214 = vmax.xlane.f32.xlu0 %v1213_v30 }
 0x157   :  { %1217 = vmax.xlane.f32.xlu1 %v1216_v31  ;;  %v3930_v43 = vpop.f32.mrb[24].mxu0 }
 0x158   :  { %v3932_v56 = vpop.f32.mrb[25].mxu0  ;;  %v3934_v57 = vpop.f32.mrb[24].mxu1  ;;  %v1231_v59 = vsel %vm1080_vm1, %v3930_v43, -inf }
 0x159   :  { %4923 = vst [vmem:[#allocation2_spill] sm:$0xff] %v3932_v56  ;;  %4924 = vst [vmem:[#allocation3_spill] sm:$0xff] %v3934_v57  ;;  %v3938_v61 = vpop.f32.mrb[25].mxu1  ;;  %1232 = vmax.xlane.f32.xlu0 %v1231_v59  ;;  %v3940_v9 = vpop.f32.mrb[26].mxu0  ;;  %v1255_v25 = vsel %vm1080_vm1, %v3934_v57, -inf  ;;  %v1225_v29 = vsel %vm1080_vm1, %v3932_v56, -inf }
 0x15a   :  { %4925 = vst [vmem:[#allocation4_spill] sm:$0xff] %v3938_v61  ;;  %4926 = vst [vmem:[#allocation5_spill] sm:$0xff] %v3940_v9  ;;  %v3942_v22 = vpop.f32.mrb[27].mxu0  ;;  %v3944_v23 = vpop.f32.mrb[26].mxu1  ;;  %v1234_v24 = vsel %vm1080_vm1, %v3940_v9, -inf  ;;  %v1249_v56 = vsel %vm1080_vm1, %v3938_v61, -inf }
 0x15b   :  { %4927 = vst [vmem:[#allocation6_spill] sm:$0xff] %v3942_v22  ;;  %4928 = vst [vmem:[#allocation7_spill] sm:$0xff] %v3944_v23  ;;  %v3950_v26 = vpop.f32.mrb[27].mxu1  ;;  %1235 = vmax.xlane.f32.xlu1 %v1234_v24  ;;  %v1258_v27 = vsel %vm1080_vm1, %v3944_v23, -inf  ;;  %v1228_v24 = vsel %vm1080_vm1, %v3942_v22, -inf }
 0x15c   :  { %4929 = vst [vmem:[#allocation8_spill] sm:$0xff] %v3950_v26 }
 0x15d   :  { %1256 = vmax.xlane.f32.xlu0 %v1255_v25 }
 0x15f   :  { %1259 = vmax.xlane.f32.xlu1 %v1258_v27  ;;  %v3954_v28 = vpop.f32.mrb[28].mxu0 }
 0x160   :  { %4930 = vst [vmem:[#allocation9_spill] sm:$0xff] %v3954_v28  ;;  %v3958_v30 = vpop.f32.mrb[29].mxu0  ;;  %v3960_v31 = vpop.f32.mrb[28].mxu1  ;;  %v1243_v9 = vsel %vm1080_vm1, %v3954_v28, -inf }
 0x161   :  { %4931 = vst [vmem:[#allocation10_spill] sm:$0xff] %v3958_v30  ;;  %4932 = vst [vmem:[#allocation11_spill] sm:$0xff] %v3960_v31  ;;  %1226 = vmax.xlane.f32.xlu0 %v1225_v29  ;;  %v3962_v59 = vpop.f32.mrb[30].mxu0  ;;  %v3964_v57 = vpop.f32.mrb[29].mxu1  ;;  %v1252_v29 = vsel %vm1080_vm1, %v3950_v26, -inf }
 0x162   :  { %4933 = vst [vmem:[#allocation12_spill] sm:$0xff] %v3962_v59  ;;  %4934 = vst [vmem:[#allocation13_spill] sm:$0xff] %v3964_v57  ;;  %v3968_v25 = vpop.f32.mrb[31].mxu0  ;;  %v3970_v27 = vpop.f32.mrb[30].mxu1  ;;  %v1246_v22 = vsel %vm1080_vm1, %v3962_v59, -inf }
 0x163   :  { %4935 = vst [vmem:[#allocation14_spill] sm:$0xff] %v3968_v25  ;;  %4936 = vst [vmem:[#allocation15_spill] sm:$0xff] %v3970_v27  ;;  %1229 = vmax.xlane.f32.xlu1 %v1228_v24  ;;  %v3972_v23 = vpop.f32.mrb[31].mxu1  ;;  %v1267_v24 = vsel %vm1080_vm1, %v3960_v31, -inf  ;;  %v1270_v61 = vsel %vm1080_vm1, %v3970_v27, -inf }
 0x164   :  { %4937 = vst [vmem:[#allocation16_spill] sm:$0xff] %v3972_v23 }
 0x165   :  { %1250 = vmax.xlane.f32.xlu0 %v1249_v56  ;;  %v1237_v56 = vsel %vm1080_vm1, %v3958_v30, -inf }
 0x167   :  { %1253 = vmax.xlane.f32.xlu1 %v1252_v29  ;;  %v1240_v29 = vsel %vm1080_vm1, %v3968_v25, -inf }
 0x169   :  { %1244 = vmax.xlane.f32.xlu0 %v1243_v9  ;;  %v1261_v9 = vsel %vm1080_vm1, %v3964_v57, -inf }
 0x16b   :  { %1247 = vmax.xlane.f32.xlu1 %v1246_v22  ;;  %v1264_v22 = vsel %vm1080_vm1, %v3972_v23, -inf }
 0x16d   :  { %1268 = vmax.xlane.f32.xlu0 %v1267_v24 }
 0x16f   :  { %1271 = vmax.xlane.f32.xlu1 %v1270_v61 }
 0x171   :  { %1238 = vmax.xlane.f32.xlu0 %v1237_v56 }
 0x173   :  { %1241 = vmax.xlane.f32.xlu1 %v1240_v29 }
 0x175   :  { %1262 = vmax.xlane.f32.xlu0 %v1261_v9 }
 0x177   :  { %1265 = vmax.xlane.f32.xlu1 %v1264_v22 }
 0x186   :  { %v1089_v24 = vpop.xlane.xlu0 %1088 }
 0x187   :  { %v1275_v27 = vsub.f32 %v3738_v32, %v1089_v24 }
 0x188   :  { %v1107_v61 = vpop.xlane.xlu1 %1106 }
 0x189   :  { %v1341_v31 = vmul.f32 1.442695, %v1275_v27  ;;  %v1281_v25 = vsub.f32 %v3746_v36, %v1107_v61 }
 0x18a   :  { %v1113_v59 = vpop.xlane.xlu0 %1112 }
 0x18b   :  { %2982 = vpow2.f32 %v1341_v31  ;;  %v1283_v56 = vsub.f32 %v3740_v33, %v1113_v59  ;;  %v1353_v23 = vmul.f32 1.442695, %v1281_v25 }
 0x18c   :  { %v1092_v29 = vpop.xlane.xlu1 %1091 }
 0x18d   :  { %v1357_v30 = vmul.f32 1.442695, %v1283_v56  ;;  %v1276_v57 = vsub.f32 %v3748_v37, %v1092_v29 }
 0x18e   :  { %v1083_v9 = vpop.xlane.xlu0 %1082 }
 0x18f   :  { %2984 = vpow2.f32 %v1357_v30  ;;  %v1343_v28 = vmul.f32 1.442695, %v1276_v57  ;;  %v1273_v22 = vsub.f32 %v3742_v34, %v1083_v9 }
 0x190   :  { %v1116_v26 = vpop.xlane.xlu1 %1115 }
 0x191   :  { %2986 = vpow2.f32 %v1343_v28  ;;  %v1337_v32 = vmul.f32 1.442695, %v1273_v22  ;;  %v1284_v27 = vsub.f32 %v3750_v38, %v1116_v26 }
 0x192   :  { %v1086_v31 = vpop.xlane.xlu0 %1085 }
 0x193   :  { %2988 = vpow2.f32 %v1337_v32  ;;  %v1359_v33 = vmul.f32 1.442695, %v1284_v27  ;;  %v1274_v36 = vsub.f32 %v3754_v40, %v1086_v31 }
 0x194   :  { %2990 = vpow2.f32 %v1353_v23  ;;  %v1110_v59 = vpop.xlane.xlu1 %1109 }
 0x195   :  { %v4001_v24 = vpop.eup %2982  ;;  %2992 = vpow2.f32 %v1359_v33  ;;  %v1339_v37 = vmul.f32 1.442695, %v1274_v36  ;;  %v1282_v57 = vsub.f32 %v3756_v41, %v1110_v59 }
 0x196   :  { %v1101_v34 = vpop.xlane.xlu0 %1100  ;;  %v1471_v28 = vsel %vm1080_vm1, %v4001_v24, 0.0 }
 0x197   :  { %2994 = vpow2.f32 %v1339_v37  ;;  %v1355_v30 = vmul.f32 1.442695, %v1282_v57  ;;  %v1279_v38 = vsub.f32 %v3762_v44, %v1101_v34  ;;  %1472 = vadd.xlane.f32.xlu0 %v1471_v28 }
 0x198   :  { %v1104_v26 = vpop.xlane.xlu1 %1103 }
 0x199   :  { %v4007_v25 = vpop.eup %2984  ;;  %v1349_v40 = vmul.f32 1.442695, %v1279_v38  ;;  %v1280_v23 = vsub.f32 %v3770_v48, %v1104_v26  ;;  %2996 = vpow2.f32 %v1355_v30 }
 0x19a   :  { %v1125_v61 = vpop.xlane.xlu0 %1124  ;;  %v1495_v41 = vsel %vm1080_vm1, %v4007_v25, 0.0 }
 0x19b   :  { %v4012_v56 = vpop.eup %2986  ;;  %2998 = vpow2.f32 %v1349_v40  ;;  %v1351_v29 = vmul.f32 1.442695, %v1280_v23  ;;  %v1287_v9 = vsub.f32 %v3768_v47, %v1125_v61  ;;  %1496 = vadd.xlane.f32.xlu0 %v1495_v41 }
 0x19c   :  { %v1128_v44 = vpop.xlane.xlu1 %1127  ;;  %v1474_v22 = vsel %vm1080_vm1, %v4012_v56, 0.0 }
 0x19d   :  { %v4017_v32 = vpop.eup %2988  ;;  %v1365_v27 = vmul.f32 1.442695, %v1287_v9  ;;  %v1288_v48 = vsub.f32 %v3778_v52, %v1128_v44  ;;  %1475 = vadd.xlane.f32.xlu1 %v1474_v22  ;;  %3000 = vpow2.f32 %v1351_v29 }
 0x19e   :  { %v4020_v31 = vpop.eup %2990  ;;  %v1095_v33 = vpop.xlane.xlu0 %1094  ;;  %v1465_v36 = vsel %vm1080_vm1, %v4017_v32, 0.0 }
 0x19f   :  { %v4024_v59 = vpop.eup %2992  ;;  %3002 = vpow2.f32 %v1365_v27  ;;  %v1367_v47 = vmul.f32 1.442695, %v1288_v48  ;;  %v1277_v37 = vsub.f32 %v3766_v46, %v1095_v33  ;;  %1466 = vadd.xlane.f32.xlu0 %v1465_v36  ;;  %v1489_v26 = vsel %vm1080_vm1, %v4020_v31, 0.0 }
 0x1a0   :  { %v1098_v57 = vpop.xlane.xlu1 %1097  ;;  %v1498_v34 = vsel %vm1080_vm1, %v4024_v59, 0.0 }
 0x1a1   :  { %v4029_v52 = vpop.eup %2994  ;;  %v1345_v28 = vmul.f32 1.442695, %v1277_v37  ;;  %v1278_v30 = vsub.f32 %v3776_v51, %v1098_v57  ;;  %1499 = vadd.xlane.f32.xlu1 %v1498_v34  ;;  %3004 = vpow2.f32 %v1367_v47 }
 0x1a2   :  { %v1119_v38 = vpop.xlane.xlu0 %1118  ;;  %v1468_v40 = vsel %vm1080_vm1, %v4029_v52, 0.0 }
 0x1a3   :  { %3006 = vpow2.f32 %v1345_v28  ;;  %v1347_v46 = vmul.f32 1.442695, %v1278_v30  ;;  %v1285_v23 = vsub.f32 %v3772_v49, %v1119_v38  ;;  %1490 = vadd.xlane.f32.xlu0 %v1489_v26  ;;  %v4037_v61 = vpop.eup %2996 }
 0x1a4   :  { %v1122_v41 = vpop.xlane.xlu1 %1121  ;;  %v1492_v36 = vsel %vm1080_vm1, %v4037_v61, 0.0 }
 0x1a5   :  { %v4039_v29 = vpop.eup %2998  ;;  %v1361_v51 = vmul.f32 1.442695, %v1285_v23  ;;  %v1286_v9 = vsub.f32 %v3780_v53, %v1122_v41  ;;  %1469 = vadd.xlane.f32.xlu1 %v1468_v40  ;;  %3008 = vpow2.f32 %v1347_v46 }
 0x1a6   :  { %v1137_v44 = vpop.xlane.xlu0 %1136  ;;  %v1483_v22 = vsel %vm1080_vm1, %v4039_v29, 0.0 }
 0x1a7   :  { %3010 = vpow2.f32 %v1361_v51  ;;  %v1363_v27 = vmul.f32 1.442695, %v1286_v9  ;;  %v1291_v48 = vsub.f32 %v3802_v0, %v1137_v44  ;;  %1484 = vadd.xlane.f32.xlu0 %v1483_v22  ;;  %v4045_v49 = vpop.eup %3000 }
 0x1a8   :  { %v1140_v33 = vpop.xlane.xlu1 %1139  ;;  %v1486_v26 = vsel %vm1080_vm1, %v4045_v49, 0.0 }
 0x1a9   :  { %v4049_v47 = vpop.eup %3002  ;;  %v1373_v53 = vmul.f32 1.442695, %v1291_v48  ;;  %v1292_v37 = vsub.f32 %v3812_v5, %v1140_v33  ;;  %1493 = vadd.xlane.f32.xlu1 %v1492_v36  ;;  %3012 = vpow2.f32 %v1363_v27  ;;  %v272_v27 = vld [vmem:[%s4884_s2 + $0x8] sm:$0xff] }
 0x1aa   :  { %v1161_v57 = vpop.xlane.xlu0 %1160  ;;  %v1507_v34 = vsel %vm1080_vm1, %v4049_v47, 0.0 }
 0x1ab   :  { %3014 = vpow2.f32 %v1373_v53  ;;  %v1375_v0 = vmul.f32 1.442695, %v1292_v37  ;;  %v1299_v28 = vsub.f32 %v3806_v2, %v1161_v57  ;;  %1508 = vadd.xlane.f32.xlu0 %v1507_v34  ;;  %v4055_v30 = vpop.eup %3004 }
 0x1ac   :  { %v1164_v38 = vpop.xlane.xlu1 %1163  ;;  %v1510_v22 = vsel %vm1080_vm1, %v4055_v30, 0.0 }
 0x1ad   :  { %v4059_v40 = vpop.eup %3006  ;;  %v1389_v5 = vmul.f32 1.442695, %v1299_v28  ;;  %v1300_v46 = vsub.f32 %v3816_v7, %v1164_v38  ;;  %1487 = vadd.xlane.f32.xlu1 %v1486_v26  ;;  %3016 = vpow2.f32 %v1375_v0  ;;  %v271_v7 = vld [vmem:[%s4884_s2] sm:$0xff]  ;;  %v274_v26 = vld [vmem:[%s4884_s2 + $0x18] sm:$0xff] }
 0x1ae   :  { %v1131_v23 = vpop.xlane.xlu0 %1130  ;;  %v1477_v41 = vsel %vm1080_vm1, %v4059_v40, 0.0  ;;  %v335_v36 = vpack.c.bf16 %v272_v27, %v271_v7 }
 0x1af   :  { %3018 = vpow2.f32 %v1389_v5  ;;  %v1391_v2 = vmul.f32 1.442695, %v1300_v46  ;;  %v1289_v51 = vsub.f32 %v3804_v1, %v1131_v23  ;;  %1478 = vadd.xlane.f32.xlu0 %v1477_v41  ;;  %v4065_v9 = vpop.eup %3008 }
 0x1b0   :  { %v1134_v44 = vpop.xlane.xlu1 %1133  ;;  %2822 = vmatprep.subr.bf16.mxu0 %v335_v36  ;;  %v1480_v38 = vsel %vm1080_vm1, %v4065_v9, 0.0 }
 0x1b1   :  { %v4075_v48 = vpop.eup %3010  ;;  %v1369_v33 = vmul.f32 1.442695, %v1289_v51  ;;  %v1290_v1 = vsub.f32 %v3814_v6, %v1134_v44  ;;  %1511 = vadd.xlane.f32.xlu1 %v1510_v22  ;;  %3020 = vpow2.f32 %v1391_v2  ;;  %2823 = vmatpush3.bf16.msra.mxu0 %v335_v36  ;;  %v273_v6 = vld [vmem:[%s4884_s2 + $0x10] sm:$0xff]  ;;  %v280_v2 = vld [vmem:[%s4884_s2 + $0x48] sm:$0xff]  ;;  %v275_v36 = vld [vmem:[%s4884_s2 + $0x20] sm:$0xff] }
 0x1b2   :  { %v1155_v53 = vpop.xlane.xlu0 %1154  ;;  %v1501_v37 = vsel %vm1080_vm1, %v4075_v48, 0.0  ;;  %v336_v41 = vpack.c.bf16 %v274_v26, %v273_v6 }
 0x1b3   :  { %3022 = vpow2.f32 %v1369_v33  ;;  %v1371_v57 = vmul.f32 1.442695, %v1290_v1  ;;  %v1297_v34 = vsub.f32 %v3810_v4, %v1155_v53  ;;  %1502 = vadd.xlane.f32.xlu0 %v1501_v37  ;;  %v4081_v0 = vpop.eup %3012  ;;  %v279_v4 = vld [vmem:[%s4884_s2 + $0x40] sm:$0xff]  ;;  %v276_v53 = vld [vmem:[%s4884_s2 + $0x28] sm:$0xff] }
 0x1b4   :  { %v1158_v28 = vpop.xlane.xlu1 %1157  ;;  %v339_v22 = vpack.c.bf16 %v280_v2, %v279_v4  ;;  %2824 = vmatprep.subr.bf16.mxu0 %v336_v41  ;;  %v1504_v1 = vsel %vm1080_vm1, %v4081_v0, 0.0 }
 0x1b5   :  { %v4094_v5 = vpop.eup %3014  ;;  %v1385_v46 = vmul.f32 1.442695, %v1297_v34  ;;  %v1298_v23 = vsub.f32 %v3822_v10, %v1158_v28  ;;  %1481 = vadd.xlane.f32.xlu1 %v1480_v38  ;;  %3024 = vpow2.f32 %v1371_v57  ;;  %2825 = vmatpush3.bf16.msra.mxu0 %v336_v41  ;;  %v337_v28 = vpack.c.bf16 %v276_v53, %v275_v36  ;;  %v282_v38 = vld [vmem:[%s4884_s2 + $0x58] sm:$0xff] }
 0x1b6   :  { %v1149_v51 = vpop.xlane.xlu0 %1148  ;;  %v1519_v44 = vsel %vm1080_vm1, %v4094_v5, 0.0  ;;  %2838 = vmatprep.subr.bf16.mxu1 %v339_v22 }
 0x1b7   :  { %3026 = vpow2.f32 %v1385_v46  ;;  %v1387_v7 = vmul.f32 1.442695, %v1298_v23  ;;  %v1295_v27 = vsub.f32 %v3826_v12, %v1149_v51  ;;  %1520 = vadd.xlane.f32.xlu0 %v1519_v44  ;;  %v4103_v33 = vpop.eup %3016  ;;  %v281_v12 = vld [vmem:[%s4884_s2 + $0x50] sm:$0xff]  ;;  %2839 = vmatpush3.bf16.msra.mxu1 %v339_v22  ;;  %v278_v44 = vld [vmem:[%s4884_s2 + $0x38] sm:$0xff] }
 0x1b8   :  { %v1152_v10 = vpop.xlane.xlu1 %1151  ;;  %v340_v4 = vpack.c.bf16 %v282_v38, %v281_v12  ;;  %2826 = vmatprep.subr.bf16.mxu0 %v337_v28  ;;  %v1522_v2 = vsel %vm1080_vm1, %v4103_v33, 0.0  ;;  %v277_v51 = vld [vmem:[%s4884_s2 + $0x30] sm:$0xff] }
 0x1b9   :  { %v4116_v37 = vpop.eup %3018  ;;  %v1381_v57 = vmul.f32 1.442695, %v1295_v27  ;;  %v1296_v34 = vsub.f32 %v3834_v16, %v1152_v10  ;;  %1505 = vadd.xlane.f32.xlu1 %v1504_v1  ;;  %3028 = vpow2.f32 %v1387_v7  ;;  %2827 = vmatpush3.bf16.msra.mxu0 %v337_v28  ;;  %v338_v10 = vpack.c.bf16 %v278_v44, %v277_v51  ;;  %v284_v1 = vld [vmem:[%s4884_s2 + $0x68] sm:$0xff] }
 0x1ba   :  { %v1173_v6 = vpop.xlane.xlu0 %1172  ;;  %v1543_v26 = vsel %vm1080_vm1, %v4116_v37, 0.0  ;;  %2840 = vmatprep.subr.bf16.mxu1 %v340_v4 }
 0x1bb   :  { %3030 = vpow2.f32 %v1381_v57  ;;  %v1383_v46 = vmul.f32 1.442695, %v1296_v34  ;;  %v1303_v23 = vsub.f32 %v3832_v15, %v1173_v6  ;;  %1544 = vadd.xlane.f32.xlu0 %v1543_v26  ;;  %v4125_v16 = vpop.eup %3020  ;;  %v283_v15 = vld [vmem:[%s4884_s2 + $0x60] sm:$0xff]  ;;  %2841 = vmatpush3.bf16.msra.mxu1 %v340_v4  ;;  %v285_v6 = vld [vmem:[%s4884_s2 + $0x70] sm:$0xff]  ;;  %v286_v26 = vld [vmem:[%s4884_s2 + $0x78] sm:$0xff] }
 0x1bc   :  { %v1176_v41 = vpop.xlane.xlu1 %1175  ;;  %v341_v12 = vpack.c.bf16 %v284_v1, %v283_v15  ;;  %2828 = vmatprep.subr.bf16.mxu0 %v338_v10  ;;  %v1546_v38 = vsel %vm1080_vm1, %v4125_v16, 0.0 }
 0x1bd   :  { %v4138_v22 = vpop.eup %3022  ;;  %v1397_v7 = vmul.f32 1.442695, %v1303_v23  ;;  %v1304_v27 = vsub.f32 %v3842_v20, %v1176_v41  ;;  %1523 = vadd.xlane.f32.xlu1 %v1522_v2  ;;  %3032 = vpow2.f32 %v1383_v46  ;;  %2829 = vmatpush3.bf16.msra.mxu0 %v338_v10  ;;  %v342_v23 = vpack.c.bf16 %v286_v26, %v285_v6 }
 0x1be   :  { %v1143_v36 = vpop.xlane.xlu0 %1142  ;;  %v1513_v53 = vsel %vm1080_vm1, %v4138_v22, 0.0  ;;  %2842 = vmatprep.subr.bf16.mxu1 %v341_v12 }
 0x1bf   :  { %3034 = vpow2.f32 %v1397_v7  ;;  %v1399_v57 = vmul.f32 1.442695, %v1304_v27  ;;  %v1293_v34 = vsub.f32 %v3830_v14, %v1143_v36  ;;  %1514 = vadd.xlane.f32.xlu0 %v1513_v53  ;;  %v4147_v20 = vpop.eup %3024  ;;  %2843 = vmatpush3.bf16.msra.mxu1 %v341_v12 }
 0x1c0   :  { %v1146_v28 = vpop.xlane.xlu1 %1145  ;;  %2844 = vmatprep.subr.bf16.mxu1 %v342_v23 }
 0x1c1   :  { %v4157_v4 = vpop.eup %3026  ;;  %v1377_v14 = vmul.f32 1.442695, %v1293_v34  ;;  %v1294_v46 = vsub.f32 %v3840_v19, %v1146_v28  ;;  %1547 = vadd.xlane.f32.xlu1 %v1546_v38  ;;  %3036 = vpow2.f32 %v1399_v57  ;;  %v1516_v19 = vsel %vm1080_vm1, %v4147_v20, 0.0 }
 0x1c2   :  { %v1167_v41 = vpop.xlane.xlu0 %1166  ;;  %v1537_v2 = vsel %vm1080_vm1, %v4157_v4, 0.0 }
 0x1c3   :  { %3038 = vpow2.f32 %v1377_v14  ;;  %v1379_v51 = vmul.f32 1.442695, %v1294_v46  ;;  %v1301_v44 = vsub.f32 %v3836_v17, %v1167_v41  ;;  %1538 = vadd.xlane.f32.xlu0 %v1537_v2  ;;  %v4163_v15 = vpop.eup %3028  ;;  %2845 = vmatpush3.bf16.msra.mxu1 %v342_v23 }
 0x1c4   :  { %v1170_v7 = vpop.xlane.xlu1 %1169  ;;  %v1540_v28 = vsel %vm1080_vm1, %v4163_v15, 0.0 }
 0x1c5   :  { %v4167_v27 = vpop.eup %3030  ;;  %v1393_v10 = vmul.f32 1.442695, %v1301_v44  ;;  %v1302_v1 = vsub.f32 %v3844_v21, %v1170_v7  ;;  %1517 = vadd.xlane.f32.xlu1 %v1516_v19  ;;  %3040 = vpow2.f32 %v1379_v51 }
 0x1c6   :  { %v1185_v36 = vpop.xlane.xlu0 %1184  ;;  %v1531_v17 = vsel %vm1080_vm1, %v4167_v27, 0.0 }
 0x1c7   :  { %3042 = vpow2.f32 %v1393_v10  ;;  %v1395_v53 = vmul.f32 1.442695, %v1302_v1  ;;  %v1307_v12 = vsub.f32 %v3866_v35, %v1185_v36  ;;  %1532 = vadd.xlane.f32.xlu0 %v1531_v17  ;;  %v4173_v57 = vpop.eup %3032 }
 0x1c8   :  { %v1188_v34 = vpop.xlane.xlu1 %1187  ;;  %v1534_v2 = vsel %vm1080_vm1, %v4173_v57, 0.0 }
 0x1c9   :  { %v4177_v38 = vpop.eup %3034  ;;  %v1405_v21 = vmul.f32 1.442695, %v1307_v12  ;;  %v1308_v6 = vsub.f32 %v3876_v50, %v1188_v34  ;;  %1541 = vadd.xlane.f32.xlu1 %v1540_v28  ;;  %3044 = vpow2.f32 %v1395_v53  ;;  %v288_v53 = vld [vmem:[%s4884_s2 + $0x88] sm:$0xff] }
 0x1ca   :  { %v1209_v26 = vpop.xlane.xlu0 %1208  ;;  %v1555_v14 = vsel %vm1080_vm1, %v4177_v38, 0.0 }
 0x1cb   :  { %3046 = vpow2.f32 %v1405_v21  ;;  %v1407_v35 = vmul.f32 1.442695, %v1308_v6  ;;  %v1315_v46 = vsub.f32 %v3870_v42, %v1209_v26  ;;  %1556 = vadd.xlane.f32.xlu0 %v1555_v14  ;;  %v4183_v23 = vpop.eup %3036 }
 0x1cc   :  { %v1212_v41 = vpop.xlane.xlu1 %1211  ;;  %v1558_v17 = vsel %vm1080_vm1, %v4183_v23, 0.0 }
 0x1cd   :  { %v4187_v51 = vpop.eup %3038  ;;  %v1421_v50 = vmul.f32 1.442695, %v1315_v46  ;;  %v1316_v44 = vsub.f32 %v3880_v55, %v1212_v41  ;;  %1535 = vadd.xlane.f32.xlu1 %v1534_v2  ;;  %3048 = vpow2.f32 %v1407_v35  ;;  %v287_v55 = vld [vmem:[%s4884_s2 + $0x80] sm:$0xff] }
 0x1ce   :  { %v1179_v7 = vpop.xlane.xlu0 %1178  ;;  %v1525_v19 = vsel %vm1080_vm1, %v4187_v51, 0.0  ;;  %v4206_v28 = vpack.c.bf16 %v288_v53, %v287_v55  ;;  %v295_v41 = vld [vmem:[%s4884_s2 + $0xc0] sm:$0xff] }
 0x1cf   :  { %3050 = vpow2.f32 %v1421_v50  ;;  %v1423_v42 = vmul.f32 1.442695, %v1316_v44  ;;  %v1305_v10 = vsub.f32 %v3868_v39, %v1179_v7  ;;  %1526 = vadd.xlane.f32.xlu0 %v1525_v19  ;;  %v4193_v1 = vpop.eup %3040 }
 0x1d0   :  { %v1182_v36 = vpop.xlane.xlu1 %1181  ;;  %2854 = vmatprep.subr.bf16.mxu0 %v4206_v28 }
 0x1d1   :  { %v4203_v12 = vpop.eup %3042  ;;  %v1401_v34 = vmul.f32 1.442695, %v1305_v10  ;;  %v1306_v39 = vsub.f32 %v3878_v54, %v1182_v36  ;;  %1559 = vadd.xlane.f32.xlu1 %v1558_v17  ;;  %3052 = vpow2.f32 %v1423_v42  ;;  %v1528_v54 = vsel %vm1080_vm1, %v4193_v1, 0.0 }
 0x1d2   :  { %v1203_v21 = vpop.xlane.xlu0 %1202  ;;  %v1549_v6 = vsel %vm1080_vm1, %v4203_v12, 0.0 }
 0x1d3   :  { %3054 = vpow2.f32 %v1401_v34  ;;  %v1403_v26 = vmul.f32 1.442695, %v1306_v39  ;;  %v1313_v14 = vsub.f32 %v3874_v45, %v1203_v21  ;;  %1550 = vadd.xlane.f32.xlu0 %v1549_v6  ;;  %v4212_v35 = vpop.eup %3044  ;;  %v296_v45 = vld [vmem:[%s4884_s2 + $0xc8] sm:$0xff] }
 0x1d4   :  { %v1206_v46 = vpop.xlane.xlu1 %1205  ;;  %v4227_v42 = vpack.c.bf16 %v296_v45, %v295_v41  ;;  %v1552_v55 = vsel %vm1080_vm1, %v4212_v35, 0.0 }
 0x1d5   :  { %v4219_v2 = vpop.eup %3046  ;;  %v1417_v50 = vmul.f32 1.442695, %v1313_v14  ;;  %v1314_v44 = vsub.f32 %v3886_v58, %v1206_v46  ;;  %1529 = vadd.xlane.f32.xlu1 %v1528_v54  ;;  %3056 = vpow2.f32 %v1403_v26 }
 0x1d6   :  { %v1197_v7 = vpop.xlane.xlu0 %1196  ;;  %v1567_v19 = vsel %vm1080_vm1, %v4219_v2, 0.0  ;;  %2870 = vmatprep.subr.bf16.mxu1 %v4227_v42 }
 0x1d7   :  { %3058 = vpow2.f32 %v1417_v50  ;;  %v1419_v10 = vmul.f32 1.442695, %v1314_v44  ;;  %v1311_v36 = vsub.f32 %v3890_v60, %v1197_v7  ;;  %1568 = vadd.xlane.f32.xlu0 %v1567_v19  ;;  %v4230_v17 = vpop.eup %3048 }
 0x1d8   :  { %v1200_v58 = vpop.xlane.xlu1 %1199  ;;  %v1570_v54 = vsel %vm1080_vm1, %v4230_v17, 0.0 }
 0x1d9   :  { %v4235_v53 = vpop.eup %3050  ;;  %v1413_v34 = vmul.f32 1.442695, %v1311_v36  ;;  %v1312_v39 = vsub.f32 %v3898_v3, %v1200_v58  ;;  %1553 = vadd.xlane.f32.xlu1 %v1552_v55  ;;  %3060 = vpow2.f32 %v1419_v10 }
 0x1da   :  { %v1221_v21 = vpop.xlane.xlu0 %1220  ;;  %v1591_v60 = vsel %vm1080_vm1, %v4235_v53, 0.0 }
 0x1db   :  { %3062 = vpow2.f32 %v1413_v34  ;;  %v1415_v6 = vmul.f32 1.442695, %v1312_v39  ;;  %v1319_v26 = vsub.f32 %v3896_v63, %v1221_v21  ;;  %1592 = vadd.xlane.f32.xlu0 %v1591_v60  ;;  %v4241_v14 = vpop.eup %3052 }
 0x1dc   :  { %v1224_v46 = vpop.xlane.xlu1 %1223  ;;  %v1594_v36 = vsel %vm1080_vm1, %v4241_v14, 0.0 }
 0x1dd   :  { %v4245_v41 = vpop.eup %3054  ;;  %v1429_v3 = vmul.f32 1.442695, %v1319_v26  ;;  %v1320_v50 = vsub.f32 %v3906_v13, %v1224_v46  ;;  %1571 = vadd.xlane.f32.xlu1 %v1570_v54  ;;  %3064 = vpow2.f32 %v1415_v6 }
 0x1de   :  { %v1191_v44 = vpop.xlane.xlu0 %1190  ;;  %v1561_v45 = vsel %vm1080_vm1, %v4245_v41, 0.0 }
 0x1df   :  { %3066 = vpow2.f32 %v1429_v3  ;;  %v1431_v63 = vmul.f32 1.442695, %v1320_v50  ;;  %v1309_v7 = vsub.f32 %v3894_v62, %v1191_v44  ;;  %1562 = vadd.xlane.f32.xlu0 %v1561_v45  ;;  %v4251_v19 = vpop.eup %3056 }
 0x1e0   :  { %v1194_v10 = vpop.xlane.xlu1 %1193  ;;  %v1564_v26 = vsel %vm1080_vm1, %v4251_v19, 0.0 }
 0x1e1   :  { %v4255_v58 = vpop.eup %3058  ;;  %v1409_v13 = vmul.f32 1.442695, %v1309_v7  ;;  %v1310_v55 = vsub.f32 %v3904_v11, %v1194_v10  ;;  %1595 = vadd.xlane.f32.xlu1 %v1594_v36  ;;  %3068 = vpow2.f32 %v1431_v63  ;;  %v4940_v36 = vld [vmem:[#allocation5_spill] sm:$0xff] }
 0x1e2   :  { %v1215_v34 = vpop.xlane.xlu0 %1214  ;;  %v1585_v39 = vsel %vm1080_vm1, %v4255_v58, 0.0 }
 0x1e3   :  { %3070 = vpow2.f32 %v1409_v13  ;;  %v1411_v62 = vmul.f32 1.442695, %v1310_v55  ;;  %v1317_v21 = vsub.f32 %v3900_v8, %v1215_v34  ;;  %1586 = vadd.xlane.f32.xlu0 %v1585_v39  ;;  %v4261_v60 = vpop.eup %3060  ;;  %v4941_v39 = vld [vmem:[#allocation3_spill] sm:$0xff] }
 0x1e4   :  { %v1218_v6 = vpop.xlane.xlu1 %1217  ;;  %v1588_v7 = vsel %vm1080_vm1, %v4261_v60, 0.0 }
 0x1e5   :  { %v4265_v46 = vpop.eup %3062  ;;  %v1425_v11 = vmul.f32 1.442695, %v1317_v21  ;;  %v1318_v54 = vsub.f32 %v3908_v18, %v1218_v6  ;;  %1565 = vadd.xlane.f32.xlu1 %v1564_v26  ;;  %3072 = vpow2.f32 %v1411_v62 }
 0x1e6   :  { %4938 = vst [vmem:[#allocation17_spill] sm:$0xff] %v4265_v46  ;;  %v1233_v3 = vpop.xlane.xlu0 %1232  ;;  %v1579_v50 = vsel %vm1080_vm1, %v4265_v46, 0.0 }
 0x1e7   :  { %3074 = vpow2.f32 %v1425_v11  ;;  %v1427_v8 = vmul.f32 1.442695, %v1318_v54  ;;  %v1323_v44 = vsub.f32 %v3930_v43, %v1233_v3  ;;  %1580 = vadd.xlane.f32.xlu0 %v1579_v50  ;;  %v4271_v45 = vpop.eup %3064  ;;  %v4943_v3 = vld [vmem:[#allocation7_spill] sm:$0xff] }
 0x1e8   :  { %v1236_v63 = vpop.xlane.xlu1 %1235  ;;  %v1582_v26 = vsel %vm1080_vm1, %v4271_v45, 0.0 }
 0x1e9   :  { %v4275_v10 = vpop.eup %3066  ;;  %v1437_v18 = vmul.f32 1.442695, %v1323_v44  ;;  %v1324_v13 = vsub.f32 %v4940_v36, %v1236_v63  ;;  %1589 = vadd.xlane.f32.xlu1 %v1588_v7  ;;  %3076 = vpow2.f32 %v1427_v8  ;;  %v4944_v7 = vld [vmem:[#allocation2_spill] sm:$0xff] }
 0x1ea   :  { %4939 = vst [vmem:[#allocation18_spill] sm:$0xff] %v4275_v10  ;;  %v1257_v55 = vpop.xlane.xlu0 %1256  ;;  %v1603_v34 = vsel %vm1080_vm1, %v4275_v10, 0.0 }
 0x1eb   :  { %3078 = vpow2.f32 %v1437_v18  ;;  %v1439_v43 = vmul.f32 1.442695, %v1324_v13  ;;  %v1331_v62 = vsub.f32 %v4941_v39, %v1257_v55  ;;  %1604 = vadd.xlane.f32.xlu0 %v1603_v34  ;;  %v4281_v21 = vpop.eup %3068 }
 0x1ec   :  { %4942 = vst [vmem:[#allocation5_spill] sm:$0xff] %v4281_v21  ;;  %v1260_v6 = vpop.xlane.xlu1 %1259  ;;  %v1606_v55 = vsel %vm1080_vm1, %v4281_v21, 0.0 }
 0x1ed   :  { %v4285_v11 = vpop.eup %3070  ;;  %v1453_v54 = vmul.f32 1.442695, %v1331_v62  ;;  %v1332_v50 = vsub.f32 %v4943_v3, %v1260_v6  ;;  %1583 = vadd.xlane.f32.xlu1 %v1582_v26  ;;  %3080 = vpow2.f32 %v1439_v43  ;;  %v4947_v62 = vld [vmem:[#allocation6_spill] sm:$0xff]  ;;  %v4948_v3 = vld [vmem:[#allocation4_spill] sm:$0xff] }
 0x1ee   :  { %v1227_v8 = vpop.xlane.xlu0 %1226  ;;  %v1573_v44 = vsel %vm1080_vm1, %v4285_v11, 0.0 }
 0x1ef   :  { %3082 = vpow2.f32 %v1453_v54  ;;  %v1455_v63 = vmul.f32 1.442695, %v1332_v50  ;;  %v1321_v18 = vsub.f32 %v4944_v7, %v1227_v8  ;;  %1574 = vadd.xlane.f32.xlu0 %v1573_v44  ;;  %v4291_v36 = vpop.eup %3072 }
 0x1f0   :  { %4945 = vst [vmem:[#allocation3_spill] sm:$0xff] %v4291_v36  ;;  %v1230_v13 = vpop.xlane.xlu1 %1229  ;;  %v1576_v7 = vsel %vm1080_vm1, %v4291_v36, 0.0 }
 0x1f1   :  { %v4295_v34 = vpop.eup %3074  ;;  %v1433_v39 = vmul.f32 1.442695, %v1321_v18  ;;  %v1322_v43 = vsub.f32 %v4947_v62, %v1230_v13  ;;  %1607 = vadd.xlane.f32.xlu1 %v1606_v55  ;;  %3084 = vpow2.f32 %v1455_v63  ;;  %v4951_v55 = vld [vmem:[#allocation8_spill] sm:$0xff] }
 0x1f2   :  { %4946 = vst [vmem:[#allocation7_spill] sm:$0xff] %v4295_v34  ;;  %v1251_v6 = vpop.xlane.xlu0 %1250  ;;  %v1597_v26 = vsel %vm1080_vm1, %v4295_v34, 0.0 }
 0x1f3   :  { %3086 = vpow2.f32 %v1433_v39  ;;  %v1435_v54 = vmul.f32 1.442695, %v1322_v43  ;;  %v1329_v50 = vsub.f32 %v4948_v3, %v1251_v6  ;;  %1598 = vadd.xlane.f32.xlu0 %v1597_v26  ;;  %v4301_v8 = vpop.eup %3076  ;;  %v4952_v6 = vld [vmem:[#allocation9_spill] sm:$0xff] }
 0x1f4   :  { %4949 = vst [vmem:[#allocation2_spill] sm:$0xff] %v4301_v8  ;;  %v1254_v44 = vpop.xlane.xlu1 %1253  ;;  %v1600_v34 = vsel %vm1080_vm1, %v4301_v8, 0.0 }
 0x1f5   :  { %v4305_v18 = vpop.eup %3078  ;;  %v1449_v13 = vmul.f32 1.442695, %v1329_v50  ;;  %v1330_v63 = vsub.f32 %v4951_v55, %v1254_v44  ;;  %1577 = vadd.xlane.f32.xlu1 %v1576_v7  ;;  %3088 = vpow2.f32 %v1435_v54  ;;  %v4955_v7 = vld [vmem:[#allocation12_spill] sm:$0xff] }
 0x1f6   :  { %4950 = vst [vmem:[#allocation6_spill] sm:$0xff] %v4305_v18  ;;  %v1245_v62 = vpop.xlane.xlu0 %1244  ;;  %v1615_v39 = vsel %vm1080_vm1, %v4305_v18, 0.0 }
 0x1f7   :  { %3090 = vpow2.f32 %v1449_v13  ;;  %v1451_v43 = vmul.f32 1.442695, %v1330_v63  ;;  %v1327_v26 = vsub.f32 %v4952_v6, %v1245_v62  ;;  %1616 = vadd.xlane.f32.xlu0 %v1615_v39  ;;  %v4311_v3 = vpop.eup %3080 }
 0x1f8   :  { %4953 = vst [vmem:[#allocation4_spill] sm:$0xff] %v4311_v3  ;;  %v1248_v10 = vpop.xlane.xlu1 %1247  ;;  %v1618_v6 = vsel %vm1080_vm1, %v4311_v3, 0.0 }
 0x1f9   :  { %v4315_v50 = vpop.eup %3082  ;;  %v1445_v44 = vmul.f32 1.442695, %v1327_v26  ;;  %v1328_v54 = vsub.f32 %v4955_v7, %v1248_v10  ;;  %1601 = vadd.xlane.f32.xlu1 %v1600_v34  ;;  %3092 = vpow2.f32 %v1451_v43  ;;  %v4958_v34 = vld [vmem:[#allocation10_spill] sm:$0xff]  ;;  %v4960_v7 = vld [vmem:[#allocation11_spill] sm:$0xff] }
 0x1fa   :  { %4954 = vst [vmem:[#allocation8_spill] sm:$0xff] %v4315_v50  ;;  %v1269_v55 = vpop.xlane.xlu0 %1268  ;;  %v1639_v13 = vsel %vm1080_vm1, %v4315_v50, 0.0 }
 0x1fb   :  { %3094 = vpow2.f32 %v1445_v44  ;;  %v1447_v63 = vmul.f32 1.442695, %v1328_v54  ;;  %1640 = vadd.xlane.f32.xlu0 %v1639_v13  ;;  %v4320_v62 = vpop.eup %3084  ;;  %v1335_v54 = vsub.f32 %v4960_v7, %v1269_v55 }
 0x1fc   :  { %4956 = vst [vmem:[#allocation9_spill] sm:$0xff] %v4320_v62  ;;  %v1272_v39 = vpop.xlane.xlu1 %1271  ;;  %v1642_v13 = vsel %vm1080_vm1, %v4320_v62, 0.0 }
 0x1fd   :  { %v4324_v18 = vpop.eup %3086  ;;  %1619 = vadd.xlane.f32.xlu1 %v1618_v6  ;;  %3096 = vpow2.f32 %v1447_v63  ;;  %v4962_v6 = vld [vmem:[#allocation14_spill] sm:$0xff]  ;;  %v1461_v62 = vmul.f32 1.442695, %v1335_v54 }
 0x1fe   :  { %4957 = vst [vmem:[#allocation12_spill] sm:$0xff] %v4324_v18  ;;  %v1239_v26 = vpop.xlane.xlu0 %1238  ;;  %v1609_v10 = vsel %vm1080_vm1, %v4324_v18, 0.0  ;;  %v4964_v18 = vld [vmem:[#allocation13_spill] sm:$0xff] }
 0x1ff   :  { %v1325_v43 = vsub.f32 %v4958_v34, %v1239_v26  ;;  %1610 = vadd.xlane.f32.xlu0 %v1609_v10  ;;  %v4329_v44 = vpop.eup %3088  ;;  %v4963_v26 = vld [vmem:[#allocation15_spill] sm:$0xff] }
 0x200   :  { %4959 = vst [vmem:[#allocation10_spill] sm:$0xff] %v4329_v44  ;;  %v1242_v50 = vpop.xlane.xlu1 %1241  ;;  %v1336_v10 = vsub.f32 %v4963_v26, %v1272_v39 }
 0x201   :  { %v4334_v3 = vpop.eup %3090  ;;  %v1441_v8 = vmul.f32 1.442695, %v1325_v43  ;;  %1643 = vadd.xlane.f32.xlu1 %v1642_v13  ;;  %v1326_v21 = vsub.f32 %v4962_v6, %v1242_v50  ;;  %v1612_v43 = vsel %vm1080_vm1, %v4329_v44, 0.0  ;;  %v4967_v6 = vld [vmem:[#allocation16_spill] sm:$0xff] }
 0x202   :  { %4961 = vst [vmem:[#allocation11_spill] sm:$0xff] %v4334_v3  ;;  %v1263_v46 = vpop.xlane.xlu0 %1262  ;;  %v1633_v63 = vsel %vm1080_vm1, %v4334_v3, 0.0 }
 0x203   :  { %3098 = vpow2.f32 %v1441_v8  ;;  %v1443_v34 = vmul.f32 1.442695, %v1326_v21  ;;  %v1333_v55 = vsub.f32 %v4964_v18, %v1263_v46  ;;  %1634 = vadd.xlane.f32.xlu0 %v1633_v63  ;;  %v4341_v7 = vpop.eup %3092  ;;  %v1463_v8 = vmul.f32 1.442695, %v1336_v10 }
 0x204   :  { %4965 = vst [vmem:[#allocation14_spill] sm:$0xff] %v4341_v7  ;;  %v1266_v13 = vpop.xlane.xlu1 %1265  ;;  %v1636_v18 = vsel %vm1080_vm1, %v4341_v7, 0.0 }
 0x205   :  { %v4345_v36 = vpop.eup %3094  ;;  %3100 = vpow2.f32 %v1443_v34  ;;  %v1457_v50 = vmul.f32 1.442695, %v1333_v55  ;;  %1613 = vadd.xlane.f32.xlu1 %v1612_v43  ;;  %v1334_v3 = vsub.f32 %v4967_v6, %v1266_v13 }
 0x206   :  { %4966 = vst [vmem:[#allocation15_spill] sm:$0xff] %v4345_v36  ;;  %v1627_v21 = vsel %vm1080_vm1, %v4345_v36, 0.0 }
 0x207   :  { %3102 = vpow2.f32 %v1457_v50  ;;  %v1459_v46 = vmul.f32 1.442695, %v1334_v3  ;;  %1628 = vadd.xlane.f32.xlu0 %v1627_v21  ;;  %v4352_v39 = vpop.eup %3096 }
 0x208   :  { %3104 = vpow2.f32 %v1461_v62  ;;  %4968 = vst [vmem:[#allocation13_spill] sm:$0xff] %v4352_v39  ;;  %v1630_v54 = vsel %vm1080_vm1, %v4352_v39, 0.0 }
 0x209   :  { %3106 = vpow2.f32 %v1459_v46  ;;  %1637 = vadd.xlane.f32.xlu1 %v1636_v18 }
 0x20a   :  { %3108 = vpow2.f32 %v1463_v8 }
 0x20d   :  { %v4356_v63 = vpop.eup %3098  ;;  %1631 = vadd.xlane.f32.xlu1 %v1630_v54 }
 0x20e   :  { %4969 = vst [vmem:[#allocation16_spill] sm:$0xff] %v4356_v63  ;;  %v1621_v26 = vsel %vm1080_vm1, %v4356_v63, 0.0 }
 0x20f   :  { %v4360_v3 = vpop.eup %3100  ;;  %1622 = vadd.xlane.f32.xlu0 %v1621_v26 }
 0x210   :  { %4970 = vst [vmem:[#allocation19_spill] sm:$0xff] %v4360_v3  ;;  %v1624_v62 = vsel %vm1080_vm1, %v4360_v3, 0.0 }
 0x211   :  { %v4364_v10 = vpop.eup %3102  ;;  %1625 = vadd.xlane.f32.xlu1 %v1624_v62 }
 0x212   :  { %4971 = vst [vmem:[#allocation20_spill] sm:$0xff] %v4364_v10  ;;  %v4366_v34 = vpop.eup %3104  ;;  %v1645_v55 = vsel %vm1080_vm1, %v4364_v10, 0.0 }
 0x213   :  { %4972 = vst [vmem:[#allocation21_spill] sm:$0xff] %v4366_v34  ;;  %v4370_v43 = vpop.eup %3106  ;;  %1646 = vadd.xlane.f32.xlu0 %v1645_v55  ;;  %v1651_v6 = vsel %vm1080_vm1, %v4366_v34, 0.0 }
 0x214   :  { %4973 = vst [vmem:[#allocation22_spill] sm:$0xff] %v4370_v43  ;;  %v1648_v13 = vsel %vm1080_vm1, %v4370_v43, 0.0  ;;  %v4374_v50 = vpop.eup %3108 }
 0x215   :  { %4974 = vst [vmem:[#allocation23_spill] sm:$0xff] %v4374_v50  ;;  %1649 = vadd.xlane.f32.xlu1 %v1648_v13  ;;  %v1654_v21 = vsel %vm1080_vm1, %v4374_v50, 0.0 }
 0x217   :  { %1652 = vadd.xlane.f32.xlu0 %v1651_v6 }
 0x219   :  { %1655 = vadd.xlane.f32.xlu1 %v1654_v21 }
 0x224   :  { %v1473_v8 = vpop.xlane.xlu0 %1472 }
 0x228   :  { %v1497_v46 = vpop.xlane.xlu0 %1496 }
 0x22a   :  { %v1476_v18 = vpop.xlane.xlu1 %1475 }
 0x22b   :  { %3110 = vrcp.f32 %v1476_v18 }
 0x22c   :  { %v1467_v54 = vpop.xlane.xlu0 %1466 }
 0x22d   :  { %3112 = vrcp.f32 %v1467_v54 }
 0x22e   :  { %v1500_v26 = vpop.xlane.xlu1 %1499  ;;  %3114 = vrcp.f32 %v1473_v8 }
 0x230   :  { %v1491_v62 = vpop.xlane.xlu0 %1490 }
 0x232   :  { %v1470_v55 = vpop.xlane.xlu1 %1469 }
 0x233   :  { %3116 = vrcp.f32 %v1470_v55 }
 0x234   :  { %3118 = vrcp.f32 %v1500_v26  ;;  %v1485_v13 = vpop.xlane.xlu0 %1484 }
 0x235   :  { %3120 = vrcp.f32 %v1491_v62  ;;  %v3111_v50 = vpop.eup %3110  ;;  %v290_v62 = vld [vmem:[%s4884_s2 + $0x98] sm:$0xff] }
 0x236   :  { %3122 = vrcp.f32 %v1497_v46  ;;  %v1494_v6 = vpop.xlane.xlu1 %1493  ;;  %v1724_v18 = vmul.f32 %v3111_v50, %v4012_v56  ;;  %v289_v46 = vld [vmem:[%s4884_s2 + $0x90] sm:$0xff] }
 0x237   :  { %3124 = vrcp.f32 %v1494_v6  ;;  %v3113_v43 = vpop.eup %3112 }
 0x238   :  { %v1509_v34 = vpop.xlane.xlu0 %1508  ;;  %v3115_v10 = vpop.eup %3114  ;;  %v1721_v8 = vmul.f32 %v3113_v43, %v4017_v32 }
 0x239   :  { %v1723_v6 = vmul.f32 %v3115_v10, %v4001_v24 }
 0x23a   :  { %v1488_v21 = vpop.xlane.xlu1 %1487 }
 0x23b   :  { %3126 = vrcp.f32 %v1488_v21  ;;  %v1786_v44 = vpack.c.bf16 %v1724_v18, %v1723_v6  ;;  %v292_v21 = vld [vmem:[%s4884_s2 + $0xa8] sm:$0xff]  ;;  %v302_v6 = vld [vmem:[%s4884_s2 + $0xf8] sm:$0xff] }
 0x23c   :  { %v1479_v36 = vpop.xlane.xlu0 %1478 }
 0x23d   :  { %v3117_v3 = vpop.eup %3116  ;;  %3128 = vrcp.f32 %v1479_v36  ;;  %v298_v36 = vld [vmem:[%s4884_s2 + $0xd8] sm:$0xff] }
 0x23e   :  { %v3119_v63 = vpop.eup %3118  ;;  %v1512_v54 = vpop.xlane.xlu1 %1511  ;;  %v1722_v26 = vmul.f32 %v3117_v3, %v4029_v52  ;;  %v344_v52 = vpack.c.bf16 %v290_v62, %v289_v46  ;;  %v291_v3 = vld [vmem:[%s4884_s2 + $0xa0] sm:$0xff]  ;;  %3130 = vrcp.f32 %v1485_v13  ;;  %v301_v46 = vld [vmem:[%s4884_s2 + $0xf0] sm:$0xff] }
 0x23f   :  { %v3121_v55 = vpop.eup %3120  ;;  %v1732_v32 = vmul.f32 %v3119_v63, %v4024_v59  ;;  %v297_v59 = vld [vmem:[%s4884_s2 + $0xd0] sm:$0xff]  ;;  %v345_v13 = vpack.c.bf16 %v292_v21, %v291_v3 }
 0x240   :  { %v3123_v39 = vpop.eup %3122  ;;  %v1503_v56 = vpop.xlane.xlu0 %1502  ;;  %v1785_v50 = vpack.c.bf16 %v1722_v26, %v1721_v8  ;;  %v1729_v24 = vmul.f32 %v3121_v55, %v4020_v31  ;;  %v348_v18 = vpack.c.bf16 %v298_v36, %v297_v59  ;;  %v293_v8 = vld [vmem:[%s4884_s2 + $0xb0] sm:$0xff] }
 0x241   :  { %v3125_v7 = vpop.eup %3124  ;;  %v1731_v63 = vmul.f32 %v3123_v39, %v4007_v25  ;;  %v300_v39 = vld [vmem:[%s4884_s2 + $0xe8] sm:$0xff] }
 0x242   :  { %2830 = vmatprep.mubr.msk.bf16.mxu0 %vm1080_vm1, %v1785_v50  ;;  %v1482_v43 = vpop.xlane.xlu1 %1481  ;;  %v1730_v10 = vmul.f32 %v3125_v7, %v4037_v61 }
 0x243   :  { %3132 = vrcp.f32 %v1482_v43  ;;  %2831 = vmatmul.mubr.msk.bf16.vlgmr.msra.gmra.mrb[32].mxu0 %vm1080_vm1, %v1786_v44  ;;  %v1790_v7 = vpack.c.bf16 %v1732_v32, %v1731_v63  ;;  %v294_v44 = vld [vmem:[%s4884_s2 + $0xb8] sm:$0xff] }
 0x244   :  { %3134 = vrcp.f32 %v1512_v54  ;;  %v1521_v31 = vpop.xlane.xlu0 %1520  ;;  %v1789_v61 = vpack.c.bf16 %v1730_v10, %v1729_v24  ;;  %2855 = vmatpush3.bf16.msra.mxu0 %v4206_v28  ;;  %v299_v28 = vld [vmem:[%s4884_s2 + $0xe0] sm:$0xff]  ;;  %v350_v24 = vpack.c.bf16 %v302_v6, %v301_v46 }
 0x245   :  { %3136 = vrcp.f32 %v1503_v56  ;;  %2856 = vmatprep.subr.bf16.mxu0 %v344_v52  ;;  %v349_v26 = vpack.c.bf16 %v300_v39, %v299_v28  ;;  %v3127_v62 = vpop.eup %3126  ;;  %v303_v56 = vld [vmem:[%s4884_s2 + $0x100] sm:$0xff] }
 0x246   :  { %3138 = vrcp.f32 %v1509_v34  ;;  %2846 = vmatprep.mubr.msk.bf16.mxu1 %vm1080_vm1, %v1789_v61  ;;  %v1506_v25 = vpop.xlane.xlu1 %1505  ;;  %v346_v34 = vpack.c.bf16 %v294_v44, %v293_v8  ;;  %v1728_v43 = vmul.f32 %v3127_v62, %v4045_v49  ;;  %v311_v61 = vld [vmem:[%s4884_s2 + $0x140] sm:$0xff] }
 0x247   :  { %3140 = vrcp.f32 %v1506_v25  ;;  %2847 = vmatmul.mubr.msk.bf16.vlgmr.msra.gmra.mrb[32].mxu1 %vm1080_vm1, %v1790_v7  ;;  %v3129_v50 = vpop.eup %3128  ;;  %v312_v7 = vld [vmem:[%s4884_s2 + $0x148] sm:$0xff] }
 0x248   :  { %v1545_v54 = vpop.xlane.xlu0 %1544  ;;  %2857 = vmatpush3.bf16.msra.mxu0 %v344_v52  ;;  %2871 = vmatpush3.bf16.msra.mxu1 %v4227_v42  ;;  %v304_v42 = vld [vmem:[%s4884_s2 + $0x108] sm:$0xff]  ;;  %v3131_v32 = vpop.eup %3130  ;;  %v1725_v36 = vmul.f32 %v3129_v50, %v4059_v40  ;;  %v4450_v28 = vpack.c.bf16 %v312_v7, %v311_v61 }
 0x249   :  { %2858 = vmatprep.subr.bf16.mxu0 %v345_v13  ;;  %2872 = vmatprep.subr.bf16.mxu1 %v348_v18  ;;  %v4437_v10 = vpack.c.bf16 %v304_v42, %v303_v56 }
 0x24a   :  { %v1524_v55 = vpop.xlane.xlu1 %1523 }
 0x24b   :  { %3142 = vrcp.f32 %v1524_v55 }
 0x24c   :  { %v1515_v52 = vpop.xlane.xlu0 %1514  ;;  %2859 = vmatpush3.bf16.msra.mxu0 %v345_v13  ;;  %2873 = vmatpush3.bf16.msra.mxu1 %v348_v18  ;;  %v1727_v13 = vmul.f32 %v3131_v32, %v4039_v29 }
 0x24d   :  { %v3133_v3 = vpop.eup %3132  ;;  %2860 = vmatprep.subr.bf16.mxu0 %v346_v34  ;;  %2874 = vmatprep.subr.bf16.mxu1 %v349_v26  ;;  %3144 = vrcp.f32 %v1515_v52 }
 0x24e   :  { %v3135_v21 = vpop.eup %3134  ;;  %v1548_v59 = vpop.xlane.xlu1 %1547  ;;  %v1726_v63 = vmul.f32 %v3133_v3, %v4065_v9  ;;  %v1788_v9 = vpack.c.bf16 %v1728_v43, %v1727_v13  ;;  %3146 = vrcp.f32 %v1521_v31  ;;  %v305_v43 = vld [vmem:[%s4884_s2 + $0x110] sm:$0xff] }
 0x24f   :  { %v3137_v49 = vpop.eup %3136  ;;  %v1736_v44 = vmul.f32 %v3135_v21, %v4055_v30 }
 0x250   :  { %v3139_v18 = vpop.eup %3138  ;;  %v1539_v8 = vpop.xlane.xlu0 %1538  ;;  %v1787_v25 = vpack.c.bf16 %v1726_v63, %v1725_v36  ;;  %2861 = vmatpush3.bf16.msra.mxu0 %v346_v34  ;;  %2875 = vmatpush3.bf16.msra.mxu1 %v349_v26  ;;  %v1733_v39 = vmul.f32 %v3137_v49, %v4075_v48  ;;  %v307_v49 = vld [vmem:[%s4884_s2 + $0x120] sm:$0xff] }
 0x251   :  { %v3141_v40 = vpop.eup %3140  ;;  %2876 = vmatprep.subr.bf16.mxu1 %v350_v24  ;;  %2886 = vmatprep.subr.bf16.mxu0 %v4437_v10  ;;  %v1735_v34 = vmul.f32 %v3139_v18, %v4049_v47 }
 0x252   :  { %2834 = vmatprep.mubr.msk.bf16.mxu0 %vm1080_vm1, %v1787_v25  ;;  %v1518_v29 = vpop.xlane.xlu1 %1517  ;;  %v1734_v46 = vmul.f32 %v3141_v40, %v4081_v0  ;;  %v314_v25 = vld [vmem:[%s4884_s2 + $0x158] sm:$0xff] }
 0x253   :  { %3148 = vrcp.f32 %v1518_v29  ;;  %2835 = vmatmul.mubr.msk.bf16.gmra.mrb[36].mxu0 %vm1080_vm1, %v1788_v9  ;;  %v1792_v62 = vpack.c.bf16 %v1736_v44, %v1735_v34  ;;  %v316_v34 = vld [vmem:[%s4884_s2 + $0x168] sm:$0xff] }
 0x254   :  { %3150 = vrcp.f32 %v1548_v59  ;;  %v1533_v30 = vpop.xlane.xlu0 %1532  ;;  %v1791_v26 = vpack.c.bf16 %v1734_v46, %v1733_v39  ;;  %2877 = vmatpush3.bf16.msra.mxu1 %v350_v24  ;;  %v306_v24 = vld [vmem:[%s4884_s2 + $0x118] sm:$0xff]  ;;  %v309_v39 = vld [vmem:[%s4884_s2 + $0x130] sm:$0xff] }
 0x255   :  { %3152 = vrcp.f32 %v1539_v8  ;;  %2902 = vmatprep.subr.bf16.mxu1 %v4450_v28  ;;  %v3143_v0 = vpop.eup %3142  ;;  %v308_v8 = vld [vmem:[%s4884_s2 + $0x128] sm:$0xff]  ;;  %v310_v46 = vld [vmem:[%s4884_s2 + $0x138] sm:$0xff] }
 0x256   :  { %3154 = vrcp.f32 %v1545_v54  ;;  %2850 = vmatprep.mubr.msk.bf16.mxu1 %vm1080_vm1, %v1791_v26  ;;  %v1542_v31 = vpop.xlane.xlu1 %1541  ;;  %v1740_v50 = vmul.f32 %v3143_v0, %v4103_v33  ;;  %v353_v44 = vpack.c.bf16 %v308_v8, %v307_v49  ;;  %v354_v26 = vpack.c.bf16 %v310_v46, %v309_v39  ;;  %v321_v46 = vld [vmem:[%s4884_s2 + $0x190] sm:$0xff] }
 0x257   :  { %3156 = vrcp.f32 %v1542_v31  ;;  %2851 = vmatmul.mubr.msk.bf16.gmra.mrb[36].mxu1 %vm1080_vm1, %v1792_v62  ;;  %v3145_v6 = vpop.eup %3144  ;;  %v317_v31 = vld [vmem:[%s4884_s2 + $0x170] sm:$0xff] }
 0x258   :  { %v1557_v48 = vpop.xlane.xlu0 %1556  ;;  %v3147_v47 = vpop.eup %3146  ;;  %v1737_v3 = vmul.f32 %v3145_v6, %v4138_v22  ;;  %v319_v6 = vld [vmem:[%s4884_s2 + $0x180] sm:$0xff] }
 0x259   :  { %v1739_v59 = vmul.f32 %v3147_v47, %v4094_v5 }
 0x25a   :  { %v1536_v55 = vpop.xlane.xlu1 %1535 }
 0x25b   :  { %3158 = vrcp.f32 %v1536_v55  ;;  %v1794_v7 = vpack.c.bf16 %v1740_v50, %v1739_v59  ;;  %v318_v55 = vld [vmem:[%s4884_s2 + $0x178] sm:$0xff]  ;;  %v327_v59 = vld [vmem:[%s4884_s2 + $0x1c0] sm:$0xff] }
 0x25c   :  { %v1527_v56 = vpop.xlane.xlu0 %1526 }
 0x25d   :  { %v3149_v42 = vpop.eup %3148  ;;  %3160 = vrcp.f32 %v1527_v56 }
 0x25e   :  { %v3151_v32 = vpop.eup %3150  ;;  %v1560_v52 = vpop.xlane.xlu1 %1559  ;;  %v1738_v54 = vmul.f32 %v3149_v42, %v4147_v20  ;;  %v352_v20 = vpack.c.bf16 %v306_v24, %v305_v43  ;;  %3162 = vrcp.f32 %v1533_v30 }
 0x25f   :  { %v3153_v21 = vpop.eup %3152  ;;  %v1748_v22 = vmul.f32 %v3151_v32, %v4125_v16  ;;  %v313_v16 = vld [vmem:[%s4884_s2 + $0x150] sm:$0xff] }
 0x260   :  { %v3155_v36 = vpop.eup %3154  ;;  %v1551_v33 = vpop.xlane.xlu0 %1550  ;;  %v1793_v63 = vpack.c.bf16 %v1738_v54, %v1737_v3  ;;  %v1745_v5 = vmul.f32 %v3153_v21, %v4157_v4  ;;  %v356_v29 = vpack.c.bf16 %v314_v25, %v313_v16 }
 0x261   :  { %v3157_v61 = vpop.eup %3156  ;;  %v1747_v40 = vmul.f32 %v3155_v36, %v4116_v37  ;;  %v328_v36 = vld [vmem:[%s4884_s2 + $0x1c8] sm:$0xff] }
 0x262   :  { %2862 = vmatprep.mubr.msk.bf16.mxu0 %vm1080_vm1, %v1793_v63  ;;  %v1530_v13 = vpop.xlane.xlu1 %1529  ;;  %v1746_v18 = vmul.f32 %v3157_v61, %v4163_v15 }
 0x263   :  { %3164 = vrcp.f32 %v1530_v13  ;;  %2863 = vmatmul.mubr.msk.bf16.vlgmr.msra.gmra.mrb[40].mxu0 %vm1080_vm1, %v1794_v7  ;;  %v1798_v9 = vpack.c.bf16 %v1748_v22, %v1747_v40 }
 0x264   :  { %3166 = vrcp.f32 %v1560_v52  ;;  %v1569_v4 = vpop.xlane.xlu0 %1568  ;;  %v1797_v15 = vpack.c.bf16 %v1746_v18, %v1745_v5  ;;  %2887 = vmatpush3.bf16.msra.mxu0 %v4437_v10  ;;  %v315_v10 = vld [vmem:[%s4884_s2 + $0x160] sm:$0xff]  ;;  %v358_v52 = vpack.c.bf16 %v318_v55, %v317_v31 }
 0x265   :  { %3168 = vrcp.f32 %v1551_v33  ;;  %2888 = vmatprep.subr.bf16.mxu0 %v352_v20  ;;  %v357_v62 = vpack.c.bf16 %v316_v34, %v315_v10  ;;  %v322_v10 = vld [vmem:[%s4884_s2 + $0x198] sm:$0xff] }
 0x266   :  { %3170 = vrcp.f32 %v1557_v48  ;;  %2878 = vmatprep.mubr.msk.bf16.mxu1 %vm1080_vm1, %v1797_v15  ;;  %v1554_v37 = vpop.xlane.xlu1 %1553  ;;  %v3159_v48 = vpop.eup %3158 }
 0x267   :  { %3172 = vrcp.f32 %v1554_v37  ;;  %2879 = vmatmul.mubr.msk.bf16.vlgmr.msra.gmra.mrb[40].mxu1 %vm1080_vm1, %v1798_v9  ;;  %v3161_v47 = vpop.eup %3160  ;;  %v1744_v32 = vmul.f32 %v3159_v48, %v4173_v57 }
 0x268   :  { %v1593_v30 = vpop.xlane.xlu0 %1592  ;;  %2889 = vmatpush3.bf16.msra.mxu0 %v352_v20  ;;  %2903 = vmatpush3.bf16.msra.mxu1 %v4450_v28  ;;  %v320_v28 = vld [vmem:[%s4884_s2 + $0x188] sm:$0xff]  ;;  %v3163_v56 = vpop.eup %3162  ;;  %v1741_v24 = vmul.f32 %v3161_v47, %v4187_v51  ;;  %v4530_v20 = vpack.c.bf16 %v328_v36, %v327_v59  ;;  %v330_v47 = vld [vmem:[%s4884_s2 + $0x1d8] sm:$0xff] }
 0x269   :  { %2890 = vmatprep.subr.bf16.mxu0 %v353_v44  ;;  %2904 = vmatprep.subr.bf16.mxu1 %v356_v29  ;;  %v4517_v3 = vpack.c.bf16 %v320_v28, %v319_v6  ;;  %v1743_v33 = vmul.f32 %v3163_v56, %v4167_v27  ;;  %v324_v28 = vld [vmem:[%s4884_s2 + $0x1a8] sm:$0xff] }
 0x26a   :  { %v1572_v0 = vpop.xlane.xlu1 %1571 }
 0x26b   :  { %3174 = vrcp.f32 %v1572_v0  ;;  %v323_v0 = vld [vmem:[%s4884_s2 + $0x1a0] sm:$0xff] }
 0x26c   :  { %v1563_v42 = vpop.xlane.xlu0 %1562  ;;  %2891 = vmatpush3.bf16.msra.mxu0 %v353_v44  ;;  %2905 = vmatpush3.bf16.msra.mxu1 %v356_v29 }
 0x26d   :  { %v3165_v50 = vpop.eup %3164  ;;  %2892 = vmatprep.subr.bf16.mxu0 %v354_v26  ;;  %2906 = vmatprep.subr.bf16.mxu1 %v357_v62  ;;  %3176 = vrcp.f32 %v1563_v42 }
 0x26e   :  { %v3167_v54 = vpop.eup %3166  ;;  %v1596_v43 = vpop.xlane.xlu1 %1595  ;;  %v1742_v21 = vmul.f32 %v3165_v50, %v4193_v1  ;;  %v1796_v1 = vpack.c.bf16 %v1744_v32, %v1743_v33  ;;  %3178 = vrcp.f32 %v1569_v4  ;;  %v361_v50 = vpack.c.bf16 %v324_v28, %v323_v0  ;;  %v333_v33 = vld [vmem:[%s4884_s2 + $0x1f0] sm:$0xff] }
 0x26f   :  { %v3169_v57 = vpop.eup %3168  ;;  %v1752_v22 = vmul.f32 %v3167_v54, %v4183_v23  ;;  %v326_v54 = vld [vmem:[%s4884_s2 + $0x1b8] sm:$0xff] }
 0x270   :  { %v3171_v63 = vpop.eup %3170  ;;  %v1587_v61 = vpop.xlane.xlu0 %1586  ;;  %v1795_v7 = vpack.c.bf16 %v1742_v21, %v1741_v24  ;;  %2893 = vmatpush3.bf16.msra.mxu0 %v354_v26  ;;  %2907 = vmatpush3.bf16.msra.mxu1 %v357_v62  ;;  %v1749_v49 = vmul.f32 %v3169_v57, %v4203_v12 }
 0x271   :  { %v3173_v51 = vpop.eup %3172  ;;  %2908 = vmatprep.subr.bf16.mxu1 %v358_v52  ;;  %2918 = vmatprep.subr.bf16.mxu0 %v4517_v3  ;;  %v1751_v5 = vmul.f32 %v3171_v63, %v4177_v38  ;;  %v334_v63 = vld [vmem:[%s4884_s2 + $0x1f8] sm:$0xff] }
 0x272   :  { %2866 = vmatprep.mubr.msk.bf16.mxu0 %vm1080_vm1, %v1795_v7  ;;  %v1566_v27 = vpop.xlane.xlu1 %1565  ;;  %v1750_v13 = vmul.f32 %v3173_v51, %v4212_v35 }
 0x273   :  { %3180 = vrcp.f32 %v1566_v27  ;;  %2867 = vmatmul.mubr.msk.bf16.gmra.mrb[44].mxu0 %vm1080_vm1, %v1796_v1  ;;  %v1800_v8 = vpack.c.bf16 %v1752_v22, %v1751_v5  ;;  %v4975_v5 = vld [vmem:[#allocation3_spill] sm:$0xff] }
 0x274   :  { %3182 = vrcp.f32 %v1596_v43  ;;  %v1581_v23 = vpop.xlane.xlu0 %1580  ;;  %v1799_v18 = vpack.c.bf16 %v1750_v13, %v1749_v49  ;;  %2909 = vmatpush3.bf16.msra.mxu1 %v358_v52  ;;  %v325_v52 = vld [vmem:[%s4884_s2 + $0x1b0] sm:$0xff]  ;;  %v332_v43 = vld [vmem:[%s4884_s2 + $0x1e8] sm:$0xff] }
 0x275   :  { %3184 = vrcp.f32 %v1587_v61  ;;  %2934 = vmatprep.subr.bf16.mxu1 %v4530_v20  ;;  %v3175_v35 = vpop.eup %3174  ;;  %v362_v21 = vpack.c.bf16 %v326_v54, %v325_v52  ;;  %v4985_v54 = vld [vmem:[#allocation9_spill] sm:$0xff] }
 0x276   :  { %3186 = vrcp.f32 %v1593_v30  ;;  %2882 = vmatprep.mubr.msk.bf16.mxu1 %vm1080_vm1, %v1799_v18  ;;  %v1590_v16 = vpop.xlane.xlu1 %1589  ;;  %v1756_v9 = vmul.f32 %v3175_v35, %v4230_v17 }
 0x277   :  { %3188 = vrcp.f32 %v1590_v16  ;;  %2883 = vmatmul.mubr.msk.bf16.gmra.mrb[44].mxu1 %vm1080_vm1, %v1800_v8  ;;  %v3177_v40 = vpop.eup %3176  ;;  %v4976_v8 = vld [vmem:[#allocation17_spill] sm:$0xff] }
 0x278   :  { %v1605_v12 = vpop.xlane.xlu0 %1604  ;;  %v3179_v38 = vpop.eup %3178  ;;  %v1753_v39 = vmul.f32 %v3177_v40, %v4245_v41  ;;  %v4977_v40 = vld [vmem:[#allocation5_spill] sm:$0xff] }
 0x279   :  { %v1755_v30 = vmul.f32 %v3179_v38, %v4219_v2 }
 0x27a   :  { %v1584_v25 = vpop.xlane.xlu1 %1583 }
 0x27b   :  { %3190 = vrcp.f32 %v1584_v25  ;;  %v1802_v48 = vpack.c.bf16 %v1756_v9, %v1755_v30 }
 0x27c   :  { %v1575_v4 = vpop.xlane.xlu0 %1574 }
 0x27d   :  { %v3181_v15 = vpop.eup %3180  ;;  %3192 = vrcp.f32 %v1575_v4 }
 0x27e   :  { %v3183_v44 = vpop.eup %3182  ;;  %v1608_v29 = vpop.xlane.xlu1 %1607  ;;  %v1754_v37 = vmul.f32 %v3181_v15, %v4251_v19  ;;  %v360_v19 = vpack.c.bf16 %v322_v10, %v321_v46  ;;  %3194 = vrcp.f32 %v1581_v23  ;;  %v4978_v15 = vld [vmem:[#allocation7_spill] sm:$0xff] }
 0x27f   :  { %v3185_v34 = vpop.eup %3184  ;;  %v1764_v41 = vmul.f32 %v3183_v44, %v4241_v14  ;;  %v329_v14 = vld [vmem:[%s4884_s2 + $0x1d0] sm:$0xff]  ;;  %v4979_v44 = vld [vmem:[#allocation2_spill] sm:$0xff] }
 0x280   :  { %v3187_v26 = vpop.eup %3186  ;;  %v1599_v17 = vpop.xlane.xlu0 %1598  ;;  %v1801_v62 = vpack.c.bf16 %v1754_v37, %v1753_v39  ;;  %v1761_v2 = vmul.f32 %v3185_v34, %v4255_v58  ;;  %v364_v32 = vpack.c.bf16 %v330_v47, %v329_v14  ;;  %v4980_v39 = vld [vmem:[#allocation18_spill] sm:$0xff] }
 0x281   :  { %v3189_v31 = vpop.eup %3188  ;;  %v1763_v56 = vmul.f32 %v3187_v26, %v4235_v53  ;;  %v4983_v14 = vld [vmem:[#allocation10_spill] sm:$0xff] }
 0x282   :  { %2894 = vmatprep.mubr.msk.bf16.mxu0 %vm1080_vm1, %v1801_v62  ;;  %v1578_v55 = vpop.xlane.xlu1 %1577  ;;  %v1762_v6 = vmul.f32 %v3189_v31, %v4261_v60 }
 0x283   :  { %3196 = vrcp.f32 %v1578_v55  ;;  %2895 = vmatmul.mubr.msk.bf16.vlgmr.msra.gmra.mrb[48].mxu0 %vm1080_vm1, %v1802_v48  ;;  %v1806_v42 = vpack.c.bf16 %v1764_v41, %v1763_v56 }
 0x284   :  { %3198 = vrcp.f32 %v1608_v29  ;;  %v1617_v58 = vpop.xlane.xlu0 %1616  ;;  %v1805_v60 = vpack.c.bf16 %v1762_v6, %v1761_v2  ;;  %2919 = vmatpush3.bf16.msra.mxu0 %v4517_v3  ;;  %v331_v3 = vld [vmem:[%s4884_s2 + $0x1e0] sm:$0xff]  ;;  %v4982_v6 = vld [vmem:[#allocation12_spill] sm:$0xff] }
 0x285   :  { %3200 = vrcp.f32 %v1599_v17  ;;  %2920 = vmatprep.subr.bf16.mxu0 %v360_v19  ;;  %v365_v59 = vpack.c.bf16 %v332_v43, %v331_v3  ;;  %v3191_v36 = vpop.eup %3190 }
 0x286   :  { %3202 = vrcp.f32 %v1605_v12  ;;  %2910 = vmatprep.mubr.msk.bf16.mxu1 %vm1080_vm1, %v1805_v60  ;;  %v1602_v53 = vpop.xlane.xlu1 %1601  ;;  %v1760_v22 = vmul.f32 %v3191_v36, %v4271_v45 }
 0x287   :  { %3204 = vrcp.f32 %v1602_v53  ;;  %2911 = vmatmul.mubr.msk.bf16.vlgmr.msra.gmra.mrb[48].mxu1 %vm1080_vm1, %v1806_v42  ;;  %v3193_v61 = vpop.eup %3192 }
 0x288   :  { %v1641_v24 = vpop.xlane.xlu0 %1640  ;;  %2921 = vmatpush3.bf16.msra.mxu0 %v360_v19  ;;  %2935 = vmatpush3.bf16.msra.mxu1 %v4530_v20  ;;  %v3195_v7 = vpop.eup %3194  ;;  %v366_v20 = vpack.c.bf16 %v334_v63, %v333_v33  ;;  %v1757_v13 = vmul.f32 %v3193_v61, %v4285_v11  ;;  %v4981_v19 = vld [vmem:[#allocation4_spill] sm:$0xff] }
 0x289   :  { %2922 = vmatprep.subr.bf16.mxu0 %v361_v50  ;;  %2936 = vmatprep.subr.bf16.mxu1 %v364_v32  ;;  %v1759_v16 = vmul.f32 %v3195_v7, %v4976_v8 }
 0x28a   :  { %v1620_v57 = vpop.xlane.xlu1 %1619 }
 0x28b   :  { %3206 = vrcp.f32 %v1620_v57  ;;  %v1804_v45 = vpack.c.bf16 %v1760_v22, %v1759_v16  ;;  %v4988_v57 = vld [vmem:[#allocation8_spill] sm:$0xff] }
 0x28c   :  { %v1611_v51 = vpop.xlane.xlu0 %1610  ;;  %2923 = vmatpush3.bf16.msra.mxu0 %v361_v50  ;;  %2937 = vmatpush3.bf16.msra.mxu1 %v364_v32 }
 0x28d   :  { %v3197_v1 = vpop.eup %3196  ;;  %2924 = vmatprep.subr.bf16.mxu0 %v362_v21  ;;  %2938 = vmatprep.subr.bf16.mxu1 %v365_v59  ;;  %3208 = vrcp.f32 %v1611_v51 }
 0x28e   :  { %v3199_v27 = vpop.eup %3198  ;;  %v1644_v49 = vpop.xlane.xlu1 %1643  ;;  %v1758_v23 = vmul.f32 %v3197_v1, %v4975_v5  ;;  %3210 = vrcp.f32 %v1617_v58  ;;  %v4984_v58 = vld [vmem:[#allocation6_spill] sm:$0xff]  ;;  %v4990_v5 = vld [vmem:[#allocation16_spill] sm:$0xff] }
 0x28f   :  { %v3201_v18 = vpop.eup %3200  ;;  %v1768_v38 = vmul.f32 %v3199_v27, %v4977_v40 }
 0x290   :  { %v3203_v12 = vpop.eup %3202  ;;  %v1803_v35 = vpack.c.bf16 %v1758_v23, %v1757_v13  ;;  %2925 = vmatpush3.bf16.msra.mxu0 %v362_v21  ;;  %2939 = vmatpush3.bf16.msra.mxu1 %v365_v59  ;;  %v1635_v4 = vpop.xlane.xlu0 %1634  ;;  %v1765_v9 = vmul.f32 %v3201_v18, %v4978_v15  ;;  %v4987_v59 = vld [vmem:[#allocation14_spill] sm:$0xff]  ;;  %v4991_v18 = vld [vmem:[#allocation19_spill] sm:$0xff] }
 0x291   :  { %v3205_v25 = vpop.eup %3204  ;;  %2940 = vmatprep.subr.bf16.mxu1 %v366_v20  ;;  %v1767_v37 = vmul.f32 %v3203_v12, %v4980_v39  ;;  %v4992_v12 = vld [vmem:[#allocation15_spill] sm:$0xff]  ;;  %v4995_v39 = vld [vmem:[#allocation21_spill] sm:$0xff] }
 0x292   :  { %2898 = vmatprep.mubr.msk.bf16.mxu0 %vm1080_vm1, %v1803_v35  ;;  %v1614_v11 = vpop.xlane.xlu1 %1613  ;;  %v1766_v29 = vmul.f32 %v3205_v25, %v4979_v44 }
 0x293   :  { %3212 = vrcp.f32 %v1614_v11  ;;  %2899 = vmatmul.mubr.msk.bf16.gmra.mrb[52].mxu0 %vm1080_vm1, %v1804_v45  ;;  %v1808_v10 = vpack.c.bf16 %v1768_v38, %v1767_v37  ;;  %v4993_v38 = vld [vmem:[#allocation20_spill] sm:$0xff]  ;;  %v4994_v11 = vld [vmem:[#allocation22_spill] sm:$0xff] }
 0x294   :  { %3214 = vrcp.f32 %v1644_v49  ;;  %v1807_v46 = vpack.c.bf16 %v1766_v29, %v1765_v9  ;;  %2941 = vmatpush3.bf16.msra.mxu1 %v366_v20  ;;  %v1629_v30 = vpop.xlane.xlu0 %1628  ;;  %v4989_v49 = vld [vmem:[#allocation13_spill] sm:$0xff] }
 0x295   :  { %3216 = vrcp.f32 %v1635_v4  ;;  %v3207_v26 = vpop.eup %3206 }
 0x296   :  { %3218 = vrcp.f32 %v1641_v24  ;;  %2914 = vmatprep.mubr.msk.bf16.mxu1 %vm1080_vm1, %v1807_v46  ;;  %v1638_v34 = vpop.xlane.xlu1 %1637  ;;  %v1772_v0 = vmul.f32 %v3207_v26, %v4981_v19  ;;  %v4986_v24 = vld [vmem:[#allocation11_spill] sm:$0xff] }
 0x297   :  { %3220 = vrcp.f32 %v1638_v34  ;;  %2915 = vmatmul.mubr.msk.bf16.gmra.mrb[52].mxu1 %vm1080_vm1, %v1808_v10  ;;  %v3209_v62 = vpop.eup %3208  ;;  %v4996_v46 = vld [vmem:[#allocation23_spill] sm:$0xff] }
 0x298   :  { %v3211_v31 = vpop.eup %3210  ;;  %v1769_v28 = vmul.f32 %v3209_v62, %v4982_v6 }
 0x299   :  { %v1771_v60 = vmul.f32 %v3211_v31, %v4984_v58 }
 0x29a   :  { %v1632_v17 = vpop.xlane.xlu1 %1631 }
 0x29b   :  { %3222 = vrcp.f32 %v1632_v17  ;;  %v1810_v53 = vpack.c.bf16 %v1772_v0, %v1771_v60 }
 0x29c   :  { %v1623_v48 = vpop.xlane.xlu0 %1622 }
 0x29d   :  { %v3213_v41 = vpop.eup %3212  ;;  %3224 = vrcp.f32 %v1623_v48 }
 0x29e   :  { %v3215_v55 = vpop.eup %3214  ;;  %3226 = vrcp.f32 %v1629_v30  ;;  %v1626_v2 = vpop.xlane.xlu1 %1625  ;;  %v1770_v47 = vmul.f32 %v3213_v41, %v4983_v14 }
 0x29f   :  { %v3217_v56 = vpop.eup %3216  ;;  %3228 = vrcp.f32 %v1626_v2  ;;  %v1780_v3 = vmul.f32 %v3215_v55, %v4985_v54 }
 0x2a0   :  { %v3219_v42 = vpop.eup %3218  ;;  %v1647_v50 = vpop.xlane.xlu0 %1646  ;;  %v1809_v32 = vpack.c.bf16 %v1770_v47, %v1769_v28  ;;  %v1777_v21 = vmul.f32 %v3217_v56, %v4986_v24 }
 0x2a1   :  { %v3221_v52 = vpop.eup %3220  ;;  %3230 = vrcp.f32 %v1647_v50  ;;  %v1779_v33 = vmul.f32 %v3219_v42, %v4988_v57 }
 0x2a2   :  { %2926 = vmatprep.mubr.msk.bf16.mxu0 %vm1080_vm1, %v1809_v32  ;;  %v1650_v43 = vpop.xlane.xlu1 %1649  ;;  %v1778_v36 = vmul.f32 %v3221_v52, %v4987_v59 }
 0x2a3   :  { %2927 = vmatmul.mubr.msk.bf16.vlgmr.msra.gmra.mrb[56].mxu0 %vm1080_vm1, %v1810_v53  ;;  %3232 = vrcp.f32 %v1650_v43  ;;  %v1814_v7 = vpack.c.bf16 %v1780_v3, %v1779_v33 }
 0x2a4   :  { %v1653_v63 = vpop.xlane.xlu0 %1652  ;;  %v1813_v61 = vpack.c.bf16 %v1778_v36, %v1777_v21 }
 0x2a5   :  { %3234 = vrcp.f32 %v1653_v63  ;;  %v3223_v51 = vpop.eup %3222 }
 0x2a6   :  { %2942 = vmatprep.mubr.msk.bf16.mxu1 %vm1080_vm1, %v1813_v61  ;;  %v1656_v1 = vpop.xlane.xlu1 %1655  ;;  %v1776_v13 = vmul.f32 %v3223_v51, %v4989_v49 }
 0x2a7   :  { %v3225_v22 = vpop.eup %3224  ;;  %2943 = vmatmul.mubr.msk.bf16.vlgmr.msra.gmra.mrb[56].mxu1 %vm1080_vm1, %v1814_v7  ;;  %3236 = vrcp.f32 %v1656_v1 }
 0x2a8   :  { %v3227_v20 = vpop.eup %3226  ;;  %v1773_v23 = vmul.f32 %v3225_v22, %v4990_v5 }
 0x2a9   :  { %v3229_v27 = vpop.eup %3228  ;;  %v1775_v35 = vmul.f32 %v3227_v20, %v4992_v12 }
 0x2aa   :  { %v1774_v8 = vmul.f32 %v3229_v27, %v4991_v18 }
 0x2ab   :  { %v3231_v16 = vpop.eup %3230  ;;  %v1812_v40 = vpack.c.bf16 %v1776_v13, %v1775_v35 }
 0x2ac   :  { %v1811_v25 = vpack.c.bf16 %v1774_v8, %v1773_v23  ;;  %v1781_v4 = vmul.f32 %v3231_v16, %v4993_v38 }
 0x2ad   :  { %v3233_v45 = vpop.eup %3232 }
 0x2ae   :  { %2930 = vmatprep.mubr.msk.bf16.mxu0 %vm1080_vm1, %v1811_v25  ;;  %v1782_v15 = vmul.f32 %v3233_v45, %v4994_v11 }
 0x2af   :  { %v3235_v9 = vpop.eup %3234  ;;  %2931 = vmatmul.mubr.msk.bf16.gmra.mrb[60].mxu0 %vm1080_vm1, %v1812_v40 }
 0x2b0   :  { %v1815_v44 = vpack.c.bf16 %v1782_v15, %v1781_v4  ;;  %v1783_v37 = vmul.f32 %v3235_v9, %v4995_v39 }
 0x2b1   :  { %v3237_v29 = vpop.eup %3236 }
 0x2b2   :  { %2946 = vmatprep.mubr.msk.bf16.mxu1 %vm1080_vm1, %v1815_v44  ;;  %v1784_v10 = vmul.f32 %v3237_v29, %v4996_v46 }
 0x2b4   :  { %v1816_v34 = vpack.c.bf16 %v1784_v10, %v1783_v37 }
 0x2b6   :  { %2947 = vmatmul.mubr.msk.bf16.gmra.mrb[60].mxu1 %vm1080_vm1, %v1816_v34 }
 0x316   :  { %v2832_v30 = vpop.f32.mrb[32].mxu0 }
 0x317   :  { %2436 = vst.msk [vmem:[%s4885_s3 + $0x10] sm:$0xff] %vm2433_vm2, %v2832_v30  ;;  %v1863_v26 = vpop.f32.mrb[33].mxu0 }
 0x318   :  { %2434 = vst.msk [vmem:[%s4885_s3] sm:$0xff] %vm2433_vm2, %v1863_v26  ;;  %v2833_v17 = vpop.f32.mrb[34].mxu0 }
 0x319   :  { %2437 = vst.msk [vmem:[%s4885_s3 + $0x18] sm:$0xff] %vm2433_vm2, %v2833_v17  ;;  %v1866_v62 = vpop.f32.mrb[35].mxu0 }
 0x31a   :  { %2435 = vst.msk [vmem:[%s4885_s3 + $0x8] sm:$0xff] %vm2433_vm2, %v1866_v62  ;;  %v2848_v31 = vpop.f32.mrb[32].mxu1 }
 0x31b   :  { %2444 = vst.msk [vmem:[%s4885_s3 + $0x50] sm:$0xff] %vm2433_vm2, %v2848_v31  ;;  %v1940_v48 = vpop.f32.mrb[33].mxu1 }
 0x31c   :  { %2442 = vst.msk [vmem:[%s4885_s3 + $0x40] sm:$0xff] %vm2433_vm2, %v1940_v48  ;;  %v2849_v41 = vpop.f32.mrb[34].mxu1 }
 0x31d   :  { %2445 = vst.msk [vmem:[%s4885_s3 + $0x58] sm:$0xff] %vm2433_vm2, %v2849_v41  ;;  %v1943_v19 = vpop.f32.mrb[35].mxu1 }
 0x31e   :  { %2443 = vst.msk [vmem:[%s4885_s3 + $0x48] sm:$0xff] %vm2433_vm2, %v1943_v19 }
 0x326   :  { %v2836_v0 = vpop.f32.mrb[36].mxu0 }
 0x327   :  { %2440 = vst.msk [vmem:[%s4885_s3 + $0x30] sm:$0xff] %vm2433_vm2, %v2836_v0  ;;  %v1879_v55 = vpop.f32.mrb[37].mxu0 }
 0x328   :  { %2438 = vst.msk [vmem:[%s4885_s3 + $0x20] sm:$0xff] %vm2433_vm2, %v1879_v55  ;;  %v2837_v2 = vpop.f32.mrb[38].mxu0 }
 0x329   :  { %2441 = vst.msk [vmem:[%s4885_s3 + $0x38] sm:$0xff] %vm2433_vm2, %v2837_v2  ;;  %v1882_v6 = vpop.f32.mrb[39].mxu0 }
 0x32a   :  { %2439 = vst.msk [vmem:[%s4885_s3 + $0x28] sm:$0xff] %vm2433_vm2, %v1882_v6  ;;  %v2852_v28 = vpop.f32.mrb[36].mxu1 }
 0x32b   :  { %2448 = vst.msk [vmem:[%s4885_s3 + $0x70] sm:$0xff] %vm2433_vm2, %v2852_v28  ;;  %v1956_v14 = vpop.f32.mrb[37].mxu1 }
 0x32c   :  { %2446 = vst.msk [vmem:[%s4885_s3 + $0x60] sm:$0xff] %vm2433_vm2, %v1956_v14  ;;  %v2853_v47 = vpop.f32.mrb[38].mxu1 }
 0x32d   :  { %2449 = vst.msk [vmem:[%s4885_s3 + $0x78] sm:$0xff] %vm2433_vm2, %v2853_v47  ;;  %v1959_v56 = vpop.f32.mrb[39].mxu1 }
 0x32e   :  { %2447 = vst.msk [vmem:[%s4885_s3 + $0x68] sm:$0xff] %vm2433_vm2, %v1959_v56 }
 0x336   :  { %v2864_v58 = vpop.f32.mrb[40].mxu0 }
 0x337   :  { %2452 = vst.msk [vmem:[%s4885_s3 + $0x90] sm:$0xff] %vm2433_vm2, %v2864_v58  ;;  %v2017_v60 = vpop.f32.mrb[41].mxu0 }
 0x338   :  { %2450 = vst.msk [vmem:[%s4885_s3 + $0x80] sm:$0xff] %vm2433_vm2, %v2017_v60  ;;  %v2865_v42 = vpop.f32.mrb[42].mxu0 }
 0x339   :  { %2453 = vst.msk [vmem:[%s4885_s3 + $0x98] sm:$0xff] %vm2433_vm2, %v2865_v42  ;;  %v2020_v50 = vpop.f32.mrb[43].mxu0 }
 0x33a   :  { %2451 = vst.msk [vmem:[%s4885_s3 + $0x88] sm:$0xff] %vm2433_vm2, %v2020_v50  ;;  %v2880_v32 = vpop.f32.mrb[40].mxu1 }
 0x33b   :  { %2460 = vst.msk [vmem:[%s4885_s3 + $0xd0] sm:$0xff] %vm2433_vm2, %v2880_v32  ;;  %v2094_v52 = vpop.f32.mrb[41].mxu1 }
 0x33c   :  { %2458 = vst.msk [vmem:[%s4885_s3 + $0xc0] sm:$0xff] %vm2433_vm2, %v2094_v52  ;;  %v2881_v53 = vpop.f32.mrb[42].mxu1 }
 0x33d   :  { %2461 = vst.msk [vmem:[%s4885_s3 + $0xd8] sm:$0xff] %vm2433_vm2, %v2881_v53  ;;  %v2097_v54 = vpop.f32.mrb[43].mxu1 }
 0x33e   :  { %2459 = vst.msk [vmem:[%s4885_s3 + $0xc8] sm:$0xff] %vm2433_vm2, %v2097_v54 }
 0x346   :  { %v2868_v3 = vpop.f32.mrb[44].mxu0 }
 0x347   :  { %2456 = vst.msk [vmem:[%s4885_s3 + $0xb0] sm:$0xff] %vm2433_vm2, %v2868_v3  ;;  %v2033_v43 = vpop.f32.mrb[45].mxu0 }
 0x348   :  { %2454 = vst.msk [vmem:[%s4885_s3 + $0xa0] sm:$0xff] %vm2433_vm2, %v2033_v43  ;;  %v2869_v24 = vpop.f32.mrb[46].mxu0 }
 0x349   :  { %2457 = vst.msk [vmem:[%s4885_s3 + $0xb8] sm:$0xff] %vm2433_vm2, %v2869_v24  ;;  %v2036_v21 = vpop.f32.mrb[47].mxu0 }
 0x34a   :  { %2455 = vst.msk [vmem:[%s4885_s3 + $0xa8] sm:$0xff] %vm2433_vm2, %v2036_v21  ;;  %v2884_v59 = vpop.f32.mrb[44].mxu1 }
 0x34b   :  { %2464 = vst.msk [vmem:[%s4885_s3 + $0xf0] sm:$0xff] %vm2433_vm2, %v2884_v59  ;;  %v2110_v36 = vpop.f32.mrb[45].mxu1 }
 0x34c   :  { %2462 = vst.msk [vmem:[%s4885_s3 + $0xe0] sm:$0xff] %vm2433_vm2, %v2110_v36  ;;  %v2885_v57 = vpop.f32.mrb[46].mxu1 }
 0x34d   :  { %2465 = vst.msk [vmem:[%s4885_s3 + $0xf8] sm:$0xff] %vm2433_vm2, %v2885_v57  ;;  %v2113_v33 = vpop.f32.mrb[47].mxu1 }
 0x34e   :  { %2463 = vst.msk [vmem:[%s4885_s3 + $0xe8] sm:$0xff] %vm2433_vm2, %v2113_v33 }
 0x356   :  { %v2896_v63 = vpop.f32.mrb[48].mxu0 }
 0x357   :  { %2468 = vst.msk [vmem:[%s4885_s3 + $0x110] sm:$0xff] %vm2433_vm2, %v2896_v63  ;;  %v2171_v61 = vpop.f32.mrb[49].mxu0 }
 0x358   :  { %2466 = vst.msk [vmem:[%s4885_s3 + $0x100] sm:$0xff] %vm2433_vm2, %v2171_v61  ;;  %v2897_v7 = vpop.f32.mrb[50].mxu0 }
 0x359   :  { %2469 = vst.msk [vmem:[%s4885_s3 + $0x118] sm:$0xff] %vm2433_vm2, %v2897_v7  ;;  %v2174_v51 = vpop.f32.mrb[51].mxu0 }
 0x35a   :  { %2467 = vst.msk [vmem:[%s4885_s3 + $0x108] sm:$0xff] %vm2433_vm2, %v2174_v51  ;;  %v2912_v1 = vpop.f32.mrb[48].mxu1 }
 0x35b   :  { %2476 = vst.msk [vmem:[%s4885_s3 + $0x150] sm:$0xff] %vm2433_vm2, %v2912_v1  ;;  %v2248_v22 = vpop.f32.mrb[49].mxu1 }
 0x35c   :  { %2474 = vst.msk [vmem:[%s4885_s3 + $0x140] sm:$0xff] %vm2433_vm2, %v2248_v22  ;;  %v2913_v20 = vpop.f32.mrb[50].mxu1 }
 0x35d   :  { %2477 = vst.msk [vmem:[%s4885_s3 + $0x158] sm:$0xff] %vm2433_vm2, %v2913_v20  ;;  %v2251_v27 = vpop.f32.mrb[51].mxu1 }
 0x35e   :  { %2475 = vst.msk [vmem:[%s4885_s3 + $0x148] sm:$0xff] %vm2433_vm2, %v2251_v27 }
 0x366   :  { %v2900_v49 = vpop.f32.mrb[52].mxu0 }
 0x367   :  { %2472 = vst.msk [vmem:[%s4885_s3 + $0x130] sm:$0xff] %vm2433_vm2, %v2900_v49  ;;  %v2187_v13 = vpop.f32.mrb[53].mxu0 }
 0x368   :  { %2470 = vst.msk [vmem:[%s4885_s3 + $0x120] sm:$0xff] %vm2433_vm2, %v2187_v13  ;;  %v2901_v5 = vpop.f32.mrb[54].mxu0 }
 0x369   :  { %2473 = vst.msk [vmem:[%s4885_s3 + $0x138] sm:$0xff] %vm2433_vm2, %v2901_v5  ;;  %v2190_v23 = vpop.f32.mrb[55].mxu0 }
 0x36a   :  { %2471 = vst.msk [vmem:[%s4885_s3 + $0x128] sm:$0xff] %vm2433_vm2, %v2190_v23  ;;  %v2916_v18 = vpop.f32.mrb[52].mxu1 }
 0x36b   :  { %2480 = vst.msk [vmem:[%s4885_s3 + $0x170] sm:$0xff] %vm2433_vm2, %v2916_v18  ;;  %v2264_v8 = vpop.f32.mrb[53].mxu1 }
 0x36c   :  { %2478 = vst.msk [vmem:[%s4885_s3 + $0x160] sm:$0xff] %vm2433_vm2, %v2264_v8  ;;  %v2917_v16 = vpop.f32.mrb[54].mxu1 }
 0x36d   :  { %2481 = vst.msk [vmem:[%s4885_s3 + $0x178] sm:$0xff] %vm2433_vm2, %v2917_v16  ;;  %v2267_v12 = vpop.f32.mrb[55].mxu1 }
 0x36e   :  { %2479 = vst.msk [vmem:[%s4885_s3 + $0x168] sm:$0xff] %vm2433_vm2, %v2267_v12 }
 0x376   :  { %v2928_v35 = vpop.f32.mrb[56].mxu0 }
 0x377   :  { %2484 = vst.msk [vmem:[%s4885_s3 + $0x190] sm:$0xff] %vm2433_vm2, %v2928_v35  ;;  %v2325_v25 = vpop.f32.mrb[57].mxu0 }
 0x378   :  { %2482 = vst.msk [vmem:[%s4885_s3 + $0x180] sm:$0xff] %vm2433_vm2, %v2325_v25  ;;  %v2929_v45 = vpop.f32.mrb[58].mxu0 }
 0x379   :  { %2485 = vst.msk [vmem:[%s4885_s3 + $0x198] sm:$0xff] %vm2433_vm2, %v2929_v45  ;;  %v2328_v40 = vpop.f32.mrb[59].mxu0 }
 0x37a   :  { %2483 = vst.msk [vmem:[%s4885_s3 + $0x188] sm:$0xff] %vm2433_vm2, %v2328_v40  ;;  %v2944_v38 = vpop.f32.mrb[56].mxu1 }
 0x37b   :  { %2492 = vst.msk [vmem:[%s4885_s3 + $0x1d0] sm:$0xff] %vm2433_vm2, %v2944_v38  ;;  %v2402_v4 = vpop.f32.mrb[57].mxu1 }
 0x37c   :  { %2490 = vst.msk [vmem:[%s4885_s3 + $0x1c0] sm:$0xff] %vm2433_vm2, %v2402_v4  ;;  %v2945_v11 = vpop.f32.mrb[58].mxu1 }
 0x37d   :  { %2493 = vst.msk [vmem:[%s4885_s3 + $0x1d8] sm:$0xff] %vm2433_vm2, %v2945_v11  ;;  %v2405_v15 = vpop.f32.mrb[59].mxu1 }
 0x37e   :  { %2491 = vst.msk [vmem:[%s4885_s3 + $0x1c8] sm:$0xff] %vm2433_vm2, %v2405_v15 }
 0x382   :  { %v2932_v9 = vpop.f32.mrb[60].mxu0 }
 0x383   :  { %2488 = vst.msk [vmem:[%s4885_s3 + $0x1b0] sm:$0xff] %vm2433_vm2, %v2932_v9  ;;  %v2341_v44 = vpop.f32.mrb[61].mxu0 }
 0x384   :  { %2486 = vst.msk [vmem:[%s4885_s3 + $0x1a0] sm:$0xff] %vm2433_vm2, %v2341_v44  ;;  %v2933_v29 = vpop.f32.mrb[62].mxu0 }
 0x385   :  { %2489 = vst.msk [vmem:[%s4885_s3 + $0x1b8] sm:$0xff] %vm2433_vm2, %v2933_v29  ;;  %v2344_v39 = vpop.f32.mrb[63].mxu0 }
 0x386   :  { %2487 = vst.msk [vmem:[%s4885_s3 + $0x1a8] sm:$0xff] %vm2433_vm2, %v2344_v39 }
 0x389   :  { %v2948_v37 = vpop.f32.mrb[60].mxu1 }
 0x38a   :  { %2496 = vst.msk [vmem:[%s4885_s3 + $0x1f0] sm:$0xff] %vm2433_vm2, %v2948_v37  ;;  %v2418_v46 = vpop.f32.mrb[61].mxu1 }
 0x38b   :  { %2494 = vst.msk [vmem:[%s4885_s3 + $0x1e0] sm:$0xff] %vm2433_vm2, %v2418_v46  ;;  %v2949_v10 = vpop.f32.mrb[62].mxu1 }
 0x38c   :  { %2497 = vst.msk [vmem:[%s4885_s3 + $0x1f8] sm:$0xff] %vm2433_vm2, %v2949_v10  ;;  %v2421_v34 = vpop.f32.mrb[63].mxu1 }
 0x38d   :  { %2495 = vst.msk [vmem:[%s4885_s3 + $0x1e8] sm:$0xff] %vm2433_vm2, %v2421_v34 }

</bundles_post_ra>
